<compile_context>
chip_gen: v7x
topology: tpu7x:2x2x1
jax: 0.10.0
libtpu: 0.0.40
codegen_flags: <defaults>
</compile_context>

<pallas_src>
import jax
import jax.numpy as jnp
from jax import lax
from jax.experimental import pallas as pl
from jax.experimental.pallas import tpu as pltpu

EPS = 1e-5  # PyTorch InstanceNorm2d default eps (affine=False, biased variance)


def _residual_block_kernel(w1_ref, w2_ref, x_ref, out_ref, xpad, ypad):
    # w1_ref/w2_ref: SMEM (C*C*9,) f32 scalar tables (scalar prefetch)
    # x_ref/out_ref: VMEM (C, H, W) blocks (one image)
    # xpad/ypad:     VMEM (C, H+2, W+2) f32 padded scratches
    C, H, W = x_ref.shape
    Hp, Wp = H + 2, W + 2
    inv_hw = 1.0 / float(H * W)

    # ---- zero only the 1-pixel halo border of both padded scratches ----
    zrow = jnp.zeros((C, 1, Wp), jnp.float32)
    zcol = jnp.zeros((C, Hp, 1), jnp.float32)
    for scr in (xpad, ypad):
        scr[:, 0:1, :] = zrow
        scr[:, Hp - 1:Hp, :] = zrow
        scr[:, :, 0:1] = zcol
        scr[:, :, Wp - 1:Wp] = zcol

    # ---- stage the input image into the interior of the padded scratch ----
    xpad[:, 1:H + 1, 1:W + 1] = x_ref[...].astype(jnp.float32)

    def conv3x3_channel(src, w_ref, co):
        # out[h, w] = sum_{ci, dy, dx} w[co, ci, dy, dx] * src[ci, h+dy, w+dx]
        acc = jnp.zeros((H, W), jnp.float32)
        for ci in range(C):
            base = (co * C + ci) * 9
            for k in range(9):
                dy, dx = k // 3, k % 3
                tap = src[ci, dy:dy + H, dx:dx + W]   # shifted 2-D window load
                acc = acc + w_ref[base + k] * tap     # VPU broadcast-FMA
        return acc

    def _mean2d(a):
        # full (H, W) mean kept as a (1, 1) value: lane reduce then sublane reduce
        return jnp.sum(jnp.sum(a, axis=1, keepdims=True), axis=0, keepdims=True) * inv_hw

    def instance_norm(a):
        mean = _mean2d(a)
        var = _mean2d(jnp.square(a - mean))           # biased variance
        return (a - mean) * lax.rsqrt(var + EPS)

    # ---- conv1 -> InstanceNorm -> ReLU, written into the padded intermediate ----
    for co in range(C):
        y = jnp.maximum(instance_norm(conv3x3_channel(xpad, w1_ref, co)), 0.0)
        ypad[co, 1:H + 1, 1:W + 1] = y

    # ---- conv2 -> InstanceNorm -> residual add ----
    for co in range(C):
        z = instance_norm(conv3x3_channel(ypad, w2_ref, co))
        out_ref[co] = (x_ref[co].astype(jnp.float32) + z).astype(out_ref.dtype)


def _residual_block(x_nchw, w1, b1, w2, b2):
    """x_nchw: (N, C, H, W). Weights in PyTorch layout: w* (C, C, 3, 3), b* (C,).

    Biases are accepted for API parity but unused: InstanceNorm2d(affine=False)
    cancels a per-channel constant bias exactly.
    """
    del b1, b2
    N, C, H, W = x_nchw.shape

    # Flatten weights for SMEM scalar reads: index (co*C + ci)*9 + dy*3 + dx.
    w1f = w1.reshape(-1).astype(jnp.float32)
    w2f = w2.reshape(-1).astype(jnp.float32)

    return pl.pallas_call(
        _residual_block_kernel,
        out_shape=jax.ShapeDtypeStruct((N, C, H, W), x_nchw.dtype),
        grid_spec=pltpu.PrefetchScalarGridSpec(
            num_scalar_prefetch=2,             # w1f, w2f -> SMEM
            grid=(N,),
            in_specs=[
                pl.BlockSpec((None, C, H, W), lambda n, w1s, w2s: (n, 0, 0, 0)),
            ],
            out_specs=pl.BlockSpec((None, C, H, W), lambda n, w1s, w2s: (n, 0, 0, 0)),
            scratch_shapes=[
                pltpu.VMEM((C, H + 2, W + 2), jnp.float32),  # padded input
                pltpu.VMEM((C, H + 2, W + 2), jnp.float32),  # padded intermediate
            ],
        ),
        compiler_params=pltpu.CompilerParams(
            dimension_semantics=("parallel",),
            vmem_limit_bytes=32 * 1024 * 1024,
        ),
    )(w1f, w2f, x_nchw)


residual_block = jax.jit(_residual_block)


def _reference_forward(x, w1, b1, w2, b2):
    """Pure-JAX reference (NCHW, same semantics as the PyTorch module, with biases)."""
    def conv(h, w, b):
        y = lax.conv_general_dilated(h, w, window_strides=(1, 1),
                                     padding=((1, 1), (1, 1)),
                                     dimension_numbers=("NCHW", "OIHW", "NCHW"),
                                     precision=lax.Precision.HIGHEST)
        return y + b[None, :, None, None]

    def inorm(y):
        mean = y.mean(axis=(2, 3), keepdims=True)
        var = ((y - mean) ** 2).mean(axis=(2, 3), keepdims=True)
        return (y - mean) / jnp.sqrt(var + EPS)

    h = jnp.maximum(inorm(conv(x, w1, b1)), 0.0)
    return x + inorm(conv(h, w2, b2))


if __name__ == "__main__":
    N, C, H, W = 2, 4, 16, 16

    key = jax.random.PRNGKey(0)
    kx, kw1, kb1, kw2, kb2 = jax.random.split(key, 5)

    x = jax.random.normal(kx, (N, C, H, W), jnp.float32)
    # deterministic synthetic parameters (PyTorch Conv2d shapes: (C, C, 3, 3), (C,))
    fan_in = C * 3 * 3
    bound = 1.0 / jnp.sqrt(fan_in)
    w1 = jax.random.uniform(kw1, (C, C, 3, 3), jnp.float32, -bound, bound)
    b1 = jax.random.uniform(kb1, (C,), jnp.float32, -bound, bound)
    w2 = jax.random.uniform(kw2, (C, C, 3, 3), jnp.float32, -bound, bound)
    b2 = jax.random.uniform(kb2, (C,), jnp.float32, -bound, bound)

    out = residual_block(x, w1, b1, w2, b2)
    out = jax.block_until_ready(out)

    ref = _reference_forward(x, w1, b1, w2, b2)
    assert out.shape == (N, C, H, W)
    assert jnp.allclose(out, ref, atol=1e-4, rtol=1e-4), "mismatch vs JAX reference"

    print("KERNEL_OK")
</pallas_src>

<mosaic_0001>
module attributes {stable_mosaic.version = 11 : i64} {
  func.func @_residual_block_kernel(%arg0: i32, %arg1: memref<144xf32, #tpu.memory_space<smem>>, %arg2: memref<144xf32, #tpu.memory_space<smem>>, %arg3: memref<1x4x16x16xf32, #tpu.memory_space<vmem>>, %arg4: memref<1x4x16x16xf32, #tpu.memory_space<vmem>>, %arg5: memref<4x18x18xf32, #tpu.memory_space<vmem>>, %arg6: memref<4x18x18xf32, #tpu.memory_space<vmem>>) attributes {dimension_semantics = [#tpu.dimension_semantics<parallel>], iteration_bounds = array<i64: 2>, scalar_prefetch = 2 : i64, scratch_operands = 2 : i64, tpu.core_type = #tpu.core_type<tc>, window_params = [{transform_indices = @transform_0, window_bounds = array<i64: 1, 4, 16, 16>}, {transform_indices = @transform_1, window_bounds = array<i64: 1, 4, 16, 16>}]} {
    %cst = arith.constant 0.000000e+00 : f32
    %0 = vector.broadcast %cst : f32 to vector<4x1x18xf32>
    %cst_0 = arith.constant 0.000000e+00 : f32
    %1 = vector.broadcast %cst_0 : f32 to vector<4x18x1xf32>
    %c0 = arith.constant 0 : index
    %c0_1 = arith.constant 0 : index
    %c0_2 = arith.constant 0 : index
    %2 = vector.load %arg5[%c0, %c0_1, %c0_2] : memref<4x18x18xf32, #tpu.memory_space<vmem>>, vector<4x1x18xf32>
    tpu.vector_store %arg5[%c0, %c0_1, %c0_2], %0 {strides = array<i32>} : memref<4x18x18xf32, #tpu.memory_space<vmem>>, vector<4x1x18xf32>,
    %c0_3 = arith.constant 0 : index
    %c17 = arith.constant 17 : index
    %c0_4 = arith.constant 0 : index
    %3 = vector.load %arg5[%c0_3, %c17, %c0_4] : memref<4x18x18xf32, #tpu.memory_space<vmem>>, vector<4x1x18xf32>
    tpu.vector_store %arg5[%c0_3, %c17, %c0_4], %0 {strides = array<i32>} : memref<4x18x18xf32, #tpu.memory_space<vmem>>, vector<4x1x18xf32>,
    %c0_5 = arith.constant 0 : index
    %c0_6 = arith.constant 0 : index
    %c0_7 = arith.constant 0 : index
    %4 = vector.load %arg5[%c0_5, %c0_6, %c0_7] : memref<4x18x18xf32, #tpu.memory_space<vmem>>, vector<4x18x1xf32>
    tpu.vector_store %arg5[%c0_5, %c0_6, %c0_7], %1 {strides = array<i32>} : memref<4x18x18xf32, #tpu.memory_space<vmem>>, vector<4x18x1xf32>,
    %c0_8 = arith.constant 0 : index
    %c0_9 = arith.constant 0 : index
    %c17_10 = arith.constant 17 : index
    %5 = vector.load %arg5[%c0_8, %c0_9, %c17_10] : memref<4x18x18xf32, #tpu.memory_space<vmem>>, vector<4x18x1xf32>
    tpu.vector_store %arg5[%c0_8, %c0_9, %c17_10], %1 {strides = array<i32>} : memref<4x18x18xf32, #tpu.memory_space<vmem>>, vector<4x18x1xf32>,
    %c0_11 = arith.constant 0 : index
    %c0_12 = arith.constant 0 : index
    %c0_13 = arith.constant 0 : index
    %6 = vector.load %arg6[%c0_11, %c0_12, %c0_13] : memref<4x18x18xf32, #tpu.memory_space<vmem>>, vector<4x1x18xf32>
    tpu.vector_store %arg6[%c0_11, %c0_12, %c0_13], %0 {strides = array<i32>} : memref<4x18x18xf32, #tpu.memory_space<vmem>>, vector<4x1x18xf32>,
    %c0_14 = arith.constant 0 : index
    %c17_15 = arith.constant 17 : index
    %c0_16 = arith.constant 0 : index
    %7 = vector.load %arg6[%c0_14, %c17_15, %c0_16] : memref<4x18x18xf32, #tpu.memory_space<vmem>>, vector<4x1x18xf32>
    tpu.vector_store %arg6[%c0_14, %c17_15, %c0_16], %0 {strides = array<i32>} : memref<4x18x18xf32, #tpu.memory_space<vmem>>, vector<4x1x18xf32>,
    %c0_17 = arith.constant 0 : index
    %c0_18 = arith.constant 0 : index
    %c0_19 = arith.constant 0 : index
    %8 = vector.load %arg6[%c0_17, %c0_18, %c0_19] : memref<4x18x18xf32, #tpu.memory_space<vmem>>, vector<4x18x1xf32>
    tpu.vector_store %arg6[%c0_17, %c0_18, %c0_19], %1 {strides = array<i32>} : memref<4x18x18xf32, #tpu.memory_space<vmem>>, vector<4x18x1xf32>,
    %c0_20 = arith.constant 0 : index
    %c0_21 = arith.constant 0 : index
    %c17_22 = arith.constant 17 : index
    %9 = vector.load %arg6[%c0_20, %c0_21, %c17_22] : memref<4x18x18xf32, #tpu.memory_space<vmem>>, vector<4x18x1xf32>
    tpu.vector_store %arg6[%c0_20, %c0_21, %c17_22], %1 {strides = array<i32>} : memref<4x18x18xf32, #tpu.memory_space<vmem>>, vector<4x18x1xf32>,
    %c0_23 = arith.constant 0 : index
    %c0_24 = arith.constant 0 : index
    %c0_25 = arith.constant 0 : index
    %c0_26 = arith.constant 0 : index
    %10 = vector.load %arg3[%c0_23, %c0_24, %c0_25, %c0_26] : memref<1x4x16x16xf32, #tpu.memory_space<vmem>>, vector<1x4x16x16xf32>
    %11 = vector.shape_cast %10 : vector<1x4x16x16xf32> to vector<4x16x16xf32>
    %c0_27 = arith.constant 0 : index
    %c1 = arith.constant 1 : index
    %c1_28 = arith.constant 1 : index
    %12 = vector.load %arg5[%c0_27, %c1, %c1_28] : memref<4x18x18xf32, #tpu.memory_space<vmem>>, vector<4x16x16xf32>
    tpu.vector_store %arg5[%c0_27, %c1, %c1_28], %11 {strides = array<i32>} : memref<4x18x18xf32, #tpu.memory_space<vmem>>, vector<4x16x16xf32>,
    %cst_29 = arith.constant 0.000000e+00 : f32
    %13 = vector.broadcast %cst_29 : f32 to vector<16x16xf32>
    %c0_30 = arith.constant 0 : index
    %c0_31 = arith.constant 0 : index
    %c0_32 = arith.constant 0 : index
    %14 = vector.load %arg5[%c0_30, %c0_31, %c0_32] : memref<4x18x18xf32, #tpu.memory_space<vmem>>, vector<1x16x16xf32>
    %15 = vector.shape_cast %14 : vector<1x16x16xf32> to vector<16x16xf32>
    %c0_33 = arith.constant 0 : index
    %16 = memref.load %arg1[%c0_33] : memref<144xf32, #tpu.memory_space<smem>>
    %17 = vector.broadcast %16 : f32 to vector<16x16xf32>
    %18 = arith.mulf %17, %15 : vector<16x16xf32>
    %19 = arith.addf %13, %18 : vector<16x16xf32>
    %c0_34 = arith.constant 0 : index
    %c0_35 = arith.constant 0 : index
    %c1_36 = arith.constant 1 : index
    %20 = vector.load %arg5[%c0_34, %c0_35, %c1_36] : memref<4x18x18xf32, #tpu.memory_space<vmem>>, vector<1x16x16xf32>
    %21 = vector.shape_cast %20 : vector<1x16x16xf32> to vector<16x16xf32>
    %c1_37 = arith.constant 1 : index
    %22 = memref.load %arg1[%c1_37] : memref<144xf32, #tpu.memory_space<smem>>
    %23 = vector.broadcast %22 : f32 to vector<16x16xf32>
    %24 = arith.mulf %23, %21 : vector<16x16xf32>
    %25 = arith.addf %19, %24 : vector<16x16xf32>
    %c0_38 = arith.constant 0 : index
    %c0_39 = arith.constant 0 : index
    %c2 = arith.constant 2 : index
    %26 = vector.load %arg5[%c0_38, %c0_39, %c2] : memref<4x18x18xf32, #tpu.memory_space<vmem>>, vector<1x16x16xf32>
    %27 = vector.shape_cast %26 : vector<1x16x16xf32> to vector<16x16xf32>
    %c2_40 = arith.constant 2 : index
    %28 = memref.load %arg1[%c2_40] : memref<144xf32, #tpu.memory_space<smem>>
    %29 = vector.broadcast %28 : f32 to vector<16x16xf32>
    %30 = arith.mulf %29, %27 : vector<16x16xf32>
    %31 = arith.addf %25, %30 : vector<16x16xf32>
    %c0_41 = arith.constant 0 : index
    %c1_42 = arith.constant 1 : index
    %c0_43 = arith.constant 0 : index
    %32 = vector.load %arg5[%c0_41, %c1_42, %c0_43] : memref<4x18x18xf32, #tpu.memory_space<vmem>>, vector<1x16x16xf32>
    %33 = vector.shape_cast %32 : vector<1x16x16xf32> to vector<16x16xf32>
    %c3 = arith.constant 3 : index
    %34 = memref.load %arg1[%c3] : memref<144xf32, #tpu.memory_space<smem>>
    %35 = vector.broadcast %34 : f32 to vector<16x16xf32>
    %36 = arith.mulf %35, %33 : vector<16x16xf32>
    %37 = arith.addf %31, %36 : vector<16x16xf32>
    %c0_44 = arith.constant 0 : index
    %c1_45 = arith.constant 1 : index
    %c1_46 = arith.constant 1 : index
    %38 = vector.load %arg5[%c0_44, %c1_45, %c1_46] : memref<4x18x18xf32, #tpu.memory_space<vmem>>, vector<1x16x16xf32>
    %39 = vector.shape_cast %38 : vector<1x16x16xf32> to vector<16x16xf32>
    %c4 = arith.constant 4 : index
    %40 = memref.load %arg1[%c4] : memref<144xf32, #tpu.memory_space<smem>>
    %41 = vector.broadcast %40 : f32 to vector<16x16xf32>
    %42 = arith.mulf %41, %39 : vector<16x16xf32>
    %43 = arith.addf %37, %42 : vector<16x16xf32>
    %c0_47 = arith.constant 0 : index
    %c1_48 = arith.constant 1 : index
    %c2_49 = arith.constant 2 : index
    %44 = vector.load %arg5[%c0_47, %c1_48, %c2_49] : memref<4x18x18xf32, #tpu.memory_space<vmem>>, vector<1x16x16xf32>
    %45 = vector.shape_cast %44 : vector<1x16x16xf32> to vector<16x16xf32>
    %c5 = arith.constant 5 : index
    %46 = memref.load %arg1[%c5] : memref<144xf32, #tpu.memory_space<smem>>
    %47 = vector.broadcast %46 : f32 to vector<16x16xf32>
    %48 = arith.mulf %47, %45 : vector<16x16xf32>
    %49 = arith.addf %43, %48 : vector<16x16xf32>
    %c0_50 = arith.constant 0 : index
    %c2_51 = arith.constant 2 : index
    %c0_52 = arith.constant 0 : index
    %50 = vector.load %arg5[%c0_50, %c2_51, %c0_52] : memref<4x18x18xf32, #tpu.memory_space<vmem>>, vector<1x16x16xf32>
    %51 = vector.shape_cast %50 : vector<1x16x16xf32> to vector<16x16xf32>
    %c6 = arith.constant 6 : index
    %52 = memref.load %arg1[%c6] : memref<144xf32, #tpu.memory_space<smem>>
    %53 = vector.broadcast %52 : f32 to vector<16x16xf32>
    %54 = arith.mulf %53, %51 : vector<16x16xf32>
    %55 = arith.addf %49, %54 : vector<16x16xf32>
    %c0_53 = arith.constant 0 : index
    %c2_54 = arith.constant 2 : index
    %c1_55 = arith.constant 1 : index
    %56 = vector.load %arg5[%c0_53, %c2_54, %c1_55] : memref<4x18x18xf32, #tpu.memory_space<vmem>>, vector<1x16x16xf32>
    %57 = vector.shape_cast %56 : vector<1x16x16xf32> to vector<16x16xf32>
    %c7 = arith.constant 7 : index
    %58 = memref.load %arg1[%c7] : memref<144xf32, #tpu.memory_space<smem>>
    %59 = vector.broadcast %58 : f32 to vector<16x16xf32>
    %60 = arith.mulf %59, %57 : vector<16x16xf32>
    %61 = arith.addf %55, %60 : vector<16x16xf32>
    %c0_56 = arith.constant 0 : index
    %c2_57 = arith.constant 2 : index
    %c2_58 = arith.constant 2 : index
    %62 = vector.load %arg5[%c0_56, %c2_57, %c2_58] : memref<4x18x18xf32, #tpu.memory_space<vmem>>, vector<1x16x16xf32>
    %63 = vector.shape_cast %62 : vector<1x16x16xf32> to vector<16x16xf32>
    %c8 = arith.constant 8 : index
    %64 = memref.load %arg1[%c8] : memref<144xf32, #tpu.memory_space<smem>>
    %65 = vector.broadcast %64 : f32 to vector<16x16xf32>
    %66 = arith.mulf %65, %63 : vector<16x16xf32>
    %67 = arith.addf %61, %66 : vector<16x16xf32>
    %c1_59 = arith.constant 1 : index
    %c0_60 = arith.constant 0 : index
    %c0_61 = arith.constant 0 : index
    %68 = vector.load %arg5[%c1_59, %c0_60, %c0_61] : memref<4x18x18xf32, #tpu.memory_space<vmem>>, vector<1x16x16xf32>
    %69 = vector.shape_cast %68 : vector<1x16x16xf32> to vector<16x16xf32>
    %c9 = arith.constant 9 : index
    %70 = memref.load %arg1[%c9] : memref<144xf32, #tpu.memory_space<smem>>
    %71 = vector.broadcast %70 : f32 to vector<16x16xf32>
    %72 = arith.mulf %71, %69 : vector<16x16xf32>
    %73 = arith.addf %67, %72 : vector<16x16xf32>
    %c1_62 = arith.constant 1 : index
    %c0_63 = arith.constant 0 : index
    %c1_64 = arith.constant 1 : index
    %74 = vector.load %arg5[%c1_62, %c0_63, %c1_64] : memref<4x18x18xf32, #tpu.memory_space<vmem>>, vector<1x16x16xf32>
    %75 = vector.shape_cast %74 : vector<1x16x16xf32> to vector<16x16xf32>
    %c10 = arith.constant 10 : index
    %76 = memref.load %arg1[%c10] : memref<144xf32, #tpu.memory_space<smem>>
    %77 = vector.broadcast %76 : f32 to vector<16x16xf32>
    %78 = arith.mulf %77, %75 : vector<16x16xf32>
    %79 = arith.addf %73, %78 : vector<16x16xf32>
    %c1_65 = arith.constant 1 : index
    %c0_66 = arith.constant 0 : index
    %c2_67 = arith.constant 2 : index
    %80 = vector.load %arg5[%c1_65, %c0_66, %c2_67] : memref<4x18x18xf32, #tpu.memory_space<vmem>>, vector<1x16x16xf32>
    %81 = vector.shape_cast %80 : vector<1x16x16xf32> to vector<16x16xf32>
    %c11 = arith.constant 11 : index
    %82 = memref.load %arg1[%c11] : memref<144xf32, #tpu.memory_space<smem>>
    %83 = vector.broadcast %82 : f32 to vector<16x16xf32>
    %84 = arith.mulf %83, %81 : vector<16x16xf32>
    %85 = arith.addf %79, %84 : vector<16x16xf32>
    %c1_68 = arith.constant 1 : index
    %c1_69 = arith.constant 1 : index
    %c0_70 = arith.constant 0 : index
    %86 = vector.load %arg5[%c1_68, %c1_69, %c0_70] : memref<4x18x18xf32, #tpu.memory_space<vmem>>, vector<1x16x16xf32>
    %87 = vector.shape_cast %86 : vector<1x16x16xf32> to vector<16x16xf32>
    %c12 = arith.constant 12 : index
    %88 = memref.load %arg1[%c12] : memref<144xf32, #tpu.memory_space<smem>>
    %89 = vector.broadcast %88 : f32 to vector<16x16xf32>
    %90 = arith.mulf %89, %87 : vector<16x16xf32>
    %91 = arith.addf %85, %90 : vector<16x16xf32>
    %c1_71 = arith.constant 1 : index
    %c1_72 = arith.constant 1 : index
    %c1_73 = arith.constant 1 : index
    %92 = vector.load %arg5[%c1_71, %c1_72, %c1_73] : memref<4x18x18xf32, #tpu.memory_space<vmem>>, vector<1x16x16xf32>
    %93 = vector.shape_cast %92 : vector<1x16x16xf32> to vector<16x16xf32>
    %c13 = arith.constant 13 : index
    %94 = memref.load %arg1[%c13] : memref<144xf32, #tpu.memory_space<smem>>
    %95 = vector.broadcast %94 : f32 to vector<16x16xf32>
    %96 = arith.mulf %95, %93 : vector<16x16xf32>
    %97 = arith.addf %91, %96 : vector<16x16xf32>
    %c1_74 = arith.constant 1 : index
    %c1_75 = arith.constant 1 : index
    %c2_76 = arith.constant 2 : index
    %98 = vector.load %arg5[%c1_74, %c1_75, %c2_76] : memref<4x18x18xf32, #tpu.memory_space<vmem>>, vector<1x16x16xf32>
    %99 = vector.shape_cast %98 : vector<1x16x16xf32> to vector<16x16xf32>
    %c14 = arith.constant 14 : index
    %100 = memref.load %arg1[%c14] : memref<144xf32, #tpu.memory_space<smem>>
    %101 = vector.broadcast %100 : f32 to vector<16x16xf32>
    %102 = arith.mulf %101, %99 : vector<16x16xf32>
    %103 = arith.addf %97, %102 : vector<16x16xf32>
    %c1_77 = arith.constant 1 : index
    %c2_78 = arith.constant 2 : index
    %c0_79 = arith.constant 0 : index
    %104 = vector.load %arg5[%c1_77, %c2_78, %c0_79] : memref<4x18x18xf32, #tpu.memory_space<vmem>>, vector<1x16x16xf32>
    %105 = vector.shape_cast %104 : vector<1x16x16xf32> to vector<16x16xf32>
    %c15 = arith.constant 15 : index
    %106 = memref.load %arg1[%c15] : memref<144xf32, #tpu.memory_space<smem>>
    %107 = vector.broadcast %106 : f32 to vector<16x16xf32>
    %108 = arith.mulf %107, %105 : vector<16x16xf32>
    %109 = arith.addf %103, %108 : vector<16x16xf32>
    %c1_80 = arith.constant 1 : index
    %c2_81 = arith.constant 2 : index
    %c1_82 = arith.constant 1 : index
    %110 = vector.load %arg5[%c1_80, %c2_81, %c1_82] : memref<4x18x18xf32, #tpu.memory_space<vmem>>, vector<1x16x16xf32>
    %111 = vector.shape_cast %110 : vector<1x16x16xf32> to vector<16x16xf32>
    %c16 = arith.constant 16 : index
    %112 = memref.load %arg1[%c16] : memref<144xf32, #tpu.memory_space<smem>>
    %113 = vector.broadcast %112 : f32 to vector<16x16xf32>
    %114 = arith.mulf %113, %111 : vector<16x16xf32>
    %115 = arith.addf %109, %114 : vector<16x16xf32>
    %c1_83 = arith.constant 1 : index
    %c2_84 = arith.constant 2 : index
    %c2_85 = arith.constant 2 : index
    %116 = vector.load %arg5[%c1_83, %c2_84, %c2_85] : memref<4x18x18xf32, #tpu.memory_space<vmem>>, vector<1x16x16xf32>
    %117 = vector.shape_cast %116 : vector<1x16x16xf32> to vector<16x16xf32>
    %c17_86 = arith.constant 17 : index
    %118 = memref.load %arg1[%c17_86] : memref<144xf32, #tpu.memory_space<smem>>
    %119 = vector.broadcast %118 : f32 to vector<16x16xf32>
    %120 = arith.mulf %119, %117 : vector<16x16xf32>
    %121 = arith.addf %115, %120 : vector<16x16xf32>
    %c2_87 = arith.constant 2 : index
    %c0_88 = arith.constant 0 : index
    %c0_89 = arith.constant 0 : index
    %122 = vector.load %arg5[%c2_87, %c0_88, %c0_89] : memref<4x18x18xf32, #tpu.memory_space<vmem>>, vector<1x16x16xf32>
    %123 = vector.shape_cast %122 : vector<1x16x16xf32> to vector<16x16xf32>
    %c18 = arith.constant 18 : index
    %124 = memref.load %arg1[%c18] : memref<144xf32, #tpu.memory_space<smem>>
    %125 = vector.broadcast %124 : f32 to vector<16x16xf32>
    %126 = arith.mulf %125, %123 : vector<16x16xf32>
    %127 = arith.addf %121, %126 : vector<16x16xf32>
    %c2_90 = arith.constant 2 : index
    %c0_91 = arith.constant 0 : index
    %c1_92 = arith.constant 1 : index
    %128 = vector.load %arg5[%c2_90, %c0_91, %c1_92] : memref<4x18x18xf32, #tpu.memory_space<vmem>>, vector<1x16x16xf32>
    %129 = vector.shape_cast %128 : vector<1x16x16xf32> to vector<16x16xf32>
    %c19 = arith.constant 19 : index
    %130 = memref.load %arg1[%c19] : memref<144xf32, #tpu.memory_space<smem>>
    %131 = vector.broadcast %130 : f32 to vector<16x16xf32>
    %132 = arith.mulf %131, %129 : vector<16x16xf32>
    %133 = arith.addf %127, %132 : vector<16x16xf32>
    %c2_93 = arith.constant 2 : index
    %c0_94 = arith.constant 0 : index
    %c2_95 = arith.constant 2 : index
    %134 = vector.load %arg5[%c2_93, %c0_94, %c2_95] : memref<4x18x18xf32, #tpu.memory_space<vmem>>, vector<1x16x16xf32>
    %135 = vector.shape_cast %134 : vector<1x16x16xf32> to vector<16x16xf32>
    %c20 = arith.constant 20 : index
    %136 = memref.load %arg1[%c20] : memref<144xf32, #tpu.memory_space<smem>>
    %137 = vector.broadcast %136 : f32 to vector<16x16xf32>
    %138 = arith.mulf %137, %135 : vector<16x16xf32>
    %139 = arith.addf %133, %138 : vector<16x16xf32>
    %c2_96 = arith.constant 2 : index
    %c1_97 = arith.constant 1 : index
    %c0_98 = arith.constant 0 : index
    %140 = vector.load %arg5[%c2_96, %c1_97, %c0_98] : memref<4x18x18xf32, #tpu.memory_space<vmem>>, vector<1x16x16xf32>
    %141 = vector.shape_cast %140 : vector<1x16x16xf32> to vector<16x16xf32>
    %c21 = arith.constant 21 : index
    %142 = memref.load %arg1[%c21] : memref<144xf32, #tpu.memory_space<smem>>
    %143 = vector.broadcast %142 : f32 to vector<16x16xf32>
    %144 = arith.mulf %143, %141 : vector<16x16xf32>
    %145 = arith.addf %139, %144 : vector<16x16xf32>
    %c2_99 = arith.constant 2 : index
    %c1_100 = arith.constant 1 : index
    %c1_101 = arith.constant 1 : index
    %146 = vector.load %arg5[%c2_99, %c1_100, %c1_101] : memref<4x18x18xf32, #tpu.memory_space<vmem>>, vector<1x16x16xf32>
    %147 = vector.shape_cast %146 : vector<1x16x16xf32> to vector<16x16xf32>
    %c22 = arith.constant 22 : index
    %148 = memref.load %arg1[%c22] : memref<144xf32, #tpu.memory_space<smem>>
    %149 = vector.broadcast %148 : f32 to vector<16x16xf32>
    %150 = arith.mulf %149, %147 : vector<16x16xf32>
    %151 = arith.addf %145, %150 : vector<16x16xf32>
    %c2_102 = arith.constant 2 : index
    %c1_103 = arith.constant 1 : index
    %c2_104 = arith.constant 2 : index
    %152 = vector.load %arg5[%c2_102, %c1_103, %c2_104] : memref<4x18x18xf32, #tpu.memory_space<vmem>>, vector<1x16x16xf32>
    %153 = vector.shape_cast %152 : vector<1x16x16xf32> to vector<16x16xf32>
    %c23 = arith.constant 23 : index
    %154 = memref.load %arg1[%c23] : memref<144xf32, #tpu.memory_space<smem>>
    %155 = vector.broadcast %154 : f32 to vector<16x16xf32>
    %156 = arith.mulf %155, %153 : vector<16x16xf32>
    %157 = arith.addf %151, %156 : vector<16x16xf32>
    %c2_105 = arith.constant 2 : index
    %c2_106 = arith.constant 2 : index
    %c0_107 = arith.constant 0 : index
    %158 = vector.load %arg5[%c2_105, %c2_106, %c0_107] : memref<4x18x18xf32, #tpu.memory_space<vmem>>, vector<1x16x16xf32>
    %159 = vector.shape_cast %158 : vector<1x16x16xf32> to vector<16x16xf32>
    %c24 = arith.constant 24 : index
    %160 = memref.load %arg1[%c24] : memref<144xf32, #tpu.memory_space<smem>>
    %161 = vector.broadcast %160 : f32 to vector<16x16xf32>
    %162 = arith.mulf %161, %159 : vector<16x16xf32>
    %163 = arith.addf %157, %162 : vector<16x16xf32>
    %c2_108 = arith.constant 2 : index
    %c2_109 = arith.constant 2 : index
    %c1_110 = arith.constant 1 : index
    %164 = vector.load %arg5[%c2_108, %c2_109, %c1_110] : memref<4x18x18xf32, #tpu.memory_space<vmem>>, vector<1x16x16xf32>
    %165 = vector.shape_cast %164 : vector<1x16x16xf32> to vector<16x16xf32>
    %c25 = arith.constant 25 : index
    %166 = memref.load %arg1[%c25] : memref<144xf32, #tpu.memory_space<smem>>
    %167 = vector.broadcast %166 : f32 to vector<16x16xf32>
    %168 = arith.mulf %167, %165 : vector<16x16xf32>
    %169 = arith.addf %163, %168 : vector<16x16xf32>
    %c2_111 = arith.constant 2 : index
    %c2_112 = arith.constant 2 : index
    %c2_113 = arith.constant 2 : index
    %170 = vector.load %arg5[%c2_111, %c2_112, %c2_113] : memref<4x18x18xf32, #tpu.memory_space<vmem>>, vector<1x16x16xf32>
    %171 = vector.shape_cast %170 : vector<1x16x16xf32> to vector<16x16xf32>
    %c26 = arith.constant 26 : index
    %172 = memref.load %arg1[%c26] : memref<144xf32, #tpu.memory_space<smem>>
    %173 = vector.broadcast %172 : f32 to vector<16x16xf32>
    %174 = arith.mulf %173, %171 : vector<16x16xf32>
    %175 = arith.addf %169, %174 : vector<16x16xf32>
    %c3_114 = arith.constant 3 : index
    %c0_115 = arith.constant 0 : index
    %c0_116 = arith.constant 0 : index
    %176 = vector.load %arg5[%c3_114, %c0_115, %c0_116] : memref<4x18x18xf32, #tpu.memory_space<vmem>>, vector<1x16x16xf32>
    %177 = vector.shape_cast %176 : vector<1x16x16xf32> to vector<16x16xf32>
    %c27 = arith.constant 27 : index
    %178 = memref.load %arg1[%c27] : memref<144xf32, #tpu.memory_space<smem>>
    %179 = vector.broadcast %178 : f32 to vector<16x16xf32>
    %180 = arith.mulf %179, %177 : vector<16x16xf32>
    %181 = arith.addf %175, %180 : vector<16x16xf32>
    %c3_117 = arith.constant 3 : index
    %c0_118 = arith.constant 0 : index
    %c1_119 = arith.constant 1 : index
    %182 = vector.load %arg5[%c3_117, %c0_118, %c1_119] : memref<4x18x18xf32, #tpu.memory_space<vmem>>, vector<1x16x16xf32>
    %183 = vector.shape_cast %182 : vector<1x16x16xf32> to vector<16x16xf32>
    %c28 = arith.constant 28 : index
    %184 = memref.load %arg1[%c28] : memref<144xf32, #tpu.memory_space<smem>>
    %185 = vector.broadcast %184 : f32 to vector<16x16xf32>
    %186 = arith.mulf %185, %183 : vector<16x16xf32>
    %187 = arith.addf %181, %186 : vector<16x16xf32>
    %c3_120 = arith.constant 3 : index
    %c0_121 = arith.constant 0 : index
    %c2_122 = arith.constant 2 : index
    %188 = vector.load %arg5[%c3_120, %c0_121, %c2_122] : memref<4x18x18xf32, #tpu.memory_space<vmem>>, vector<1x16x16xf32>
    %189 = vector.shape_cast %188 : vector<1x16x16xf32> to vector<16x16xf32>
    %c29 = arith.constant 29 : index
    %190 = memref.load %arg1[%c29] : memref<144xf32, #tpu.memory_space<smem>>
    %191 = vector.broadcast %190 : f32 to vector<16x16xf32>
    %192 = arith.mulf %191, %189 : vector<16x16xf32>
    %193 = arith.addf %187, %192 : vector<16x16xf32>
    %c3_123 = arith.constant 3 : index
    %c1_124 = arith.constant 1 : index
    %c0_125 = arith.constant 0 : index
    %194 = vector.load %arg5[%c3_123, %c1_124, %c0_125] : memref<4x18x18xf32, #tpu.memory_space<vmem>>, vector<1x16x16xf32>
    %195 = vector.shape_cast %194 : vector<1x16x16xf32> to vector<16x16xf32>
    %c30 = arith.constant 30 : index
    %196 = memref.load %arg1[%c30] : memref<144xf32, #tpu.memory_space<smem>>
    %197 = vector.broadcast %196 : f32 to vector<16x16xf32>
    %198 = arith.mulf %197, %195 : vector<16x16xf32>
    %199 = arith.addf %193, %198 : vector<16x16xf32>
    %c3_126 = arith.constant 3 : index
    %c1_127 = arith.constant 1 : index
    %c1_128 = arith.constant 1 : index
    %200 = vector.load %arg5[%c3_126, %c1_127, %c1_128] : memref<4x18x18xf32, #tpu.memory_space<vmem>>, vector<1x16x16xf32>
    %201 = vector.shape_cast %200 : vector<1x16x16xf32> to vector<16x16xf32>
    %c31 = arith.constant 31 : index
    %202 = memref.load %arg1[%c31] : memref<144xf32, #tpu.memory_space<smem>>
    %203 = vector.broadcast %202 : f32 to vector<16x16xf32>
    %204 = arith.mulf %203, %201 : vector<16x16xf32>
    %205 = arith.addf %199, %204 : vector<16x16xf32>
    %c3_129 = arith.constant 3 : index
    %c1_130 = arith.constant 1 : index
    %c2_131 = arith.constant 2 : index
    %206 = vector.load %arg5[%c3_129, %c1_130, %c2_131] : memref<4x18x18xf32, #tpu.memory_space<vmem>>, vector<1x16x16xf32>
    %207 = vector.shape_cast %206 : vector<1x16x16xf32> to vector<16x16xf32>
    %c32 = arith.constant 32 : index
    %208 = memref.load %arg1[%c32] : memref<144xf32, #tpu.memory_space<smem>>
    %209 = vector.broadcast %208 : f32 to vector<16x16xf32>
    %210 = arith.mulf %209, %207 : vector<16x16xf32>
    %211 = arith.addf %205, %210 : vector<16x16xf32>
    %c3_132 = arith.constant 3 : index
    %c2_133 = arith.constant 2 : index
    %c0_134 = arith.constant 0 : index
    %212 = vector.load %arg5[%c3_132, %c2_133, %c0_134] : memref<4x18x18xf32, #tpu.memory_space<vmem>>, vector<1x16x16xf32>
    %213 = vector.shape_cast %212 : vector<1x16x16xf32> to vector<16x16xf32>
    %c33 = arith.constant 33 : index
    %214 = memref.load %arg1[%c33] : memref<144xf32, #tpu.memory_space<smem>>
    %215 = vector.broadcast %214 : f32 to vector<16x16xf32>
    %216 = arith.mulf %215, %213 : vector<16x16xf32>
    %217 = arith.addf %211, %216 : vector<16x16xf32>
    %c3_135 = arith.constant 3 : index
    %c2_136 = arith.constant 2 : index
    %c1_137 = arith.constant 1 : index
    %218 = vector.load %arg5[%c3_135, %c2_136, %c1_137] : memref<4x18x18xf32, #tpu.memory_space<vmem>>, vector<1x16x16xf32>
    %219 = vector.shape_cast %218 : vector<1x16x16xf32> to vector<16x16xf32>
    %c34 = arith.constant 34 : index
    %220 = memref.load %arg1[%c34] : memref<144xf32, #tpu.memory_space<smem>>
    %221 = vector.broadcast %220 : f32 to vector<16x16xf32>
    %222 = arith.mulf %221, %219 : vector<16x16xf32>
    %223 = arith.addf %217, %222 : vector<16x16xf32>
    %c3_138 = arith.constant 3 : index
    %c2_139 = arith.constant 2 : index
    %c2_140 = arith.constant 2 : index
    %224 = vector.load %arg5[%c3_138, %c2_139, %c2_140] : memref<4x18x18xf32, #tpu.memory_space<vmem>>, vector<1x16x16xf32>
    %225 = vector.shape_cast %224 : vector<1x16x16xf32> to vector<16x16xf32>
    %c35 = arith.constant 35 : index
    %226 = memref.load %arg1[%c35] : memref<144xf32, #tpu.memory_space<smem>>
    %227 = vector.broadcast %226 : f32 to vector<16x16xf32>
    %228 = arith.mulf %227, %225 : vector<16x16xf32>
    %229 = arith.addf %223, %228 : vector<16x16xf32>
    %cst_141 = arith.constant dense<0.000000e+00> : vector<16xf32>
    %230 = vector.multi_reduction <add>, %229, %cst_141 [1] : vector<16x16xf32> to vector<16xf32>
    %231 = vector.shape_cast %230 : vector<16xf32> to vector<16x1xf32>
    %cst_142 = arith.constant dense<0.000000e+00> : vector<1xf32>
    %232 = vector.multi_reduction <add>, %231, %cst_142 [0] : vector<16x1xf32> to vector<1xf32>
    %233 = vector.shape_cast %232 : vector<1xf32> to vector<1x1xf32>
    %cst_143 = arith.constant 3.906250e-03 : f32
    %234 = vector.broadcast %cst_143 : f32 to vector<1x1xf32>
    %235 = arith.mulf %233, %234 : vector<1x1xf32>
    %236 = vector.broadcast %235 : vector<1x1xf32> to vector<16x16xf32>
    %237 = arith.subf %229, %236 : vector<16x16xf32>
    %238 = arith.mulf %237, %237 : vector<16x16xf32>
    %cst_144 = arith.constant dense<0.000000e+00> : vector<16xf32>
    %239 = vector.multi_reduction <add>, %238, %cst_144 [1] : vector<16x16xf32> to vector<16xf32>
    %240 = vector.shape_cast %239 : vector<16xf32> to vector<16x1xf32>
    %cst_145 = arith.constant dense<0.000000e+00> : vector<1xf32>
    %241 = vector.multi_reduction <add>, %240, %cst_145 [0] : vector<16x1xf32> to vector<1xf32>
    %242 = vector.shape_cast %241 : vector<1xf32> to vector<1x1xf32>
    %cst_146 = arith.constant 3.906250e-03 : f32
    %243 = vector.broadcast %cst_146 : f32 to vector<1x1xf32>
    %244 = arith.mulf %242, %243 : vector<1x1xf32>
    %245 = vector.broadcast %235 : vector<1x1xf32> to vector<16x16xf32>
    %246 = arith.subf %229, %245 : vector<16x16xf32>
    %cst_147 = arith.constant 9.99999974E-6 : f32
    %247 = vector.broadcast %cst_147 : f32 to vector<1x1xf32>
    %248 = arith.addf %244, %247 : vector<1x1xf32>
    %249 = math.rsqrt %248 : vector<1x1xf32>
    %250 = vector.broadcast %249 : vector<1x1xf32> to vector<16x16xf32>
    %251 = arith.mulf %246, %250 : vector<16x16xf32>
    %cst_148 = arith.constant 0.000000e+00 : f32
    %252 = vector.broadcast %cst_148 : f32 to vector<16x16xf32>
    %253 = arith.maximumf %251, %252 : vector<16x16xf32>
    %c0_149 = arith.constant 0 : index
    %c1_150 = arith.constant 1 : index
    %c1_151 = arith.constant 1 : index
    %254 = vector.load %arg6[%c0_149, %c1_150, %c1_151] : memref<4x18x18xf32, #tpu.memory_space<vmem>>, vector<1x16x16xf32>
    %255 = vector.shape_cast %254 : vector<1x16x16xf32> to vector<16x16xf32>
    %256 = vector.shape_cast %253 : vector<16x16xf32> to vector<1x16x16xf32>
    tpu.vector_store %arg6[%c0_149, %c1_150, %c1_151], %256 {strides = array<i32>} : memref<4x18x18xf32, #tpu.memory_space<vmem>>, vector<1x16x16xf32>,
    %cst_152 = arith.constant 0.000000e+00 : f32
    %257 = vector.broadcast %cst_152 : f32 to vector<16x16xf32>
    %c0_153 = arith.constant 0 : index
    %c0_154 = arith.constant 0 : index
    %c0_155 = arith.constant 0 : index
    %258 = vector.load %arg5[%c0_153, %c0_154, %c0_155] : memref<4x18x18xf32, #tpu.memory_space<vmem>>, vector<1x16x16xf32>
    %259 = vector.shape_cast %258 : vector<1x16x16xf32> to vector<16x16xf32>
    %c36 = arith.constant 36 : index
    %260 = memref.load %arg1[%c36] : memref<144xf32, #tpu.memory_space<smem>>
    %261 = vector.broadcast %260 : f32 to vector<16x16xf32>
    %262 = arith.mulf %261, %259 : vector<16x16xf32>
    %263 = arith.addf %257, %262 : vector<16x16xf32>
    %c0_156 = arith.constant 0 : index
    %c0_157 = arith.constant 0 : index
    %c1_158 = arith.constant 1 : index
    %264 = vector.load %arg5[%c0_156, %c0_157, %c1_158] : memref<4x18x18xf32, #tpu.memory_space<vmem>>, vector<1x16x16xf32>
    %265 = vector.shape_cast %264 : vector<1x16x16xf32> to vector<16x16xf32>
    %c37 = arith.constant 37 : index
    %266 = memref.load %arg1[%c37] : memref<144xf32, #tpu.memory_space<smem>>
    %267 = vector.broadcast %266 : f32 to vector<16x16xf32>
    %268 = arith.mulf %267, %265 : vector<16x16xf32>
    %269 = arith.addf %263, %268 : vector<16x16xf32>
    %c0_159 = arith.constant 0 : index
    %c0_160 = arith.constant 0 : index
    %c2_161 = arith.constant 2 : index
    %270 = vector.load %arg5[%c0_159, %c0_160, %c2_161] : memref<4x18x18xf32, #tpu.memory_space<vmem>>, vector<1x16x16xf32>
    %271 = vector.shape_cast %270 : vector<1x16x16xf32> to vector<16x16xf32>
    %c38 = arith.constant 38 : index
    %272 = memref.load %arg1[%c38] : memref<144xf32, #tpu.memory_space<smem>>
    %273 = vector.broadcast %272 : f32 to vector<16x16xf32>
    %274 = arith.mulf %273, %271 : vector<16x16xf32>
    %275 = arith.addf %269, %274 : vector<16x16xf32>
    %c0_162 = arith.constant 0 : index
    %c1_163 = arith.constant 1 : index
    %c0_164 = arith.constant 0 : index
    %276 = vector.load %arg5[%c0_162, %c1_163, %c0_164] : memref<4x18x18xf32, #tpu.memory_space<vmem>>, vector<1x16x16xf32>
    %277 = vector.shape_cast %276 : vector<1x16x16xf32> to vector<16x16xf32>
    %c39 = arith.constant 39 : index
    %278 = memref.load %arg1[%c39] : memref<144xf32, #tpu.memory_space<smem>>
    %279 = vector.broadcast %278 : f32 to vector<16x16xf32>
    %280 = arith.mulf %279, %277 : vector<16x16xf32>
    %281 = arith.addf %275, %280 : vector<16x16xf32>
    %c0_165 = arith.constant 0 : index
    %c1_166 = arith.constant 1 : index
    %c1_167 = arith.constant 1 : index
    %282 = vector.load %arg5[%c0_165, %c1_166, %c1_167] : memref<4x18x18xf32, #tpu.memory_space<vmem>>, vector<1x16x16xf32>
    %283 = vector.shape_cast %282 : vector<1x16x16xf32> to vector<16x16xf32>
    %c40 = arith.constant 40 : index
    %284 = memref.load %arg1[%c40] : memref<144xf32, #tpu.memory_space<smem>>
    %285 = vector.broadcast %284 : f32 to vector<16x16xf32>
    %286 = arith.mulf %285, %283 : vector<16x16xf32>
    %287 = arith.addf %281, %286 : vector<16x16xf32>
    %c0_168 = arith.constant 0 : index
    %c1_169 = arith.constant 1 : index
    %c2_170 = arith.constant 2 : index
    %288 = vector.load %arg5[%c0_168, %c1_169, %c2_170] : memref<4x18x18xf32, #tpu.memory_space<vmem>>, vector<1x16x16xf32>
    %289 = vector.shape_cast %288 : vector<1x16x16xf32> to vector<16x16xf32>
    %c41 = arith.constant 41 : index
    %290 = memref.load %arg1[%c41] : memref<144xf32, #tpu.memory_space<smem>>
    %291 = vector.broadcast %290 : f32 to vector<16x16xf32>
    %292 = arith.mulf %291, %289 : vector<16x16xf32>
    %293 = arith.addf %287, %292 : vector<16x16xf32>
    %c0_171 = arith.constant 0 : index
    %c2_172 = arith.constant 2 : index
    %c0_173 = arith.constant 0 : index
    %294 = vector.load %arg5[%c0_171, %c2_172, %c0_173] : memref<4x18x18xf32, #tpu.memory_space<vmem>>, vector<1x16x16xf32>
    %295 = vector.shape_cast %294 : vector<1x16x16xf32> to vector<16x16xf32>
    %c42 = arith.constant 42 : index
    %296 = memref.load %arg1[%c42] : memref<144xf32, #tpu.memory_space<smem>>
    %297 = vector.broadcast %296 : f32 to vector<16x16xf32>
    %298 = arith.mulf %297, %295 : vector<16x16xf32>
    %299 = arith.addf %293, %298 : vector<16x16xf32>
    %c0_174 = arith.constant 0 : index
    %c2_175 = arith.constant 2 : index
    %c1_176 = arith.constant 1 : index
    %300 = vector.load %arg5[%c0_174, %c2_175, %c1_176] : memref<4x18x18xf32, #tpu.memory_space<vmem>>, vector<1x16x16xf32>
    %301 = vector.shape_cast %300 : vector<1x16x16xf32> to vector<16x16xf32>
    %c43 = arith.constant 43 : index
    %302 = memref.load %arg1[%c43] : memref<144xf32, #tpu.memory_space<smem>>
    %303 = vector.broadcast %302 : f32 to vector<16x16xf32>
    %304 = arith.mulf %303, %301 : vector<16x16xf32>
    %305 = arith.addf %299, %304 : vector<16x16xf32>
    %c0_177 = arith.constant 0 : index
    %c2_178 = arith.constant 2 : index
    %c2_179 = arith.constant 2 : index
    %306 = vector.load %arg5[%c0_177, %c2_178, %c2_179] : memref<4x18x18xf32, #tpu.memory_space<vmem>>, vector<1x16x16xf32>
    %307 = vector.shape_cast %306 : vector<1x16x16xf32> to vector<16x16xf32>
    %c44 = arith.constant 44 : index
    %308 = memref.load %arg1[%c44] : memref<144xf32, #tpu.memory_space<smem>>
    %309 = vector.broadcast %308 : f32 to vector<16x16xf32>
    %310 = arith.mulf %309, %307 : vector<16x16xf32>
    %311 = arith.addf %305, %310 : vector<16x16xf32>
    %c1_180 = arith.constant 1 : index
    %c0_181 = arith.constant 0 : index
    %c0_182 = arith.constant 0 : index
    %312 = vector.load %arg5[%c1_180, %c0_181, %c0_182] : memref<4x18x18xf32, #tpu.memory_space<vmem>>, vector<1x16x16xf32>
    %313 = vector.shape_cast %312 : vector<1x16x16xf32> to vector<16x16xf32>
    %c45 = arith.constant 45 : index
    %314 = memref.load %arg1[%c45] : memref<144xf32, #tpu.memory_space<smem>>
    %315 = vector.broadcast %314 : f32 to vector<16x16xf32>
    %316 = arith.mulf %315, %313 : vector<16x16xf32>
    %317 = arith.addf %311, %316 : vector<16x16xf32>
    %c1_183 = arith.constant 1 : index
    %c0_184 = arith.constant 0 : index
    %c1_185 = arith.constant 1 : index
    %318 = vector.load %arg5[%c1_183, %c0_184, %c1_185] : memref<4x18x18xf32, #tpu.memory_space<vmem>>, vector<1x16x16xf32>
    %319 = vector.shape_cast %318 : vector<1x16x16xf32> to vector<16x16xf32>
    %c46 = arith.constant 46 : index
    %320 = memref.load %arg1[%c46] : memref<144xf32, #tpu.memory_space<smem>>
    %321 = vector.broadcast %320 : f32 to vector<16x16xf32>
    %322 = arith.mulf %321, %319 : vector<16x16xf32>
    %323 = arith.addf %317, %322 : vector<16x16xf32>
    %c1_186 = arith.constant 1 : index
    %c0_187 = arith.constant 0 : index
    %c2_188 = arith.constant 2 : index
    %324 = vector.load %arg5[%c1_186, %c0_187, %c2_188] : memref<4x18x18xf32, #tpu.memory_space<vmem>>, vector<1x16x16xf32>
    %325 = vector.shape_cast %324 : vector<1x16x16xf32> to vector<16x16xf32>
    %c47 = arith.constant 47 : index
    %326 = memref.load %arg1[%c47] : memref<144xf32, #tpu.memory_space<smem>>
    %327 = vector.broadcast %326 : f32 to vector<16x16xf32>
    %328 = arith.mulf %327, %325 : vector<16x16xf32>
    %329 = arith.addf %323, %328 : vector<16x16xf32>
    %c1_189 = arith.constant 1 : index
    %c1_190 = arith.constant 1 : index
    %c0_191 = arith.constant 0 : index
    %330 = vector.load %arg5[%c1_189, %c1_190, %c0_191] : memref<4x18x18xf32, #tpu.memory_space<vmem>>, vector<1x16x16xf32>
    %331 = vector.shape_cast %330 : vector<1x16x16xf32> to vector<16x16xf32>
    %c48 = arith.constant 48 : index
    %332 = memref.load %arg1[%c48] : memref<144xf32, #tpu.memory_space<smem>>
    %333 = vector.broadcast %332 : f32 to vector<16x16xf32>
    %334 = arith.mulf %333, %331 : vector<16x16xf32>
    %335 = arith.addf %329, %334 : vector<16x16xf32>
    %c1_192 = arith.constant 1 : index
    %c1_193 = arith.constant 1 : index
    %c1_194 = arith.constant 1 : index
    %336 = vector.load %arg5[%c1_192, %c1_193, %c1_194] : memref<4x18x18xf32, #tpu.memory_space<vmem>>, vector<1x16x16xf32>
    %337 = vector.shape_cast %336 : vector<1x16x16xf32> to vector<16x16xf32>
    %c49 = arith.constant 49 : index
    %338 = memref.load %arg1[%c49] : memref<144xf32, #tpu.memory_space<smem>>
    %339 = vector.broadcast %338 : f32 to vector<16x16xf32>
    %340 = arith.mulf %339, %337 : vector<16x16xf32>
    %341 = arith.addf %335, %340 : vector<16x16xf32>
    %c1_195 = arith.constant 1 : index
    %c1_196 = arith.constant 1 : index
    %c2_197 = arith.constant 2 : index
    %342 = vector.load %arg5[%c1_195, %c1_196, %c2_197] : memref<4x18x18xf32, #tpu.memory_space<vmem>>, vector<1x16x16xf32>
    %343 = vector.shape_cast %342 : vector<1x16x16xf32> to vector<16x16xf32>
    %c50 = arith.constant 50 : index
    %344 = memref.load %arg1[%c50] : memref<144xf32, #tpu.memory_space<smem>>
    %345 = vector.broadcast %344 : f32 to vector<16x16xf32>
    %346 = arith.mulf %345, %343 : vector<16x16xf32>
    %347 = arith.addf %341, %346 : vector<16x16xf32>
    %c1_198 = arith.constant 1 : index
    %c2_199 = arith.constant 2 : index
    %c0_200 = arith.constant 0 : index
    %348 = vector.load %arg5[%c1_198, %c2_199, %c0_200] : memref<4x18x18xf32, #tpu.memory_space<vmem>>, vector<1x16x16xf32>
    %349 = vector.shape_cast %348 : vector<1x16x16xf32> to vector<16x16xf32>
    %c51 = arith.constant 51 : index
    %350 = memref.load %arg1[%c51] : memref<144xf32, #tpu.memory_space<smem>>
    %351 = vector.broadcast %350 : f32 to vector<16x16xf32>
    %352 = arith.mulf %351, %349 : vector<16x16xf32>
    %353 = arith.addf %347, %352 : vector<16x16xf32>
    %c1_201 = arith.constant 1 : index
    %c2_202 = arith.constant 2 : index
    %c1_203 = arith.constant 1 : index
    %354 = vector.load %arg5[%c1_201, %c2_202, %c1_203] : memref<4x18x18xf32, #tpu.memory_space<vmem>>, vector<1x16x16xf32>
    %355 = vector.shape_cast %354 : vector<1x16x16xf32> to vector<16x16xf32>
    %c52 = arith.constant 52 : index
    %356 = memref.load %arg1[%c52] : memref<144xf32, #tpu.memory_space<smem>>
    %357 = vector.broadcast %356 : f32 to vector<16x16xf32>
    %358 = arith.mulf %357, %355 : vector<16x16xf32>
    %359 = arith.addf %353, %358 : vector<16x16xf32>
    %c1_204 = arith.constant 1 : index
    %c2_205 = arith.constant 2 : index
    %c2_206 = arith.constant 2 : index
    %360 = vector.load %arg5[%c1_204, %c2_205, %c2_206] : memref<4x18x18xf32, #tpu.memory_space<vmem>>, vector<1x16x16xf32>
    %361 = vector.shape_cast %360 : vector<1x16x16xf32> to vector<16x16xf32>
    %c53 = arith.constant 53 : index
    %362 = memref.load %arg1[%c53] : memref<144xf32, #tpu.memory_space<smem>>
    %363 = vector.broadcast %362 : f32 to vector<16x16xf32>
    %364 = arith.mulf %363, %361 : vector<16x16xf32>
    %365 = arith.addf %359, %364 : vector<16x16xf32>
    %c2_207 = arith.constant 2 : index
    %c0_208 = arith.constant 0 : index
    %c0_209 = arith.constant 0 : index
    %366 = vector.load %arg5[%c2_207, %c0_208, %c0_209] : memref<4x18x18xf32, #tpu.memory_space<vmem>>, vector<1x16x16xf32>
    %367 = vector.shape_cast %366 : vector<1x16x16xf32> to vector<16x16xf32>
    %c54 = arith.constant 54 : index
    %368 = memref.load %arg1[%c54] : memref<144xf32, #tpu.memory_space<smem>>
    %369 = vector.broadcast %368 : f32 to vector<16x16xf32>
    %370 = arith.mulf %369, %367 : vector<16x16xf32>
    %371 = arith.addf %365, %370 : vector<16x16xf32>
    %c2_210 = arith.constant 2 : index
    %c0_211 = arith.constant 0 : index
    %c1_212 = arith.constant 1 : index
    %372 = vector.load %arg5[%c2_210, %c0_211, %c1_212] : memref<4x18x18xf32, #tpu.memory_space<vmem>>, vector<1x16x16xf32>
    %373 = vector.shape_cast %372 : vector<1x16x16xf32> to vector<16x16xf32>
    %c55 = arith.constant 55 : index
    %374 = memref.load %arg1[%c55] : memref<144xf32, #tpu.memory_space<smem>>
    %375 = vector.broadcast %374 : f32 to vector<16x16xf32>
    %376 = arith.mulf %375, %373 : vector<16x16xf32>
    %377 = arith.addf %371, %376 : vector<16x16xf32>
    %c2_213 = arith.constant 2 : index
    %c0_214 = arith.constant 0 : index
    %c2_215 = arith.constant 2 : index
    %378 = vector.load %arg5[%c2_213, %c0_214, %c2_215] : memref<4x18x18xf32, #tpu.memory_space<vmem>>, vector<1x16x16xf32>
    %379 = vector.shape_cast %378 : vector<1x16x16xf32> to vector<16x16xf32>
    %c56 = arith.constant 56 : index
    %380 = memref.load %arg1[%c56] : memref<144xf32, #tpu.memory_space<smem>>
    %381 = vector.broadcast %380 : f32 to vector<16x16xf32>
    %382 = arith.mulf %381, %379 : vector<16x16xf32>
    %383 = arith.addf %377, %382 : vector<16x16xf32>
    %c2_216 = arith.constant 2 : index
    %c1_217 = arith.constant 1 : index
    %c0_218 = arith.constant 0 : index
    %384 = vector.load %arg5[%c2_216, %c1_217, %c0_218] : memref<4x18x18xf32, #tpu.memory_space<vmem>>, vector<1x16x16xf32>
    %385 = vector.shape_cast %384 : vector<1x16x16xf32> to vector<16x16xf32>
    %c57 = arith.constant 57 : index
    %386 = memref.load %arg1[%c57] : memref<144xf32, #tpu.memory_space<smem>>
    %387 = vector.broadcast %386 : f32 to vector<16x16xf32>
    %388 = arith.mulf %387, %385 : vector<16x16xf32>
    %389 = arith.addf %383, %388 : vector<16x16xf32>
    %c2_219 = arith.constant 2 : index
    %c1_220 = arith.constant 1 : index
    %c1_221 = arith.constant 1 : index
    %390 = vector.load %arg5[%c2_219, %c1_220, %c1_221] : memref<4x18x18xf32, #tpu.memory_space<vmem>>, vector<1x16x16xf32>
    %391 = vector.shape_cast %390 : vector<1x16x16xf32> to vector<16x16xf32>
    %c58 = arith.constant 58 : index
    %392 = memref.load %arg1[%c58] : memref<144xf32, #tpu.memory_space<smem>>
    %393 = vector.broadcast %392 : f32 to vector<16x16xf32>
    %394 = arith.mulf %393, %391 : vector<16x16xf32>
    %395 = arith.addf %389, %394 : vector<16x16xf32>
    %c2_222 = arith.constant 2 : index
    %c1_223 = arith.constant 1 : index
    %c2_224 = arith.constant 2 : index
    %396 = vector.load %arg5[%c2_222, %c1_223, %c2_224] : memref<4x18x18xf32, #tpu.memory_space<vmem>>, vector<1x16x16xf32>
    %397 = vector.shape_cast %396 : vector<1x16x16xf32> to vector<16x16xf32>
    %c59 = arith.constant 59 : index
    %398 = memref.load %arg1[%c59] : memref<144xf32, #tpu.memory_space<smem>>
    %399 = vector.broadcast %398 : f32 to vector<16x16xf32>
    %400 = arith.mulf %399, %397 : vector<16x16xf32>
    %401 = arith.addf %395, %400 : vector<16x16xf32>
    %c2_225 = arith.constant 2 : index
    %c2_226 = arith.constant 2 : index
    %c0_227 = arith.constant 0 : index
    %402 = vector.load %arg5[%c2_225, %c2_226, %c0_227] : memref<4x18x18xf32, #tpu.memory_space<vmem>>, vector<1x16x16xf32>
    %403 = vector.shape_cast %402 : vector<1x16x16xf32> to vector<16x16xf32>
    %c60 = arith.constant 60 : index
    %404 = memref.load %arg1[%c60] : memref<144xf32, #tpu.memory_space<smem>>
    %405 = vector.broadcast %404 : f32 to vector<16x16xf32>
    %406 = arith.mulf %405, %403 : vector<16x16xf32>
    %407 = arith.addf %401, %406 : vector<16x16xf32>
    %c2_228 = arith.constant 2 : index
    %c2_229 = arith.constant 2 : index
    %c1_230 = arith.constant 1 : index
    %408 = vector.load %arg5[%c2_228, %c2_229, %c1_230] : memref<4x18x18xf32, #tpu.memory_space<vmem>>, vector<1x16x16xf32>
    %409 = vector.shape_cast %408 : vector<1x16x16xf32> to vector<16x16xf32>
    %c61 = arith.constant 61 : index
    %410 = memref.load %arg1[%c61] : memref<144xf32, #tpu.memory_space<smem>>
    %411 = vector.broadcast %410 : f32 to vector<16x16xf32>
    %412 = arith.mulf %411, %409 : vector<16x16xf32>
    %413 = arith.addf %407, %412 : vector<16x16xf32>
    %c2_231 = arith.constant 2 : index
    %c2_232 = arith.constant 2 : index
    %c2_233 = arith.constant 2 : index
    %414 = vector.load %arg5[%c2_231, %c2_232, %c2_233] : memref<4x18x18xf32, #tpu.memory_space<vmem>>, vector<1x16x16xf32>
    %415 = vector.shape_cast %414 : vector<1x16x16xf32> to vector<16x16xf32>
    %c62 = arith.constant 62 : index
    %416 = memref.load %arg1[%c62] : memref<144xf32, #tpu.memory_space<smem>>
    %417 = vector.broadcast %416 : f32 to vector<16x16xf32>
    %418 = arith.mulf %417, %415 : vector<16x16xf32>
    %419 = arith.addf %413, %418 : vector<16x16xf32>
    %c3_234 = arith.constant 3 : index
    %c0_235 = arith.constant 0 : index
    %c0_236 = arith.constant 0 : index
    %420 = vector.load %arg5[%c3_234, %c0_235, %c0_236] : memref<4x18x18xf32, #tpu.memory_space<vmem>>, vector<1x16x16xf32>
    %421 = vector.shape_cast %420 : vector<1x16x16xf32> to vector<16x16xf32>
    %c63 = arith.constant 63 : index
    %422 = memref.load %arg1[%c63] : memref<144xf32, #tpu.memory_space<smem>>
    %423 = vector.broadcast %422 : f32 to vector<16x16xf32>
    %424 = arith.mulf %423, %421 : vector<16x16xf32>
    %425 = arith.addf %419, %424 : vector<16x16xf32>
    %c3_237 = arith.constant 3 : index
    %c0_238 = arith.constant 0 : index
    %c1_239 = arith.constant 1 : index
    %426 = vector.load %arg5[%c3_237, %c0_238, %c1_239] : memref<4x18x18xf32, #tpu.memory_space<vmem>>, vector<1x16x16xf32>
    %427 = vector.shape_cast %426 : vector<1x16x16xf32> to vector<16x16xf32>
    %c64 = arith.constant 64 : index
    %428 = memref.load %arg1[%c64] : memref<144xf32, #tpu.memory_space<smem>>
    %429 = vector.broadcast %428 : f32 to vector<16x16xf32>
    %430 = arith.mulf %429, %427 : vector<16x16xf32>
    %431 = arith.addf %425, %430 : vector<16x16xf32>
    %c3_240 = arith.constant 3 : index
    %c0_241 = arith.constant 0 : index
    %c2_242 = arith.constant 2 : index
    %432 = vector.load %arg5[%c3_240, %c0_241, %c2_242] : memref<4x18x18xf32, #tpu.memory_space<vmem>>, vector<1x16x16xf32>
    %433 = vector.shape_cast %432 : vector<1x16x16xf32> to vector<16x16xf32>
    %c65 = arith.constant 65 : index
    %434 = memref.load %arg1[%c65] : memref<144xf32, #tpu.memory_space<smem>>
    %435 = vector.broadcast %434 : f32 to vector<16x16xf32>
    %436 = arith.mulf %435, %433 : vector<16x16xf32>
    %437 = arith.addf %431, %436 : vector<16x16xf32>
    %c3_243 = arith.constant 3 : index
    %c1_244 = arith.constant 1 : index
    %c0_245 = arith.constant 0 : index
    %438 = vector.load %arg5[%c3_243, %c1_244, %c0_245] : memref<4x18x18xf32, #tpu.memory_space<vmem>>, vector<1x16x16xf32>
    %439 = vector.shape_cast %438 : vector<1x16x16xf32> to vector<16x16xf32>
    %c66 = arith.constant 66 : index
    %440 = memref.load %arg1[%c66] : memref<144xf32, #tpu.memory_space<smem>>
    %441 = vector.broadcast %440 : f32 to vector<16x16xf32>
    %442 = arith.mulf %441, %439 : vector<16x16xf32>
    %443 = arith.addf %437, %442 : vector<16x16xf32>
    %c3_246 = arith.constant 3 : index
    %c1_247 = arith.constant 1 : index
    %c1_248 = arith.constant 1 : index
    %444 = vector.load %arg5[%c3_246, %c1_247, %c1_248] : memref<4x18x18xf32, #tpu.memory_space<vmem>>, vector<1x16x16xf32>
    %445 = vector.shape_cast %444 : vector<1x16x16xf32> to vector<16x16xf32>
    %c67 = arith.constant 67 : index
    %446 = memref.load %arg1[%c67] : memref<144xf32, #tpu.memory_space<smem>>
    %447 = vector.broadcast %446 : f32 to vector<16x16xf32>
    %448 = arith.mulf %447, %445 : vector<16x16xf32>
    %449 = arith.addf %443, %448 : vector<16x16xf32>
    %c3_249 = arith.constant 3 : index
    %c1_250 = arith.constant 1 : index
    %c2_251 = arith.constant 2 : index
    %450 = vector.load %arg5[%c3_249, %c1_250, %c2_251] : memref<4x18x18xf32, #tpu.memory_space<vmem>>, vector<1x16x16xf32>
    %451 = vector.shape_cast %450 : vector<1x16x16xf32> to vector<16x16xf32>
    %c68 = arith.constant 68 : index
    %452 = memref.load %arg1[%c68] : memref<144xf32, #tpu.memory_space<smem>>
    %453 = vector.broadcast %452 : f32 to vector<16x16xf32>
    %454 = arith.mulf %453, %451 : vector<16x16xf32>
    %455 = arith.addf %449, %454 : vector<16x16xf32>
    %c3_252 = arith.constant 3 : index
    %c2_253 = arith.constant 2 : index
    %c0_254 = arith.constant 0 : index
    %456 = vector.load %arg5[%c3_252, %c2_253, %c0_254] : memref<4x18x18xf32, #tpu.memory_space<vmem>>, vector<1x16x16xf32>
    %457 = vector.shape_cast %456 : vector<1x16x16xf32> to vector<16x16xf32>
    %c69 = arith.constant 69 : index
    %458 = memref.load %arg1[%c69] : memref<144xf32, #tpu.memory_space<smem>>
    %459 = vector.broadcast %458 : f32 to vector<16x16xf32>
    %460 = arith.mulf %459, %457 : vector<16x16xf32>
    %461 = arith.addf %455, %460 : vector<16x16xf32>
    %c3_255 = arith.constant 3 : index
    %c2_256 = arith.constant 2 : index
    %c1_257 = arith.constant 1 : index
    %462 = vector.load %arg5[%c3_255, %c2_256, %c1_257] : memref<4x18x18xf32, #tpu.memory_space<vmem>>, vector<1x16x16xf32>
    %463 = vector.shape_cast %462 : vector<1x16x16xf32> to vector<16x16xf32>
    %c70 = arith.constant 70 : index
    %464 = memref.load %arg1[%c70] : memref<144xf32, #tpu.memory_space<smem>>
    %465 = vector.broadcast %464 : f32 to vector<16x16xf32>
    %466 = arith.mulf %465, %463 : vector<16x16xf32>
    %467 = arith.addf %461, %466 : vector<16x16xf32>
    %c3_258 = arith.constant 3 : index
    %c2_259 = arith.constant 2 : index
    %c2_260 = arith.constant 2 : index
    %468 = vector.load %arg5[%c3_258, %c2_259, %c2_260] : memref<4x18x18xf32, #tpu.memory_space<vmem>>, vector<1x16x16xf32>
    %469 = vector.shape_cast %468 : vector<1x16x16xf32> to vector<16x16xf32>
    %c71 = arith.constant 71 : index
    %470 = memref.load %arg1[%c71] : memref<144xf32, #tpu.memory_space<smem>>
    %471 = vector.broadcast %470 : f32 to vector<16x16xf32>
    %472 = arith.mulf %471, %469 : vector<16x16xf32>
    %473 = arith.addf %467, %472 : vector<16x16xf32>
    %cst_261 = arith.constant dense<0.000000e+00> : vector<16xf32>
    %474 = vector.multi_reduction <add>, %473, %cst_261 [1] : vector<16x16xf32> to vector<16xf32>
    %475 = vector.shape_cast %474 : vector<16xf32> to vector<16x1xf32>
    %cst_262 = arith.constant dense<0.000000e+00> : vector<1xf32>
    %476 = vector.multi_reduction <add>, %475, %cst_262 [0] : vector<16x1xf32> to vector<1xf32>
    %477 = vector.shape_cast %476 : vector<1xf32> to vector<1x1xf32>
    %cst_263 = arith.constant 3.906250e-03 : f32
    %478 = vector.broadcast %cst_263 : f32 to vector<1x1xf32>
    %479 = arith.mulf %477, %478 : vector<1x1xf32>
    %480 = vector.broadcast %479 : vector<1x1xf32> to vector<16x16xf32>
    %481 = arith.subf %473, %480 : vector<16x16xf32>
    %482 = arith.mulf %481, %481 : vector<16x16xf32>
    %cst_264 = arith.constant dense<0.000000e+00> : vector<16xf32>
    %483 = vector.multi_reduction <add>, %482, %cst_264 [1] : vector<16x16xf32> to vector<16xf32>
    %484 = vector.shape_cast %483 : vector<16xf32> to vector<16x1xf32>
    %cst_265 = arith.constant dense<0.000000e+00> : vector<1xf32>
    %485 = vector.multi_reduction <add>, %484, %cst_265 [0] : vector<16x1xf32> to vector<1xf32>
    %486 = vector.shape_cast %485 : vector<1xf32> to vector<1x1xf32>
    %cst_266 = arith.constant 3.906250e-03 : f32
    %487 = vector.broadcast %cst_266 : f32 to vector<1x1xf32>
    %488 = arith.mulf %486, %487 : vector<1x1xf32>
    %489 = vector.broadcast %479 : vector<1x1xf32> to vector<16x16xf32>
    %490 = arith.subf %473, %489 : vector<16x16xf32>
    %cst_267 = arith.constant 9.99999974E-6 : f32
    %491 = vector.broadcast %cst_267 : f32 to vector<1x1xf32>
    %492 = arith.addf %488, %491 : vector<1x1xf32>
    %493 = math.rsqrt %492 : vector<1x1xf32>
    %494 = vector.broadcast %493 : vector<1x1xf32> to vector<16x16xf32>
    %495 = arith.mulf %490, %494 : vector<16x16xf32>
    %cst_268 = arith.constant 0.000000e+00 : f32
    %496 = vector.broadcast %cst_268 : f32 to vector<16x16xf32>
    %497 = arith.maximumf %495, %496 : vector<16x16xf32>
    %c1_269 = arith.constant 1 : index
    %c1_270 = arith.constant 1 : index
    %c1_271 = arith.constant 1 : index
    %498 = vector.load %arg6[%c1_269, %c1_270, %c1_271] : memref<4x18x18xf32, #tpu.memory_space<vmem>>, vector<1x16x16xf32>
    %499 = vector.shape_cast %498 : vector<1x16x16xf32> to vector<16x16xf32>
    %500 = vector.shape_cast %497 : vector<16x16xf32> to vector<1x16x16xf32>
    tpu.vector_store %arg6[%c1_269, %c1_270, %c1_271], %500 {strides = array<i32>} : memref<4x18x18xf32, #tpu.memory_space<vmem>>, vector<1x16x16xf32>,
    %cst_272 = arith.constant 0.000000e+00 : f32
    %501 = vector.broadcast %cst_272 : f32 to vector<16x16xf32>
    %c0_273 = arith.constant 0 : index
    %c0_274 = arith.constant 0 : index
    %c0_275 = arith.constant 0 : index
    %502 = vector.load %arg5[%c0_273, %c0_274, %c0_275] : memref<4x18x18xf32, #tpu.memory_space<vmem>>, vector<1x16x16xf32>
    %503 = vector.shape_cast %502 : vector<1x16x16xf32> to vector<16x16xf32>
    %c72 = arith.constant 72 : index
    %504 = memref.load %arg1[%c72] : memref<144xf32, #tpu.memory_space<smem>>
    %505 = vector.broadcast %504 : f32 to vector<16x16xf32>
    %506 = arith.mulf %505, %503 : vector<16x16xf32>
    %507 = arith.addf %501, %506 : vector<16x16xf32>
    %c0_276 = arith.constant 0 : index
    %c0_277 = arith.constant 0 : index
    %c1_278 = arith.constant 1 : index
    %508 = vector.load %arg5[%c0_276, %c0_277, %c1_278] : memref<4x18x18xf32, #tpu.memory_space<vmem>>, vector<1x16x16xf32>
    %509 = vector.shape_cast %508 : vector<1x16x16xf32> to vector<16x16xf32>
    %c73 = arith.constant 73 : index
    %510 = memref.load %arg1[%c73] : memref<144xf32, #tpu.memory_space<smem>>
    %511 = vector.broadcast %510 : f32 to vector<16x16xf32>
    %512 = arith.mulf %511, %509 : vector<16x16xf32>
    %513 = arith.addf %507, %512 : vector<16x16xf32>
    %c0_279 = arith.constant 0 : index
    %c0_280 = arith.constant 0 : index
    %c2_281 = arith.constant 2 : index
    %514 = vector.load %arg5[%c0_279, %c0_280, %c2_281] : memref<4x18x18xf32, #tpu.memory_space<vmem>>, vector<1x16x16xf32>
    %515 = vector.shape_cast %514 : vector<1x16x16xf32> to vector<16x16xf32>
    %c74 = arith.constant 74 : index
    %516 = memref.load %arg1[%c74] : memref<144xf32, #tpu.memory_space<smem>>
    %517 = vector.broadcast %516 : f32 to vector<16x16xf32>
    %518 = arith.mulf %517, %515 : vector<16x16xf32>
    %519 = arith.addf %513, %518 : vector<16x16xf32>
    %c0_282 = arith.constant 0 : index
    %c1_283 = arith.constant 1 : index
    %c0_284 = arith.constant 0 : index
    %520 = vector.load %arg5[%c0_282, %c1_283, %c0_284] : memref<4x18x18xf32, #tpu.memory_space<vmem>>, vector<1x16x16xf32>
    %521 = vector.shape_cast %520 : vector<1x16x16xf32> to vector<16x16xf32>
    %c75 = arith.constant 75 : index
    %522 = memref.load %arg1[%c75] : memref<144xf32, #tpu.memory_space<smem>>
    %523 = vector.broadcast %522 : f32 to vector<16x16xf32>
    %524 = arith.mulf %523, %521 : vector<16x16xf32>
    %525 = arith.addf %519, %524 : vector<16x16xf32>
    %c0_285 = arith.constant 0 : index
    %c1_286 = arith.constant 1 : index
    %c1_287 = arith.constant 1 : index
    %526 = vector.load %arg5[%c0_285, %c1_286, %c1_287] : memref<4x18x18xf32, #tpu.memory_space<vmem>>, vector<1x16x16xf32>
    %527 = vector.shape_cast %526 : vector<1x16x16xf32> to vector<16x16xf32>
    %c76 = arith.constant 76 : index
    %528 = memref.load %arg1[%c76] : memref<144xf32, #tpu.memory_space<smem>>
    %529 = vector.broadcast %528 : f32 to vector<16x16xf32>
    %530 = arith.mulf %529, %527 : vector<16x16xf32>
    %531 = arith.addf %525, %530 : vector<16x16xf32>
    %c0_288 = arith.constant 0 : index
    %c1_289 = arith.constant 1 : index
    %c2_290 = arith.constant 2 : index
    %532 = vector.load %arg5[%c0_288, %c1_289, %c2_290] : memref<4x18x18xf32, #tpu.memory_space<vmem>>, vector<1x16x16xf32>
    %533 = vector.shape_cast %532 : vector<1x16x16xf32> to vector<16x16xf32>
    %c77 = arith.constant 77 : index
    %534 = memref.load %arg1[%c77] : memref<144xf32, #tpu.memory_space<smem>>
    %535 = vector.broadcast %534 : f32 to vector<16x16xf32>
    %536 = arith.mulf %535, %533 : vector<16x16xf32>
    %537 = arith.addf %531, %536 : vector<16x16xf32>
    %c0_291 = arith.constant 0 : index
    %c2_292 = arith.constant 2 : index
    %c0_293 = arith.constant 0 : index
    %538 = vector.load %arg5[%c0_291, %c2_292, %c0_293] : memref<4x18x18xf32, #tpu.memory_space<vmem>>, vector<1x16x16xf32>
    %539 = vector.shape_cast %538 : vector<1x16x16xf32> to vector<16x16xf32>
    %c78 = arith.constant 78 : index
    %540 = memref.load %arg1[%c78] : memref<144xf32, #tpu.memory_space<smem>>
    %541 = vector.broadcast %540 : f32 to vector<16x16xf32>
    %542 = arith.mulf %541, %539 : vector<16x16xf32>
    %543 = arith.addf %537, %542 : vector<16x16xf32>
    %c0_294 = arith.constant 0 : index
    %c2_295 = arith.constant 2 : index
    %c1_296 = arith.constant 1 : index
    %544 = vector.load %arg5[%c0_294, %c2_295, %c1_296] : memref<4x18x18xf32, #tpu.memory_space<vmem>>, vector<1x16x16xf32>
    %545 = vector.shape_cast %544 : vector<1x16x16xf32> to vector<16x16xf32>
    %c79 = arith.constant 79 : index
    %546 = memref.load %arg1[%c79] : memref<144xf32, #tpu.memory_space<smem>>
    %547 = vector.broadcast %546 : f32 to vector<16x16xf32>
    %548 = arith.mulf %547, %545 : vector<16x16xf32>
    %549 = arith.addf %543, %548 : vector<16x16xf32>
    %c0_297 = arith.constant 0 : index
    %c2_298 = arith.constant 2 : index
    %c2_299 = arith.constant 2 : index
    %550 = vector.load %arg5[%c0_297, %c2_298, %c2_299] : memref<4x18x18xf32, #tpu.memory_space<vmem>>, vector<1x16x16xf32>
    %551 = vector.shape_cast %550 : vector<1x16x16xf32> to vector<16x16xf32>
    %c80 = arith.constant 80 : index
    %552 = memref.load %arg1[%c80] : memref<144xf32, #tpu.memory_space<smem>>
    %553 = vector.broadcast %552 : f32 to vector<16x16xf32>
    %554 = arith.mulf %553, %551 : vector<16x16xf32>
    %555 = arith.addf %549, %554 : vector<16x16xf32>
    %c1_300 = arith.constant 1 : index
    %c0_301 = arith.constant 0 : index
    %c0_302 = arith.constant 0 : index
    %556 = vector.load %arg5[%c1_300, %c0_301, %c0_302] : memref<4x18x18xf32, #tpu.memory_space<vmem>>, vector<1x16x16xf32>
    %557 = vector.shape_cast %556 : vector<1x16x16xf32> to vector<16x16xf32>
    %c81 = arith.constant 81 : index
    %558 = memref.load %arg1[%c81] : memref<144xf32, #tpu.memory_space<smem>>
    %559 = vector.broadcast %558 : f32 to vector<16x16xf32>
    %560 = arith.mulf %559, %557 : vector<16x16xf32>
    %561 = arith.addf %555, %560 : vector<16x16xf32>
    %c1_303 = arith.constant 1 : index
    %c0_304 = arith.constant 0 : index
    %c1_305 = arith.constant 1 : index
    %562 = vector.load %arg5[%c1_303, %c0_304, %c1_305] : memref<4x18x18xf32, #tpu.memory_space<vmem>>, vector<1x16x16xf32>
    %563 = vector.shape_cast %562 : vector<1x16x16xf32> to vector<16x16xf32>
    %c82 = arith.constant 82 : index
    %564 = memref.load %arg1[%c82] : memref<144xf32, #tpu.memory_space<smem>>
    %565 = vector.broadcast %564 : f32 to vector<16x16xf32>
    %566 = arith.mulf %565, %563 : vector<16x16xf32>
    %567 = arith.addf %561, %566 : vector<16x16xf32>
    %c1_306 = arith.constant 1 : index
    %c0_307 = arith.constant 0 : index
    %c2_308 = arith.constant 2 : index
    %568 = vector.load %arg5[%c1_306, %c0_307, %c2_308] : memref<4x18x18xf32, #tpu.memory_space<vmem>>, vector<1x16x16xf32>
    %569 = vector.shape_cast %568 : vector<1x16x16xf32> to vector<16x16xf32>
    %c83 = arith.constant 83 : index
    %570 = memref.load %arg1[%c83] : memref<144xf32, #tpu.memory_space<smem>>
    %571 = vector.broadcast %570 : f32 to vector<16x16xf32>
    %572 = arith.mulf %571, %569 : vector<16x16xf32>
    %573 = arith.addf %567, %572 : vector<16x16xf32>
    %c1_309 = arith.constant 1 : index
    %c1_310 = arith.constant 1 : index
    %c0_311 = arith.constant 0 : index
    %574 = vector.load %arg5[%c1_309, %c1_310, %c0_311] : memref<4x18x18xf32, #tpu.memory_space<vmem>>, vector<1x16x16xf32>
    %575 = vector.shape_cast %574 : vector<1x16x16xf32> to vector<16x16xf32>
    %c84 = arith.constant 84 : index
    %576 = memref.load %arg1[%c84] : memref<144xf32, #tpu.memory_space<smem>>
    %577 = vector.broadcast %576 : f32 to vector<16x16xf32>
    %578 = arith.mulf %577, %575 : vector<16x16xf32>
    %579 = arith.addf %573, %578 : vector<16x16xf32>
    %c1_312 = arith.constant 1 : index
    %c1_313 = arith.constant 1 : index
    %c1_314 = arith.constant 1 : index
    %580 = vector.load %arg5[%c1_312, %c1_313, %c1_314] : memref<4x18x18xf32, #tpu.memory_space<vmem>>, vector<1x16x16xf32>
    %581 = vector.shape_cast %580 : vector<1x16x16xf32> to vector<16x16xf32>
    %c85 = arith.constant 85 : index
    %582 = memref.load %arg1[%c85] : memref<144xf32, #tpu.memory_space<smem>>
    %583 = vector.broadcast %582 : f32 to vector<16x16xf32>
    %584 = arith.mulf %583, %581 : vector<16x16xf32>
    %585 = arith.addf %579, %584 : vector<16x16xf32>
    %c1_315 = arith.constant 1 : index
    %c1_316 = arith.constant 1 : index
    %c2_317 = arith.constant 2 : index
    %586 = vector.load %arg5[%c1_315, %c1_316, %c2_317] : memref<4x18x18xf32, #tpu.memory_space<vmem>>, vector<1x16x16xf32>
    %587 = vector.shape_cast %586 : vector<1x16x16xf32> to vector<16x16xf32>
    %c86 = arith.constant 86 : index
    %588 = memref.load %arg1[%c86] : memref<144xf32, #tpu.memory_space<smem>>
    %589 = vector.broadcast %588 : f32 to vector<16x16xf32>
    %590 = arith.mulf %589, %587 : vector<16x16xf32>
    %591 = arith.addf %585, %590 : vector<16x16xf32>
    %c1_318 = arith.constant 1 : index
    %c2_319 = arith.constant 2 : index
    %c0_320 = arith.constant 0 : index
    %592 = vector.load %arg5[%c1_318, %c2_319, %c0_320] : memref<4x18x18xf32, #tpu.memory_space<vmem>>, vector<1x16x16xf32>
    %593 = vector.shape_cast %592 : vector<1x16x16xf32> to vector<16x16xf32>
    %c87 = arith.constant 87 : index
    %594 = memref.load %arg1[%c87] : memref<144xf32, #tpu.memory_space<smem>>
    %595 = vector.broadcast %594 : f32 to vector<16x16xf32>
    %596 = arith.mulf %595, %593 : vector<16x16xf32>
    %597 = arith.addf %591, %596 : vector<16x16xf32>
    %c1_321 = arith.constant 1 : index
    %c2_322 = arith.constant 2 : index
    %c1_323 = arith.constant 1 : index
    %598 = vector.load %arg5[%c1_321, %c2_322, %c1_323] : memref<4x18x18xf32, #tpu.memory_space<vmem>>, vector<1x16x16xf32>
    %599 = vector.shape_cast %598 : vector<1x16x16xf32> to vector<16x16xf32>
    %c88 = arith.constant 88 : index
    %600 = memref.load %arg1[%c88] : memref<144xf32, #tpu.memory_space<smem>>
    %601 = vector.broadcast %600 : f32 to vector<16x16xf32>
    %602 = arith.mulf %601, %599 : vector<16x16xf32>
    %603 = arith.addf %597, %602 : vector<16x16xf32>
    %c1_324 = arith.constant 1 : index
    %c2_325 = arith.constant 2 : index
    %c2_326 = arith.constant 2 : index
    %604 = vector.load %arg5[%c1_324, %c2_325, %c2_326] : memref<4x18x18xf32, #tpu.memory_space<vmem>>, vector<1x16x16xf32>
    %605 = vector.shape_cast %604 : vector<1x16x16xf32> to vector<16x16xf32>
    %c89 = arith.constant 89 : index
    %606 = memref.load %arg1[%c89] : memref<144xf32, #tpu.memory_space<smem>>
    %607 = vector.broadcast %606 : f32 to vector<16x16xf32>
    %608 = arith.mulf %607, %605 : vector<16x16xf32>
    %609 = arith.addf %603, %608 : vector<16x16xf32>
    %c2_327 = arith.constant 2 : index
    %c0_328 = arith.constant 0 : index
    %c0_329 = arith.constant 0 : index
    %610 = vector.load %arg5[%c2_327, %c0_328, %c0_329] : memref<4x18x18xf32, #tpu.memory_space<vmem>>, vector<1x16x16xf32>
    %611 = vector.shape_cast %610 : vector<1x16x16xf32> to vector<16x16xf32>
    %c90 = arith.constant 90 : index
    %612 = memref.load %arg1[%c90] : memref<144xf32, #tpu.memory_space<smem>>
    %613 = vector.broadcast %612 : f32 to vector<16x16xf32>
    %614 = arith.mulf %613, %611 : vector<16x16xf32>
    %615 = arith.addf %609, %614 : vector<16x16xf32>
    %c2_330 = arith.constant 2 : index
    %c0_331 = arith.constant 0 : index
    %c1_332 = arith.constant 1 : index
    %616 = vector.load %arg5[%c2_330, %c0_331, %c1_332] : memref<4x18x18xf32, #tpu.memory_space<vmem>>, vector<1x16x16xf32>
    %617 = vector.shape_cast %616 : vector<1x16x16xf32> to vector<16x16xf32>
    %c91 = arith.constant 91 : index
    %618 = memref.load %arg1[%c91] : memref<144xf32, #tpu.memory_space<smem>>
    %619 = vector.broadcast %618 : f32 to vector<16x16xf32>
    %620 = arith.mulf %619, %617 : vector<16x16xf32>
    %621 = arith.addf %615, %620 : vector<16x16xf32>
    %c2_333 = arith.constant 2 : index
    %c0_334 = arith.constant 0 : index
    %c2_335 = arith.constant 2 : index
    %622 = vector.load %arg5[%c2_333, %c0_334, %c2_335] : memref<4x18x18xf32, #tpu.memory_space<vmem>>, vector<1x16x16xf32>
    %623 = vector.shape_cast %622 : vector<1x16x16xf32> to vector<16x16xf32>
    %c92 = arith.constant 92 : index
    %624 = memref.load %arg1[%c92] : memref<144xf32, #tpu.memory_space<smem>>
    %625 = vector.broadcast %624 : f32 to vector<16x16xf32>
    %626 = arith.mulf %625, %623 : vector<16x16xf32>
    %627 = arith.addf %621, %626 : vector<16x16xf32>
    %c2_336 = arith.constant 2 : index
    %c1_337 = arith.constant 1 : index
    %c0_338 = arith.constant 0 : index
    %628 = vector.load %arg5[%c2_336, %c1_337, %c0_338] : memref<4x18x18xf32, #tpu.memory_space<vmem>>, vector<1x16x16xf32>
    %629 = vector.shape_cast %628 : vector<1x16x16xf32> to vector<16x16xf32>
    %c93 = arith.constant 93 : index
    %630 = memref.load %arg1[%c93] : memref<144xf32, #tpu.memory_space<smem>>
    %631 = vector.broadcast %630 : f32 to vector<16x16xf32>
    %632 = arith.mulf %631, %629 : vector<16x16xf32>
    %633 = arith.addf %627, %632 : vector<16x16xf32>
    %c2_339 = arith.constant 2 : index
    %c1_340 = arith.constant 1 : index
    %c1_341 = arith.constant 1 : index
    %634 = vector.load %arg5[%c2_339, %c1_340, %c1_341] : memref<4x18x18xf32, #tpu.memory_space<vmem>>, vector<1x16x16xf32>
    %635 = vector.shape_cast %634 : vector<1x16x16xf32> to vector<16x16xf32>
    %c94 = arith.constant 94 : index
    %636 = memref.load %arg1[%c94] : memref<144xf32, #tpu.memory_space<smem>>
    %637 = vector.broadcast %636 : f32 to vector<16x16xf32>
    %638 = arith.mulf %637, %635 : vector<16x16xf32>
    %639 = arith.addf %633, %638 : vector<16x16xf32>
    %c2_342 = arith.constant 2 : index
    %c1_343 = arith.constant 1 : index
    %c2_344 = arith.constant 2 : index
    %640 = vector.load %arg5[%c2_342, %c1_343, %c2_344] : memref<4x18x18xf32, #tpu.memory_space<vmem>>, vector<1x16x16xf32>
    %641 = vector.shape_cast %640 : vector<1x16x16xf32> to vector<16x16xf32>
    %c95 = arith.constant 95 : index
    %642 = memref.load %arg1[%c95] : memref<144xf32, #tpu.memory_space<smem>>
    %643 = vector.broadcast %642 : f32 to vector<16x16xf32>
    %644 = arith.mulf %643, %641 : vector<16x16xf32>
    %645 = arith.addf %639, %644 : vector<16x16xf32>
    %c2_345 = arith.constant 2 : index
    %c2_346 = arith.constant 2 : index
    %c0_347 = arith.constant 0 : index
    %646 = vector.load %arg5[%c2_345, %c2_346, %c0_347] : memref<4x18x18xf32, #tpu.memory_space<vmem>>, vector<1x16x16xf32>
    %647 = vector.shape_cast %646 : vector<1x16x16xf32> to vector<16x16xf32>
    %c96 = arith.constant 96 : index
    %648 = memref.load %arg1[%c96] : memref<144xf32, #tpu.memory_space<smem>>
    %649 = vector.broadcast %648 : f32 to vector<16x16xf32>
    %650 = arith.mulf %649, %647 : vector<16x16xf32>
    %651 = arith.addf %645, %650 : vector<16x16xf32>
    %c2_348 = arith.constant 2 : index
    %c2_349 = arith.constant 2 : index
    %c1_350 = arith.constant 1 : index
    %652 = vector.load %arg5[%c2_348, %c2_349, %c1_350] : memref<4x18x18xf32, #tpu.memory_space<vmem>>, vector<1x16x16xf32>
    %653 = vector.shape_cast %652 : vector<1x16x16xf32> to vector<16x16xf32>
    %c97 = arith.constant 97 : index
    %654 = memref.load %arg1[%c97] : memref<144xf32, #tpu.memory_space<smem>>
    %655 = vector.broadcast %654 : f32 to vector<16x16xf32>
    %656 = arith.mulf %655, %653 : vector<16x16xf32>
    %657 = arith.addf %651, %656 : vector<16x16xf32>
    %c2_351 = arith.constant 2 : index
    %c2_352 = arith.constant 2 : index
    %c2_353 = arith.constant 2 : index
    %658 = vector.load %arg5[%c2_351, %c2_352, %c2_353] : memref<4x18x18xf32, #tpu.memory_space<vmem>>, vector<1x16x16xf32>
    %659 = vector.shape_cast %658 : vector<1x16x16xf32> to vector<16x16xf32>
    %c98 = arith.constant 98 : index
    %660 = memref.load %arg1[%c98] : memref<144xf32, #tpu.memory_space<smem>>
    %661 = vector.broadcast %660 : f32 to vector<16x16xf32>
    %662 = arith.mulf %661, %659 : vector<16x16xf32>
    %663 = arith.addf %657, %662 : vector<16x16xf32>
    %c3_354 = arith.constant 3 : index
    %c0_355 = arith.constant 0 : index
    %c0_356 = arith.constant 0 : index
    %664 = vector.load %arg5[%c3_354, %c0_355, %c0_356] : memref<4x18x18xf32, #tpu.memory_space<vmem>>, vector<1x16x16xf32>
    %665 = vector.shape_cast %664 : vector<1x16x16xf32> to vector<16x16xf32>
    %c99 = arith.constant 99 : index
    %666 = memref.load %arg1[%c99] : memref<144xf32, #tpu.memory_space<smem>>
    %667 = vector.broadcast %666 : f32 to vector<16x16xf32>
    %668 = arith.mulf %667, %665 : vector<16x16xf32>
    %669 = arith.addf %663, %668 : vector<16x16xf32>
    %c3_357 = arith.constant 3 : index
    %c0_358 = arith.constant 0 : index
    %c1_359 = arith.constant 1 : index
    %670 = vector.load %arg5[%c3_357, %c0_358, %c1_359] : memref<4x18x18xf32, #tpu.memory_space<vmem>>, vector<1x16x16xf32>
    %671 = vector.shape_cast %670 : vector<1x16x16xf32> to vector<16x16xf32>
    %c100 = arith.constant 100 : index
    %672 = memref.load %arg1[%c100] : memref<144xf32, #tpu.memory_space<smem>>
    %673 = vector.broadcast %672 : f32 to vector<16x16xf32>
    %674 = arith.mulf %673, %671 : vector<16x16xf32>
    %675 = arith.addf %669, %674 : vector<16x16xf32>
    %c3_360 = arith.constant 3 : index
    %c0_361 = arith.constant 0 : index
    %c2_362 = arith.constant 2 : index
    %676 = vector.load %arg5[%c3_360, %c0_361, %c2_362] : memref<4x18x18xf32, #tpu.memory_space<vmem>>, vector<1x16x16xf32>
    %677 = vector.shape_cast %676 : vector<1x16x16xf32> to vector<16x16xf32>
    %c101 = arith.constant 101 : index
    %678 = memref.load %arg1[%c101] : memref<144xf32, #tpu.memory_space<smem>>
    %679 = vector.broadcast %678 : f32 to vector<16x16xf32>
    %680 = arith.mulf %679, %677 : vector<16x16xf32>
    %681 = arith.addf %675, %680 : vector<16x16xf32>
    %c3_363 = arith.constant 3 : index
    %c1_364 = arith.constant 1 : index
    %c0_365 = arith.constant 0 : index
    %682 = vector.load %arg5[%c3_363, %c1_364, %c0_365] : memref<4x18x18xf32, #tpu.memory_space<vmem>>, vector<1x16x16xf32>
    %683 = vector.shape_cast %682 : vector<1x16x16xf32> to vector<16x16xf32>
    %c102 = arith.constant 102 : index
    %684 = memref.load %arg1[%c102] : memref<144xf32, #tpu.memory_space<smem>>
    %685 = vector.broadcast %684 : f32 to vector<16x16xf32>
    %686 = arith.mulf %685, %683 : vector<16x16xf32>
    %687 = arith.addf %681, %686 : vector<16x16xf32>
    %c3_366 = arith.constant 3 : index
    %c1_367 = arith.constant 1 : index
    %c1_368 = arith.constant 1 : index
    %688 = vector.load %arg5[%c3_366, %c1_367, %c1_368] : memref<4x18x18xf32, #tpu.memory_space<vmem>>, vector<1x16x16xf32>
    %689 = vector.shape_cast %688 : vector<1x16x16xf32> to vector<16x16xf32>
    %c103 = arith.constant 103 : index
    %690 = memref.load %arg1[%c103] : memref<144xf32, #tpu.memory_space<smem>>
    %691 = vector.broadcast %690 : f32 to vector<16x16xf32>
    %692 = arith.mulf %691, %689 : vector<16x16xf32>
    %693 = arith.addf %687, %692 : vector<16x16xf32>
    %c3_369 = arith.constant 3 : index
    %c1_370 = arith.constant 1 : index
    %c2_371 = arith.constant 2 : index
    %694 = vector.load %arg5[%c3_369, %c1_370, %c2_371] : memref<4x18x18xf32, #tpu.memory_space<vmem>>, vector<1x16x16xf32>
    %695 = vector.shape_cast %694 : vector<1x16x16xf32> to vector<16x16xf32>
    %c104 = arith.constant 104 : index
    %696 = memref.load %arg1[%c104] : memref<144xf32, #tpu.memory_space<smem>>
    %697 = vector.broadcast %696 : f32 to vector<16x16xf32>
    %698 = arith.mulf %697, %695 : vector<16x16xf32>
    %699 = arith.addf %693, %698 : vector<16x16xf32>
    %c3_372 = arith.constant 3 : index
    %c2_373 = arith.constant 2 : index
    %c0_374 = arith.constant 0 : index
    %700 = vector.load %arg5[%c3_372, %c2_373, %c0_374] : memref<4x18x18xf32, #tpu.memory_space<vmem>>, vector<1x16x16xf32>
    %701 = vector.shape_cast %700 : vector<1x16x16xf32> to vector<16x16xf32>
    %c105 = arith.constant 105 : index
    %702 = memref.load %arg1[%c105] : memref<144xf32, #tpu.memory_space<smem>>
    %703 = vector.broadcast %702 : f32 to vector<16x16xf32>
    %704 = arith.mulf %703, %701 : vector<16x16xf32>
    %705 = arith.addf %699, %704 : vector<16x16xf32>
    %c3_375 = arith.constant 3 : index
    %c2_376 = arith.constant 2 : index
    %c1_377 = arith.constant 1 : index
    %706 = vector.load %arg5[%c3_375, %c2_376, %c1_377] : memref<4x18x18xf32, #tpu.memory_space<vmem>>, vector<1x16x16xf32>
    %707 = vector.shape_cast %706 : vector<1x16x16xf32> to vector<16x16xf32>
    %c106 = arith.constant 106 : index
    %708 = memref.load %arg1[%c106] : memref<144xf32, #tpu.memory_space<smem>>
    %709 = vector.broadcast %708 : f32 to vector<16x16xf32>
    %710 = arith.mulf %709, %707 : vector<16x16xf32>
    %711 = arith.addf %705, %710 : vector<16x16xf32>
    %c3_378 = arith.constant 3 : index
    %c2_379 = arith.constant 2 : index
    %c2_380 = arith.constant 2 : index
    %712 = vector.load %arg5[%c3_378, %c2_379, %c2_380] : memref<4x18x18xf32, #tpu.memory_space<vmem>>, vector<1x16x16xf32>
    %713 = vector.shape_cast %712 : vector<1x16x16xf32> to vector<16x16xf32>
    %c107 = arith.constant 107 : index
    %714 = memref.load %arg1[%c107] : memref<144xf32, #tpu.memory_space<smem>>
    %715 = vector.broadcast %714 : f32 to vector<16x16xf32>
    %716 = arith.mulf %715, %713 : vector<16x16xf32>
    %717 = arith.addf %711, %716 : vector<16x16xf32>
    %cst_381 = arith.constant dense<0.000000e+00> : vector<16xf32>
    %718 = vector.multi_reduction <add>, %717, %cst_381 [1] : vector<16x16xf32> to vector<16xf32>
    %719 = vector.shape_cast %718 : vector<16xf32> to vector<16x1xf32>
    %cst_382 = arith.constant dense<0.000000e+00> : vector<1xf32>
    %720 = vector.multi_reduction <add>, %719, %cst_382 [0] : vector<16x1xf32> to vector<1xf32>
    %721 = vector.shape_cast %720 : vector<1xf32> to vector<1x1xf32>
    %cst_383 = arith.constant 3.906250e-03 : f32
    %722 = vector.broadcast %cst_383 : f32 to vector<1x1xf32>
    %723 = arith.mulf %721, %722 : vector<1x1xf32>
    %724 = vector.broadcast %723 : vector<1x1xf32> to vector<16x16xf32>
    %725 = arith.subf %717, %724 : vector<16x16xf32>
    %726 = arith.mulf %725, %725 : vector<16x16xf32>
    %cst_384 = arith.constant dense<0.000000e+00> : vector<16xf32>
    %727 = vector.multi_reduction <add>, %726, %cst_384 [1] : vector<16x16xf32> to vector<16xf32>
    %728 = vector.shape_cast %727 : vector<16xf32> to vector<16x1xf32>
    %cst_385 = arith.constant dense<0.000000e+00> : vector<1xf32>
    %729 = vector.multi_reduction <add>, %728, %cst_385 [0] : vector<16x1xf32> to vector<1xf32>
    %730 = vector.shape_cast %729 : vector<1xf32> to vector<1x1xf32>
    %cst_386 = arith.constant 3.906250e-03 : f32
    %731 = vector.broadcast %cst_386 : f32 to vector<1x1xf32>
    %732 = arith.mulf %730, %731 : vector<1x1xf32>
    %733 = vector.broadcast %723 : vector<1x1xf32> to vector<16x16xf32>
    %734 = arith.subf %717, %733 : vector<16x16xf32>
    %cst_387 = arith.constant 9.99999974E-6 : f32
    %735 = vector.broadcast %cst_387 : f32 to vector<1x1xf32>
    %736 = arith.addf %732, %735 : vector<1x1xf32>
    %737 = math.rsqrt %736 : vector<1x1xf32>
    %738 = vector.broadcast %737 : vector<1x1xf32> to vector<16x16xf32>
    %739 = arith.mulf %734, %738 : vector<16x16xf32>
    %cst_388 = arith.constant 0.000000e+00 : f32
    %740 = vector.broadcast %cst_388 : f32 to vector<16x16xf32>
    %741 = arith.maximumf %739, %740 : vector<16x16xf32>
    %c2_389 = arith.constant 2 : index
    %c1_390 = arith.constant 1 : index
    %c1_391 = arith.constant 1 : index
    %742 = vector.load %arg6[%c2_389, %c1_390, %c1_391] : memref<4x18x18xf32, #tpu.memory_space<vmem>>, vector<1x16x16xf32>
    %743 = vector.shape_cast %742 : vector<1x16x16xf32> to vector<16x16xf32>
    %744 = vector.shape_cast %741 : vector<16x16xf32> to vector<1x16x16xf32>
    tpu.vector_store %arg6[%c2_389, %c1_390, %c1_391], %744 {strides = array<i32>} : memref<4x18x18xf32, #tpu.memory_space<vmem>>, vector<1x16x16xf32>,
    %cst_392 = arith.constant 0.000000e+00 : f32
    %745 = vector.broadcast %cst_392 : f32 to vector<16x16xf32>
    %c0_393 = arith.constant 0 : index
    %c0_394 = arith.constant 0 : index
    %c0_395 = arith.constant 0 : index
    %746 = vector.load %arg5[%c0_393, %c0_394, %c0_395] : memref<4x18x18xf32, #tpu.memory_space<vmem>>, vector<1x16x16xf32>
    %747 = vector.shape_cast %746 : vector<1x16x16xf32> to vector<16x16xf32>
    %c108 = arith.constant 108 : index
    %748 = memref.load %arg1[%c108] : memref<144xf32, #tpu.memory_space<smem>>
    %749 = vector.broadcast %748 : f32 to vector<16x16xf32>
    %750 = arith.mulf %749, %747 : vector<16x16xf32>
    %751 = arith.addf %745, %750 : vector<16x16xf32>
    %c0_396 = arith.constant 0 : index
    %c0_397 = arith.constant 0 : index
    %c1_398 = arith.constant 1 : index
    %752 = vector.load %arg5[%c0_396, %c0_397, %c1_398] : memref<4x18x18xf32, #tpu.memory_space<vmem>>, vector<1x16x16xf32>
    %753 = vector.shape_cast %752 : vector<1x16x16xf32> to vector<16x16xf32>
    %c109 = arith.constant 109 : index
    %754 = memref.load %arg1[%c109] : memref<144xf32, #tpu.memory_space<smem>>
    %755 = vector.broadcast %754 : f32 to vector<16x16xf32>
    %756 = arith.mulf %755, %753 : vector<16x16xf32>
    %757 = arith.addf %751, %756 : vector<16x16xf32>
    %c0_399 = arith.constant 0 : index
    %c0_400 = arith.constant 0 : index
    %c2_401 = arith.constant 2 : index
    %758 = vector.load %arg5[%c0_399, %c0_400, %c2_401] : memref<4x18x18xf32, #tpu.memory_space<vmem>>, vector<1x16x16xf32>
    %759 = vector.shape_cast %758 : vector<1x16x16xf32> to vector<16x16xf32>
    %c110 = arith.constant 110 : index
    %760 = memref.load %arg1[%c110] : memref<144xf32, #tpu.memory_space<smem>>
    %761 = vector.broadcast %760 : f32 to vector<16x16xf32>
    %762 = arith.mulf %761, %759 : vector<16x16xf32>
    %763 = arith.addf %757, %762 : vector<16x16xf32>
    %c0_402 = arith.constant 0 : index
    %c1_403 = arith.constant 1 : index
    %c0_404 = arith.constant 0 : index
    %764 = vector.load %arg5[%c0_402, %c1_403, %c0_404] : memref<4x18x18xf32, #tpu.memory_space<vmem>>, vector<1x16x16xf32>
    %765 = vector.shape_cast %764 : vector<1x16x16xf32> to vector<16x16xf32>
    %c111 = arith.constant 111 : index
    %766 = memref.load %arg1[%c111] : memref<144xf32, #tpu.memory_space<smem>>
    %767 = vector.broadcast %766 : f32 to vector<16x16xf32>
    %768 = arith.mulf %767, %765 : vector<16x16xf32>
    %769 = arith.addf %763, %768 : vector<16x16xf32>
    %c0_405 = arith.constant 0 : index
    %c1_406 = arith.constant 1 : index
    %c1_407 = arith.constant 1 : index
    %770 = vector.load %arg5[%c0_405, %c1_406, %c1_407] : memref<4x18x18xf32, #tpu.memory_space<vmem>>, vector<1x16x16xf32>
    %771 = vector.shape_cast %770 : vector<1x16x16xf32> to vector<16x16xf32>
    %c112 = arith.constant 112 : index
    %772 = memref.load %arg1[%c112] : memref<144xf32, #tpu.memory_space<smem>>
    %773 = vector.broadcast %772 : f32 to vector<16x16xf32>
    %774 = arith.mulf %773, %771 : vector<16x16xf32>
    %775 = arith.addf %769, %774 : vector<16x16xf32>
    %c0_408 = arith.constant 0 : index
    %c1_409 = arith.constant 1 : index
    %c2_410 = arith.constant 2 : index
    %776 = vector.load %arg5[%c0_408, %c1_409, %c2_410] : memref<4x18x18xf32, #tpu.memory_space<vmem>>, vector<1x16x16xf32>
    %777 = vector.shape_cast %776 : vector<1x16x16xf32> to vector<16x16xf32>
    %c113 = arith.constant 113 : index
    %778 = memref.load %arg1[%c113] : memref<144xf32, #tpu.memory_space<smem>>
    %779 = vector.broadcast %778 : f32 to vector<16x16xf32>
    %780 = arith.mulf %779, %777 : vector<16x16xf32>
    %781 = arith.addf %775, %780 : vector<16x16xf32>
    %c0_411 = arith.constant 0 : index
    %c2_412 = arith.constant 2 : index
    %c0_413 = arith.constant 0 : index
    %782 = vector.load %arg5[%c0_411, %c2_412, %c0_413] : memref<4x18x18xf32, #tpu.memory_space<vmem>>, vector<1x16x16xf32>
    %783 = vector.shape_cast %782 : vector<1x16x16xf32> to vector<16x16xf32>
    %c114 = arith.constant 114 : index
    %784 = memref.load %arg1[%c114] : memref<144xf32, #tpu.memory_space<smem>>
    %785 = vector.broadcast %784 : f32 to vector<16x16xf32>
    %786 = arith.mulf %785, %783 : vector<16x16xf32>
    %787 = arith.addf %781, %786 : vector<16x16xf32>
    %c0_414 = arith.constant 0 : index
    %c2_415 = arith.constant 2 : index
    %c1_416 = arith.constant 1 : index
    %788 = vector.load %arg5[%c0_414, %c2_415, %c1_416] : memref<4x18x18xf32, #tpu.memory_space<vmem>>, vector<1x16x16xf32>
    %789 = vector.shape_cast %788 : vector<1x16x16xf32> to vector<16x16xf32>
    %c115 = arith.constant 115 : index
    %790 = memref.load %arg1[%c115] : memref<144xf32, #tpu.memory_space<smem>>
    %791 = vector.broadcast %790 : f32 to vector<16x16xf32>
    %792 = arith.mulf %791, %789 : vector<16x16xf32>
    %793 = arith.addf %787, %792 : vector<16x16xf32>
    %c0_417 = arith.constant 0 : index
    %c2_418 = arith.constant 2 : index
    %c2_419 = arith.constant 2 : index
    %794 = vector.load %arg5[%c0_417, %c2_418, %c2_419] : memref<4x18x18xf32, #tpu.memory_space<vmem>>, vector<1x16x16xf32>
    %795 = vector.shape_cast %794 : vector<1x16x16xf32> to vector<16x16xf32>
    %c116 = arith.constant 116 : index
    %796 = memref.load %arg1[%c116] : memref<144xf32, #tpu.memory_space<smem>>
    %797 = vector.broadcast %796 : f32 to vector<16x16xf32>
    %798 = arith.mulf %797, %795 : vector<16x16xf32>
    %799 = arith.addf %793, %798 : vector<16x16xf32>
    %c1_420 = arith.constant 1 : index
    %c0_421 = arith.constant 0 : index
    %c0_422 = arith.constant 0 : index
    %800 = vector.load %arg5[%c1_420, %c0_421, %c0_422] : memref<4x18x18xf32, #tpu.memory_space<vmem>>, vector<1x16x16xf32>
    %801 = vector.shape_cast %800 : vector<1x16x16xf32> to vector<16x16xf32>
    %c117 = arith.constant 117 : index
    %802 = memref.load %arg1[%c117] : memref<144xf32, #tpu.memory_space<smem>>
    %803 = vector.broadcast %802 : f32 to vector<16x16xf32>
    %804 = arith.mulf %803, %801 : vector<16x16xf32>
    %805 = arith.addf %799, %804 : vector<16x16xf32>
    %c1_423 = arith.constant 1 : index
    %c0_424 = arith.constant 0 : index
    %c1_425 = arith.constant 1 : index
    %806 = vector.load %arg5[%c1_423, %c0_424, %c1_425] : memref<4x18x18xf32, #tpu.memory_space<vmem>>, vector<1x16x16xf32>
    %807 = vector.shape_cast %806 : vector<1x16x16xf32> to vector<16x16xf32>
    %c118 = arith.constant 118 : index
    %808 = memref.load %arg1[%c118] : memref<144xf32, #tpu.memory_space<smem>>
    %809 = vector.broadcast %808 : f32 to vector<16x16xf32>
    %810 = arith.mulf %809, %807 : vector<16x16xf32>
    %811 = arith.addf %805, %810 : vector<16x16xf32>
    %c1_426 = arith.constant 1 : index
    %c0_427 = arith.constant 0 : index
    %c2_428 = arith.constant 2 : index
    %812 = vector.load %arg5[%c1_426, %c0_427, %c2_428] : memref<4x18x18xf32, #tpu.memory_space<vmem>>, vector<1x16x16xf32>
    %813 = vector.shape_cast %812 : vector<1x16x16xf32> to vector<16x16xf32>
    %c119 = arith.constant 119 : index
    %814 = memref.load %arg1[%c119] : memref<144xf32, #tpu.memory_space<smem>>
    %815 = vector.broadcast %814 : f32 to vector<16x16xf32>
    %816 = arith.mulf %815, %813 : vector<16x16xf32>
    %817 = arith.addf %811, %816 : vector<16x16xf32>
    %c1_429 = arith.constant 1 : index
    %c1_430 = arith.constant 1 : index
    %c0_431 = arith.constant 0 : index
    %818 = vector.load %arg5[%c1_429, %c1_430, %c0_431] : memref<4x18x18xf32, #tpu.memory_space<vmem>>, vector<1x16x16xf32>
    %819 = vector.shape_cast %818 : vector<1x16x16xf32> to vector<16x16xf32>
    %c120 = arith.constant 120 : index
    %820 = memref.load %arg1[%c120] : memref<144xf32, #tpu.memory_space<smem>>
    %821 = vector.broadcast %820 : f32 to vector<16x16xf32>
    %822 = arith.mulf %821, %819 : vector<16x16xf32>
    %823 = arith.addf %817, %822 : vector<16x16xf32>
    %c1_432 = arith.constant 1 : index
    %c1_433 = arith.constant 1 : index
    %c1_434 = arith.constant 1 : index
    %824 = vector.load %arg5[%c1_432, %c1_433, %c1_434] : memref<4x18x18xf32, #tpu.memory_space<vmem>>, vector<1x16x16xf32>
    %825 = vector.shape_cast %824 : vector<1x16x16xf32> to vector<16x16xf32>
    %c121 = arith.constant 121 : index
    %826 = memref.load %arg1[%c121] : memref<144xf32, #tpu.memory_space<smem>>
    %827 = vector.broadcast %826 : f32 to vector<16x16xf32>
    %828 = arith.mulf %827, %825 : vector<16x16xf32>
    %829 = arith.addf %823, %828 : vector<16x16xf32>
    %c1_435 = arith.constant 1 : index
    %c1_436 = arith.constant 1 : index
    %c2_437 = arith.constant 2 : index
    %830 = vector.load %arg5[%c1_435, %c1_436, %c2_437] : memref<4x18x18xf32, #tpu.memory_space<vmem>>, vector<1x16x16xf32>
    %831 = vector.shape_cast %830 : vector<1x16x16xf32> to vector<16x16xf32>
    %c122 = arith.constant 122 : index
    %832 = memref.load %arg1[%c122] : memref<144xf32, #tpu.memory_space<smem>>
    %833 = vector.broadcast %832 : f32 to vector<16x16xf32>
    %834 = arith.mulf %833, %831 : vector<16x16xf32>
    %835 = arith.addf %829, %834 : vector<16x16xf32>
    %c1_438 = arith.constant 1 : index
    %c2_439 = arith.constant 2 : index
    %c0_440 = arith.constant 0 : index
    %836 = vector.load %arg5[%c1_438, %c2_439, %c0_440] : memref<4x18x18xf32, #tpu.memory_space<vmem>>, vector<1x16x16xf32>
    %837 = vector.shape_cast %836 : vector<1x16x16xf32> to vector<16x16xf32>
    %c123 = arith.constant 123 : index
    %838 = memref.load %arg1[%c123] : memref<144xf32, #tpu.memory_space<smem>>
    %839 = vector.broadcast %838 : f32 to vector<16x16xf32>
    %840 = arith.mulf %839, %837 : vector<16x16xf32>
    %841 = arith.addf %835, %840 : vector<16x16xf32>
    %c1_441 = arith.constant 1 : index
    %c2_442 = arith.constant 2 : index
    %c1_443 = arith.constant 1 : index
    %842 = vector.load %arg5[%c1_441, %c2_442, %c1_443] : memref<4x18x18xf32, #tpu.memory_space<vmem>>, vector<1x16x16xf32>
    %843 = vector.shape_cast %842 : vector<1x16x16xf32> to vector<16x16xf32>
    %c124 = arith.constant 124 : index
    %844 = memref.load %arg1[%c124] : memref<144xf32, #tpu.memory_space<smem>>
    %845 = vector.broadcast %844 : f32 to vector<16x16xf32>
    %846 = arith.mulf %845, %843 : vector<16x16xf32>
    %847 = arith.addf %841, %846 : vector<16x16xf32>
    %c1_444 = arith.constant 1 : index
    %c2_445 = arith.constant 2 : index
    %c2_446 = arith.constant 2 : index
    %848 = vector.load %arg5[%c1_444, %c2_445, %c2_446] : memref<4x18x18xf32, #tpu.memory_space<vmem>>, vector<1x16x16xf32>
    %849 = vector.shape_cast %848 : vector<1x16x16xf32> to vector<16x16xf32>
    %c125 = arith.constant 125 : index
    %850 = memref.load %arg1[%c125] : memref<144xf32, #tpu.memory_space<smem>>
    %851 = vector.broadcast %850 : f32 to vector<16x16xf32>
    %852 = arith.mulf %851, %849 : vector<16x16xf32>
    %853 = arith.addf %847, %852 : vector<16x16xf32>
    %c2_447 = arith.constant 2 : index
    %c0_448 = arith.constant 0 : index
    %c0_449 = arith.constant 0 : index
    %854 = vector.load %arg5[%c2_447, %c0_448, %c0_449] : memref<4x18x18xf32, #tpu.memory_space<vmem>>, vector<1x16x16xf32>
    %855 = vector.shape_cast %854 : vector<1x16x16xf32> to vector<16x16xf32>
    %c126 = arith.constant 126 : index
    %856 = memref.load %arg1[%c126] : memref<144xf32, #tpu.memory_space<smem>>
    %857 = vector.broadcast %856 : f32 to vector<16x16xf32>
    %858 = arith.mulf %857, %855 : vector<16x16xf32>
    %859 = arith.addf %853, %858 : vector<16x16xf32>
    %c2_450 = arith.constant 2 : index
    %c0_451 = arith.constant 0 : index
    %c1_452 = arith.constant 1 : index
    %860 = vector.load %arg5[%c2_450, %c0_451, %c1_452] : memref<4x18x18xf32, #tpu.memory_space<vmem>>, vector<1x16x16xf32>
    %861 = vector.shape_cast %860 : vector<1x16x16xf32> to vector<16x16xf32>
    %c127 = arith.constant 127 : index
    %862 = memref.load %arg1[%c127] : memref<144xf32, #tpu.memory_space<smem>>
    %863 = vector.broadcast %862 : f32 to vector<16x16xf32>
    %864 = arith.mulf %863, %861 : vector<16x16xf32>
    %865 = arith.addf %859, %864 : vector<16x16xf32>
    %c2_453 = arith.constant 2 : index
    %c0_454 = arith.constant 0 : index
    %c2_455 = arith.constant 2 : index
    %866 = vector.load %arg5[%c2_453, %c0_454, %c2_455] : memref<4x18x18xf32, #tpu.memory_space<vmem>>, vector<1x16x16xf32>
    %867 = vector.shape_cast %866 : vector<1x16x16xf32> to vector<16x16xf32>
    %c128 = arith.constant 128 : index
    %868 = memref.load %arg1[%c128] : memref<144xf32, #tpu.memory_space<smem>>
    %869 = vector.broadcast %868 : f32 to vector<16x16xf32>
    %870 = arith.mulf %869, %867 : vector<16x16xf32>
    %871 = arith.addf %865, %870 : vector<16x16xf32>
    %c2_456 = arith.constant 2 : index
    %c1_457 = arith.constant 1 : index
    %c0_458 = arith.constant 0 : index
    %872 = vector.load %arg5[%c2_456, %c1_457, %c0_458] : memref<4x18x18xf32, #tpu.memory_space<vmem>>, vector<1x16x16xf32>
    %873 = vector.shape_cast %872 : vector<1x16x16xf32> to vector<16x16xf32>
    %c129 = arith.constant 129 : index
    %874 = memref.load %arg1[%c129] : memref<144xf32, #tpu.memory_space<smem>>
    %875 = vector.broadcast %874 : f32 to vector<16x16xf32>
    %876 = arith.mulf %875, %873 : vector<16x16xf32>
    %877 = arith.addf %871, %876 : vector<16x16xf32>
    %c2_459 = arith.constant 2 : index
    %c1_460 = arith.constant 1 : index
    %c1_461 = arith.constant 1 : index
    %878 = vector.load %arg5[%c2_459, %c1_460, %c1_461] : memref<4x18x18xf32, #tpu.memory_space<vmem>>, vector<1x16x16xf32>
    %879 = vector.shape_cast %878 : vector<1x16x16xf32> to vector<16x16xf32>
    %c130 = arith.constant 130 : index
    %880 = memref.load %arg1[%c130] : memref<144xf32, #tpu.memory_space<smem>>
    %881 = vector.broadcast %880 : f32 to vector<16x16xf32>
    %882 = arith.mulf %881, %879 : vector<16x16xf32>
    %883 = arith.addf %877, %882 : vector<16x16xf32>
    %c2_462 = arith.constant 2 : index
    %c1_463 = arith.constant 1 : index
    %c2_464 = arith.constant 2 : index
    %884 = vector.load %arg5[%c2_462, %c1_463, %c2_464] : memref<4x18x18xf32, #tpu.memory_space<vmem>>, vector<1x16x16xf32>
    %885 = vector.shape_cast %884 : vector<1x16x16xf32> to vector<16x16xf32>
    %c131 = arith.constant 131 : index
    %886 = memref.load %arg1[%c131] : memref<144xf32, #tpu.memory_space<smem>>
    %887 = vector.broadcast %886 : f32 to vector<16x16xf32>
    %888 = arith.mulf %887, %885 : vector<16x16xf32>
    %889 = arith.addf %883, %888 : vector<16x16xf32>
    %c2_465 = arith.constant 2 : index
    %c2_466 = arith.constant 2 : index
    %c0_467 = arith.constant 0 : index
    %890 = vector.load %arg5[%c2_465, %c2_466, %c0_467] : memref<4x18x18xf32, #tpu.memory_space<vmem>>, vector<1x16x16xf32>
    %891 = vector.shape_cast %890 : vector<1x16x16xf32> to vector<16x16xf32>
    %c132 = arith.constant 132 : index
    %892 = memref.load %arg1[%c132] : memref<144xf32, #tpu.memory_space<smem>>
    %893 = vector.broadcast %892 : f32 to vector<16x16xf32>
    %894 = arith.mulf %893, %891 : vector<16x16xf32>
    %895 = arith.addf %889, %894 : vector<16x16xf32>
    %c2_468 = arith.constant 2 : index
    %c2_469 = arith.constant 2 : index
    %c1_470 = arith.constant 1 : index
    %896 = vector.load %arg5[%c2_468, %c2_469, %c1_470] : memref<4x18x18xf32, #tpu.memory_space<vmem>>, vector<1x16x16xf32>
    %897 = vector.shape_cast %896 : vector<1x16x16xf32> to vector<16x16xf32>
    %c133 = arith.constant 133 : index
    %898 = memref.load %arg1[%c133] : memref<144xf32, #tpu.memory_space<smem>>
    %899 = vector.broadcast %898 : f32 to vector<16x16xf32>
    %900 = arith.mulf %899, %897 : vector<16x16xf32>
    %901 = arith.addf %895, %900 : vector<16x16xf32>
    %c2_471 = arith.constant 2 : index
    %c2_472 = arith.constant 2 : index
    %c2_473 = arith.constant 2 : index
    %902 = vector.load %arg5[%c2_471, %c2_472, %c2_473] : memref<4x18x18xf32, #tpu.memory_space<vmem>>, vector<1x16x16xf32>
    %903 = vector.shape_cast %902 : vector<1x16x16xf32> to vector<16x16xf32>
    %c134 = arith.constant 134 : index
    %904 = memref.load %arg1[%c134] : memref<144xf32, #tpu.memory_space<smem>>
    %905 = vector.broadcast %904 : f32 to vector<16x16xf32>
    %906 = arith.mulf %905, %903 : vector<16x16xf32>
    %907 = arith.addf %901, %906 : vector<16x16xf32>
    %c3_474 = arith.constant 3 : index
    %c0_475 = arith.constant 0 : index
    %c0_476 = arith.constant 0 : index
    %908 = vector.load %arg5[%c3_474, %c0_475, %c0_476] : memref<4x18x18xf32, #tpu.memory_space<vmem>>, vector<1x16x16xf32>
    %909 = vector.shape_cast %908 : vector<1x16x16xf32> to vector<16x16xf32>
    %c135 = arith.constant 135 : index
    %910 = memref.load %arg1[%c135] : memref<144xf32, #tpu.memory_space<smem>>
    %911 = vector.broadcast %910 : f32 to vector<16x16xf32>
    %912 = arith.mulf %911, %909 : vector<16x16xf32>
    %913 = arith.addf %907, %912 : vector<16x16xf32>
    %c3_477 = arith.constant 3 : index
    %c0_478 = arith.constant 0 : index
    %c1_479 = arith.constant 1 : index
    %914 = vector.load %arg5[%c3_477, %c0_478, %c1_479] : memref<4x18x18xf32, #tpu.memory_space<vmem>>, vector<1x16x16xf32>
    %915 = vector.shape_cast %914 : vector<1x16x16xf32> to vector<16x16xf32>
    %c136 = arith.constant 136 : index
    %916 = memref.load %arg1[%c136] : memref<144xf32, #tpu.memory_space<smem>>
    %917 = vector.broadcast %916 : f32 to vector<16x16xf32>
    %918 = arith.mulf %917, %915 : vector<16x16xf32>
    %919 = arith.addf %913, %918 : vector<16x16xf32>
    %c3_480 = arith.constant 3 : index
    %c0_481 = arith.constant 0 : index
    %c2_482 = arith.constant 2 : index
    %920 = vector.load %arg5[%c3_480, %c0_481, %c2_482] : memref<4x18x18xf32, #tpu.memory_space<vmem>>, vector<1x16x16xf32>
    %921 = vector.shape_cast %920 : vector<1x16x16xf32> to vector<16x16xf32>
    %c137 = arith.constant 137 : index
    %922 = memref.load %arg1[%c137] : memref<144xf32, #tpu.memory_space<smem>>
    %923 = vector.broadcast %922 : f32 to vector<16x16xf32>
    %924 = arith.mulf %923, %921 : vector<16x16xf32>
    %925 = arith.addf %919, %924 : vector<16x16xf32>
    %c3_483 = arith.constant 3 : index
    %c1_484 = arith.constant 1 : index
    %c0_485 = arith.constant 0 : index
    %926 = vector.load %arg5[%c3_483, %c1_484, %c0_485] : memref<4x18x18xf32, #tpu.memory_space<vmem>>, vector<1x16x16xf32>
    %927 = vector.shape_cast %926 : vector<1x16x16xf32> to vector<16x16xf32>
    %c138 = arith.constant 138 : index
    %928 = memref.load %arg1[%c138] : memref<144xf32, #tpu.memory_space<smem>>
    %929 = vector.broadcast %928 : f32 to vector<16x16xf32>
    %930 = arith.mulf %929, %927 : vector<16x16xf32>
    %931 = arith.addf %925, %930 : vector<16x16xf32>
    %c3_486 = arith.constant 3 : index
    %c1_487 = arith.constant 1 : index
    %c1_488 = arith.constant 1 : index
    %932 = vector.load %arg5[%c3_486, %c1_487, %c1_488] : memref<4x18x18xf32, #tpu.memory_space<vmem>>, vector<1x16x16xf32>
    %933 = vector.shape_cast %932 : vector<1x16x16xf32> to vector<16x16xf32>
    %c139 = arith.constant 139 : index
    %934 = memref.load %arg1[%c139] : memref<144xf32, #tpu.memory_space<smem>>
    %935 = vector.broadcast %934 : f32 to vector<16x16xf32>
    %936 = arith.mulf %935, %933 : vector<16x16xf32>
    %937 = arith.addf %931, %936 : vector<16x16xf32>
    %c3_489 = arith.constant 3 : index
    %c1_490 = arith.constant 1 : index
    %c2_491 = arith.constant 2 : index
    %938 = vector.load %arg5[%c3_489, %c1_490, %c2_491] : memref<4x18x18xf32, #tpu.memory_space<vmem>>, vector<1x16x16xf32>
    %939 = vector.shape_cast %938 : vector<1x16x16xf32> to vector<16x16xf32>
    %c140 = arith.constant 140 : index
    %940 = memref.load %arg1[%c140] : memref<144xf32, #tpu.memory_space<smem>>
    %941 = vector.broadcast %940 : f32 to vector<16x16xf32>
    %942 = arith.mulf %941, %939 : vector<16x16xf32>
    %943 = arith.addf %937, %942 : vector<16x16xf32>
    %c3_492 = arith.constant 3 : index
    %c2_493 = arith.constant 2 : index
    %c0_494 = arith.constant 0 : index
    %944 = vector.load %arg5[%c3_492, %c2_493, %c0_494] : memref<4x18x18xf32, #tpu.memory_space<vmem>>, vector<1x16x16xf32>
    %945 = vector.shape_cast %944 : vector<1x16x16xf32> to vector<16x16xf32>
    %c141 = arith.constant 141 : index
    %946 = memref.load %arg1[%c141] : memref<144xf32, #tpu.memory_space<smem>>
    %947 = vector.broadcast %946 : f32 to vector<16x16xf32>
    %948 = arith.mulf %947, %945 : vector<16x16xf32>
    %949 = arith.addf %943, %948 : vector<16x16xf32>
    %c3_495 = arith.constant 3 : index
    %c2_496 = arith.constant 2 : index
    %c1_497 = arith.constant 1 : index
    %950 = vector.load %arg5[%c3_495, %c2_496, %c1_497] : memref<4x18x18xf32, #tpu.memory_space<vmem>>, vector<1x16x16xf32>
    %951 = vector.shape_cast %950 : vector<1x16x16xf32> to vector<16x16xf32>
    %c142 = arith.constant 142 : index
    %952 = memref.load %arg1[%c142] : memref<144xf32, #tpu.memory_space<smem>>
    %953 = vector.broadcast %952 : f32 to vector<16x16xf32>
    %954 = arith.mulf %953, %951 : vector<16x16xf32>
    %955 = arith.addf %949, %954 : vector<16x16xf32>
    %c3_498 = arith.constant 3 : index
    %c2_499 = arith.constant 2 : index
    %c2_500 = arith.constant 2 : index
    %956 = vector.load %arg5[%c3_498, %c2_499, %c2_500] : memref<4x18x18xf32, #tpu.memory_space<vmem>>, vector<1x16x16xf32>
    %957 = vector.shape_cast %956 : vector<1x16x16xf32> to vector<16x16xf32>
    %c143 = arith.constant 143 : index
    %958 = memref.load %arg1[%c143] : memref<144xf32, #tpu.memory_space<smem>>
    %959 = vector.broadcast %958 : f32 to vector<16x16xf32>
    %960 = arith.mulf %959, %957 : vector<16x16xf32>
    %961 = arith.addf %955, %960 : vector<16x16xf32>
    %cst_501 = arith.constant dense<0.000000e+00> : vector<16xf32>
    %962 = vector.multi_reduction <add>, %961, %cst_501 [1] : vector<16x16xf32> to vector<16xf32>
    %963 = vector.shape_cast %962 : vector<16xf32> to vector<16x1xf32>
    %cst_502 = arith.constant dense<0.000000e+00> : vector<1xf32>
    %964 = vector.multi_reduction <add>, %963, %cst_502 [0] : vector<16x1xf32> to vector<1xf32>
    %965 = vector.shape_cast %964 : vector<1xf32> to vector<1x1xf32>
    %cst_503 = arith.constant 3.906250e-03 : f32
    %966 = vector.broadcast %cst_503 : f32 to vector<1x1xf32>
    %967 = arith.mulf %965, %966 : vector<1x1xf32>
    %968 = vector.broadcast %967 : vector<1x1xf32> to vector<16x16xf32>
    %969 = arith.subf %961, %968 : vector<16x16xf32>
    %970 = arith.mulf %969, %969 : vector<16x16xf32>
    %cst_504 = arith.constant dense<0.000000e+00> : vector<16xf32>
    %971 = vector.multi_reduction <add>, %970, %cst_504 [1] : vector<16x16xf32> to vector<16xf32>
    %972 = vector.shape_cast %971 : vector<16xf32> to vector<16x1xf32>
    %cst_505 = arith.constant dense<0.000000e+00> : vector<1xf32>
    %973 = vector.multi_reduction <add>, %972, %cst_505 [0] : vector<16x1xf32> to vector<1xf32>
    %974 = vector.shape_cast %973 : vector<1xf32> to vector<1x1xf32>
    %cst_506 = arith.constant 3.906250e-03 : f32
    %975 = vector.broadcast %cst_506 : f32 to vector<1x1xf32>
    %976 = arith.mulf %974, %975 : vector<1x1xf32>
    %977 = vector.broadcast %967 : vector<1x1xf32> to vector<16x16xf32>
    %978 = arith.subf %961, %977 : vector<16x16xf32>
    %cst_507 = arith.constant 9.99999974E-6 : f32
    %979 = vector.broadcast %cst_507 : f32 to vector<1x1xf32>
    %980 = arith.addf %976, %979 : vector<1x1xf32>
    %981 = math.rsqrt %980 : vector<1x1xf32>
    %982 = vector.broadcast %981 : vector<1x1xf32> to vector<16x16xf32>
    %983 = arith.mulf %978, %982 : vector<16x16xf32>
    %cst_508 = arith.constant 0.000000e+00 : f32
    %984 = vector.broadcast %cst_508 : f32 to vector<16x16xf32>
    %985 = arith.maximumf %983, %984 : vector<16x16xf32>
    %c3_509 = arith.constant 3 : index
    %c1_510 = arith.constant 1 : index
    %c1_511 = arith.constant 1 : index
    %986 = vector.load %arg6[%c3_509, %c1_510, %c1_511] : memref<4x18x18xf32, #tpu.memory_space<vmem>>, vector<1x16x16xf32>
    %987 = vector.shape_cast %986 : vector<1x16x16xf32> to vector<16x16xf32>
    %988 = vector.shape_cast %985 : vector<16x16xf32> to vector<1x16x16xf32>
    tpu.vector_store %arg6[%c3_509, %c1_510, %c1_511], %988 {strides = array<i32>} : memref<4x18x18xf32, #tpu.memory_space<vmem>>, vector<1x16x16xf32>,
    %cst_512 = arith.constant 0.000000e+00 : f32
    %989 = vector.broadcast %cst_512 : f32 to vector<16x16xf32>
    %c0_513 = arith.constant 0 : index
    %c0_514 = arith.constant 0 : index
    %c0_515 = arith.constant 0 : index
    %990 = vector.load %arg6[%c0_513, %c0_514, %c0_515] : memref<4x18x18xf32, #tpu.memory_space<vmem>>, vector<1x16x16xf32>
    %991 = vector.shape_cast %990 : vector<1x16x16xf32> to vector<16x16xf32>
    %c0_516 = arith.constant 0 : index
    %992 = memref.load %arg2[%c0_516] : memref<144xf32, #tpu.memory_space<smem>>
    %993 = vector.broadcast %992 : f32 to vector<16x16xf32>
    %994 = arith.mulf %993, %991 : vector<16x16xf32>
    %995 = arith.addf %989, %994 : vector<16x16xf32>
    %c0_517 = arith.constant 0 : index
    %c0_518 = arith.constant 0 : index
    %c1_519 = arith.constant 1 : index
    %996 = vector.load %arg6[%c0_517, %c0_518, %c1_519] : memref<4x18x18xf32, #tpu.memory_space<vmem>>, vector<1x16x16xf32>
    %997 = vector.shape_cast %996 : vector<1x16x16xf32> to vector<16x16xf32>
    %c1_520 = arith.constant 1 : index
    %998 = memref.load %arg2[%c1_520] : memref<144xf32, #tpu.memory_space<smem>>
    %999 = vector.broadcast %998 : f32 to vector<16x16xf32>
    %1000 = arith.mulf %999, %997 : vector<16x16xf32>
    %1001 = arith.addf %995, %1000 : vector<16x16xf32>
    %c0_521 = arith.constant 0 : index
    %c0_522 = arith.constant 0 : index
    %c2_523 = arith.constant 2 : index
    %1002 = vector.load %arg6[%c0_521, %c0_522, %c2_523] : memref<4x18x18xf32, #tpu.memory_space<vmem>>, vector<1x16x16xf32>
    %1003 = vector.shape_cast %1002 : vector<1x16x16xf32> to vector<16x16xf32>
    %c2_524 = arith.constant 2 : index
    %1004 = memref.load %arg2[%c2_524] : memref<144xf32, #tpu.memory_space<smem>>
    %1005 = vector.broadcast %1004 : f32 to vector<16x16xf32>
    %1006 = arith.mulf %1005, %1003 : vector<16x16xf32>
    %1007 = arith.addf %1001, %1006 : vector<16x16xf32>
    %c0_525 = arith.constant 0 : index
    %c1_526 = arith.constant 1 : index
    %c0_527 = arith.constant 0 : index
    %1008 = vector.load %arg6[%c0_525, %c1_526, %c0_527] : memref<4x18x18xf32, #tpu.memory_space<vmem>>, vector<1x16x16xf32>
    %1009 = vector.shape_cast %1008 : vector<1x16x16xf32> to vector<16x16xf32>
    %c3_528 = arith.constant 3 : index
    %1010 = memref.load %arg2[%c3_528] : memref<144xf32, #tpu.memory_space<smem>>
    %1011 = vector.broadcast %1010 : f32 to vector<16x16xf32>
    %1012 = arith.mulf %1011, %1009 : vector<16x16xf32>
    %1013 = arith.addf %1007, %1012 : vector<16x16xf32>
    %c0_529 = arith.constant 0 : index
    %c1_530 = arith.constant 1 : index
    %c1_531 = arith.constant 1 : index
    %1014 = vector.load %arg6[%c0_529, %c1_530, %c1_531] : memref<4x18x18xf32, #tpu.memory_space<vmem>>, vector<1x16x16xf32>
    %1015 = vector.shape_cast %1014 : vector<1x16x16xf32> to vector<16x16xf32>
    %c4_532 = arith.constant 4 : index
    %1016 = memref.load %arg2[%c4_532] : memref<144xf32, #tpu.memory_space<smem>>
    %1017 = vector.broadcast %1016 : f32 to vector<16x16xf32>
    %1018 = arith.mulf %1017, %1015 : vector<16x16xf32>
    %1019 = arith.addf %1013, %1018 : vector<16x16xf32>
    %c0_533 = arith.constant 0 : index
    %c1_534 = arith.constant 1 : index
    %c2_535 = arith.constant 2 : index
    %1020 = vector.load %arg6[%c0_533, %c1_534, %c2_535] : memref<4x18x18xf32, #tpu.memory_space<vmem>>, vector<1x16x16xf32>
    %1021 = vector.shape_cast %1020 : vector<1x16x16xf32> to vector<16x16xf32>
    %c5_536 = arith.constant 5 : index
    %1022 = memref.load %arg2[%c5_536] : memref<144xf32, #tpu.memory_space<smem>>
    %1023 = vector.broadcast %1022 : f32 to vector<16x16xf32>
    %1024 = arith.mulf %1023, %1021 : vector<16x16xf32>
    %1025 = arith.addf %1019, %1024 : vector<16x16xf32>
    %c0_537 = arith.constant 0 : index
    %c2_538 = arith.constant 2 : index
    %c0_539 = arith.constant 0 : index
    %1026 = vector.load %arg6[%c0_537, %c2_538, %c0_539] : memref<4x18x18xf32, #tpu.memory_space<vmem>>, vector<1x16x16xf32>
    %1027 = vector.shape_cast %1026 : vector<1x16x16xf32> to vector<16x16xf32>
    %c6_540 = arith.constant 6 : index
    %1028 = memref.load %arg2[%c6_540] : memref<144xf32, #tpu.memory_space<smem>>
    %1029 = vector.broadcast %1028 : f32 to vector<16x16xf32>
    %1030 = arith.mulf %1029, %1027 : vector<16x16xf32>
    %1031 = arith.addf %1025, %1030 : vector<16x16xf32>
    %c0_541 = arith.constant 0 : index
    %c2_542 = arith.constant 2 : index
    %c1_543 = arith.constant 1 : index
    %1032 = vector.load %arg6[%c0_541, %c2_542, %c1_543] : memref<4x18x18xf32, #tpu.memory_space<vmem>>, vector<1x16x16xf32>
    %1033 = vector.shape_cast %1032 : vector<1x16x16xf32> to vector<16x16xf32>
    %c7_544 = arith.constant 7 : index
    %1034 = memref.load %arg2[%c7_544] : memref<144xf32, #tpu.memory_space<smem>>
    %1035 = vector.broadcast %1034 : f32 to vector<16x16xf32>
    %1036 = arith.mulf %1035, %1033 : vector<16x16xf32>
    %1037 = arith.addf %1031, %1036 : vector<16x16xf32>
    %c0_545 = arith.constant 0 : index
    %c2_546 = arith.constant 2 : index
    %c2_547 = arith.constant 2 : index
    %1038 = vector.load %arg6[%c0_545, %c2_546, %c2_547] : memref<4x18x18xf32, #tpu.memory_space<vmem>>, vector<1x16x16xf32>
    %1039 = vector.shape_cast %1038 : vector<1x16x16xf32> to vector<16x16xf32>
    %c8_548 = arith.constant 8 : index
    %1040 = memref.load %arg2[%c8_548] : memref<144xf32, #tpu.memory_space<smem>>
    %1041 = vector.broadcast %1040 : f32 to vector<16x16xf32>
    %1042 = arith.mulf %1041, %1039 : vector<16x16xf32>
    %1043 = arith.addf %1037, %1042 : vector<16x16xf32>
    %c1_549 = arith.constant 1 : index
    %c0_550 = arith.constant 0 : index
    %c0_551 = arith.constant 0 : index
    %1044 = vector.load %arg6[%c1_549, %c0_550, %c0_551] : memref<4x18x18xf32, #tpu.memory_space<vmem>>, vector<1x16x16xf32>
    %1045 = vector.shape_cast %1044 : vector<1x16x16xf32> to vector<16x16xf32>
    %c9_552 = arith.constant 9 : index
    %1046 = memref.load %arg2[%c9_552] : memref<144xf32, #tpu.memory_space<smem>>
    %1047 = vector.broadcast %1046 : f32 to vector<16x16xf32>
    %1048 = arith.mulf %1047, %1045 : vector<16x16xf32>
    %1049 = arith.addf %1043, %1048 : vector<16x16xf32>
    %c1_553 = arith.constant 1 : index
    %c0_554 = arith.constant 0 : index
    %c1_555 = arith.constant 1 : index
    %1050 = vector.load %arg6[%c1_553, %c0_554, %c1_555] : memref<4x18x18xf32, #tpu.memory_space<vmem>>, vector<1x16x16xf32>
    %1051 = vector.shape_cast %1050 : vector<1x16x16xf32> to vector<16x16xf32>
    %c10_556 = arith.constant 10 : index
    %1052 = memref.load %arg2[%c10_556] : memref<144xf32, #tpu.memory_space<smem>>
    %1053 = vector.broadcast %1052 : f32 to vector<16x16xf32>
    %1054 = arith.mulf %1053, %1051 : vector<16x16xf32>
    %1055 = arith.addf %1049, %1054 : vector<16x16xf32>
    %c1_557 = arith.constant 1 : index
    %c0_558 = arith.constant 0 : index
    %c2_559 = arith.constant 2 : index
    %1056 = vector.load %arg6[%c1_557, %c0_558, %c2_559] : memref<4x18x18xf32, #tpu.memory_space<vmem>>, vector<1x16x16xf32>
    %1057 = vector.shape_cast %1056 : vector<1x16x16xf32> to vector<16x16xf32>
    %c11_560 = arith.constant 11 : index
    %1058 = memref.load %arg2[%c11_560] : memref<144xf32, #tpu.memory_space<smem>>
    %1059 = vector.broadcast %1058 : f32 to vector<16x16xf32>
    %1060 = arith.mulf %1059, %1057 : vector<16x16xf32>
    %1061 = arith.addf %1055, %1060 : vector<16x16xf32>
    %c1_561 = arith.constant 1 : index
    %c1_562 = arith.constant 1 : index
    %c0_563 = arith.constant 0 : index
    %1062 = vector.load %arg6[%c1_561, %c1_562, %c0_563] : memref<4x18x18xf32, #tpu.memory_space<vmem>>, vector<1x16x16xf32>
    %1063 = vector.shape_cast %1062 : vector<1x16x16xf32> to vector<16x16xf32>
    %c12_564 = arith.constant 12 : index
    %1064 = memref.load %arg2[%c12_564] : memref<144xf32, #tpu.memory_space<smem>>
    %1065 = vector.broadcast %1064 : f32 to vector<16x16xf32>
    %1066 = arith.mulf %1065, %1063 : vector<16x16xf32>
    %1067 = arith.addf %1061, %1066 : vector<16x16xf32>
    %c1_565 = arith.constant 1 : index
    %c1_566 = arith.constant 1 : index
    %c1_567 = arith.constant 1 : index
    %1068 = vector.load %arg6[%c1_565, %c1_566, %c1_567] : memref<4x18x18xf32, #tpu.memory_space<vmem>>, vector<1x16x16xf32>
    %1069 = vector.shape_cast %1068 : vector<1x16x16xf32> to vector<16x16xf32>
    %c13_568 = arith.constant 13 : index
    %1070 = memref.load %arg2[%c13_568] : memref<144xf32, #tpu.memory_space<smem>>
    %1071 = vector.broadcast %1070 : f32 to vector<16x16xf32>
    %1072 = arith.mulf %1071, %1069 : vector<16x16xf32>
    %1073 = arith.addf %1067, %1072 : vector<16x16xf32>
    %c1_569 = arith.constant 1 : index
    %c1_570 = arith.constant 1 : index
    %c2_571 = arith.constant 2 : index
    %1074 = vector.load %arg6[%c1_569, %c1_570, %c2_571] : memref<4x18x18xf32, #tpu.memory_space<vmem>>, vector<1x16x16xf32>
    %1075 = vector.shape_cast %1074 : vector<1x16x16xf32> to vector<16x16xf32>
    %c14_572 = arith.constant 14 : index
    %1076 = memref.load %arg2[%c14_572] : memref<144xf32, #tpu.memory_space<smem>>
    %1077 = vector.broadcast %1076 : f32 to vector<16x16xf32>
    %1078 = arith.mulf %1077, %1075 : vector<16x16xf32>
    %1079 = arith.addf %1073, %1078 : vector<16x16xf32>
    %c1_573 = arith.constant 1 : index
    %c2_574 = arith.constant 2 : index
    %c0_575 = arith.constant 0 : index
    %1080 = vector.load %arg6[%c1_573, %c2_574, %c0_575] : memref<4x18x18xf32, #tpu.memory_space<vmem>>, vector<1x16x16xf32>
    %1081 = vector.shape_cast %1080 : vector<1x16x16xf32> to vector<16x16xf32>
    %c15_576 = arith.constant 15 : index
    %1082 = memref.load %arg2[%c15_576] : memref<144xf32, #tpu.memory_space<smem>>
    %1083 = vector.broadcast %1082 : f32 to vector<16x16xf32>
    %1084 = arith.mulf %1083, %1081 : vector<16x16xf32>
    %1085 = arith.addf %1079, %1084 : vector<16x16xf32>
    %c1_577 = arith.constant 1 : index
    %c2_578 = arith.constant 2 : index
    %c1_579 = arith.constant 1 : index
    %1086 = vector.load %arg6[%c1_577, %c2_578, %c1_579] : memref<4x18x18xf32, #tpu.memory_space<vmem>>, vector<1x16x16xf32>
    %1087 = vector.shape_cast %1086 : vector<1x16x16xf32> to vector<16x16xf32>
    %c16_580 = arith.constant 16 : index
    %1088 = memref.load %arg2[%c16_580] : memref<144xf32, #tpu.memory_space<smem>>
    %1089 = vector.broadcast %1088 : f32 to vector<16x16xf32>
    %1090 = arith.mulf %1089, %1087 : vector<16x16xf32>
    %1091 = arith.addf %1085, %1090 : vector<16x16xf32>
    %c1_581 = arith.constant 1 : index
    %c2_582 = arith.constant 2 : index
    %c2_583 = arith.constant 2 : index
    %1092 = vector.load %arg6[%c1_581, %c2_582, %c2_583] : memref<4x18x18xf32, #tpu.memory_space<vmem>>, vector<1x16x16xf32>
    %1093 = vector.shape_cast %1092 : vector<1x16x16xf32> to vector<16x16xf32>
    %c17_584 = arith.constant 17 : index
    %1094 = memref.load %arg2[%c17_584] : memref<144xf32, #tpu.memory_space<smem>>
    %1095 = vector.broadcast %1094 : f32 to vector<16x16xf32>
    %1096 = arith.mulf %1095, %1093 : vector<16x16xf32>
    %1097 = arith.addf %1091, %1096 : vector<16x16xf32>
    %c2_585 = arith.constant 2 : index
    %c0_586 = arith.constant 0 : index
    %c0_587 = arith.constant 0 : index
    %1098 = vector.load %arg6[%c2_585, %c0_586, %c0_587] : memref<4x18x18xf32, #tpu.memory_space<vmem>>, vector<1x16x16xf32>
    %1099 = vector.shape_cast %1098 : vector<1x16x16xf32> to vector<16x16xf32>
    %c18_588 = arith.constant 18 : index
    %1100 = memref.load %arg2[%c18_588] : memref<144xf32, #tpu.memory_space<smem>>
    %1101 = vector.broadcast %1100 : f32 to vector<16x16xf32>
    %1102 = arith.mulf %1101, %1099 : vector<16x16xf32>
    %1103 = arith.addf %1097, %1102 : vector<16x16xf32>
    %c2_589 = arith.constant 2 : index
    %c0_590 = arith.constant 0 : index
    %c1_591 = arith.constant 1 : index
    %1104 = vector.load %arg6[%c2_589, %c0_590, %c1_591] : memref<4x18x18xf32, #tpu.memory_space<vmem>>, vector<1x16x16xf32>
    %1105 = vector.shape_cast %1104 : vector<1x16x16xf32> to vector<16x16xf32>
    %c19_592 = arith.constant 19 : index
    %1106 = memref.load %arg2[%c19_592] : memref<144xf32, #tpu.memory_space<smem>>
    %1107 = vector.broadcast %1106 : f32 to vector<16x16xf32>
    %1108 = arith.mulf %1107, %1105 : vector<16x16xf32>
    %1109 = arith.addf %1103, %1108 : vector<16x16xf32>
    %c2_593 = arith.constant 2 : index
    %c0_594 = arith.constant 0 : index
    %c2_595 = arith.constant 2 : index
    %1110 = vector.load %arg6[%c2_593, %c0_594, %c2_595] : memref<4x18x18xf32, #tpu.memory_space<vmem>>, vector<1x16x16xf32>
    %1111 = vector.shape_cast %1110 : vector<1x16x16xf32> to vector<16x16xf32>
    %c20_596 = arith.constant 20 : index
    %1112 = memref.load %arg2[%c20_596] : memref<144xf32, #tpu.memory_space<smem>>
    %1113 = vector.broadcast %1112 : f32 to vector<16x16xf32>
    %1114 = arith.mulf %1113, %1111 : vector<16x16xf32>
    %1115 = arith.addf %1109, %1114 : vector<16x16xf32>
    %c2_597 = arith.constant 2 : index
    %c1_598 = arith.constant 1 : index
    %c0_599 = arith.constant 0 : index
    %1116 = vector.load %arg6[%c2_597, %c1_598, %c0_599] : memref<4x18x18xf32, #tpu.memory_space<vmem>>, vector<1x16x16xf32>
    %1117 = vector.shape_cast %1116 : vector<1x16x16xf32> to vector<16x16xf32>
    %c21_600 = arith.constant 21 : index
    %1118 = memref.load %arg2[%c21_600] : memref<144xf32, #tpu.memory_space<smem>>
    %1119 = vector.broadcast %1118 : f32 to vector<16x16xf32>
    %1120 = arith.mulf %1119, %1117 : vector<16x16xf32>
    %1121 = arith.addf %1115, %1120 : vector<16x16xf32>
    %c2_601 = arith.constant 2 : index
    %c1_602 = arith.constant 1 : index
    %c1_603 = arith.constant 1 : index
    %1122 = vector.load %arg6[%c2_601, %c1_602, %c1_603] : memref<4x18x18xf32, #tpu.memory_space<vmem>>, vector<1x16x16xf32>
    %1123 = vector.shape_cast %1122 : vector<1x16x16xf32> to vector<16x16xf32>
    %c22_604 = arith.constant 22 : index
    %1124 = memref.load %arg2[%c22_604] : memref<144xf32, #tpu.memory_space<smem>>
    %1125 = vector.broadcast %1124 : f32 to vector<16x16xf32>
    %1126 = arith.mulf %1125, %1123 : vector<16x16xf32>
    %1127 = arith.addf %1121, %1126 : vector<16x16xf32>
    %c2_605 = arith.constant 2 : index
    %c1_606 = arith.constant 1 : index
    %c2_607 = arith.constant 2 : index
    %1128 = vector.load %arg6[%c2_605, %c1_606, %c2_607] : memref<4x18x18xf32, #tpu.memory_space<vmem>>, vector<1x16x16xf32>
    %1129 = vector.shape_cast %1128 : vector<1x16x16xf32> to vector<16x16xf32>
    %c23_608 = arith.constant 23 : index
    %1130 = memref.load %arg2[%c23_608] : memref<144xf32, #tpu.memory_space<smem>>
    %1131 = vector.broadcast %1130 : f32 to vector<16x16xf32>
    %1132 = arith.mulf %1131, %1129 : vector<16x16xf32>
    %1133 = arith.addf %1127, %1132 : vector<16x16xf32>
    %c2_609 = arith.constant 2 : index
    %c2_610 = arith.constant 2 : index
    %c0_611 = arith.constant 0 : index
    %1134 = vector.load %arg6[%c2_609, %c2_610, %c0_611] : memref<4x18x18xf32, #tpu.memory_space<vmem>>, vector<1x16x16xf32>
    %1135 = vector.shape_cast %1134 : vector<1x16x16xf32> to vector<16x16xf32>
    %c24_612 = arith.constant 24 : index
    %1136 = memref.load %arg2[%c24_612] : memref<144xf32, #tpu.memory_space<smem>>
    %1137 = vector.broadcast %1136 : f32 to vector<16x16xf32>
    %1138 = arith.mulf %1137, %1135 : vector<16x16xf32>
    %1139 = arith.addf %1133, %1138 : vector<16x16xf32>
    %c2_613 = arith.constant 2 : index
    %c2_614 = arith.constant 2 : index
    %c1_615 = arith.constant 1 : index
    %1140 = vector.load %arg6[%c2_613, %c2_614, %c1_615] : memref<4x18x18xf32, #tpu.memory_space<vmem>>, vector<1x16x16xf32>
    %1141 = vector.shape_cast %1140 : vector<1x16x16xf32> to vector<16x16xf32>
    %c25_616 = arith.constant 25 : index
    %1142 = memref.load %arg2[%c25_616] : memref<144xf32, #tpu.memory_space<smem>>
    %1143 = vector.broadcast %1142 : f32 to vector<16x16xf32>
    %1144 = arith.mulf %1143, %1141 : vector<16x16xf32>
    %1145 = arith.addf %1139, %1144 : vector<16x16xf32>
    %c2_617 = arith.constant 2 : index
    %c2_618 = arith.constant 2 : index
    %c2_619 = arith.constant 2 : index
    %1146 = vector.load %arg6[%c2_617, %c2_618, %c2_619] : memref<4x18x18xf32, #tpu.memory_space<vmem>>, vector<1x16x16xf32>
    %1147 = vector.shape_cast %1146 : vector<1x16x16xf32> to vector<16x16xf32>
    %c26_620 = arith.constant 26 : index
    %1148 = memref.load %arg2[%c26_620] : memref<144xf32, #tpu.memory_space<smem>>
    %1149 = vector.broadcast %1148 : f32 to vector<16x16xf32>
    %1150 = arith.mulf %1149, %1147 : vector<16x16xf32>
    %1151 = arith.addf %1145, %1150 : vector<16x16xf32>
    %c3_621 = arith.constant 3 : index
    %c0_622 = arith.constant 0 : index
    %c0_623 = arith.constant 0 : index
    %1152 = vector.load %arg6[%c3_621, %c0_622, %c0_623] : memref<4x18x18xf32, #tpu.memory_space<vmem>>, vector<1x16x16xf32>
    %1153 = vector.shape_cast %1152 : vector<1x16x16xf32> to vector<16x16xf32>
    %c27_624 = arith.constant 27 : index
    %1154 = memref.load %arg2[%c27_624] : memref<144xf32, #tpu.memory_space<smem>>
    %1155 = vector.broadcast %1154 : f32 to vector<16x16xf32>
    %1156 = arith.mulf %1155, %1153 : vector<16x16xf32>
    %1157 = arith.addf %1151, %1156 : vector<16x16xf32>
    %c3_625 = arith.constant 3 : index
    %c0_626 = arith.constant 0 : index
    %c1_627 = arith.constant 1 : index
    %1158 = vector.load %arg6[%c3_625, %c0_626, %c1_627] : memref<4x18x18xf32, #tpu.memory_space<vmem>>, vector<1x16x16xf32>
    %1159 = vector.shape_cast %1158 : vector<1x16x16xf32> to vector<16x16xf32>
    %c28_628 = arith.constant 28 : index
    %1160 = memref.load %arg2[%c28_628] : memref<144xf32, #tpu.memory_space<smem>>
    %1161 = vector.broadcast %1160 : f32 to vector<16x16xf32>
    %1162 = arith.mulf %1161, %1159 : vector<16x16xf32>
    %1163 = arith.addf %1157, %1162 : vector<16x16xf32>
    %c3_629 = arith.constant 3 : index
    %c0_630 = arith.constant 0 : index
    %c2_631 = arith.constant 2 : index
    %1164 = vector.load %arg6[%c3_629, %c0_630, %c2_631] : memref<4x18x18xf32, #tpu.memory_space<vmem>>, vector<1x16x16xf32>
    %1165 = vector.shape_cast %1164 : vector<1x16x16xf32> to vector<16x16xf32>
    %c29_632 = arith.constant 29 : index
    %1166 = memref.load %arg2[%c29_632] : memref<144xf32, #tpu.memory_space<smem>>
    %1167 = vector.broadcast %1166 : f32 to vector<16x16xf32>
    %1168 = arith.mulf %1167, %1165 : vector<16x16xf32>
    %1169 = arith.addf %1163, %1168 : vector<16x16xf32>
    %c3_633 = arith.constant 3 : index
    %c1_634 = arith.constant 1 : index
    %c0_635 = arith.constant 0 : index
    %1170 = vector.load %arg6[%c3_633, %c1_634, %c0_635] : memref<4x18x18xf32, #tpu.memory_space<vmem>>, vector<1x16x16xf32>
    %1171 = vector.shape_cast %1170 : vector<1x16x16xf32> to vector<16x16xf32>
    %c30_636 = arith.constant 30 : index
    %1172 = memref.load %arg2[%c30_636] : memref<144xf32, #tpu.memory_space<smem>>
    %1173 = vector.broadcast %1172 : f32 to vector<16x16xf32>
    %1174 = arith.mulf %1173, %1171 : vector<16x16xf32>
    %1175 = arith.addf %1169, %1174 : vector<16x16xf32>
    %c3_637 = arith.constant 3 : index
    %c1_638 = arith.constant 1 : index
    %c1_639 = arith.constant 1 : index
    %1176 = vector.load %arg6[%c3_637, %c1_638, %c1_639] : memref<4x18x18xf32, #tpu.memory_space<vmem>>, vector<1x16x16xf32>
    %1177 = vector.shape_cast %1176 : vector<1x16x16xf32> to vector<16x16xf32>
    %c31_640 = arith.constant 31 : index
    %1178 = memref.load %arg2[%c31_640] : memref<144xf32, #tpu.memory_space<smem>>
    %1179 = vector.broadcast %1178 : f32 to vector<16x16xf32>
    %1180 = arith.mulf %1179, %1177 : vector<16x16xf32>
    %1181 = arith.addf %1175, %1180 : vector<16x16xf32>
    %c3_641 = arith.constant 3 : index
    %c1_642 = arith.constant 1 : index
    %c2_643 = arith.constant 2 : index
    %1182 = vector.load %arg6[%c3_641, %c1_642, %c2_643] : memref<4x18x18xf32, #tpu.memory_space<vmem>>, vector<1x16x16xf32>
    %1183 = vector.shape_cast %1182 : vector<1x16x16xf32> to vector<16x16xf32>
    %c32_644 = arith.constant 32 : index
    %1184 = memref.load %arg2[%c32_644] : memref<144xf32, #tpu.memory_space<smem>>
    %1185 = vector.broadcast %1184 : f32 to vector<16x16xf32>
    %1186 = arith.mulf %1185, %1183 : vector<16x16xf32>
    %1187 = arith.addf %1181, %1186 : vector<16x16xf32>
    %c3_645 = arith.constant 3 : index
    %c2_646 = arith.constant 2 : index
    %c0_647 = arith.constant 0 : index
    %1188 = vector.load %arg6[%c3_645, %c2_646, %c0_647] : memref<4x18x18xf32, #tpu.memory_space<vmem>>, vector<1x16x16xf32>
    %1189 = vector.shape_cast %1188 : vector<1x16x16xf32> to vector<16x16xf32>
    %c33_648 = arith.constant 33 : index
    %1190 = memref.load %arg2[%c33_648] : memref<144xf32, #tpu.memory_space<smem>>
    %1191 = vector.broadcast %1190 : f32 to vector<16x16xf32>
    %1192 = arith.mulf %1191, %1189 : vector<16x16xf32>
    %1193 = arith.addf %1187, %1192 : vector<16x16xf32>
    %c3_649 = arith.constant 3 : index
    %c2_650 = arith.constant 2 : index
    %c1_651 = arith.constant 1 : index
    %1194 = vector.load %arg6[%c3_649, %c2_650, %c1_651] : memref<4x18x18xf32, #tpu.memory_space<vmem>>, vector<1x16x16xf32>
    %1195 = vector.shape_cast %1194 : vector<1x16x16xf32> to vector<16x16xf32>
    %c34_652 = arith.constant 34 : index
    %1196 = memref.load %arg2[%c34_652] : memref<144xf32, #tpu.memory_space<smem>>
    %1197 = vector.broadcast %1196 : f32 to vector<16x16xf32>
    %1198 = arith.mulf %1197, %1195 : vector<16x16xf32>
    %1199 = arith.addf %1193, %1198 : vector<16x16xf32>
    %c3_653 = arith.constant 3 : index
    %c2_654 = arith.constant 2 : index
    %c2_655 = arith.constant 2 : index
    %1200 = vector.load %arg6[%c3_653, %c2_654, %c2_655] : memref<4x18x18xf32, #tpu.memory_space<vmem>>, vector<1x16x16xf32>
    %1201 = vector.shape_cast %1200 : vector<1x16x16xf32> to vector<16x16xf32>
    %c35_656 = arith.constant 35 : index
    %1202 = memref.load %arg2[%c35_656] : memref<144xf32, #tpu.memory_space<smem>>
    %1203 = vector.broadcast %1202 : f32 to vector<16x16xf32>
    %1204 = arith.mulf %1203, %1201 : vector<16x16xf32>
    %1205 = arith.addf %1199, %1204 : vector<16x16xf32>
    %cst_657 = arith.constant dense<0.000000e+00> : vector<16xf32>
    %1206 = vector.multi_reduction <add>, %1205, %cst_657 [1] : vector<16x16xf32> to vector<16xf32>
    %1207 = vector.shape_cast %1206 : vector<16xf32> to vector<16x1xf32>
    %cst_658 = arith.constant dense<0.000000e+00> : vector<1xf32>
    %1208 = vector.multi_reduction <add>, %1207, %cst_658 [0] : vector<16x1xf32> to vector<1xf32>
    %1209 = vector.shape_cast %1208 : vector<1xf32> to vector<1x1xf32>
    %cst_659 = arith.constant 3.906250e-03 : f32
    %1210 = vector.broadcast %cst_659 : f32 to vector<1x1xf32>
    %1211 = arith.mulf %1209, %1210 : vector<1x1xf32>
    %1212 = vector.broadcast %1211 : vector<1x1xf32> to vector<16x16xf32>
    %1213 = arith.subf %1205, %1212 : vector<16x16xf32>
    %1214 = arith.mulf %1213, %1213 : vector<16x16xf32>
    %cst_660 = arith.constant dense<0.000000e+00> : vector<16xf32>
    %1215 = vector.multi_reduction <add>, %1214, %cst_660 [1] : vector<16x16xf32> to vector<16xf32>
    %1216 = vector.shape_cast %1215 : vector<16xf32> to vector<16x1xf32>
    %cst_661 = arith.constant dense<0.000000e+00> : vector<1xf32>
    %1217 = vector.multi_reduction <add>, %1216, %cst_661 [0] : vector<16x1xf32> to vector<1xf32>
    %1218 = vector.shape_cast %1217 : vector<1xf32> to vector<1x1xf32>
    %cst_662 = arith.constant 3.906250e-03 : f32
    %1219 = vector.broadcast %cst_662 : f32 to vector<1x1xf32>
    %1220 = arith.mulf %1218, %1219 : vector<1x1xf32>
    %1221 = vector.broadcast %1211 : vector<1x1xf32> to vector<16x16xf32>
    %1222 = arith.subf %1205, %1221 : vector<16x16xf32>
    %cst_663 = arith.constant 9.99999974E-6 : f32
    %1223 = vector.broadcast %cst_663 : f32 to vector<1x1xf32>
    %1224 = arith.addf %1220, %1223 : vector<1x1xf32>
    %1225 = math.rsqrt %1224 : vector<1x1xf32>
    %1226 = vector.broadcast %1225 : vector<1x1xf32> to vector<16x16xf32>
    %1227 = arith.mulf %1222, %1226 : vector<16x16xf32>
    %c0_664 = arith.constant 0 : index
    %c0_665 = arith.constant 0 : index
    %c0_666 = arith.constant 0 : index
    %c0_667 = arith.constant 0 : index
    %1228 = vector.load %arg3[%c0_664, %c0_665, %c0_666, %c0_667] : memref<1x4x16x16xf32, #tpu.memory_space<vmem>>, vector<1x1x16x16xf32>
    %1229 = vector.shape_cast %1228 : vector<1x1x16x16xf32> to vector<16x16xf32>
    %1230 = arith.addf %1229, %1227 : vector<16x16xf32>
    %c0_668 = arith.constant 0 : index
    %c0_669 = arith.constant 0 : index
    %c0_670 = arith.constant 0 : index
    %c0_671 = arith.constant 0 : index
    %1231 = vector.load %arg4[%c0_668, %c0_669, %c0_670, %c0_671] : memref<1x4x16x16xf32, #tpu.memory_space<vmem>>, vector<1x1x16x16xf32>
    %1232 = vector.shape_cast %1231 : vector<1x1x16x16xf32> to vector<16x16xf32>
    %1233 = vector.shape_cast %1230 : vector<16x16xf32> to vector<1x1x16x16xf32>
    tpu.vector_store %arg4[%c0_668, %c0_669, %c0_670, %c0_671], %1233 {strides = array<i32>} : memref<1x4x16x16xf32, #tpu.memory_space<vmem>>, vector<1x1x16x16xf32>,
    %cst_672 = arith.constant 0.000000e+00 : f32
    %1234 = vector.broadcast %cst_672 : f32 to vector<16x16xf32>
    %c0_673 = arith.constant 0 : index
    %c0_674 = arith.constant 0 : index
    %c0_675 = arith.constant 0 : index
    %1235 = vector.load %arg6[%c0_673, %c0_674, %c0_675] : memref<4x18x18xf32, #tpu.memory_space<vmem>>, vector<1x16x16xf32>
    %1236 = vector.shape_cast %1235 : vector<1x16x16xf32> to vector<16x16xf32>
    %c36_676 = arith.constant 36 : index
    %1237 = memref.load %arg2[%c36_676] : memref<144xf32, #tpu.memory_space<smem>>
    %1238 = vector.broadcast %1237 : f32 to vector<16x16xf32>
    %1239 = arith.mulf %1238, %1236 : vector<16x16xf32>
    %1240 = arith.addf %1234, %1239 : vector<16x16xf32>
    %c0_677 = arith.constant 0 : index
    %c0_678 = arith.constant 0 : index
    %c1_679 = arith.constant 1 : index
    %1241 = vector.load %arg6[%c0_677, %c0_678, %c1_679] : memref<4x18x18xf32, #tpu.memory_space<vmem>>, vector<1x16x16xf32>
    %1242 = vector.shape_cast %1241 : vector<1x16x16xf32> to vector<16x16xf32>
    %c37_680 = arith.constant 37 : index
    %1243 = memref.load %arg2[%c37_680] : memref<144xf32, #tpu.memory_space<smem>>
    %1244 = vector.broadcast %1243 : f32 to vector<16x16xf32>
    %1245 = arith.mulf %1244, %1242 : vector<16x16xf32>
    %1246 = arith.addf %1240, %1245 : vector<16x16xf32>
    %c0_681 = arith.constant 0 : index
    %c0_682 = arith.constant 0 : index
    %c2_683 = arith.constant 2 : index
    %1247 = vector.load %arg6[%c0_681, %c0_682, %c2_683] : memref<4x18x18xf32, #tpu.memory_space<vmem>>, vector<1x16x16xf32>
    %1248 = vector.shape_cast %1247 : vector<1x16x16xf32> to vector<16x16xf32>
    %c38_684 = arith.constant 38 : index
    %1249 = memref.load %arg2[%c38_684] : memref<144xf32, #tpu.memory_space<smem>>
    %1250 = vector.broadcast %1249 : f32 to vector<16x16xf32>
    %1251 = arith.mulf %1250, %1248 : vector<16x16xf32>
    %1252 = arith.addf %1246, %1251 : vector<16x16xf32>
    %c0_685 = arith.constant 0 : index
    %c1_686 = arith.constant 1 : index
    %c0_687 = arith.constant 0 : index
    %1253 = vector.load %arg6[%c0_685, %c1_686, %c0_687] : memref<4x18x18xf32, #tpu.memory_space<vmem>>, vector<1x16x16xf32>
    %1254 = vector.shape_cast %1253 : vector<1x16x16xf32> to vector<16x16xf32>
    %c39_688 = arith.constant 39 : index
    %1255 = memref.load %arg2[%c39_688] : memref<144xf32, #tpu.memory_space<smem>>
    %1256 = vector.broadcast %1255 : f32 to vector<16x16xf32>
    %1257 = arith.mulf %1256, %1254 : vector<16x16xf32>
    %1258 = arith.addf %1252, %1257 : vector<16x16xf32>
    %c0_689 = arith.constant 0 : index
    %c1_690 = arith.constant 1 : index
    %c1_691 = arith.constant 1 : index
    %1259 = vector.load %arg6[%c0_689, %c1_690, %c1_691] : memref<4x18x18xf32, #tpu.memory_space<vmem>>, vector<1x16x16xf32>
    %1260 = vector.shape_cast %1259 : vector<1x16x16xf32> to vector<16x16xf32>
    %c40_692 = arith.constant 40 : index
    %1261 = memref.load %arg2[%c40_692] : memref<144xf32, #tpu.memory_space<smem>>
    %1262 = vector.broadcast %1261 : f32 to vector<16x16xf32>
    %1263 = arith.mulf %1262, %1260 : vector<16x16xf32>
    %1264 = arith.addf %1258, %1263 : vector<16x16xf32>
    %c0_693 = arith.constant 0 : index
    %c1_694 = arith.constant 1 : index
    %c2_695 = arith.constant 2 : index
    %1265 = vector.load %arg6[%c0_693, %c1_694, %c2_695] : memref<4x18x18xf32, #tpu.memory_space<vmem>>, vector<1x16x16xf32>
    %1266 = vector.shape_cast %1265 : vector<1x16x16xf32> to vector<16x16xf32>
    %c41_696 = arith.constant 41 : index
    %1267 = memref.load %arg2[%c41_696] : memref<144xf32, #tpu.memory_space<smem>>
    %1268 = vector.broadcast %1267 : f32 to vector<16x16xf32>
    %1269 = arith.mulf %1268, %1266 : vector<16x16xf32>
    %1270 = arith.addf %1264, %1269 : vector<16x16xf32>
    %c0_697 = arith.constant 0 : index
    %c2_698 = arith.constant 2 : index
    %c0_699 = arith.constant 0 : index
    %1271 = vector.load %arg6[%c0_697, %c2_698, %c0_699] : memref<4x18x18xf32, #tpu.memory_space<vmem>>, vector<1x16x16xf32>
    %1272 = vector.shape_cast %1271 : vector<1x16x16xf32> to vector<16x16xf32>
    %c42_700 = arith.constant 42 : index
    %1273 = memref.load %arg2[%c42_700] : memref<144xf32, #tpu.memory_space<smem>>
    %1274 = vector.broadcast %1273 : f32 to vector<16x16xf32>
    %1275 = arith.mulf %1274, %1272 : vector<16x16xf32>
    %1276 = arith.addf %1270, %1275 : vector<16x16xf32>
    %c0_701 = arith.constant 0 : index
    %c2_702 = arith.constant 2 : index
    %c1_703 = arith.constant 1 : index
    %1277 = vector.load %arg6[%c0_701, %c2_702, %c1_703] : memref<4x18x18xf32, #tpu.memory_space<vmem>>, vector<1x16x16xf32>
    %1278 = vector.shape_cast %1277 : vector<1x16x16xf32> to vector<16x16xf32>
    %c43_704 = arith.constant 43 : index
    %1279 = memref.load %arg2[%c43_704] : memref<144xf32, #tpu.memory_space<smem>>
    %1280 = vector.broadcast %1279 : f32 to vector<16x16xf32>
    %1281 = arith.mulf %1280, %1278 : vector<16x16xf32>
    %1282 = arith.addf %1276, %1281 : vector<16x16xf32>
    %c0_705 = arith.constant 0 : index
    %c2_706 = arith.constant 2 : index
    %c2_707 = arith.constant 2 : index
    %1283 = vector.load %arg6[%c0_705, %c2_706, %c2_707] : memref<4x18x18xf32, #tpu.memory_space<vmem>>, vector<1x16x16xf32>
    %1284 = vector.shape_cast %1283 : vector<1x16x16xf32> to vector<16x16xf32>
    %c44_708 = arith.constant 44 : index
    %1285 = memref.load %arg2[%c44_708] : memref<144xf32, #tpu.memory_space<smem>>
    %1286 = vector.broadcast %1285 : f32 to vector<16x16xf32>
    %1287 = arith.mulf %1286, %1284 : vector<16x16xf32>
    %1288 = arith.addf %1282, %1287 : vector<16x16xf32>
    %c1_709 = arith.constant 1 : index
    %c0_710 = arith.constant 0 : index
    %c0_711 = arith.constant 0 : index
    %1289 = vector.load %arg6[%c1_709, %c0_710, %c0_711] : memref<4x18x18xf32, #tpu.memory_space<vmem>>, vector<1x16x16xf32>
    %1290 = vector.shape_cast %1289 : vector<1x16x16xf32> to vector<16x16xf32>
    %c45_712 = arith.constant 45 : index
    %1291 = memref.load %arg2[%c45_712] : memref<144xf32, #tpu.memory_space<smem>>
    %1292 = vector.broadcast %1291 : f32 to vector<16x16xf32>
    %1293 = arith.mulf %1292, %1290 : vector<16x16xf32>
    %1294 = arith.addf %1288, %1293 : vector<16x16xf32>
    %c1_713 = arith.constant 1 : index
    %c0_714 = arith.constant 0 : index
    %c1_715 = arith.constant 1 : index
    %1295 = vector.load %arg6[%c1_713, %c0_714, %c1_715] : memref<4x18x18xf32, #tpu.memory_space<vmem>>, vector<1x16x16xf32>
    %1296 = vector.shape_cast %1295 : vector<1x16x16xf32> to vector<16x16xf32>
    %c46_716 = arith.constant 46 : index
    %1297 = memref.load %arg2[%c46_716] : memref<144xf32, #tpu.memory_space<smem>>
    %1298 = vector.broadcast %1297 : f32 to vector<16x16xf32>
    %1299 = arith.mulf %1298, %1296 : vector<16x16xf32>
    %1300 = arith.addf %1294, %1299 : vector<16x16xf32>
    %c1_717 = arith.constant 1 : index
    %c0_718 = arith.constant 0 : index
    %c2_719 = arith.constant 2 : index
    %1301 = vector.load %arg6[%c1_717, %c0_718, %c2_719] : memref<4x18x18xf32, #tpu.memory_space<vmem>>, vector<1x16x16xf32>
    %1302 = vector.shape_cast %1301 : vector<1x16x16xf32> to vector<16x16xf32>
    %c47_720 = arith.constant 47 : index
    %1303 = memref.load %arg2[%c47_720] : memref<144xf32, #tpu.memory_space<smem>>
    %1304 = vector.broadcast %1303 : f32 to vector<16x16xf32>
    %1305 = arith.mulf %1304, %1302 : vector<16x16xf32>
    %1306 = arith.addf %1300, %1305 : vector<16x16xf32>
    %c1_721 = arith.constant 1 : index
    %c1_722 = arith.constant 1 : index
    %c0_723 = arith.constant 0 : index
    %1307 = vector.load %arg6[%c1_721, %c1_722, %c0_723] : memref<4x18x18xf32, #tpu.memory_space<vmem>>, vector<1x16x16xf32>
    %1308 = vector.shape_cast %1307 : vector<1x16x16xf32> to vector<16x16xf32>
    %c48_724 = arith.constant 48 : index
    %1309 = memref.load %arg2[%c48_724] : memref<144xf32, #tpu.memory_space<smem>>
    %1310 = vector.broadcast %1309 : f32 to vector<16x16xf32>
    %1311 = arith.mulf %1310, %1308 : vector<16x16xf32>
    %1312 = arith.addf %1306, %1311 : vector<16x16xf32>
    %c1_725 = arith.constant 1 : index
    %c1_726 = arith.constant 1 : index
    %c1_727 = arith.constant 1 : index
    %1313 = vector.load %arg6[%c1_725, %c1_726, %c1_727] : memref<4x18x18xf32, #tpu.memory_space<vmem>>, vector<1x16x16xf32>
    %1314 = vector.shape_cast %1313 : vector<1x16x16xf32> to vector<16x16xf32>
    %c49_728 = arith.constant 49 : index
    %1315 = memref.load %arg2[%c49_728] : memref<144xf32, #tpu.memory_space<smem>>
    %1316 = vector.broadcast %1315 : f32 to vector<16x16xf32>
    %1317 = arith.mulf %1316, %1314 : vector<16x16xf32>
    %1318 = arith.addf %1312, %1317 : vector<16x16xf32>
    %c1_729 = arith.constant 1 : index
    %c1_730 = arith.constant 1 : index
    %c2_731 = arith.constant 2 : index
    %1319 = vector.load %arg6[%c1_729, %c1_730, %c2_731] : memref<4x18x18xf32, #tpu.memory_space<vmem>>, vector<1x16x16xf32>
    %1320 = vector.shape_cast %1319 : vector<1x16x16xf32> to vector<16x16xf32>
    %c50_732 = arith.constant 50 : index
    %1321 = memref.load %arg2[%c50_732] : memref<144xf32, #tpu.memory_space<smem>>
    %1322 = vector.broadcast %1321 : f32 to vector<16x16xf32>
    %1323 = arith.mulf %1322, %1320 : vector<16x16xf32>
    %1324 = arith.addf %1318, %1323 : vector<16x16xf32>
    %c1_733 = arith.constant 1 : index
    %c2_734 = arith.constant 2 : index
    %c0_735 = arith.constant 0 : index
    %1325 = vector.load %arg6[%c1_733, %c2_734, %c0_735] : memref<4x18x18xf32, #tpu.memory_space<vmem>>, vector<1x16x16xf32>
    %1326 = vector.shape_cast %1325 : vector<1x16x16xf32> to vector<16x16xf32>
    %c51_736 = arith.constant 51 : index
    %1327 = memref.load %arg2[%c51_736] : memref<144xf32, #tpu.memory_space<smem>>
    %1328 = vector.broadcast %1327 : f32 to vector<16x16xf32>
    %1329 = arith.mulf %1328, %1326 : vector<16x16xf32>
    %1330 = arith.addf %1324, %1329 : vector<16x16xf32>
    %c1_737 = arith.constant 1 : index
    %c2_738 = arith.constant 2 : index
    %c1_739 = arith.constant 1 : index
    %1331 = vector.load %arg6[%c1_737, %c2_738, %c1_739] : memref<4x18x18xf32, #tpu.memory_space<vmem>>, vector<1x16x16xf32>
    %1332 = vector.shape_cast %1331 : vector<1x16x16xf32> to vector<16x16xf32>
    %c52_740 = arith.constant 52 : index
    %1333 = memref.load %arg2[%c52_740] : memref<144xf32, #tpu.memory_space<smem>>
    %1334 = vector.broadcast %1333 : f32 to vector<16x16xf32>
    %1335 = arith.mulf %1334, %1332 : vector<16x16xf32>
    %1336 = arith.addf %1330, %1335 : vector<16x16xf32>
    %c1_741 = arith.constant 1 : index
    %c2_742 = arith.constant 2 : index
    %c2_743 = arith.constant 2 : index
    %1337 = vector.load %arg6[%c1_741, %c2_742, %c2_743] : memref<4x18x18xf32, #tpu.memory_space<vmem>>, vector<1x16x16xf32>
    %1338 = vector.shape_cast %1337 : vector<1x16x16xf32> to vector<16x16xf32>
    %c53_744 = arith.constant 53 : index
    %1339 = memref.load %arg2[%c53_744] : memref<144xf32, #tpu.memory_space<smem>>
    %1340 = vector.broadcast %1339 : f32 to vector<16x16xf32>
    %1341 = arith.mulf %1340, %1338 : vector<16x16xf32>
    %1342 = arith.addf %1336, %1341 : vector<16x16xf32>
    %c2_745 = arith.constant 2 : index
    %c0_746 = arith.constant 0 : index
    %c0_747 = arith.constant 0 : index
    %1343 = vector.load %arg6[%c2_745, %c0_746, %c0_747] : memref<4x18x18xf32, #tpu.memory_space<vmem>>, vector<1x16x16xf32>
    %1344 = vector.shape_cast %1343 : vector<1x16x16xf32> to vector<16x16xf32>
    %c54_748 = arith.constant 54 : index
    %1345 = memref.load %arg2[%c54_748] : memref<144xf32, #tpu.memory_space<smem>>
    %1346 = vector.broadcast %1345 : f32 to vector<16x16xf32>
    %1347 = arith.mulf %1346, %1344 : vector<16x16xf32>
    %1348 = arith.addf %1342, %1347 : vector<16x16xf32>
    %c2_749 = arith.constant 2 : index
    %c0_750 = arith.constant 0 : index
    %c1_751 = arith.constant 1 : index
    %1349 = vector.load %arg6[%c2_749, %c0_750, %c1_751] : memref<4x18x18xf32, #tpu.memory_space<vmem>>, vector<1x16x16xf32>
    %1350 = vector.shape_cast %1349 : vector<1x16x16xf32> to vector<16x16xf32>
    %c55_752 = arith.constant 55 : index
    %1351 = memref.load %arg2[%c55_752] : memref<144xf32, #tpu.memory_space<smem>>
    %1352 = vector.broadcast %1351 : f32 to vector<16x16xf32>
    %1353 = arith.mulf %1352, %1350 : vector<16x16xf32>
    %1354 = arith.addf %1348, %1353 : vector<16x16xf32>
    %c2_753 = arith.constant 2 : index
    %c0_754 = arith.constant 0 : index
    %c2_755 = arith.constant 2 : index
    %1355 = vector.load %arg6[%c2_753, %c0_754, %c2_755] : memref<4x18x18xf32, #tpu.memory_space<vmem>>, vector<1x16x16xf32>
    %1356 = vector.shape_cast %1355 : vector<1x16x16xf32> to vector<16x16xf32>
    %c56_756 = arith.constant 56 : index
    %1357 = memref.load %arg2[%c56_756] : memref<144xf32, #tpu.memory_space<smem>>
    %1358 = vector.broadcast %1357 : f32 to vector<16x16xf32>
    %1359 = arith.mulf %1358, %1356 : vector<16x16xf32>
    %1360 = arith.addf %1354, %1359 : vector<16x16xf32>
    %c2_757 = arith.constant 2 : index
    %c1_758 = arith.constant 1 : index
    %c0_759 = arith.constant 0 : index
    %1361 = vector.load %arg6[%c2_757, %c1_758, %c0_759] : memref<4x18x18xf32, #tpu.memory_space<vmem>>, vector<1x16x16xf32>
    %1362 = vector.shape_cast %1361 : vector<1x16x16xf32> to vector<16x16xf32>
    %c57_760 = arith.constant 57 : index
    %1363 = memref.load %arg2[%c57_760] : memref<144xf32, #tpu.memory_space<smem>>
    %1364 = vector.broadcast %1363 : f32 to vector<16x16xf32>
    %1365 = arith.mulf %1364, %1362 : vector<16x16xf32>
    %1366 = arith.addf %1360, %1365 : vector<16x16xf32>
    %c2_761 = arith.constant 2 : index
    %c1_762 = arith.constant 1 : index
    %c1_763 = arith.constant 1 : index
    %1367 = vector.load %arg6[%c2_761, %c1_762, %c1_763] : memref<4x18x18xf32, #tpu.memory_space<vmem>>, vector<1x16x16xf32>
    %1368 = vector.shape_cast %1367 : vector<1x16x16xf32> to vector<16x16xf32>
    %c58_764 = arith.constant 58 : index
    %1369 = memref.load %arg2[%c58_764] : memref<144xf32, #tpu.memory_space<smem>>
    %1370 = vector.broadcast %1369 : f32 to vector<16x16xf32>
    %1371 = arith.mulf %1370, %1368 : vector<16x16xf32>
    %1372 = arith.addf %1366, %1371 : vector<16x16xf32>
    %c2_765 = arith.constant 2 : index
    %c1_766 = arith.constant 1 : index
    %c2_767 = arith.constant 2 : index
    %1373 = vector.load %arg6[%c2_765, %c1_766, %c2_767] : memref<4x18x18xf32, #tpu.memory_space<vmem>>, vector<1x16x16xf32>
    %1374 = vector.shape_cast %1373 : vector<1x16x16xf32> to vector<16x16xf32>
    %c59_768 = arith.constant 59 : index
    %1375 = memref.load %arg2[%c59_768] : memref<144xf32, #tpu.memory_space<smem>>
    %1376 = vector.broadcast %1375 : f32 to vector<16x16xf32>
    %1377 = arith.mulf %1376, %1374 : vector<16x16xf32>
    %1378 = arith.addf %1372, %1377 : vector<16x16xf32>
    %c2_769 = arith.constant 2 : index
    %c2_770 = arith.constant 2 : index
    %c0_771 = arith.constant 0 : index
    %1379 = vector.load %arg6[%c2_769, %c2_770, %c0_771] : memref<4x18x18xf32, #tpu.memory_space<vmem>>, vector<1x16x16xf32>
    %1380 = vector.shape_cast %1379 : vector<1x16x16xf32> to vector<16x16xf32>
    %c60_772 = arith.constant 60 : index
    %1381 = memref.load %arg2[%c60_772] : memref<144xf32, #tpu.memory_space<smem>>
    %1382 = vector.broadcast %1381 : f32 to vector<16x16xf32>
    %1383 = arith.mulf %1382, %1380 : vector<16x16xf32>
    %1384 = arith.addf %1378, %1383 : vector<16x16xf32>
    %c2_773 = arith.constant 2 : index
    %c2_774 = arith.constant 2 : index
    %c1_775 = arith.constant 1 : index
    %1385 = vector.load %arg6[%c2_773, %c2_774, %c1_775] : memref<4x18x18xf32, #tpu.memory_space<vmem>>, vector<1x16x16xf32>
    %1386 = vector.shape_cast %1385 : vector<1x16x16xf32> to vector<16x16xf32>
    %c61_776 = arith.constant 61 : index
    %1387 = memref.load %arg2[%c61_776] : memref<144xf32, #tpu.memory_space<smem>>
    %1388 = vector.broadcast %1387 : f32 to vector<16x16xf32>
    %1389 = arith.mulf %1388, %1386 : vector<16x16xf32>
    %1390 = arith.addf %1384, %1389 : vector<16x16xf32>
    %c2_777 = arith.constant 2 : index
    %c2_778 = arith.constant 2 : index
    %c2_779 = arith.constant 2 : index
    %1391 = vector.load %arg6[%c2_777, %c2_778, %c2_779] : memref<4x18x18xf32, #tpu.memory_space<vmem>>, vector<1x16x16xf32>
    %1392 = vector.shape_cast %1391 : vector<1x16x16xf32> to vector<16x16xf32>
    %c62_780 = arith.constant 62 : index
    %1393 = memref.load %arg2[%c62_780] : memref<144xf32, #tpu.memory_space<smem>>
    %1394 = vector.broadcast %1393 : f32 to vector<16x16xf32>
    %1395 = arith.mulf %1394, %1392 : vector<16x16xf32>
    %1396 = arith.addf %1390, %1395 : vector<16x16xf32>
    %c3_781 = arith.constant 3 : index
    %c0_782 = arith.constant 0 : index
    %c0_783 = arith.constant 0 : index
    %1397 = vector.load %arg6[%c3_781, %c0_782, %c0_783] : memref<4x18x18xf32, #tpu.memory_space<vmem>>, vector<1x16x16xf32>
    %1398 = vector.shape_cast %1397 : vector<1x16x16xf32> to vector<16x16xf32>
    %c63_784 = arith.constant 63 : index
    %1399 = memref.load %arg2[%c63_784] : memref<144xf32, #tpu.memory_space<smem>>
    %1400 = vector.broadcast %1399 : f32 to vector<16x16xf32>
    %1401 = arith.mulf %1400, %1398 : vector<16x16xf32>
    %1402 = arith.addf %1396, %1401 : vector<16x16xf32>
    %c3_785 = arith.constant 3 : index
    %c0_786 = arith.constant 0 : index
    %c1_787 = arith.constant 1 : index
    %1403 = vector.load %arg6[%c3_785, %c0_786, %c1_787] : memref<4x18x18xf32, #tpu.memory_space<vmem>>, vector<1x16x16xf32>
    %1404 = vector.shape_cast %1403 : vector<1x16x16xf32> to vector<16x16xf32>
    %c64_788 = arith.constant 64 : index
    %1405 = memref.load %arg2[%c64_788] : memref<144xf32, #tpu.memory_space<smem>>
    %1406 = vector.broadcast %1405 : f32 to vector<16x16xf32>
    %1407 = arith.mulf %1406, %1404 : vector<16x16xf32>
    %1408 = arith.addf %1402, %1407 : vector<16x16xf32>
    %c3_789 = arith.constant 3 : index
    %c0_790 = arith.constant 0 : index
    %c2_791 = arith.constant 2 : index
    %1409 = vector.load %arg6[%c3_789, %c0_790, %c2_791] : memref<4x18x18xf32, #tpu.memory_space<vmem>>, vector<1x16x16xf32>
    %1410 = vector.shape_cast %1409 : vector<1x16x16xf32> to vector<16x16xf32>
    %c65_792 = arith.constant 65 : index
    %1411 = memref.load %arg2[%c65_792] : memref<144xf32, #tpu.memory_space<smem>>
    %1412 = vector.broadcast %1411 : f32 to vector<16x16xf32>
    %1413 = arith.mulf %1412, %1410 : vector<16x16xf32>
    %1414 = arith.addf %1408, %1413 : vector<16x16xf32>
    %c3_793 = arith.constant 3 : index
    %c1_794 = arith.constant 1 : index
    %c0_795 = arith.constant 0 : index
    %1415 = vector.load %arg6[%c3_793, %c1_794, %c0_795] : memref<4x18x18xf32, #tpu.memory_space<vmem>>, vector<1x16x16xf32>
    %1416 = vector.shape_cast %1415 : vector<1x16x16xf32> to vector<16x16xf32>
    %c66_796 = arith.constant 66 : index
    %1417 = memref.load %arg2[%c66_796] : memref<144xf32, #tpu.memory_space<smem>>
    %1418 = vector.broadcast %1417 : f32 to vector<16x16xf32>
    %1419 = arith.mulf %1418, %1416 : vector<16x16xf32>
    %1420 = arith.addf %1414, %1419 : vector<16x16xf32>
    %c3_797 = arith.constant 3 : index
    %c1_798 = arith.constant 1 : index
    %c1_799 = arith.constant 1 : index
    %1421 = vector.load %arg6[%c3_797, %c1_798, %c1_799] : memref<4x18x18xf32, #tpu.memory_space<vmem>>, vector<1x16x16xf32>
    %1422 = vector.shape_cast %1421 : vector<1x16x16xf32> to vector<16x16xf32>
    %c67_800 = arith.constant 67 : index
    %1423 = memref.load %arg2[%c67_800] : memref<144xf32, #tpu.memory_space<smem>>
    %1424 = vector.broadcast %1423 : f32 to vector<16x16xf32>
    %1425 = arith.mulf %1424, %1422 : vector<16x16xf32>
    %1426 = arith.addf %1420, %1425 : vector<16x16xf32>
    %c3_801 = arith.constant 3 : index
    %c1_802 = arith.constant 1 : index
    %c2_803 = arith.constant 2 : index
    %1427 = vector.load %arg6[%c3_801, %c1_802, %c2_803] : memref<4x18x18xf32, #tpu.memory_space<vmem>>, vector<1x16x16xf32>
    %1428 = vector.shape_cast %1427 : vector<1x16x16xf32> to vector<16x16xf32>
    %c68_804 = arith.constant 68 : index
    %1429 = memref.load %arg2[%c68_804] : memref<144xf32, #tpu.memory_space<smem>>
    %1430 = vector.broadcast %1429 : f32 to vector<16x16xf32>
    %1431 = arith.mulf %1430, %1428 : vector<16x16xf32>
    %1432 = arith.addf %1426, %1431 : vector<16x16xf32>
    %c3_805 = arith.constant 3 : index
    %c2_806 = arith.constant 2 : index
    %c0_807 = arith.constant 0 : index
    %1433 = vector.load %arg6[%c3_805, %c2_806, %c0_807] : memref<4x18x18xf32, #tpu.memory_space<vmem>>, vector<1x16x16xf32>
    %1434 = vector.shape_cast %1433 : vector<1x16x16xf32> to vector<16x16xf32>
    %c69_808 = arith.constant 69 : index
    %1435 = memref.load %arg2[%c69_808] : memref<144xf32, #tpu.memory_space<smem>>
    %1436 = vector.broadcast %1435 : f32 to vector<16x16xf32>
    %1437 = arith.mulf %1436, %1434 : vector<16x16xf32>
    %1438 = arith.addf %1432, %1437 : vector<16x16xf32>
    %c3_809 = arith.constant 3 : index
    %c2_810 = arith.constant 2 : index
    %c1_811 = arith.constant 1 : index
    %1439 = vector.load %arg6[%c3_809, %c2_810, %c1_811] : memref<4x18x18xf32, #tpu.memory_space<vmem>>, vector<1x16x16xf32>
    %1440 = vector.shape_cast %1439 : vector<1x16x16xf32> to vector<16x16xf32>
    %c70_812 = arith.constant 70 : index
    %1441 = memref.load %arg2[%c70_812] : memref<144xf32, #tpu.memory_space<smem>>
    %1442 = vector.broadcast %1441 : f32 to vector<16x16xf32>
    %1443 = arith.mulf %1442, %1440 : vector<16x16xf32>
    %1444 = arith.addf %1438, %1443 : vector<16x16xf32>
    %c3_813 = arith.constant 3 : index
    %c2_814 = arith.constant 2 : index
    %c2_815 = arith.constant 2 : index
    %1445 = vector.load %arg6[%c3_813, %c2_814, %c2_815] : memref<4x18x18xf32, #tpu.memory_space<vmem>>, vector<1x16x16xf32>
    %1446 = vector.shape_cast %1445 : vector<1x16x16xf32> to vector<16x16xf32>
    %c71_816 = arith.constant 71 : index
    %1447 = memref.load %arg2[%c71_816] : memref<144xf32, #tpu.memory_space<smem>>
    %1448 = vector.broadcast %1447 : f32 to vector<16x16xf32>
    %1449 = arith.mulf %1448, %1446 : vector<16x16xf32>
    %1450 = arith.addf %1444, %1449 : vector<16x16xf32>
    %cst_817 = arith.constant dense<0.000000e+00> : vector<16xf32>
    %1451 = vector.multi_reduction <add>, %1450, %cst_817 [1] : vector<16x16xf32> to vector<16xf32>
    %1452 = vector.shape_cast %1451 : vector<16xf32> to vector<16x1xf32>
    %cst_818 = arith.constant dense<0.000000e+00> : vector<1xf32>
    %1453 = vector.multi_reduction <add>, %1452, %cst_818 [0] : vector<16x1xf32> to vector<1xf32>
    %1454 = vector.shape_cast %1453 : vector<1xf32> to vector<1x1xf32>
    %cst_819 = arith.constant 3.906250e-03 : f32
    %1455 = vector.broadcast %cst_819 : f32 to vector<1x1xf32>
    %1456 = arith.mulf %1454, %1455 : vector<1x1xf32>
    %1457 = vector.broadcast %1456 : vector<1x1xf32> to vector<16x16xf32>
    %1458 = arith.subf %1450, %1457 : vector<16x16xf32>
    %1459 = arith.mulf %1458, %1458 : vector<16x16xf32>
    %cst_820 = arith.constant dense<0.000000e+00> : vector<16xf32>
    %1460 = vector.multi_reduction <add>, %1459, %cst_820 [1] : vector<16x16xf32> to vector<16xf32>
    %1461 = vector.shape_cast %1460 : vector<16xf32> to vector<16x1xf32>
    %cst_821 = arith.constant dense<0.000000e+00> : vector<1xf32>
    %1462 = vector.multi_reduction <add>, %1461, %cst_821 [0] : vector<16x1xf32> to vector<1xf32>
    %1463 = vector.shape_cast %1462 : vector<1xf32> to vector<1x1xf32>
    %cst_822 = arith.constant 3.906250e-03 : f32
    %1464 = vector.broadcast %cst_822 : f32 to vector<1x1xf32>
    %1465 = arith.mulf %1463, %1464 : vector<1x1xf32>
    %1466 = vector.broadcast %1456 : vector<1x1xf32> to vector<16x16xf32>
    %1467 = arith.subf %1450, %1466 : vector<16x16xf32>
    %cst_823 = arith.constant 9.99999974E-6 : f32
    %1468 = vector.broadcast %cst_823 : f32 to vector<1x1xf32>
    %1469 = arith.addf %1465, %1468 : vector<1x1xf32>
    %1470 = math.rsqrt %1469 : vector<1x1xf32>
    %1471 = vector.broadcast %1470 : vector<1x1xf32> to vector<16x16xf32>
    %1472 = arith.mulf %1467, %1471 : vector<16x16xf32>
    %c0_824 = arith.constant 0 : index
    %c1_825 = arith.constant 1 : index
    %c0_826 = arith.constant 0 : index
    %c0_827 = arith.constant 0 : index
    %1473 = vector.load %arg3[%c0_824, %c1_825, %c0_826, %c0_827] : memref<1x4x16x16xf32, #tpu.memory_space<vmem>>, vector<1x1x16x16xf32>
    %1474 = vector.shape_cast %1473 : vector<1x1x16x16xf32> to vector<16x16xf32>
    %1475 = arith.addf %1474, %1472 : vector<16x16xf32>
    %c0_828 = arith.constant 0 : index
    %c1_829 = arith.constant 1 : index
    %c0_830 = arith.constant 0 : index
    %c0_831 = arith.constant 0 : index
    %1476 = vector.load %arg4[%c0_828, %c1_829, %c0_830, %c0_831] : memref<1x4x16x16xf32, #tpu.memory_space<vmem>>, vector<1x1x16x16xf32>
    %1477 = vector.shape_cast %1476 : vector<1x1x16x16xf32> to vector<16x16xf32>
    %1478 = vector.shape_cast %1475 : vector<16x16xf32> to vector<1x1x16x16xf32>
    tpu.vector_store %arg4[%c0_828, %c1_829, %c0_830, %c0_831], %1478 {strides = array<i32>} : memref<1x4x16x16xf32, #tpu.memory_space<vmem>>, vector<1x1x16x16xf32>,
    %cst_832 = arith.constant 0.000000e+00 : f32
    %1479 = vector.broadcast %cst_832 : f32 to vector<16x16xf32>
    %c0_833 = arith.constant 0 : index
    %c0_834 = arith.constant 0 : index
    %c0_835 = arith.constant 0 : index
    %1480 = vector.load %arg6[%c0_833, %c0_834, %c0_835] : memref<4x18x18xf32, #tpu.memory_space<vmem>>, vector<1x16x16xf32>
    %1481 = vector.shape_cast %1480 : vector<1x16x16xf32> to vector<16x16xf32>
    %c72_836 = arith.constant 72 : index
    %1482 = memref.load %arg2[%c72_836] : memref<144xf32, #tpu.memory_space<smem>>
    %1483 = vector.broadcast %1482 : f32 to vector<16x16xf32>
    %1484 = arith.mulf %1483, %1481 : vector<16x16xf32>
    %1485 = arith.addf %1479, %1484 : vector<16x16xf32>
    %c0_837 = arith.constant 0 : index
    %c0_838 = arith.constant 0 : index
    %c1_839 = arith.constant 1 : index
    %1486 = vector.load %arg6[%c0_837, %c0_838, %c1_839] : memref<4x18x18xf32, #tpu.memory_space<vmem>>, vector<1x16x16xf32>
    %1487 = vector.shape_cast %1486 : vector<1x16x16xf32> to vector<16x16xf32>
    %c73_840 = arith.constant 73 : index
    %1488 = memref.load %arg2[%c73_840] : memref<144xf32, #tpu.memory_space<smem>>
    %1489 = vector.broadcast %1488 : f32 to vector<16x16xf32>
    %1490 = arith.mulf %1489, %1487 : vector<16x16xf32>
    %1491 = arith.addf %1485, %1490 : vector<16x16xf32>
    %c0_841 = arith.constant 0 : index
    %c0_842 = arith.constant 0 : index
    %c2_843 = arith.constant 2 : index
    %1492 = vector.load %arg6[%c0_841, %c0_842, %c2_843] : memref<4x18x18xf32, #tpu.memory_space<vmem>>, vector<1x16x16xf32>
    %1493 = vector.shape_cast %1492 : vector<1x16x16xf32> to vector<16x16xf32>
    %c74_844 = arith.constant 74 : index
    %1494 = memref.load %arg2[%c74_844] : memref<144xf32, #tpu.memory_space<smem>>
    %1495 = vector.broadcast %1494 : f32 to vector<16x16xf32>
    %1496 = arith.mulf %1495, %1493 : vector<16x16xf32>
    %1497 = arith.addf %1491, %1496 : vector<16x16xf32>
    %c0_845 = arith.constant 0 : index
    %c1_846 = arith.constant 1 : index
    %c0_847 = arith.constant 0 : index
    %1498 = vector.load %arg6[%c0_845, %c1_846, %c0_847] : memref<4x18x18xf32, #tpu.memory_space<vmem>>, vector<1x16x16xf32>
    %1499 = vector.shape_cast %1498 : vector<1x16x16xf32> to vector<16x16xf32>
    %c75_848 = arith.constant 75 : index
    %1500 = memref.load %arg2[%c75_848] : memref<144xf32, #tpu.memory_space<smem>>
    %1501 = vector.broadcast %1500 : f32 to vector<16x16xf32>
    %1502 = arith.mulf %1501, %1499 : vector<16x16xf32>
    %1503 = arith.addf %1497, %1502 : vector<16x16xf32>
    %c0_849 = arith.constant 0 : index
    %c1_850 = arith.constant 1 : index
    %c1_851 = arith.constant 1 : index
    %1504 = vector.load %arg6[%c0_849, %c1_850, %c1_851] : memref<4x18x18xf32, #tpu.memory_space<vmem>>, vector<1x16x16xf32>
    %1505 = vector.shape_cast %1504 : vector<1x16x16xf32> to vector<16x16xf32>
    %c76_852 = arith.constant 76 : index
    %1506 = memref.load %arg2[%c76_852] : memref<144xf32, #tpu.memory_space<smem>>
    %1507 = vector.broadcast %1506 : f32 to vector<16x16xf32>
    %1508 = arith.mulf %1507, %1505 : vector<16x16xf32>
    %1509 = arith.addf %1503, %1508 : vector<16x16xf32>
    %c0_853 = arith.constant 0 : index
    %c1_854 = arith.constant 1 : index
    %c2_855 = arith.constant 2 : index
    %1510 = vector.load %arg6[%c0_853, %c1_854, %c2_855] : memref<4x18x18xf32, #tpu.memory_space<vmem>>, vector<1x16x16xf32>
    %1511 = vector.shape_cast %1510 : vector<1x16x16xf32> to vector<16x16xf32>
    %c77_856 = arith.constant 77 : index
    %1512 = memref.load %arg2[%c77_856] : memref<144xf32, #tpu.memory_space<smem>>
    %1513 = vector.broadcast %1512 : f32 to vector<16x16xf32>
    %1514 = arith.mulf %1513, %1511 : vector<16x16xf32>
    %1515 = arith.addf %1509, %1514 : vector<16x16xf32>
    %c0_857 = arith.constant 0 : index
    %c2_858 = arith.constant 2 : index
    %c0_859 = arith.constant 0 : index
    %1516 = vector.load %arg6[%c0_857, %c2_858, %c0_859] : memref<4x18x18xf32, #tpu.memory_space<vmem>>, vector<1x16x16xf32>
    %1517 = vector.shape_cast %1516 : vector<1x16x16xf32> to vector<16x16xf32>
    %c78_860 = arith.constant 78 : index
    %1518 = memref.load %arg2[%c78_860] : memref<144xf32, #tpu.memory_space<smem>>
    %1519 = vector.broadcast %1518 : f32 to vector<16x16xf32>
    %1520 = arith.mulf %1519, %1517 : vector<16x16xf32>
    %1521 = arith.addf %1515, %1520 : vector<16x16xf32>
    %c0_861 = arith.constant 0 : index
    %c2_862 = arith.constant 2 : index
    %c1_863 = arith.constant 1 : index
    %1522 = vector.load %arg6[%c0_861, %c2_862, %c1_863] : memref<4x18x18xf32, #tpu.memory_space<vmem>>, vector<1x16x16xf32>
    %1523 = vector.shape_cast %1522 : vector<1x16x16xf32> to vector<16x16xf32>
    %c79_864 = arith.constant 79 : index
    %1524 = memref.load %arg2[%c79_864] : memref<144xf32, #tpu.memory_space<smem>>
    %1525 = vector.broadcast %1524 : f32 to vector<16x16xf32>
    %1526 = arith.mulf %1525, %1523 : vector<16x16xf32>
    %1527 = arith.addf %1521, %1526 : vector<16x16xf32>
    %c0_865 = arith.constant 0 : index
    %c2_866 = arith.constant 2 : index
    %c2_867 = arith.constant 2 : index
    %1528 = vector.load %arg6[%c0_865, %c2_866, %c2_867] : memref<4x18x18xf32, #tpu.memory_space<vmem>>, vector<1x16x16xf32>
    %1529 = vector.shape_cast %1528 : vector<1x16x16xf32> to vector<16x16xf32>
    %c80_868 = arith.constant 80 : index
    %1530 = memref.load %arg2[%c80_868] : memref<144xf32, #tpu.memory_space<smem>>
    %1531 = vector.broadcast %1530 : f32 to vector<16x16xf32>
    %1532 = arith.mulf %1531, %1529 : vector<16x16xf32>
    %1533 = arith.addf %1527, %1532 : vector<16x16xf32>
    %c1_869 = arith.constant 1 : index
    %c0_870 = arith.constant 0 : index
    %c0_871 = arith.constant 0 : index
    %1534 = vector.load %arg6[%c1_869, %c0_870, %c0_871] : memref<4x18x18xf32, #tpu.memory_space<vmem>>, vector<1x16x16xf32>
    %1535 = vector.shape_cast %1534 : vector<1x16x16xf32> to vector<16x16xf32>
    %c81_872 = arith.constant 81 : index
    %1536 = memref.load %arg2[%c81_872] : memref<144xf32, #tpu.memory_space<smem>>
    %1537 = vector.broadcast %1536 : f32 to vector<16x16xf32>
    %1538 = arith.mulf %1537, %1535 : vector<16x16xf32>
    %1539 = arith.addf %1533, %1538 : vector<16x16xf32>
    %c1_873 = arith.constant 1 : index
    %c0_874 = arith.constant 0 : index
    %c1_875 = arith.constant 1 : index
    %1540 = vector.load %arg6[%c1_873, %c0_874, %c1_875] : memref<4x18x18xf32, #tpu.memory_space<vmem>>, vector<1x16x16xf32>
    %1541 = vector.shape_cast %1540 : vector<1x16x16xf32> to vector<16x16xf32>
    %c82_876 = arith.constant 82 : index
    %1542 = memref.load %arg2[%c82_876] : memref<144xf32, #tpu.memory_space<smem>>
    %1543 = vector.broadcast %1542 : f32 to vector<16x16xf32>
    %1544 = arith.mulf %1543, %1541 : vector<16x16xf32>
    %1545 = arith.addf %1539, %1544 : vector<16x16xf32>
    %c1_877 = arith.constant 1 : index
    %c0_878 = arith.constant 0 : index
    %c2_879 = arith.constant 2 : index
    %1546 = vector.load %arg6[%c1_877, %c0_878, %c2_879] : memref<4x18x18xf32, #tpu.memory_space<vmem>>, vector<1x16x16xf32>
    %1547 = vector.shape_cast %1546 : vector<1x16x16xf32> to vector<16x16xf32>
    %c83_880 = arith.constant 83 : index
    %1548 = memref.load %arg2[%c83_880] : memref<144xf32, #tpu.memory_space<smem>>
    %1549 = vector.broadcast %1548 : f32 to vector<16x16xf32>
    %1550 = arith.mulf %1549, %1547 : vector<16x16xf32>
    %1551 = arith.addf %1545, %1550 : vector<16x16xf32>
    %c1_881 = arith.constant 1 : index
    %c1_882 = arith.constant 1 : index
    %c0_883 = arith.constant 0 : index
    %1552 = vector.load %arg6[%c1_881, %c1_882, %c0_883] : memref<4x18x18xf32, #tpu.memory_space<vmem>>, vector<1x16x16xf32>
    %1553 = vector.shape_cast %1552 : vector<1x16x16xf32> to vector<16x16xf32>
    %c84_884 = arith.constant 84 : index
    %1554 = memref.load %arg2[%c84_884] : memref<144xf32, #tpu.memory_space<smem>>
    %1555 = vector.broadcast %1554 : f32 to vector<16x16xf32>
    %1556 = arith.mulf %1555, %1553 : vector<16x16xf32>
    %1557 = arith.addf %1551, %1556 : vector<16x16xf32>
    %c1_885 = arith.constant 1 : index
    %c1_886 = arith.constant 1 : index
    %c1_887 = arith.constant 1 : index
    %1558 = vector.load %arg6[%c1_885, %c1_886, %c1_887] : memref<4x18x18xf32, #tpu.memory_space<vmem>>, vector<1x16x16xf32>
    %1559 = vector.shape_cast %1558 : vector<1x16x16xf32> to vector<16x16xf32>
    %c85_888 = arith.constant 85 : index
    %1560 = memref.load %arg2[%c85_888] : memref<144xf32, #tpu.memory_space<smem>>
    %1561 = vector.broadcast %1560 : f32 to vector<16x16xf32>
    %1562 = arith.mulf %1561, %1559 : vector<16x16xf32>
    %1563 = arith.addf %1557, %1562 : vector<16x16xf32>
    %c1_889 = arith.constant 1 : index
    %c1_890 = arith.constant 1 : index
    %c2_891 = arith.constant 2 : index
    %1564 = vector.load %arg6[%c1_889, %c1_890, %c2_891] : memref<4x18x18xf32, #tpu.memory_space<vmem>>, vector<1x16x16xf32>
    %1565 = vector.shape_cast %1564 : vector<1x16x16xf32> to vector<16x16xf32>
    %c86_892 = arith.constant 86 : index
    %1566 = memref.load %arg2[%c86_892] : memref<144xf32, #tpu.memory_space<smem>>
    %1567 = vector.broadcast %1566 : f32 to vector<16x16xf32>
    %1568 = arith.mulf %1567, %1565 : vector<16x16xf32>
    %1569 = arith.addf %1563, %1568 : vector<16x16xf32>
    %c1_893 = arith.constant 1 : index
    %c2_894 = arith.constant 2 : index
    %c0_895 = arith.constant 0 : index
    %1570 = vector.load %arg6[%c1_893, %c2_894, %c0_895] : memref<4x18x18xf32, #tpu.memory_space<vmem>>, vector<1x16x16xf32>
    %1571 = vector.shape_cast %1570 : vector<1x16x16xf32> to vector<16x16xf32>
    %c87_896 = arith.constant 87 : index
    %1572 = memref.load %arg2[%c87_896] : memref<144xf32, #tpu.memory_space<smem>>
    %1573 = vector.broadcast %1572 : f32 to vector<16x16xf32>
    %1574 = arith.mulf %1573, %1571 : vector<16x16xf32>
    %1575 = arith.addf %1569, %1574 : vector<16x16xf32>
    %c1_897 = arith.constant 1 : index
    %c2_898 = arith.constant 2 : index
    %c1_899 = arith.constant 1 : index
    %1576 = vector.load %arg6[%c1_897, %c2_898, %c1_899] : memref<4x18x18xf32, #tpu.memory_space<vmem>>, vector<1x16x16xf32>
    %1577 = vector.shape_cast %1576 : vector<1x16x16xf32> to vector<16x16xf32>
    %c88_900 = arith.constant 88 : index
    %1578 = memref.load %arg2[%c88_900] : memref<144xf32, #tpu.memory_space<smem>>
    %1579 = vector.broadcast %1578 : f32 to vector<16x16xf32>
    %1580 = arith.mulf %1579, %1577 : vector<16x16xf32>
    %1581 = arith.addf %1575, %1580 : vector<16x16xf32>
    %c1_901 = arith.constant 1 : index
    %c2_902 = arith.constant 2 : index
    %c2_903 = arith.constant 2 : index
    %1582 = vector.load %arg6[%c1_901, %c2_902, %c2_903] : memref<4x18x18xf32, #tpu.memory_space<vmem>>, vector<1x16x16xf32>
    %1583 = vector.shape_cast %1582 : vector<1x16x16xf32> to vector<16x16xf32>
    %c89_904 = arith.constant 89 : index
    %1584 = memref.load %arg2[%c89_904] : memref<144xf32, #tpu.memory_space<smem>>
    %1585 = vector.broadcast %1584 : f32 to vector<16x16xf32>
    %1586 = arith.mulf %1585, %1583 : vector<16x16xf32>
    %1587 = arith.addf %1581, %1586 : vector<16x16xf32>
    %c2_905 = arith.constant 2 : index
    %c0_906 = arith.constant 0 : index
    %c0_907 = arith.constant 0 : index
    %1588 = vector.load %arg6[%c2_905, %c0_906, %c0_907] : memref<4x18x18xf32, #tpu.memory_space<vmem>>, vector<1x16x16xf32>
    %1589 = vector.shape_cast %1588 : vector<1x16x16xf32> to vector<16x16xf32>
    %c90_908 = arith.constant 90 : index
    %1590 = memref.load %arg2[%c90_908] : memref<144xf32, #tpu.memory_space<smem>>
    %1591 = vector.broadcast %1590 : f32 to vector<16x16xf32>
    %1592 = arith.mulf %1591, %1589 : vector<16x16xf32>
    %1593 = arith.addf %1587, %1592 : vector<16x16xf32>
    %c2_909 = arith.constant 2 : index
    %c0_910 = arith.constant 0 : index
    %c1_911 = arith.constant 1 : index
    %1594 = vector.load %arg6[%c2_909, %c0_910, %c1_911] : memref<4x18x18xf32, #tpu.memory_space<vmem>>, vector<1x16x16xf32>
    %1595 = vector.shape_cast %1594 : vector<1x16x16xf32> to vector<16x16xf32>
    %c91_912 = arith.constant 91 : index
    %1596 = memref.load %arg2[%c91_912] : memref<144xf32, #tpu.memory_space<smem>>
    %1597 = vector.broadcast %1596 : f32 to vector<16x16xf32>
    %1598 = arith.mulf %1597, %1595 : vector<16x16xf32>
    %1599 = arith.addf %1593, %1598 : vector<16x16xf32>
    %c2_913 = arith.constant 2 : index
    %c0_914 = arith.constant 0 : index
    %c2_915 = arith.constant 2 : index
    %1600 = vector.load %arg6[%c2_913, %c0_914, %c2_915] : memref<4x18x18xf32, #tpu.memory_space<vmem>>, vector<1x16x16xf32>
    %1601 = vector.shape_cast %1600 : vector<1x16x16xf32> to vector<16x16xf32>
    %c92_916 = arith.constant 92 : index
    %1602 = memref.load %arg2[%c92_916] : memref<144xf32, #tpu.memory_space<smem>>
    %1603 = vector.broadcast %1602 : f32 to vector<16x16xf32>
    %1604 = arith.mulf %1603, %1601 : vector<16x16xf32>
    %1605 = arith.addf %1599, %1604 : vector<16x16xf32>
    %c2_917 = arith.constant 2 : index
    %c1_918 = arith.constant 1 : index
    %c0_919 = arith.constant 0 : index
    %1606 = vector.load %arg6[%c2_917, %c1_918, %c0_919] : memref<4x18x18xf32, #tpu.memory_space<vmem>>, vector<1x16x16xf32>
    %1607 = vector.shape_cast %1606 : vector<1x16x16xf32> to vector<16x16xf32>
    %c93_920 = arith.constant 93 : index
    %1608 = memref.load %arg2[%c93_920] : memref<144xf32, #tpu.memory_space<smem>>
    %1609 = vector.broadcast %1608 : f32 to vector<16x16xf32>
    %1610 = arith.mulf %1609, %1607 : vector<16x16xf32>
    %1611 = arith.addf %1605, %1610 : vector<16x16xf32>
    %c2_921 = arith.constant 2 : index
    %c1_922 = arith.constant 1 : index
    %c1_923 = arith.constant 1 : index
    %1612 = vector.load %arg6[%c2_921, %c1_922, %c1_923] : memref<4x18x18xf32, #tpu.memory_space<vmem>>, vector<1x16x16xf32>
    %1613 = vector.shape_cast %1612 : vector<1x16x16xf32> to vector<16x16xf32>
    %c94_924 = arith.constant 94 : index
    %1614 = memref.load %arg2[%c94_924] : memref<144xf32, #tpu.memory_space<smem>>
    %1615 = vector.broadcast %1614 : f32 to vector<16x16xf32>
    %1616 = arith.mulf %1615, %1613 : vector<16x16xf32>
    %1617 = arith.addf %1611, %1616 : vector<16x16xf32>
    %c2_925 = arith.constant 2 : index
    %c1_926 = arith.constant 1 : index
    %c2_927 = arith.constant 2 : index
    %1618 = vector.load %arg6[%c2_925, %c1_926, %c2_927] : memref<4x18x18xf32, #tpu.memory_space<vmem>>, vector<1x16x16xf32>
    %1619 = vector.shape_cast %1618 : vector<1x16x16xf32> to vector<16x16xf32>
    %c95_928 = arith.constant 95 : index
    %1620 = memref.load %arg2[%c95_928] : memref<144xf32, #tpu.memory_space<smem>>
    %1621 = vector.broadcast %1620 : f32 to vector<16x16xf32>
    %1622 = arith.mulf %1621, %1619 : vector<16x16xf32>
    %1623 = arith.addf %1617, %1622 : vector<16x16xf32>
    %c2_929 = arith.constant 2 : index
    %c2_930 = arith.constant 2 : index
    %c0_931 = arith.constant 0 : index
    %1624 = vector.load %arg6[%c2_929, %c2_930, %c0_931] : memref<4x18x18xf32, #tpu.memory_space<vmem>>, vector<1x16x16xf32>
    %1625 = vector.shape_cast %1624 : vector<1x16x16xf32> to vector<16x16xf32>
    %c96_932 = arith.constant 96 : index
    %1626 = memref.load %arg2[%c96_932] : memref<144xf32, #tpu.memory_space<smem>>
    %1627 = vector.broadcast %1626 : f32 to vector<16x16xf32>
    %1628 = arith.mulf %1627, %1625 : vector<16x16xf32>
    %1629 = arith.addf %1623, %1628 : vector<16x16xf32>
    %c2_933 = arith.constant 2 : index
    %c2_934 = arith.constant 2 : index
    %c1_935 = arith.constant 1 : index
    %1630 = vector.load %arg6[%c2_933, %c2_934, %c1_935] : memref<4x18x18xf32, #tpu.memory_space<vmem>>, vector<1x16x16xf32>
    %1631 = vector.shape_cast %1630 : vector<1x16x16xf32> to vector<16x16xf32>
    %c97_936 = arith.constant 97 : index
    %1632 = memref.load %arg2[%c97_936] : memref<144xf32, #tpu.memory_space<smem>>
    %1633 = vector.broadcast %1632 : f32 to vector<16x16xf32>
    %1634 = arith.mulf %1633, %1631 : vector<16x16xf32>
    %1635 = arith.addf %1629, %1634 : vector<16x16xf32>
    %c2_937 = arith.constant 2 : index
    %c2_938 = arith.constant 2 : index
    %c2_939 = arith.constant 2 : index
    %1636 = vector.load %arg6[%c2_937, %c2_938, %c2_939] : memref<4x18x18xf32, #tpu.memory_space<vmem>>, vector<1x16x16xf32>
    %1637 = vector.shape_cast %1636 : vector<1x16x16xf32> to vector<16x16xf32>
    %c98_940 = arith.constant 98 : index
    %1638 = memref.load %arg2[%c98_940] : memref<144xf32, #tpu.memory_space<smem>>
    %1639 = vector.broadcast %1638 : f32 to vector<16x16xf32>
    %1640 = arith.mulf %1639, %1637 : vector<16x16xf32>
    %1641 = arith.addf %1635, %1640 : vector<16x16xf32>
    %c3_941 = arith.constant 3 : index
    %c0_942 = arith.constant 0 : index
    %c0_943 = arith.constant 0 : index
    %1642 = vector.load %arg6[%c3_941, %c0_942, %c0_943] : memref<4x18x18xf32, #tpu.memory_space<vmem>>, vector<1x16x16xf32>
    %1643 = vector.shape_cast %1642 : vector<1x16x16xf32> to vector<16x16xf32>
    %c99_944 = arith.constant 99 : index
    %1644 = memref.load %arg2[%c99_944] : memref<144xf32, #tpu.memory_space<smem>>
    %1645 = vector.broadcast %1644 : f32 to vector<16x16xf32>
    %1646 = arith.mulf %1645, %1643 : vector<16x16xf32>
    %1647 = arith.addf %1641, %1646 : vector<16x16xf32>
    %c3_945 = arith.constant 3 : index
    %c0_946 = arith.constant 0 : index
    %c1_947 = arith.constant 1 : index
    %1648 = vector.load %arg6[%c3_945, %c0_946, %c1_947] : memref<4x18x18xf32, #tpu.memory_space<vmem>>, vector<1x16x16xf32>
    %1649 = vector.shape_cast %1648 : vector<1x16x16xf32> to vector<16x16xf32>
    %c100_948 = arith.constant 100 : index
    %1650 = memref.load %arg2[%c100_948] : memref<144xf32, #tpu.memory_space<smem>>
    %1651 = vector.broadcast %1650 : f32 to vector<16x16xf32>
    %1652 = arith.mulf %1651, %1649 : vector<16x16xf32>
    %1653 = arith.addf %1647, %1652 : vector<16x16xf32>
    %c3_949 = arith.constant 3 : index
    %c0_950 = arith.constant 0 : index
    %c2_951 = arith.constant 2 : index
    %1654 = vector.load %arg6[%c3_949, %c0_950, %c2_951] : memref<4x18x18xf32, #tpu.memory_space<vmem>>, vector<1x16x16xf32>
    %1655 = vector.shape_cast %1654 : vector<1x16x16xf32> to vector<16x16xf32>
    %c101_952 = arith.constant 101 : index
    %1656 = memref.load %arg2[%c101_952] : memref<144xf32, #tpu.memory_space<smem>>
    %1657 = vector.broadcast %1656 : f32 to vector<16x16xf32>
    %1658 = arith.mulf %1657, %1655 : vector<16x16xf32>
    %1659 = arith.addf %1653, %1658 : vector<16x16xf32>
    %c3_953 = arith.constant 3 : index
    %c1_954 = arith.constant 1 : index
    %c0_955 = arith.constant 0 : index
    %1660 = vector.load %arg6[%c3_953, %c1_954, %c0_955] : memref<4x18x18xf32, #tpu.memory_space<vmem>>, vector<1x16x16xf32>
    %1661 = vector.shape_cast %1660 : vector<1x16x16xf32> to vector<16x16xf32>
    %c102_956 = arith.constant 102 : index
    %1662 = memref.load %arg2[%c102_956] : memref<144xf32, #tpu.memory_space<smem>>
    %1663 = vector.broadcast %1662 : f32 to vector<16x16xf32>
    %1664 = arith.mulf %1663, %1661 : vector<16x16xf32>
    %1665 = arith.addf %1659, %1664 : vector<16x16xf32>
    %c3_957 = arith.constant 3 : index
    %c1_958 = arith.constant 1 : index
    %c1_959 = arith.constant 1 : index
    %1666 = vector.load %arg6[%c3_957, %c1_958, %c1_959] : memref<4x18x18xf32, #tpu.memory_space<vmem>>, vector<1x16x16xf32>
    %1667 = vector.shape_cast %1666 : vector<1x16x16xf32> to vector<16x16xf32>
    %c103_960 = arith.constant 103 : index
    %1668 = memref.load %arg2[%c103_960] : memref<144xf32, #tpu.memory_space<smem>>
    %1669 = vector.broadcast %1668 : f32 to vector<16x16xf32>
    %1670 = arith.mulf %1669, %1667 : vector<16x16xf32>
    %1671 = arith.addf %1665, %1670 : vector<16x16xf32>
    %c3_961 = arith.constant 3 : index
    %c1_962 = arith.constant 1 : index
    %c2_963 = arith.constant 2 : index
    %1672 = vector.load %arg6[%c3_961, %c1_962, %c2_963] : memref<4x18x18xf32, #tpu.memory_space<vmem>>, vector<1x16x16xf32>
    %1673 = vector.shape_cast %1672 : vector<1x16x16xf32> to vector<16x16xf32>
    %c104_964 = arith.constant 104 : index
    %1674 = memref.load %arg2[%c104_964] : memref<144xf32, #tpu.memory_space<smem>>
    %1675 = vector.broadcast %1674 : f32 to vector<16x16xf32>
    %1676 = arith.mulf %1675, %1673 : vector<16x16xf32>
    %1677 = arith.addf %1671, %1676 : vector<16x16xf32>
    %c3_965 = arith.constant 3 : index
    %c2_966 = arith.constant 2 : index
    %c0_967 = arith.constant 0 : index
    %1678 = vector.load %arg6[%c3_965, %c2_966, %c0_967] : memref<4x18x18xf32, #tpu.memory_space<vmem>>, vector<1x16x16xf32>
    %1679 = vector.shape_cast %1678 : vector<1x16x16xf32> to vector<16x16xf32>
    %c105_968 = arith.constant 105 : index
    %1680 = memref.load %arg2[%c105_968] : memref<144xf32, #tpu.memory_space<smem>>
    %1681 = vector.broadcast %1680 : f32 to vector<16x16xf32>
    %1682 = arith.mulf %1681, %1679 : vector<16x16xf32>
    %1683 = arith.addf %1677, %1682 : vector<16x16xf32>
    %c3_969 = arith.constant 3 : index
    %c2_970 = arith.constant 2 : index
    %c1_971 = arith.constant 1 : index
    %1684 = vector.load %arg6[%c3_969, %c2_970, %c1_971] : memref<4x18x18xf32, #tpu.memory_space<vmem>>, vector<1x16x16xf32>
    %1685 = vector.shape_cast %1684 : vector<1x16x16xf32> to vector<16x16xf32>
    %c106_972 = arith.constant 106 : index
    %1686 = memref.load %arg2[%c106_972] : memref<144xf32, #tpu.memory_space<smem>>
    %1687 = vector.broadcast %1686 : f32 to vector<16x16xf32>
    %1688 = arith.mulf %1687, %1685 : vector<16x16xf32>
    %1689 = arith.addf %1683, %1688 : vector<16x16xf32>
    %c3_973 = arith.constant 3 : index
    %c2_974 = arith.constant 2 : index
    %c2_975 = arith.constant 2 : index
    %1690 = vector.load %arg6[%c3_973, %c2_974, %c2_975] : memref<4x18x18xf32, #tpu.memory_space<vmem>>, vector<1x16x16xf32>
    %1691 = vector.shape_cast %1690 : vector<1x16x16xf32> to vector<16x16xf32>
    %c107_976 = arith.constant 107 : index
    %1692 = memref.load %arg2[%c107_976] : memref<144xf32, #tpu.memory_space<smem>>
    %1693 = vector.broadcast %1692 : f32 to vector<16x16xf32>
    %1694 = arith.mulf %1693, %1691 : vector<16x16xf32>
    %1695 = arith.addf %1689, %1694 : vector<16x16xf32>
    %cst_977 = arith.constant dense<0.000000e+00> : vector<16xf32>
    %1696 = vector.multi_reduction <add>, %1695, %cst_977 [1] : vector<16x16xf32> to vector<16xf32>
    %1697 = vector.shape_cast %1696 : vector<16xf32> to vector<16x1xf32>
    %cst_978 = arith.constant dense<0.000000e+00> : vector<1xf32>
    %1698 = vector.multi_reduction <add>, %1697, %cst_978 [0] : vector<16x1xf32> to vector<1xf32>
    %1699 = vector.shape_cast %1698 : vector<1xf32> to vector<1x1xf32>
    %cst_979 = arith.constant 3.906250e-03 : f32
    %1700 = vector.broadcast %cst_979 : f32 to vector<1x1xf32>
    %1701 = arith.mulf %1699, %1700 : vector<1x1xf32>
    %1702 = vector.broadcast %1701 : vector<1x1xf32> to vector<16x16xf32>
    %1703 = arith.subf %1695, %1702 : vector<16x16xf32>
    %1704 = arith.mulf %1703, %1703 : vector<16x16xf32>
    %cst_980 = arith.constant dense<0.000000e+00> : vector<16xf32>
    %1705 = vector.multi_reduction <add>, %1704, %cst_980 [1] : vector<16x16xf32> to vector<16xf32>
    %1706 = vector.shape_cast %1705 : vector<16xf32> to vector<16x1xf32>
    %cst_981 = arith.constant dense<0.000000e+00> : vector<1xf32>
    %1707 = vector.multi_reduction <add>, %1706, %cst_981 [0] : vector<16x1xf32> to vector<1xf32>
    %1708 = vector.shape_cast %1707 : vector<1xf32> to vector<1x1xf32>
    %cst_982 = arith.constant 3.906250e-03 : f32
    %1709 = vector.broadcast %cst_982 : f32 to vector<1x1xf32>
    %1710 = arith.mulf %1708, %1709 : vector<1x1xf32>
    %1711 = vector.broadcast %1701 : vector<1x1xf32> to vector<16x16xf32>
    %1712 = arith.subf %1695, %1711 : vector<16x16xf32>
    %cst_983 = arith.constant 9.99999974E-6 : f32
    %1713 = vector.broadcast %cst_983 : f32 to vector<1x1xf32>
    %1714 = arith.addf %1710, %1713 : vector<1x1xf32>
    %1715 = math.rsqrt %1714 : vector<1x1xf32>
    %1716 = vector.broadcast %1715 : vector<1x1xf32> to vector<16x16xf32>
    %1717 = arith.mulf %1712, %1716 : vector<16x16xf32>
    %c0_984 = arith.constant 0 : index
    %c2_985 = arith.constant 2 : index
    %c0_986 = arith.constant 0 : index
    %c0_987 = arith.constant 0 : index
    %1718 = vector.load %arg3[%c0_984, %c2_985, %c0_986, %c0_987] : memref<1x4x16x16xf32, #tpu.memory_space<vmem>>, vector<1x1x16x16xf32>
    %1719 = vector.shape_cast %1718 : vector<1x1x16x16xf32> to vector<16x16xf32>
    %1720 = arith.addf %1719, %1717 : vector<16x16xf32>
    %c0_988 = arith.constant 0 : index
    %c2_989 = arith.constant 2 : index
    %c0_990 = arith.constant 0 : index
    %c0_991 = arith.constant 0 : index
    %1721 = vector.load %arg4[%c0_988, %c2_989, %c0_990, %c0_991] : memref<1x4x16x16xf32, #tpu.memory_space<vmem>>, vector<1x1x16x16xf32>
    %1722 = vector.shape_cast %1721 : vector<1x1x16x16xf32> to vector<16x16xf32>
    %1723 = vector.shape_cast %1720 : vector<16x16xf32> to vector<1x1x16x16xf32>
    tpu.vector_store %arg4[%c0_988, %c2_989, %c0_990, %c0_991], %1723 {strides = array<i32>} : memref<1x4x16x16xf32, #tpu.memory_space<vmem>>, vector<1x1x16x16xf32>,
    %cst_992 = arith.constant 0.000000e+00 : f32
    %1724 = vector.broadcast %cst_992 : f32 to vector<16x16xf32>
    %c0_993 = arith.constant 0 : index
    %c0_994 = arith.constant 0 : index
    %c0_995 = arith.constant 0 : index
    %1725 = vector.load %arg6[%c0_993, %c0_994, %c0_995] : memref<4x18x18xf32, #tpu.memory_space<vmem>>, vector<1x16x16xf32>
    %1726 = vector.shape_cast %1725 : vector<1x16x16xf32> to vector<16x16xf32>
    %c108_996 = arith.constant 108 : index
    %1727 = memref.load %arg2[%c108_996] : memref<144xf32, #tpu.memory_space<smem>>
    %1728 = vector.broadcast %1727 : f32 to vector<16x16xf32>
    %1729 = arith.mulf %1728, %1726 : vector<16x16xf32>
    %1730 = arith.addf %1724, %1729 : vector<16x16xf32>
    %c0_997 = arith.constant 0 : index
    %c0_998 = arith.constant 0 : index
    %c1_999 = arith.constant 1 : index
    %1731 = vector.load %arg6[%c0_997, %c0_998, %c1_999] : memref<4x18x18xf32, #tpu.memory_space<vmem>>, vector<1x16x16xf32>
    %1732 = vector.shape_cast %1731 : vector<1x16x16xf32> to vector<16x16xf32>
    %c109_1000 = arith.constant 109 : index
    %1733 = memref.load %arg2[%c109_1000] : memref<144xf32, #tpu.memory_space<smem>>
    %1734 = vector.broadcast %1733 : f32 to vector<16x16xf32>
    %1735 = arith.mulf %1734, %1732 : vector<16x16xf32>
    %1736 = arith.addf %1730, %1735 : vector<16x16xf32>
    %c0_1001 = arith.constant 0 : index
    %c0_1002 = arith.constant 0 : index
    %c2_1003 = arith.constant 2 : index
    %1737 = vector.load %arg6[%c0_1001, %c0_1002, %c2_1003] : memref<4x18x18xf32, #tpu.memory_space<vmem>>, vector<1x16x16xf32>
    %1738 = vector.shape_cast %1737 : vector<1x16x16xf32> to vector<16x16xf32>
    %c110_1004 = arith.constant 110 : index
    %1739 = memref.load %arg2[%c110_1004] : memref<144xf32, #tpu.memory_space<smem>>
    %1740 = vector.broadcast %1739 : f32 to vector<16x16xf32>
    %1741 = arith.mulf %1740, %1738 : vector<16x16xf32>
    %1742 = arith.addf %1736, %1741 : vector<16x16xf32>
    %c0_1005 = arith.constant 0 : index
    %c1_1006 = arith.constant 1 : index
    %c0_1007 = arith.constant 0 : index
    %1743 = vector.load %arg6[%c0_1005, %c1_1006, %c0_1007] : memref<4x18x18xf32, #tpu.memory_space<vmem>>, vector<1x16x16xf32>
    %1744 = vector.shape_cast %1743 : vector<1x16x16xf32> to vector<16x16xf32>
    %c111_1008 = arith.constant 111 : index
    %1745 = memref.load %arg2[%c111_1008] : memref<144xf32, #tpu.memory_space<smem>>
    %1746 = vector.broadcast %1745 : f32 to vector<16x16xf32>
    %1747 = arith.mulf %1746, %1744 : vector<16x16xf32>
    %1748 = arith.addf %1742, %1747 : vector<16x16xf32>
    %c0_1009 = arith.constant 0 : index
    %c1_1010 = arith.constant 1 : index
    %c1_1011 = arith.constant 1 : index
    %1749 = vector.load %arg6[%c0_1009, %c1_1010, %c1_1011] : memref<4x18x18xf32, #tpu.memory_space<vmem>>, vector<1x16x16xf32>
    %1750 = vector.shape_cast %1749 : vector<1x16x16xf32> to vector<16x16xf32>
    %c112_1012 = arith.constant 112 : index
    %1751 = memref.load %arg2[%c112_1012] : memref<144xf32, #tpu.memory_space<smem>>
    %1752 = vector.broadcast %1751 : f32 to vector<16x16xf32>
    %1753 = arith.mulf %1752, %1750 : vector<16x16xf32>
    %1754 = arith.addf %1748, %1753 : vector<16x16xf32>
    %c0_1013 = arith.constant 0 : index
    %c1_1014 = arith.constant 1 : index
    %c2_1015 = arith.constant 2 : index
    %1755 = vector.load %arg6[%c0_1013, %c1_1014, %c2_1015] : memref<4x18x18xf32, #tpu.memory_space<vmem>>, vector<1x16x16xf32>
    %1756 = vector.shape_cast %1755 : vector<1x16x16xf32> to vector<16x16xf32>
    %c113_1016 = arith.constant 113 : index
    %1757 = memref.load %arg2[%c113_1016] : memref<144xf32, #tpu.memory_space<smem>>
    %1758 = vector.broadcast %1757 : f32 to vector<16x16xf32>
    %1759 = arith.mulf %1758, %1756 : vector<16x16xf32>
    %1760 = arith.addf %1754, %1759 : vector<16x16xf32>
    %c0_1017 = arith.constant 0 : index
    %c2_1018 = arith.constant 2 : index
    %c0_1019 = arith.constant 0 : index
    %1761 = vector.load %arg6[%c0_1017, %c2_1018, %c0_1019] : memref<4x18x18xf32, #tpu.memory_space<vmem>>, vector<1x16x16xf32>
    %1762 = vector.shape_cast %1761 : vector<1x16x16xf32> to vector<16x16xf32>
    %c114_1020 = arith.constant 114 : index
    %1763 = memref.load %arg2[%c114_1020] : memref<144xf32, #tpu.memory_space<smem>>
    %1764 = vector.broadcast %1763 : f32 to vector<16x16xf32>
    %1765 = arith.mulf %1764, %1762 : vector<16x16xf32>
    %1766 = arith.addf %1760, %1765 : vector<16x16xf32>
    %c0_1021 = arith.constant 0 : index
    %c2_1022 = arith.constant 2 : index
    %c1_1023 = arith.constant 1 : index
    %1767 = vector.load %arg6[%c0_1021, %c2_1022, %c1_1023] : memref<4x18x18xf32, #tpu.memory_space<vmem>>, vector<1x16x16xf32>
    %1768 = vector.shape_cast %1767 : vector<1x16x16xf32> to vector<16x16xf32>
    %c115_1024 = arith.constant 115 : index
    %1769 = memref.load %arg2[%c115_1024] : memref<144xf32, #tpu.memory_space<smem>>
    %1770 = vector.broadcast %1769 : f32 to vector<16x16xf32>
    %1771 = arith.mulf %1770, %1768 : vector<16x16xf32>
    %1772 = arith.addf %1766, %1771 : vector<16x16xf32>
    %c0_1025 = arith.constant 0 : index
    %c2_1026 = arith.constant 2 : index
    %c2_1027 = arith.constant 2 : index
    %1773 = vector.load %arg6[%c0_1025, %c2_1026, %c2_1027] : memref<4x18x18xf32, #tpu.memory_space<vmem>>, vector<1x16x16xf32>
    %1774 = vector.shape_cast %1773 : vector<1x16x16xf32> to vector<16x16xf32>
    %c116_1028 = arith.constant 116 : index
    %1775 = memref.load %arg2[%c116_1028] : memref<144xf32, #tpu.memory_space<smem>>
    %1776 = vector.broadcast %1775 : f32 to vector<16x16xf32>
    %1777 = arith.mulf %1776, %1774 : vector<16x16xf32>
    %1778 = arith.addf %1772, %1777 : vector<16x16xf32>
    %c1_1029 = arith.constant 1 : index
    %c0_1030 = arith.constant 0 : index
    %c0_1031 = arith.constant 0 : index
    %1779 = vector.load %arg6[%c1_1029, %c0_1030, %c0_1031] : memref<4x18x18xf32, #tpu.memory_space<vmem>>, vector<1x16x16xf32>
    %1780 = vector.shape_cast %1779 : vector<1x16x16xf32> to vector<16x16xf32>
    %c117_1032 = arith.constant 117 : index
    %1781 = memref.load %arg2[%c117_1032] : memref<144xf32, #tpu.memory_space<smem>>
    %1782 = vector.broadcast %1781 : f32 to vector<16x16xf32>
    %1783 = arith.mulf %1782, %1780 : vector<16x16xf32>
    %1784 = arith.addf %1778, %1783 : vector<16x16xf32>
    %c1_1033 = arith.constant 1 : index
    %c0_1034 = arith.constant 0 : index
    %c1_1035 = arith.constant 1 : index
    %1785 = vector.load %arg6[%c1_1033, %c0_1034, %c1_1035] : memref<4x18x18xf32, #tpu.memory_space<vmem>>, vector<1x16x16xf32>
    %1786 = vector.shape_cast %1785 : vector<1x16x16xf32> to vector<16x16xf32>
    %c118_1036 = arith.constant 118 : index
    %1787 = memref.load %arg2[%c118_1036] : memref<144xf32, #tpu.memory_space<smem>>
    %1788 = vector.broadcast %1787 : f32 to vector<16x16xf32>
    %1789 = arith.mulf %1788, %1786 : vector<16x16xf32>
    %1790 = arith.addf %1784, %1789 : vector<16x16xf32>
    %c1_1037 = arith.constant 1 : index
    %c0_1038 = arith.constant 0 : index
    %c2_1039 = arith.constant 2 : index
    %1791 = vector.load %arg6[%c1_1037, %c0_1038, %c2_1039] : memref<4x18x18xf32, #tpu.memory_space<vmem>>, vector<1x16x16xf32>
    %1792 = vector.shape_cast %1791 : vector<1x16x16xf32> to vector<16x16xf32>
    %c119_1040 = arith.constant 119 : index
    %1793 = memref.load %arg2[%c119_1040] : memref<144xf32, #tpu.memory_space<smem>>
    %1794 = vector.broadcast %1793 : f32 to vector<16x16xf32>
    %1795 = arith.mulf %1794, %1792 : vector<16x16xf32>
    %1796 = arith.addf %1790, %1795 : vector<16x16xf32>
    %c1_1041 = arith.constant 1 : index
    %c1_1042 = arith.constant 1 : index
    %c0_1043 = arith.constant 0 : index
    %1797 = vector.load %arg6[%c1_1041, %c1_1042, %c0_1043] : memref<4x18x18xf32, #tpu.memory_space<vmem>>, vector<1x16x16xf32>
    %1798 = vector.shape_cast %1797 : vector<1x16x16xf32> to vector<16x16xf32>
    %c120_1044 = arith.constant 120 : index
    %1799 = memref.load %arg2[%c120_1044] : memref<144xf32, #tpu.memory_space<smem>>
    %1800 = vector.broadcast %1799 : f32 to vector<16x16xf32>
    %1801 = arith.mulf %1800, %1798 : vector<16x16xf32>
    %1802 = arith.addf %1796, %1801 : vector<16x16xf32>
    %c1_1045 = arith.constant 1 : index
    %c1_1046 = arith.constant 1 : index
    %c1_1047 = arith.constant 1 : index
    %1803 = vector.load %arg6[%c1_1045, %c1_1046, %c1_1047] : memref<4x18x18xf32, #tpu.memory_space<vmem>>, vector<1x16x16xf32>
    %1804 = vector.shape_cast %1803 : vector<1x16x16xf32> to vector<16x16xf32>
    %c121_1048 = arith.constant 121 : index
    %1805 = memref.load %arg2[%c121_1048] : memref<144xf32, #tpu.memory_space<smem>>
    %1806 = vector.broadcast %1805 : f32 to vector<16x16xf32>
    %1807 = arith.mulf %1806, %1804 : vector<16x16xf32>
    %1808 = arith.addf %1802, %1807 : vector<16x16xf32>
    %c1_1049 = arith.constant 1 : index
    %c1_1050 = arith.constant 1 : index
    %c2_1051 = arith.constant 2 : index
    %1809 = vector.load %arg6[%c1_1049, %c1_1050, %c2_1051] : memref<4x18x18xf32, #tpu.memory_space<vmem>>, vector<1x16x16xf32>
    %1810 = vector.shape_cast %1809 : vector<1x16x16xf32> to vector<16x16xf32>
    %c122_1052 = arith.constant 122 : index
    %1811 = memref.load %arg2[%c122_1052] : memref<144xf32, #tpu.memory_space<smem>>
    %1812 = vector.broadcast %1811 : f32 to vector<16x16xf32>
    %1813 = arith.mulf %1812, %1810 : vector<16x16xf32>
    %1814 = arith.addf %1808, %1813 : vector<16x16xf32>
    %c1_1053 = arith.constant 1 : index
    %c2_1054 = arith.constant 2 : index
    %c0_1055 = arith.constant 0 : index
    %1815 = vector.load %arg6[%c1_1053, %c2_1054, %c0_1055] : memref<4x18x18xf32, #tpu.memory_space<vmem>>, vector<1x16x16xf32>
    %1816 = vector.shape_cast %1815 : vector<1x16x16xf32> to vector<16x16xf32>
    %c123_1056 = arith.constant 123 : index
    %1817 = memref.load %arg2[%c123_1056] : memref<144xf32, #tpu.memory_space<smem>>
    %1818 = vector.broadcast %1817 : f32 to vector<16x16xf32>
    %1819 = arith.mulf %1818, %1816 : vector<16x16xf32>
    %1820 = arith.addf %1814, %1819 : vector<16x16xf32>
    %c1_1057 = arith.constant 1 : index
    %c2_1058 = arith.constant 2 : index
    %c1_1059 = arith.constant 1 : index
    %1821 = vector.load %arg6[%c1_1057, %c2_1058, %c1_1059] : memref<4x18x18xf32, #tpu.memory_space<vmem>>, vector<1x16x16xf32>
    %1822 = vector.shape_cast %1821 : vector<1x16x16xf32> to vector<16x16xf32>
    %c124_1060 = arith.constant 124 : index
    %1823 = memref.load %arg2[%c124_1060] : memref<144xf32, #tpu.memory_space<smem>>
    %1824 = vector.broadcast %1823 : f32 to vector<16x16xf32>
    %1825 = arith.mulf %1824, %1822 : vector<16x16xf32>
    %1826 = arith.addf %1820, %1825 : vector<16x16xf32>
    %c1_1061 = arith.constant 1 : index
    %c2_1062 = arith.constant 2 : index
    %c2_1063 = arith.constant 2 : index
    %1827 = vector.load %arg6[%c1_1061, %c2_1062, %c2_1063] : memref<4x18x18xf32, #tpu.memory_space<vmem>>, vector<1x16x16xf32>
    %1828 = vector.shape_cast %1827 : vector<1x16x16xf32> to vector<16x16xf32>
    %c125_1064 = arith.constant 125 : index
    %1829 = memref.load %arg2[%c125_1064] : memref<144xf32, #tpu.memory_space<smem>>
    %1830 = vector.broadcast %1829 : f32 to vector<16x16xf32>
    %1831 = arith.mulf %1830, %1828 : vector<16x16xf32>
    %1832 = arith.addf %1826, %1831 : vector<16x16xf32>
    %c2_1065 = arith.constant 2 : index
    %c0_1066 = arith.constant 0 : index
    %c0_1067 = arith.constant 0 : index
    %1833 = vector.load %arg6[%c2_1065, %c0_1066, %c0_1067] : memref<4x18x18xf32, #tpu.memory_space<vmem>>, vector<1x16x16xf32>
    %1834 = vector.shape_cast %1833 : vector<1x16x16xf32> to vector<16x16xf32>
    %c126_1068 = arith.constant 126 : index
    %1835 = memref.load %arg2[%c126_1068] : memref<144xf32, #tpu.memory_space<smem>>
    %1836 = vector.broadcast %1835 : f32 to vector<16x16xf32>
    %1837 = arith.mulf %1836, %1834 : vector<16x16xf32>
    %1838 = arith.addf %1832, %1837 : vector<16x16xf32>
    %c2_1069 = arith.constant 2 : index
    %c0_1070 = arith.constant 0 : index
    %c1_1071 = arith.constant 1 : index
    %1839 = vector.load %arg6[%c2_1069, %c0_1070, %c1_1071] : memref<4x18x18xf32, #tpu.memory_space<vmem>>, vector<1x16x16xf32>
    %1840 = vector.shape_cast %1839 : vector<1x16x16xf32> to vector<16x16xf32>
    %c127_1072 = arith.constant 127 : index
    %1841 = memref.load %arg2[%c127_1072] : memref<144xf32, #tpu.memory_space<smem>>
    %1842 = vector.broadcast %1841 : f32 to vector<16x16xf32>
    %1843 = arith.mulf %1842, %1840 : vector<16x16xf32>
    %1844 = arith.addf %1838, %1843 : vector<16x16xf32>
    %c2_1073 = arith.constant 2 : index
    %c0_1074 = arith.constant 0 : index
    %c2_1075 = arith.constant 2 : index
    %1845 = vector.load %arg6[%c2_1073, %c0_1074, %c2_1075] : memref<4x18x18xf32, #tpu.memory_space<vmem>>, vector<1x16x16xf32>
    %1846 = vector.shape_cast %1845 : vector<1x16x16xf32> to vector<16x16xf32>
    %c128_1076 = arith.constant 128 : index
    %1847 = memref.load %arg2[%c128_1076] : memref<144xf32, #tpu.memory_space<smem>>
    %1848 = vector.broadcast %1847 : f32 to vector<16x16xf32>
    %1849 = arith.mulf %1848, %1846 : vector<16x16xf32>
    %1850 = arith.addf %1844, %1849 : vector<16x16xf32>
    %c2_1077 = arith.constant 2 : index
    %c1_1078 = arith.constant 1 : index
    %c0_1079 = arith.constant 0 : index
    %1851 = vector.load %arg6[%c2_1077, %c1_1078, %c0_1079] : memref<4x18x18xf32, #tpu.memory_space<vmem>>, vector<1x16x16xf32>
    %1852 = vector.shape_cast %1851 : vector<1x16x16xf32> to vector<16x16xf32>
    %c129_1080 = arith.constant 129 : index
    %1853 = memref.load %arg2[%c129_1080] : memref<144xf32, #tpu.memory_space<smem>>
    %1854 = vector.broadcast %1853 : f32 to vector<16x16xf32>
    %1855 = arith.mulf %1854, %1852 : vector<16x16xf32>
    %1856 = arith.addf %1850, %1855 : vector<16x16xf32>
    %c2_1081 = arith.constant 2 : index
    %c1_1082 = arith.constant 1 : index
    %c1_1083 = arith.constant 1 : index
    %1857 = vector.load %arg6[%c2_1081, %c1_1082, %c1_1083] : memref<4x18x18xf32, #tpu.memory_space<vmem>>, vector<1x16x16xf32>
    %1858 = vector.shape_cast %1857 : vector<1x16x16xf32> to vector<16x16xf32>
    %c130_1084 = arith.constant 130 : index
    %1859 = memref.load %arg2[%c130_1084] : memref<144xf32, #tpu.memory_space<smem>>
    %1860 = vector.broadcast %1859 : f32 to vector<16x16xf32>
    %1861 = arith.mulf %1860, %1858 : vector<16x16xf32>
    %1862 = arith.addf %1856, %1861 : vector<16x16xf32>
    %c2_1085 = arith.constant 2 : index
    %c1_1086 = arith.constant 1 : index
    %c2_1087 = arith.constant 2 : index
    %1863 = vector.load %arg6[%c2_1085, %c1_1086, %c2_1087] : memref<4x18x18xf32, #tpu.memory_space<vmem>>, vector<1x16x16xf32>
    %1864 = vector.shape_cast %1863 : vector<1x16x16xf32> to vector<16x16xf32>
    %c131_1088 = arith.constant 131 : index
    %1865 = memref.load %arg2[%c131_1088] : memref<144xf32, #tpu.memory_space<smem>>
    %1866 = vector.broadcast %1865 : f32 to vector<16x16xf32>
    %1867 = arith.mulf %1866, %1864 : vector<16x16xf32>
    %1868 = arith.addf %1862, %1867 : vector<16x16xf32>
    %c2_1089 = arith.constant 2 : index
    %c2_1090 = arith.constant 2 : index
    %c0_1091 = arith.constant 0 : index
    %1869 = vector.load %arg6[%c2_1089, %c2_1090, %c0_1091] : memref<4x18x18xf32, #tpu.memory_space<vmem>>, vector<1x16x16xf32>
    %1870 = vector.shape_cast %1869 : vector<1x16x16xf32> to vector<16x16xf32>
    %c132_1092 = arith.constant 132 : index
    %1871 = memref.load %arg2[%c132_1092] : memref<144xf32, #tpu.memory_space<smem>>
    %1872 = vector.broadcast %1871 : f32 to vector<16x16xf32>
    %1873 = arith.mulf %1872, %1870 : vector<16x16xf32>
    %1874 = arith.addf %1868, %1873 : vector<16x16xf32>
    %c2_1093 = arith.constant 2 : index
    %c2_1094 = arith.constant 2 : index
    %c1_1095 = arith.constant 1 : index
    %1875 = vector.load %arg6[%c2_1093, %c2_1094, %c1_1095] : memref<4x18x18xf32, #tpu.memory_space<vmem>>, vector<1x16x16xf32>
    %1876 = vector.shape_cast %1875 : vector<1x16x16xf32> to vector<16x16xf32>
    %c133_1096 = arith.constant 133 : index
    %1877 = memref.load %arg2[%c133_1096] : memref<144xf32, #tpu.memory_space<smem>>
    %1878 = vector.broadcast %1877 : f32 to vector<16x16xf32>
    %1879 = arith.mulf %1878, %1876 : vector<16x16xf32>
    %1880 = arith.addf %1874, %1879 : vector<16x16xf32>
    %c2_1097 = arith.constant 2 : index
    %c2_1098 = arith.constant 2 : index
    %c2_1099 = arith.constant 2 : index
    %1881 = vector.load %arg6[%c2_1097, %c2_1098, %c2_1099] : memref<4x18x18xf32, #tpu.memory_space<vmem>>, vector<1x16x16xf32>
    %1882 = vector.shape_cast %1881 : vector<1x16x16xf32> to vector<16x16xf32>
    %c134_1100 = arith.constant 134 : index
    %1883 = memref.load %arg2[%c134_1100] : memref<144xf32, #tpu.memory_space<smem>>
    %1884 = vector.broadcast %1883 : f32 to vector<16x16xf32>
    %1885 = arith.mulf %1884, %1882 : vector<16x16xf32>
    %1886 = arith.addf %1880, %1885 : vector<16x16xf32>
    %c3_1101 = arith.constant 3 : index
    %c0_1102 = arith.constant 0 : index
    %c0_1103 = arith.constant 0 : index
    %1887 = vector.load %arg6[%c3_1101, %c0_1102, %c0_1103] : memref<4x18x18xf32, #tpu.memory_space<vmem>>, vector<1x16x16xf32>
    %1888 = vector.shape_cast %1887 : vector<1x16x16xf32> to vector<16x16xf32>
    %c135_1104 = arith.constant 135 : index
    %1889 = memref.load %arg2[%c135_1104] : memref<144xf32, #tpu.memory_space<smem>>
    %1890 = vector.broadcast %1889 : f32 to vector<16x16xf32>
    %1891 = arith.mulf %1890, %1888 : vector<16x16xf32>
    %1892 = arith.addf %1886, %1891 : vector<16x16xf32>
    %c3_1105 = arith.constant 3 : index
    %c0_1106 = arith.constant 0 : index
    %c1_1107 = arith.constant 1 : index
    %1893 = vector.load %arg6[%c3_1105, %c0_1106, %c1_1107] : memref<4x18x18xf32, #tpu.memory_space<vmem>>, vector<1x16x16xf32>
    %1894 = vector.shape_cast %1893 : vector<1x16x16xf32> to vector<16x16xf32>
    %c136_1108 = arith.constant 136 : index
    %1895 = memref.load %arg2[%c136_1108] : memref<144xf32, #tpu.memory_space<smem>>
    %1896 = vector.broadcast %1895 : f32 to vector<16x16xf32>
    %1897 = arith.mulf %1896, %1894 : vector<16x16xf32>
    %1898 = arith.addf %1892, %1897 : vector<16x16xf32>
    %c3_1109 = arith.constant 3 : index
    %c0_1110 = arith.constant 0 : index
    %c2_1111 = arith.constant 2 : index
    %1899 = vector.load %arg6[%c3_1109, %c0_1110, %c2_1111] : memref<4x18x18xf32, #tpu.memory_space<vmem>>, vector<1x16x16xf32>
    %1900 = vector.shape_cast %1899 : vector<1x16x16xf32> to vector<16x16xf32>
    %c137_1112 = arith.constant 137 : index
    %1901 = memref.load %arg2[%c137_1112] : memref<144xf32, #tpu.memory_space<smem>>
    %1902 = vector.broadcast %1901 : f32 to vector<16x16xf32>
    %1903 = arith.mulf %1902, %1900 : vector<16x16xf32>
    %1904 = arith.addf %1898, %1903 : vector<16x16xf32>
    %c3_1113 = arith.constant 3 : index
    %c1_1114 = arith.constant 1 : index
    %c0_1115 = arith.constant 0 : index
    %1905 = vector.load %arg6[%c3_1113, %c1_1114, %c0_1115] : memref<4x18x18xf32, #tpu.memory_space<vmem>>, vector<1x16x16xf32>
    %1906 = vector.shape_cast %1905 : vector<1x16x16xf32> to vector<16x16xf32>
    %c138_1116 = arith.constant 138 : index
    %1907 = memref.load %arg2[%c138_1116] : memref<144xf32, #tpu.memory_space<smem>>
    %1908 = vector.broadcast %1907 : f32 to vector<16x16xf32>
    %1909 = arith.mulf %1908, %1906 : vector<16x16xf32>
    %1910 = arith.addf %1904, %1909 : vector<16x16xf32>
    %c3_1117 = arith.constant 3 : index
    %c1_1118 = arith.constant 1 : index
    %c1_1119 = arith.constant 1 : index
    %1911 = vector.load %arg6[%c3_1117, %c1_1118, %c1_1119] : memref<4x18x18xf32, #tpu.memory_space<vmem>>, vector<1x16x16xf32>
    %1912 = vector.shape_cast %1911 : vector<1x16x16xf32> to vector<16x16xf32>
    %c139_1120 = arith.constant 139 : index
    %1913 = memref.load %arg2[%c139_1120] : memref<144xf32, #tpu.memory_space<smem>>
    %1914 = vector.broadcast %1913 : f32 to vector<16x16xf32>
    %1915 = arith.mulf %1914, %1912 : vector<16x16xf32>
    %1916 = arith.addf %1910, %1915 : vector<16x16xf32>
    %c3_1121 = arith.constant 3 : index
    %c1_1122 = arith.constant 1 : index
    %c2_1123 = arith.constant 2 : index
    %1917 = vector.load %arg6[%c3_1121, %c1_1122, %c2_1123] : memref<4x18x18xf32, #tpu.memory_space<vmem>>, vector<1x16x16xf32>
    %1918 = vector.shape_cast %1917 : vector<1x16x16xf32> to vector<16x16xf32>
    %c140_1124 = arith.constant 140 : index
    %1919 = memref.load %arg2[%c140_1124] : memref<144xf32, #tpu.memory_space<smem>>
    %1920 = vector.broadcast %1919 : f32 to vector<16x16xf32>
    %1921 = arith.mulf %1920, %1918 : vector<16x16xf32>
    %1922 = arith.addf %1916, %1921 : vector<16x16xf32>
    %c3_1125 = arith.constant 3 : index
    %c2_1126 = arith.constant 2 : index
    %c0_1127 = arith.constant 0 : index
    %1923 = vector.load %arg6[%c3_1125, %c2_1126, %c0_1127] : memref<4x18x18xf32, #tpu.memory_space<vmem>>, vector<1x16x16xf32>
    %1924 = vector.shape_cast %1923 : vector<1x16x16xf32> to vector<16x16xf32>
    %c141_1128 = arith.constant 141 : index
    %1925 = memref.load %arg2[%c141_1128] : memref<144xf32, #tpu.memory_space<smem>>
    %1926 = vector.broadcast %1925 : f32 to vector<16x16xf32>
    %1927 = arith.mulf %1926, %1924 : vector<16x16xf32>
    %1928 = arith.addf %1922, %1927 : vector<16x16xf32>
    %c3_1129 = arith.constant 3 : index
    %c2_1130 = arith.constant 2 : index
    %c1_1131 = arith.constant 1 : index
    %1929 = vector.load %arg6[%c3_1129, %c2_1130, %c1_1131] : memref<4x18x18xf32, #tpu.memory_space<vmem>>, vector<1x16x16xf32>
    %1930 = vector.shape_cast %1929 : vector<1x16x16xf32> to vector<16x16xf32>
    %c142_1132 = arith.constant 142 : index
    %1931 = memref.load %arg2[%c142_1132] : memref<144xf32, #tpu.memory_space<smem>>
    %1932 = vector.broadcast %1931 : f32 to vector<16x16xf32>
    %1933 = arith.mulf %1932, %1930 : vector<16x16xf32>
    %1934 = arith.addf %1928, %1933 : vector<16x16xf32>
    %c3_1133 = arith.constant 3 : index
    %c2_1134 = arith.constant 2 : index
    %c2_1135 = arith.constant 2 : index
    %1935 = vector.load %arg6[%c3_1133, %c2_1134, %c2_1135] : memref<4x18x18xf32, #tpu.memory_space<vmem>>, vector<1x16x16xf32>
    %1936 = vector.shape_cast %1935 : vector<1x16x16xf32> to vector<16x16xf32>
    %c143_1136 = arith.constant 143 : index
    %1937 = memref.load %arg2[%c143_1136] : memref<144xf32, #tpu.memory_space<smem>>
    %1938 = vector.broadcast %1937 : f32 to vector<16x16xf32>
    %1939 = arith.mulf %1938, %1936 : vector<16x16xf32>
    %1940 = arith.addf %1934, %1939 : vector<16x16xf32>
    %cst_1137 = arith.constant dense<0.000000e+00> : vector<16xf32>
    %1941 = vector.multi_reduction <add>, %1940, %cst_1137 [1] : vector<16x16xf32> to vector<16xf32>
    %1942 = vector.shape_cast %1941 : vector<16xf32> to vector<16x1xf32>
    %cst_1138 = arith.constant dense<0.000000e+00> : vector<1xf32>
    %1943 = vector.multi_reduction <add>, %1942, %cst_1138 [0] : vector<16x1xf32> to vector<1xf32>
    %1944 = vector.shape_cast %1943 : vector<1xf32> to vector<1x1xf32>
    %cst_1139 = arith.constant 3.906250e-03 : f32
    %1945 = vector.broadcast %cst_1139 : f32 to vector<1x1xf32>
    %1946 = arith.mulf %1944, %1945 : vector<1x1xf32>
    %1947 = vector.broadcast %1946 : vector<1x1xf32> to vector<16x16xf32>
    %1948 = arith.subf %1940, %1947 : vector<16x16xf32>
    %1949 = arith.mulf %1948, %1948 : vector<16x16xf32>
    %cst_1140 = arith.constant dense<0.000000e+00> : vector<16xf32>
    %1950 = vector.multi_reduction <add>, %1949, %cst_1140 [1] : vector<16x16xf32> to vector<16xf32>
    %1951 = vector.shape_cast %1950 : vector<16xf32> to vector<16x1xf32>
    %cst_1141 = arith.constant dense<0.000000e+00> : vector<1xf32>
    %1952 = vector.multi_reduction <add>, %1951, %cst_1141 [0] : vector<16x1xf32> to vector<1xf32>
    %1953 = vector.shape_cast %1952 : vector<1xf32> to vector<1x1xf32>
    %cst_1142 = arith.constant 3.906250e-03 : f32
    %1954 = vector.broadcast %cst_1142 : f32 to vector<1x1xf32>
    %1955 = arith.mulf %1953, %1954 : vector<1x1xf32>
    %1956 = vector.broadcast %1946 : vector<1x1xf32> to vector<16x16xf32>
    %1957 = arith.subf %1940, %1956 : vector<16x16xf32>
    %cst_1143 = arith.constant 9.99999974E-6 : f32
    %1958 = vector.broadcast %cst_1143 : f32 to vector<1x1xf32>
    %1959 = arith.addf %1955, %1958 : vector<1x1xf32>
    %1960 = math.rsqrt %1959 : vector<1x1xf32>
    %1961 = vector.broadcast %1960 : vector<1x1xf32> to vector<16x16xf32>
    %1962 = arith.mulf %1957, %1961 : vector<16x16xf32>
    %c0_1144 = arith.constant 0 : index
    %c3_1145 = arith.constant 3 : index
    %c0_1146 = arith.constant 0 : index
    %c0_1147 = arith.constant 0 : index
    %1963 = vector.load %arg3[%c0_1144, %c3_1145, %c0_1146, %c0_1147] : memref<1x4x16x16xf32, #tpu.memory_space<vmem>>, vector<1x1x16x16xf32>
    %1964 = vector.shape_cast %1963 : vector<1x1x16x16xf32> to vector<16x16xf32>
    %1965 = arith.addf %1964, %1962 : vector<16x16xf32>
    %c0_1148 = arith.constant 0 : index
    %c3_1149 = arith.constant 3 : index
    %c0_1150 = arith.constant 0 : index
    %c0_1151 = arith.constant 0 : index
    %1966 = vector.load %arg4[%c0_1148, %c3_1149, %c0_1150, %c0_1151] : memref<1x4x16x16xf32, #tpu.memory_space<vmem>>, vector<1x1x16x16xf32>
    %1967 = vector.shape_cast %1966 : vector<1x1x16x16xf32> to vector<16x16xf32>
    %1968 = vector.shape_cast %1965 : vector<16x16xf32> to vector<1x1x16x16xf32>
    tpu.vector_store %arg4[%c0_1148, %c3_1149, %c0_1150, %c0_1151], %1968 {strides = array<i32>} : memref<1x4x16x16xf32, #tpu.memory_space<vmem>>, vector<1x1x16x16xf32>,
    return
  }
  func.func @transform_0(%arg0: i32, %arg1: memref<144xf32, #tpu.memory_space<smem>>, %arg2: memref<144xf32, #tpu.memory_space<smem>>) -> (i32, i32, i32, i32) {
    %c0_i32 = arith.constant 0 : i32
    %c0_i32_0 = arith.constant 0 : i32
    %c0_i32_1 = arith.constant 0 : i32
    %c0_i32_2 = arith.constant 0 : i32
    return %arg0, %c0_i32, %c0_i32_0, %c0_i32_1 : i32, i32, i32, i32
  }
  func.func @transform_1(%arg0: i32, %arg1: memref<144xf32, #tpu.memory_space<smem>>, %arg2: memref<144xf32, #tpu.memory_space<smem>>) -> (i32, i32, i32, i32) {
    %c0_i32 = arith.constant 0 : i32
    %c0_i32_0 = arith.constant 0 : i32
    %c0_i32_1 = arith.constant 0 : i32
    %c0_i32_2 = arith.constant 0 : i32
    return %arg0, %c0_i32, %c0_i32_0, %c0_i32_1 : i32, i32, i32, i32
  }
}

</mosaic_0001>

<bundles_post_ra>
// kernel: _residual_block.1
= control target key start
LH: loop header
LB: loop body
LE: loop exit
PB: predicated region body
PF: predicated region fallthrough
CT: control target
= control target key end

     0   :  { %s7163_s0 = inlined_call_operand.vmem [shape: f32[144], index: 0, kind: input, shape index: {}]   ;;  %s7164_s2 = inlined_call_operand.vmem [shape: f32[2,4,16,16], index: 2, kind: input, shape index: {}]   ;;  %s7165_s3 = inlined_call_operand.hbm [shape: f32[2,4,16,16], index: 3, kind: output, shape index: {}]   ;;  %s7166_s1 = inlined_call_operand.vmem [shape: f32[144], index: 1, kind: input, shape index: {}]  }
   0x1   :  { %s8_s14 = sshll.u32 %s7163_s0, 4  ;;  %s12_s17 = sshll.u32 %s7166_s1, 4  ;;  %s9_s14 = int_to_ptr.vmem [resolvable:$true] %s8_s14  ;;  %s13_s17 = int_to_ptr.vmem [resolvable:$true] %s12_s17 }
   0x2   :  { %s4566_s18 = scalar_lea.vmem %s9_s14, 32  ;;  %p4571_p1 = scmp.lt.s32.totalorder %s9_s14, %s9_s14 }
   0x3   :  { %p4567_p0 = scmp.ne.s32.totalorder %s9_s14, %s4566_s18  ;;  %p4572_p2 = scmp.lt.s32.totalorder %s4566_s18, %s4566_s18 }
   0x5   :  { %p4573_p3 = por %p4572_p2, %p4571_p1 }
   0x7   :  { %p4574_p4 = pnand %p4573_p3, %p4567_p0 }
   0x9   :  { %4577 = shalt.err (!%p4574_p4)  }
   0xa   :  { %s4656_s19 = smov [#allocation5]   ;;  %s4578_s20 = scalar_lea.vmem %s13_s17, 32 }
   0xb   :  { %11 = dma.vmem_to_smem %s9_s14, 32, %s4656_s19, [#allocation4] }
   0xc   :  { %p4579_p5 = scmp.ne.s32.totalorder %s13_s17, %s4578_s20  ;;  %p4583_p6 = scmp.lt.s32.totalorder %s13_s17, %s13_s17 }
   0xd   :  { %p4584_p7 = scmp.lt.s32.totalorder %s4578_s20, %s4578_s20 }
   0xf   :  { %p4585_p8 = por %p4584_p7, %p4583_p6 }
  0x11   :  { %p4586_p9 = pnand %p4585_p8, %p4579_p5 }
  0x13   :  { %4589 = shalt.err (!%p4586_p9)  }
  0x14   :  { %s4657_s0 = smov [#allocation6]  }
  0x15   :  { %15 = dma.vmem_to_smem %s13_s17, 32, %s4657_s0, [#allocation4] }
  0x16   :  { %4634 = dma.done.wait [#allocation4], 64 }
  0x17   :  { %4635 = vsyncadd [#allocation4], 4294967232 }
  0x18   :  { %17 = sfence }
  0x19   :  { %18 = vsyncpa [#allocation8], 0 }
  0x1a   :  { %20 = vsyncpa [#allocation8 + $0x1], 0  ;;  %s4691_s1 = smov 0   ;;  %s4693_s21 = smov 0  }
  0x1b   :  { %s4695_s22 = smov 0   ;;  %s4697_s23 = smov 0  }
  0x1c LB: > { %s4712_s24 = sadd.s32 4294967295, %s4654_s23   ;;  %s4150_s25 = sadd.s32 4294967294, %s4654_s23   ;;  %s4654_s23 = sphi %s4697_s23, %s7172_s23   ;;  %s4650_s22 = sphi %s4695_s22, %s7171_s22   ;;  %s4646_s21 = sphi %s4693_s21, %s7170_s21   ;;  %s4642_s1 = sphi %s4691_s1, %s7169_s1  }
  0x1d   : > { %s4716_s26 = sadd.s32 1, %s4654_s23   ;;  %s59_s27 = sadd.s32 1, %s4650_s22 }
  0x1e   : > { %s56_s28 = ssub.s32 %s4654_s23, %s4716_s26  ;;  %p69_p10 = scmp.ne.s32.totalorder %s4650_s22, %s4646_s21 }
  0x1f   : > { %p57_p11 = scmp.eq.s32.totalorder %s56_s28, 0  ;;  %p70_p12 = scmp.eq.s32.totalorder %s4712_s24, 1 }
  0x20   : > { %p75_p13 = scmp.ne.s32.totalorder %s4646_s21, %s4642_s1  ;;  %p76_p0 = scmp.eq.s32.totalorder %s4150_s25, 1 }
  0x21   : > { %s4727_s29 = scalar_select %p57_p11, %s4650_s22, %s59_s27  }
  0x22   : > { %p4729_p1 = por %p70_p12, %p69_p10  ;;  %p4733_p2 = por %p76_p0, %p75_p13 }
  0x23   : > { %p4153_p3 = scmp.ge.s32.totalorder %s4654_s23, 1  ;;  %p102_p4 = scmp.lt.s32.totalorder %s4654_s23, 3 }
  0x25   : > { %p103_p5 = pnand %p4153_p3, %p102_p4 }
  0x26   : > { %p122_p6 = scmp.lt.s32.totalorder (!%p103_p5), %s4712_s24, 1  ;;  %vm127_vm0 = vcmask (!%p103_p5), 139264   ;;  %vm136_vm1 = vcmask (!%p103_p5), 7168   ;;  %vm150_vm2 = vcmask (!%p103_p5), 146568   ;;  %v4658_v0 = vmov (!%p103_p5), 0.0   ;;  %s4659_s10 = smov (!%p103_p5), 1  }
  0x27   : > { %106 = sbr.rel (%p103_p5) target bundleno = 2252 (0x8cc), region = 24  ;;  %128 = vst.msk [vmem:[#allocation2] sm:$0x1] (!%p103_p5), %vm127_vm0, %v4658_v0  ;;  %129 = vst.msk [vmem:[#allocation2 + $0x18] sm:$0x1] (!%p103_p5), %vm127_vm0, %v4658_v0  ;;  %vm139_vm3 = vcmask (!%p103_p5), 1024  }
  0x28   : > { %138 = vst.msk [vmem:[#allocation2 + $0x8] sm:$0xff] (!%p103_p5), %vm136_vm1, %v4658_v0  ;;  %142 = vst.msk [vmem:[#allocation2 + $0x20] sm:$0xff] (!%p103_p5), %vm136_vm1, %v4658_v0  ;;  %vm153_vm4 = vcmask (!%p103_p5), 140424   ;;  %vm236_vm5 = vcmask (!%p103_p5), 138248   ;;  %s4157_s11 = sld [smem:[#allocation5 + $0x1]] (!%p103_p5)  ;;  %s4897_s12 = sld [smem:[#allocation5 + $0x2]] (!%p103_p5) }
  0x29   : > { %130 = vst.msk [vmem:[#allocation2 + $0x30] sm:$0x1] (!%p103_p5), %vm127_vm0, %v4658_v0  ;;  %131 = vst.msk [vmem:[#allocation2 + $0x48] sm:$0x1] (!%p103_p5), %vm127_vm0, %v4658_v0  ;;  %s4901_s13 = sld [smem:[#allocation5 + $0x4]] (!%p103_p5)  ;;  %s4909_s14 = sld [smem:[#allocation5 + $0x5]] (!%p103_p5) }
  0x2a   : > { %132 = vst.msk [vmem:[#allocation2 + $0x11] sm:$0x1] (!%p103_p5), %vm127_vm0, %v4658_v0  ;;  %133 = vst.msk [vmem:[#allocation2 + $0x29] sm:$0x1] (!%p103_p5), %vm127_vm0, %v4658_v0  ;;  %s4660_s15 = smov (!%p103_p5), 127   ;;  %s4163_s16 = sld [smem:[#allocation5 + $0x7]] (!%p103_p5) }
  0x2b   : > { %134 = vst.msk [vmem:[#allocation2 + $0x41] sm:$0x1] (!%p103_p5), %vm127_vm0, %v4658_v0  ;;  %135 = vst.msk [vmem:[#allocation2 + $0x59] sm:$0x1] (!%p103_p5), %vm127_vm0, %v4658_v0  ;;  %s4661_s17 = smov (!%p103_p5), 126   ;;  %s4164_s18 = sld [smem:[#allocation5 + $0x8]] (!%p103_p5) }
  0x2c   : > { %145 = vst.msk [vmem:[#allocation2 + $0x38] sm:$0xff] (!%p103_p5), %vm136_vm1, %v4658_v0  ;;  %148 = vst.msk [vmem:[#allocation2 + $0x50] sm:$0xff] (!%p103_p5), %vm136_vm1, %v4658_v0  ;;  %s4166_s19 = sld [smem:[#allocation5 + $0xa]] (!%p103_p5)  ;;  %s4167_s20 = sld [smem:[#allocation5 + $0xb]] (!%p103_p5)  ;;  %vm680_vm6 = vcmask (!%p103_p5), 130048  }
  0x2d   : > { %164 = vst.msk [vmem:[#allocation3] sm:$0x1] (!%p103_p5), %vm127_vm0, %v4658_v0  ;;  %165 = vst.msk [vmem:[#allocation3 + $0x18] sm:$0x1] (!%p103_p5), %vm127_vm0, %v4658_v0  ;;  %s4169_s0 = sld [smem:[#allocation5 + $0xd]] (!%p103_p5)  ;;  %s4170_s25 = sld [smem:[#allocation5 + $0xe]] (!%p103_p5) }
  0x2e   : > { %166 = vst.msk [vmem:[#allocation3 + $0x30] sm:$0x1] %vm127_vm0, %v4658_v0  ;;  %167 = vst.msk [vmem:[#allocation3 + $0x48] sm:$0x1] %vm127_vm0, %v4658_v0  ;;  %s4791_s5 = scalar_select %p122_p6, %s4712_s24, 1  ;;  %v254_v13 = vstv %s4157_s11  ;;  %v268_v18 = vstv %s4897_s12 }
  0x2f   : > { %168 = vst.msk [vmem:[#allocation3 + $0x11] sm:$0x1] %vm127_vm0, %v4658_v0  ;;  %169 = vst.msk [vmem:[#allocation3 + $0x29] sm:$0x1] %vm127_vm0, %v4658_v0  ;;  %v290_v25 = vstv %s4901_s13  ;;  %v304_v28 = vstv %s4909_s14  ;;  %s4172_s27 = sld [smem:[#allocation5 + $0x10]]  ;;  %s4173_s28 = sld [smem:[#allocation5 + $0x11]] }
  0x30   : > { %170 = vst.msk [vmem:[#allocation3 + $0x41] sm:$0x1] %vm127_vm0, %v4658_v0  ;;  %171 = vst.msk [vmem:[#allocation3 + $0x59] sm:$0x1] %vm127_vm0, %v4658_v0  ;;  %s4460_s6 = sshll.u32 %s4791_s5, 6  ;;  %v326_v33 = vstv %s4163_s16  ;;  %s4175_s5 = sld [smem:[#allocation5 + $0x13]] }
  0x31   : > { %173 = vst.msk [vmem:[#allocation3 + $0x8] sm:$0xff] %vm136_vm1, %v4658_v0  ;;  %176 = vst.msk [vmem:[#allocation3 + $0x20] sm:$0xff] %vm136_vm1, %v4658_v0  ;;  %s4877_s9 = scalar_lea.vmem %s7164_s2, %s4460_s6  ;;  %v340_v36 = vstv %s4164_s18  ;;  %s4176_s6 = sld [smem:[#allocation5 + $0x14]] }
  0x32   : > { %179 = vst.msk [vmem:[#allocation3 + $0x38] sm:$0xff] %vm136_vm1, %v4658_v0  ;;  %182 = vst.msk [vmem:[#allocation3 + $0x50] sm:$0xff] %vm136_vm1, %v4658_v0  ;;  %v196_v1 = vld [vmem:[%s4877_s9] sm:$0xff]  ;;  %v198_v2 = vld [vmem:[%s4877_s9 + $0x10] sm:$0xff]  ;;  %v363_v39 = vstv %s4166_s19  ;;  %v377_v44 = vstv %s4167_s20  ;;  %s4178_s7 = sld [smem:[#allocation5 + $0x16]]  ;;  %s4179_s8 = sld [smem:[#allocation5 + $0x17]] }
  0x33   : > { %137 = vst.msk [vmem:[#allocation2] sm:$0xff] %vm136_vm1, %v4658_v0  ;;  %141 = vst.msk [vmem:[#allocation2 + $0x18] sm:$0xff] %vm136_vm1, %v4658_v0  ;;  %212 = vrot.lane.b32.xlu0 %v196_v1, %s4659_s10  ;;  %216 = vrot.lane.b32.xlu1 %v198_v2, %s4659_s10  ;;  %v197_v3 = vld [vmem:[%s4877_s9 + $0x8] sm:$0xff]  ;;  %v199_v4 = vld [vmem:[%s4877_s9 + $0x18] sm:$0xff]  ;;  %s4181_s11 = sld [smem:[#allocation5 + $0x19]]  ;;  %s4182_s12 = sld [smem:[#allocation5 + $0x1a]] }
  0x34   : > { %152 = vst.msk [vmem:[#allocation2 + $0x8] sm:$0xff] %vm150_vm2, %v4658_v0  ;;  %156 = vst.msk [vmem:[#allocation2 + $0x20] sm:$0xff] %vm150_vm2, %v4658_v0  ;;  %v200_v5 = vld [vmem:[%s4877_s9 + $0x20] sm:$0xff]  ;;  %v201_v6 = vld [vmem:[%s4877_s9 + $0x28] sm:$0xff]  ;;  %v399_v49 = vstv %s4169_s0  ;;  %v413_v52 = vstv %s4170_s25  ;;  %s4184_s13 = sld [smem:[#allocation5 + $0x1c]]  ;;  %s4185_s14 = sld [smem:[#allocation5 + $0x1d]] }
  0x35   : > { %140 = vst.msk [vmem:[#allocation2 + $0x10] sm:$0x3] %vm139_vm3, %v4658_v0  ;;  %143 = vst.msk [vmem:[#allocation2 + $0x28] sm:$0x3] %vm139_vm3, %v4658_v0  ;;  %v202_v7 = vld [vmem:[%s4877_s9 + $0x30] sm:$0xff]  ;;  %v203_v8 = vld [vmem:[%s4877_s9 + $0x38] sm:$0xff]  ;;  %v435_v57 = vstv %s4172_s27  ;;  %v449_v60 = vstv %s4173_s28 }
  0x36   : > { %144 = vst.msk [vmem:[#allocation2 + $0x30] sm:$0xff] %vm136_vm1, %v4658_v0  ;;  %147 = vst.msk [vmem:[#allocation2 + $0x48] sm:$0xff] %vm136_vm1, %v4658_v0  ;;  %v472_v63 = vstv %s4175_s5  ;;  %s4187_s16 = sld [smem:[#allocation5 + $0x1f]]  ;;  %s4188_s18 = sld [smem:[#allocation5 + $0x20]] }
  0x37   : > { %146 = vst.msk [vmem:[#allocation2 + $0x40] sm:$0x3] %vm139_vm3, %v4658_v0  ;;  %149 = vst.msk [vmem:[#allocation2 + $0x58] sm:$0x3] %vm139_vm3, %v4658_v0  ;;  %214 = vrot.lane.b32.xlu0 %v197_v3, %s4659_s10  ;;  %218 = vrot.lane.b32.xlu1 %v199_v4, %s4659_s10  ;;  %v486_v4 = vstv %s4176_s6  ;;  %s4190_s19 = sld [smem:[#allocation5 + $0x22]]  ;;  %s4191_s20 = sld [smem:[#allocation5 + $0x23]] }
  0x38   : > { %159 = vst.msk [vmem:[#allocation2 + $0x38] sm:$0xff] %vm150_vm2, %v4658_v0  ;;  %162 = vst.msk [vmem:[#allocation2 + $0x50] sm:$0xff] %vm150_vm2, %v4658_v0  ;;  %s5042_s0 = sld [smem:[#allocation5 + $0x26]]  ;;  %s4193_s25 = sld [smem:[#allocation5 + $0x25]] }
  0x39   : > { %172 = vst.msk [vmem:[#allocation3] sm:$0xff] %vm136_vm1, %v4658_v0  ;;  %175 = vst.msk [vmem:[#allocation3 + $0x18] sm:$0xff] %vm136_vm1, %v4658_v0  ;;  %s5050_s27 = sld [smem:[#allocation5 + $0x28]]  ;;  %s5057_s28 = sld [smem:[#allocation5 + $0x29]] }
  0x3a   : > { %174 = vst.msk [vmem:[#allocation3 + $0x10] sm:$0x3] %vm139_vm3, %v4658_v0  ;;  %177 = vst.msk [vmem:[#allocation3 + $0x28] sm:$0x3] %vm139_vm3, %v4658_v0  ;;  %s5064_s5 = sld [smem:[#allocation5 + $0x2b]]  ;;  %s5071_s6 = sld [smem:[#allocation5 + $0x2c]] }
  0x3b   : > { %178 = vst.msk [vmem:[#allocation3 + $0x30] sm:$0xff] %vm136_vm1, %v4658_v0  ;;  %181 = vst.msk [vmem:[#allocation3 + $0x48] sm:$0xff] %vm136_vm1, %v4658_v0  ;;  %220 = vrot.lane.b32.xlu0 %v200_v5, %s4659_s10  ;;  %222 = vrot.lane.b32.xlu1 %v201_v6, %s4659_s10 }
  0x3c   : > { %180 = vst.msk [vmem:[#allocation3 + $0x40] sm:$0x3] %vm139_vm3, %v4658_v0  ;;  %183 = vst.msk [vmem:[#allocation3 + $0x58] sm:$0x3] %vm139_vm3, %v4658_v0 }
  0x3d   : > { %185 = vst.msk [vmem:[#allocation3 + $0x8] sm:$0xff] %vm150_vm2, %v4658_v0  ;;  %188 = vst.msk [vmem:[#allocation3 + $0x20] sm:$0xff] %vm150_vm2, %v4658_v0 }
  0x3e   : > { %191 = vst.msk [vmem:[#allocation3 + $0x38] sm:$0xff] %vm150_vm2, %v4658_v0  ;;  %194 = vst.msk [vmem:[#allocation3 + $0x50] sm:$0xff] %vm150_vm2, %v4658_v0 }
  0x3f   : > { %151 = vst.msk [vmem:[#allocation2] sm:$0xff] %vm150_vm2, %v4658_v0  ;;  %155 = vst.msk [vmem:[#allocation2 + $0x18] sm:$0xff] %vm150_vm2, %v4658_v0  ;;  %224 = vrot.lane.b32.xlu0 %v202_v7, %s4659_s10  ;;  %226 = vrot.lane.b32.xlu1 %v203_v8, %s4659_s10 }
  0x40   : > { %154 = vst.msk [vmem:[#allocation2 + $0x10] sm:$0x3] %vm153_vm4, %v4658_v0  ;;  %157 = vst.msk [vmem:[#allocation2 + $0x28] sm:$0x3] %vm153_vm4, %v4658_v0 }
  0x41   : > { %158 = vst.msk [vmem:[#allocation2 + $0x30] sm:$0xff] %vm150_vm2, %v4658_v0  ;;  %161 = vst.msk [vmem:[#allocation2 + $0x48] sm:$0xff] %vm150_vm2, %v4658_v0 }
  0x42   : > { %160 = vst.msk [vmem:[#allocation2 + $0x40] sm:$0x3] %vm153_vm4, %v4658_v0  ;;  %163 = vst.msk [vmem:[#allocation2 + $0x58] sm:$0x3] %vm153_vm4, %v4658_v0 }
  0x43   : > { %184 = vst.msk [vmem:[#allocation3] sm:$0xff] %vm150_vm2, %v4658_v0  ;;  %187 = vst.msk [vmem:[#allocation3 + $0x18] sm:$0xff] %vm150_vm2, %v4658_v0 }
  0x44   : > { %186 = vst.msk [vmem:[#allocation3 + $0x10] sm:$0x3] %vm153_vm4, %v4658_v0  ;;  %189 = vst.msk [vmem:[#allocation3 + $0x28] sm:$0x3] %vm153_vm4, %v4658_v0 }
  0x45   : > { %190 = vst.msk [vmem:[#allocation3 + $0x30] sm:$0xff] %vm150_vm2, %v4658_v0  ;;  %193 = vst.msk [vmem:[#allocation3 + $0x48] sm:$0xff] %vm150_vm2, %v4658_v0 }
  0x46   : > { %192 = vst.msk [vmem:[#allocation3 + $0x40] sm:$0x3] %vm153_vm4, %v4658_v0  ;;  %195 = vst.msk [vmem:[#allocation3 + $0x58] sm:$0x3] %vm153_vm4, %v4658_v0 }
  0xa5   : > { %v213_v9 = vpop.permute.xlu0 %212  ;;  %v217_v10 = vpop.permute.xlu1 %216 }
  0xa6   : > { %237 = vst.msk [vmem:[#allocation2 + $0x1] sm:$0xff] %vm236_vm5, %v213_v9  ;;  %239 = vst.msk [vmem:[#allocation2 + $0x19] sm:$0xff] %vm236_vm5, %v217_v10  ;;  %v508_v9 = vstv %s4178_s7  ;;  %s5078_s7 = sld [smem:[#allocation5 + $0x2e]] }
  0xa9   : > { %v215_v11 = vpop.permute.xlu0 %214  ;;  %v219_v12 = vpop.permute.xlu1 %218 }
  0xaa   : > { %238 = vst.msk [vmem:[#allocation2 + $0x9] sm:$0xff] %vm236_vm5, %v215_v11  ;;  %240 = vst.msk [vmem:[#allocation2 + $0x21] sm:$0xff] %vm236_vm5, %v219_v12 }
  0xad   : > { %v4903_v14 = vld [vmem:[#allocation2] sm:$0xff]  ;;  %v221_v15 = vpop.permute.xlu0 %220  ;;  %v223_v16 = vpop.permute.xlu1 %222  ;;  %v4942_v38 = vld [vmem:[#allocation2 + $0x18] sm:$0xff] }
  0xae   : > { %v255_v17 = vmul.f32 %v254_v13, %v4903_v14  ;;  %241 = vst.msk [vmem:[#allocation2 + $0x31] sm:$0xff] %vm236_vm5, %v221_v15  ;;  %242 = vst.msk [vmem:[#allocation2 + $0x39] sm:$0xff] %vm236_vm5, %v223_v16  ;;  %v269_v22 = vmul.f32 %v268_v18, %v4903_v14  ;;  %v4918_v24 = vld [vmem:[#allocation2 + $0x1] sm:$0xff]  ;;  %v364_v42 = vmul.f32 %v363_v39, %v4942_v38  ;;  %v4956_v48 = vld [vmem:[#allocation2 + $0x19] sm:$0xff] }
  0xaf   : > { %v291_v26 = vmul.f32 %v290_v25, %v4918_v24  ;;  %v305_v30 = vmul.f32 %v304_v28, %v4918_v24  ;;  %v378_v46 = vmul.f32 %v377_v44, %v4942_v38  ;;  %v400_v50 = vmul.f32 %v399_v49, %v4956_v48 }
  0xb0   : > { %259 = vrot.lane.b32.xlu0 %v255_v17, %s4660_s15  ;;  %v414_v54 = vmul.f32 %v413_v52, %v4956_v48 }
  0xb1   : > { %v4912_v19 = vld [vmem:[#allocation2 + $0x8] sm:$0xff]  ;;  %v225_v20 = vpop.permute.xlu0 %224  ;;  %v227_v21 = vpop.permute.xlu1 %226  ;;  %v4950_v45 = vld [vmem:[#allocation2 + $0x20] sm:$0xff] }
  0xb2   : > { %v256_v23 = vmul.f32 %v254_v13, %v4912_v19  ;;  %243 = vst.msk [vmem:[#allocation2 + $0x49] sm:$0xff] %vm236_vm5, %v225_v20  ;;  %244 = vst.msk [vmem:[#allocation2 + $0x51] sm:$0xff] %vm236_vm5, %v227_v21  ;;  %v270_v27 = vmul.f32 %v268_v18, %v4912_v19  ;;  %v4926_v29 = vld [vmem:[#allocation2 + $0x9] sm:$0xff]  ;;  %v365_v47 = vmul.f32 %v363_v39, %v4950_v45  ;;  %v4962_v53 = vld [vmem:[#allocation2 + $0x21] sm:$0xff]  ;;  %v522_v13 = vstv %s4179_s8  ;;  %s247_s8 = sld [smem:[#allocation5]] }
  0xb3   : > { %v292_v31 = vmul.f32 %v290_v25, %v4926_v29  ;;  %v4932_v32 = vld [vmem:[#allocation2 + $0x2] sm:$0xff]  ;;  %v306_v35 = vmul.f32 %v304_v28, %v4926_v29  ;;  %v4938_v37 = vld [vmem:[#allocation2 + $0xa] sm:$0xff]  ;;  %v379_v51 = vmul.f32 %v377_v44, %v4950_v45  ;;  %v401_v55 = vmul.f32 %v399_v49, %v4962_v53  ;;  %v4968_v56 = vld [vmem:[#allocation2 + $0x1a] sm:$0xff] }
  0xb4   : > { %273 = vrot.lane.b32.xlu0 %v269_v22, %s4661_s17  ;;  %261 = vrot.lane.b32.xlu1 %v256_v23, %s4660_s15  ;;  %v327_v34 = vmul.f32 %v326_v33, %v4932_v32  ;;  %v341_v40 = vmul.f32 %v340_v36, %v4932_v32  ;;  %v328_v41 = vmul.f32 %v326_v33, %v4938_v37  ;;  %v4974_v61 = vld [vmem:[#allocation2 + $0x22] sm:$0xff]  ;;  %v544_v18 = vstv %s4181_s11  ;;  %s5085_s11 = sld [smem:[#allocation5 + $0x2f]] }
  0xb5   : > { %v342_v43 = vmul.f32 %v340_v36, %v4938_v37  ;;  %v436_v58 = vmul.f32 %v435_v57, %v4968_v56  ;;  %v415_v59 = vmul.f32 %v413_v52, %v4962_v53  ;;  %v4978_v62 = vld [vmem:[#allocation2 + $0x30] sm:$0xff]  ;;  %v450_v0 = vmul.f32 %v449_v60, %v4968_v56  ;;  %v4985_v3 = vld [vmem:[#allocation2 + $0x38] sm:$0xff] }
  0xb6   : > { %v437_v1 = vmul.f32 %v435_v57, %v4974_v61  ;;  %v473_v2 = vmul.f32 %v472_v63, %v4978_v62  ;;  %v451_v5 = vmul.f32 %v449_v60, %v4974_v61  ;;  %v474_v6 = vmul.f32 %v472_v63, %v4985_v3  ;;  %v4992_v8 = vld [vmem:[#allocation2 + $0x31] sm:$0xff]  ;;  %v4998_v12 = vld [vmem:[#allocation2 + $0x39] sm:$0xff] }
  0xb7   : > { %v487_v7 = vmul.f32 %v486_v4, %v4978_v62  ;;  %v488_v10 = vmul.f32 %v486_v4, %v4985_v3  ;;  %v509_v11 = vmul.f32 %v508_v9, %v4992_v8  ;;  %v510_v15 = vmul.f32 %v508_v9, %v4998_v12  ;;  %v5004_v17 = vld [vmem:[#allocation2 + $0x32] sm:$0xff]  ;;  %v5010_v22 = vld [vmem:[#allocation2 + $0x3a] sm:$0xff] }
  0xb8   : > { %295 = vrot.lane.b32.xlu0 %v291_v26, %s4660_s15  ;;  %275 = vrot.lane.b32.xlu1 %v270_v27, %s4661_s17  ;;  %v523_v16 = vmul.f32 %v522_v13, %v4992_v8  ;;  %v524_v20 = vmul.f32 %v522_v13, %v4998_v12  ;;  %v545_v21 = vmul.f32 %v544_v18, %v5004_v17  ;;  %v558_v23 = vstv %s4182_s12  ;;  %s5089_s12 = sld [smem:[#allocation5 + $0x3]] }
  0xb9   : > { %v5014_v25 = vld [vmem:[#allocation2 + $0x48] sm:$0xff]  ;;  %v581_v26 = vstv %s4184_s13  ;;  %v546_v27 = vmul.f32 %v544_v18, %v5010_v22  ;;  %v559_v28 = vmul.f32 %v558_v23, %v5004_v17  ;;  %v595_v33 = vstv %s4185_s14  ;;  %s5094_s13 = sld [smem:[#allocation5 + $0x31]]  ;;  %s5102_s14 = sld [smem:[#allocation5 + $0x32]] }
  0xba   : > { %v596_v36 = vmul.f32 %v595_v33, %v5014_v25  ;;  %v5028_v39 = vld [vmem:[#allocation2 + $0x49] sm:$0xff]  ;;  %v631_v44 = vstv %s4188_s18  ;;  %v810_v9 = vstv %s5064_s5  ;;  %v824_v13 = vstv %s5071_s6  ;;  %s5114_s18 = sld [smem:[#allocation5 + $0x34]]  ;;  %s5160_s5 = sld [smem:[#allocation5 + $0x3b]] }
  0xbb   : > { %v5040_v49 = vld [vmem:[#allocation2 + $0x4a] sm:$0xff]  ;;  %v846_v18 = vstv %s5078_s7  ;;  %s5165_s6 = sld [smem:[#allocation5 + $0xf]]  ;;  %s5171_s7 = sld [smem:[#allocation5 + $0x3d]] }
  0xbc   : > { %309 = vrot.lane.b32.xlu0 %v305_v30, %s4661_s17  ;;  %297 = vrot.lane.b32.xlu1 %v292_v31, %s4660_s15  ;;  %v582_v30 = vmul.f32 %v581_v26, %v5014_v25  ;;  %v5021_v31 = vld [vmem:[#allocation2 + $0x50] sm:$0xff] }
  0xc0   : > { %331 = vrot.lane.b32.xlu0 %v327_v34, %s4660_s15  ;;  %311 = vrot.lane.b32.xlu1 %v306_v35, %s4661_s17  ;;  %v560_v34 = vmul.f32 %v558_v23, %v5010_v22  ;;  %v583_v35 = vmul.f32 %v581_v26, %v5021_v31  ;;  %v847_v26 = vmul.f32 %v846_v18, %v4942_v38 }
  0xc4   : > { %345 = vrot.lane.b32.xlu0 %v341_v40, %s4661_s17  ;;  %333 = vrot.lane.b32.xlu1 %v328_v41, %s4660_s15  ;;  %v617_v40 = vstv %s4187_s16  ;;  %v597_v41 = vmul.f32 %v595_v33, %v5021_v31  ;;  %s5107_s16 = sld [smem:[#allocation5 + $0x6]] }
  0xc8   : > { %368 = vrot.lane.b32.xlu0 %v364_v42, %s4660_s15  ;;  %347 = vrot.lane.b32.xlu1 %v342_v43, %s4661_s17  ;;  %v618_v42 = vmul.f32 %v617_v40, %v5028_v39  ;;  %v5034_v43 = vld [vmem:[#allocation2 + $0x51] sm:$0xff] }
  0xcc   : > { %382 = vrot.lane.b32.xlu0 %v378_v46, %s4661_s17  ;;  %370 = vrot.lane.b32.xlu1 %v365_v47, %s4660_s15  ;;  %v619_v46 = vmul.f32 %v617_v40, %v5034_v43  ;;  %v632_v47 = vmul.f32 %v631_v44, %v5028_v39 }
  0xd0   : > { %404 = vrot.lane.b32.xlu0 %v400_v50, %s4660_s15  ;;  %384 = vrot.lane.b32.xlu1 %v379_v51, %s4661_s17  ;;  %v653_v50 = vstv %s4190_s19  ;;  %v633_v51 = vmul.f32 %v631_v44, %v5034_v43  ;;  %s5122_s19 = sld [smem:[#allocation5 + $0x35]] }
  0xd1   : > { %v654_v52 = vmul.f32 %v653_v50, %v5040_v49 }
  0xd4   : > { %418 = vrot.lane.b32.xlu0 %v414_v54, %s4661_s17  ;;  %406 = vrot.lane.b32.xlu1 %v401_v55, %s4660_s15  ;;  %v5048_v54 = vld [vmem:[#allocation2 + $0x52] sm:$0xff]  ;;  %v667_v55 = vstv %s4191_s20  ;;  %s5127_s20 = sld [smem:[#allocation5 + $0x9]] }
  0xd5   : > { %v655_v57 = vmul.f32 %v653_v50, %v5048_v54  ;;  %v669_v60 = vmul.f32 %v667_v55, %v5048_v54 }
  0xd8   : > { %440 = vrot.lane.b32.xlu0 %v436_v58, %s4660_s15  ;;  %420 = vrot.lane.b32.xlu1 %v415_v59, %s4661_s17  ;;  %v668_v58 = vmul.f32 %v667_v55, %v5040_v49  ;;  %v752_v59 = vstv %s5042_s0  ;;  %v826_v55 = vmul.f32 %v824_v13, %v4938_v37  ;;  %s5133_s0 = sld [smem:[#allocation5 + $0x37]] }
  0xd9   : > { %v753_v63 = vmul.f32 %v752_v59, %v4903_v14 }
  0xdc   : > { %454 = vrot.lane.b32.xlu0 %v450_v0, %s4661_s17  ;;  %442 = vrot.lane.b32.xlu1 %v437_v1, %s4660_s15  ;;  %v738_v0 = vstv %s4193_s25  ;;  %v774_v1 = vstv %s5050_s27  ;;  %s5141_s25 = sld [smem:[#allocation5 + $0x38]]  ;;  %s5146_s27 = sld [smem:[#allocation5 + $0xc]] }
  0xdd   : > { %v775_v4 = vmul.f32 %v774_v1, %v4918_v24 }
  0xe0   : > { %456 = vrot.lane.b32.xlu1 %v451_v5, %s4661_s17  ;;  %477 = vrot.lane.b32.xlu0 %v473_v2, %s4660_s15  ;;  %v739_v2 = vmul.f32 %v738_v0, %v4903_v14  ;;  %v788_v5 = vstv %s5057_s28  ;;  %s5152_s28 = sld [smem:[#allocation5 + $0x3a]] }
  0xe1   : > { %v790_v23 = vmul.f32 %v788_v5, %v4926_v29 }
  0xe4   : > { %479 = vrot.lane.b32.xlu1 %v474_v6, %s4660_s15  ;;  %491 = vrot.lane.b32.xlu0 %v487_v7, %s4661_s17  ;;  %v740_v6 = vmul.f32 %v738_v0, %v4912_v19  ;;  %v789_v7 = vmul.f32 %v788_v5, %v4918_v24 }
  0xe8   : > { %493 = vrot.lane.b32.xlu1 %v488_v10, %s4661_s17  ;;  %513 = vrot.lane.b32.xlu0 %v509_v11, %s4660_s15  ;;  %v754_v10 = vmul.f32 %v752_v59, %v4912_v19  ;;  %v811_v11 = vmul.f32 %v810_v9, %v4932_v32  ;;  %v896_v59 = vstv %s5102_s14  ;;  %s5203_s14 = sld [smem:[#allocation5 + $0x15]] }
  0xe9   : > { %v897_v5 = vmul.f32 %v896_v59, %v4956_v48 }
  0xec   : > { %515 = vrot.lane.b32.xlu1 %v510_v15, %s4660_s15  ;;  %527 = vrot.lane.b32.xlu0 %v523_v16, %s4661_s17  ;;  %v776_v15 = vmul.f32 %v774_v1, %v4926_v29  ;;  %v825_v16 = vmul.f32 %v824_v13, %v4932_v32 }
  0xf0   : > { %529 = vrot.lane.b32.xlu1 %v524_v20, %s4661_s17  ;;  %549 = vrot.lane.b32.xlu0 %v545_v21, %s4660_s15  ;;  %v248_v20 = vstv %s247_s8  ;;  %s5179_s8 = sld [smem:[#allocation5 + $0x3e]] }
  0xf4   : > { %551 = vrot.lane.b32.xlu1 %v546_v27, %s4660_s15  ;;  %563 = vrot.lane.b32.xlu0 %v559_v28, %s4661_s17  ;;  %v249_v27 = vmul.f32 %v248_v20, %v4903_v14  ;;  %v860_v28 = vstv %s5085_s11  ;;  %s5184_s11 = sld [smem:[#allocation5 + $0x12]] }
  0xf5   : > { %v861_v40 = vmul.f32 %v860_v28, %v4942_v38 }
  0xf8   : > { %565 = vrot.lane.b32.xlu1 %v560_v34, %s4661_s17  ;;  %586 = vrot.lane.b32.xlu0 %v582_v30, %s4660_s15  ;;  %v284_v30 = vstv %s5089_s12  ;;  %s5190_s12 = sld [smem:[#allocation5 + $0x40]] }
  0xf9   : > { %v285_v44 = vmul.f32 %v284_v30, %v4918_v24 }
  0xfc   : > { %588 = vrot.lane.b32.xlu1 %v583_v35, %s4660_s15  ;;  %600 = vrot.lane.b32.xlu0 %v596_v36, %s4661_s17  ;;  %v812_v36 = vmul.f32 %v810_v9, %v4938_v37 }
 0x100   : > { %602 = vrot.lane.b32.xlu1 %v597_v41, %s4661_s17  ;;  %622 = vrot.lane.b32.xlu0 %v618_v42, %s4660_s15  ;;  %v250_v41 = vmul.f32 %v248_v20, %v4912_v19 }
 0x104   : > { %624 = vrot.lane.b32.xlu1 %v619_v46, %s4660_s15  ;;  %636 = vrot.lane.b32.xlu0 %v632_v47, %s4661_s17  ;;  %v882_v46 = vstv %s5094_s13  ;;  %s5198_s13 = sld [smem:[#allocation5 + $0x41]] }
 0x108   : > { %638 = vrot.lane.b32.xlu1 %v633_v51, %s4661_s17  ;;  %658 = vrot.lane.b32.xlu0 %v654_v52, %s4660_s15 }
 0x10c   : > { %660 = vrot.lane.b32.xlu1 %v655_v57, %s4660_s15  ;;  %672 = vrot.lane.b32.xlu0 %v668_v58, %s4661_s17  ;;  %v883_v57 = vmul.f32 %v882_v46, %v4956_v48  ;;  %v286_v58 = vmul.f32 %v284_v30, %v4926_v29 }
 0x110   : > { %674 = vrot.lane.b32.xlu1 %v669_v60, %s4661_s17  ;;  %757 = vrot.lane.b32.xlu0 %v753_v63, %s4661_s17  ;;  %v320_v60 = vstv %s5107_s16  ;;  %s5209_s16 = sld [smem:[#allocation5 + $0x43]] }
 0x111   : > { %v322_v20 = vmul.f32 %v320_v60, %v4938_v37 }
 0x114   : > { %743 = vrot.lane.b32.xlu1 %v739_v2, %s4660_s15  ;;  %779 = vrot.lane.b32.xlu0 %v775_v4, %s4660_s15  ;;  %v848_v4 = vmul.f32 %v846_v18, %v4950_v45 }
 0x118   : > { %745 = vrot.lane.b32.xlu1 %v740_v6, %s4660_s15  ;;  %793 = vrot.lane.b32.xlu0 %v789_v7, %s4661_s17  ;;  %v321_v6 = vmul.f32 %v320_v60, %v4932_v32  ;;  %v918_v7 = vstv %s5114_s18  ;;  %s5217_s18 = sld [smem:[#allocation5 + $0x44]] }
 0x119   : > { %v920_v60 = vmul.f32 %v918_v7, %v4974_v61 }
 0x11c   : > { %759 = vrot.lane.b32.xlu1 %v754_v10, %s4661_s17  ;;  %815 = vrot.lane.b32.xlu0 %v811_v11, %s4660_s15 }
 0x120   : > { %781 = vrot.lane.b32.xlu1 %v776_v15, %s4660_s15  ;;  %829 = vrot.lane.b32.xlu0 %v825_v16, %s4661_s17  ;;  %v862_v15 = vmul.f32 %v860_v28, %v4950_v45  ;;  %v919_v16 = vmul.f32 %v918_v7, %v4968_v56 }
 0x122   : > { %v260_v21 = vpop.permute.xlu0 %259 }
 0x123   : > { %v265_v33 = vadd.f32 %v260_v21, %v249_v27  ;;  %v932_v21 = vstv %s5122_s19  ;;  %s5222_s19 = sld [smem:[#allocation5 + $0x18]] }
 0x124   : > { %795 = vrot.lane.b32.xlu1 %v790_v23, %s4661_s17  ;;  %851 = vrot.lane.b32.xlu0 %v847_v26, %s4660_s15  ;;  %v357_v23 = vstv %s5127_s20  ;;  %s5228_s20 = sld [smem:[#allocation5 + $0x46]] }
 0x126   : > { %v262_v34 = vpop.permute.xlu1 %261  ;;  %v274_v35 = vpop.permute.xlu0 %273 }
 0x127   : > { %v279_v42 = vadd.f32 %v274_v35, %v265_v33  ;;  %v266_v47 = vadd.f32 %v262_v34, %v250_v41  ;;  %v884_v33 = vmul.f32 %v882_v46, %v4962_v53  ;;  %v933_v34 = vmul.f32 %v932_v21, %v4968_v56 }
 0x128   : > { %817 = vrot.lane.b32.xlu1 %v812_v36, %s4660_s15  ;;  %865 = vrot.lane.b32.xlu0 %v861_v40, %s4661_s17  ;;  %v358_v35 = vmul.f32 %v357_v23, %v4942_v38  ;;  %v954_v36 = vstv %s5133_s0  ;;  %v898_v46 = vmul.f32 %v896_v59, %v4962_v53  ;;  %s5236_s0 = sld [smem:[#allocation5 + $0x47]] }
 0x129   : > { %v287_v50 = vadd.f32 %v285_v44, %v279_v42 }
 0x12a   : > { %v276_v51 = vpop.permute.xlu1 %275  ;;  %v296_v52 = vpop.permute.xlu0 %295 }
 0x12b   : > { %v280_v19 = vadd.f32 %v276_v51, %v266_v47  ;;  %v301_v63 = vadd.f32 %v296_v52, %v287_v50  ;;  %v955_v47 = vmul.f32 %v954_v36, %v4978_v62  ;;  %v359_v51 = vmul.f32 %v357_v23, %v4950_v45 }
 0x12c   : > { %831 = vrot.lane.b32.xlu1 %v826_v55, %s4661_s17  ;;  %887 = vrot.lane.b32.xlu0 %v883_v57, %s4660_s15  ;;  %v968_v52 = vstv %s5141_s25  ;;  %v393_v55 = vstv %s5146_s27  ;;  %s5241_s25 = sld [smem:[#allocation5 + $0x1b]]  ;;  %s5247_s27 = sld [smem:[#allocation5 + $0x4a]] }
 0x12d   : > { %v288_v0 = vadd.f32 %v286_v58, %v280_v19 }
 0x12e   : > { %v298_v1 = vpop.permute.xlu1 %297  ;;  %v310_v2 = vpop.permute.xlu0 %309 }
 0x12f   : > { %v315_v29 = vadd.f32 %v310_v2, %v301_v63  ;;  %v302_v9 = vadd.f32 %v298_v1, %v288_v0  ;;  %v969_v63 = vmul.f32 %v968_v52, %v4978_v62  ;;  %v394_v0 = vmul.f32 %v393_v55, %v4956_v48 }
 0x130   : > { %853 = vrot.lane.b32.xlu1 %v848_v4, %s4660_s15  ;;  %901 = vrot.lane.b32.xlu0 %v897_v5, %s4661_s17  ;;  %v990_v1 = vstv %s5152_s28  ;;  %v395_v48 = vmul.f32 %v393_v55, %v4962_v53  ;;  %s5255_s28 = sld [smem:[#allocation5 + $0x4c]] }
 0x131   : > { %v323_v10 = vadd.f32 %v321_v6, %v315_v29  ;;  %v934_v6 = vmul.f32 %v932_v21, %v4974_v61  ;;  %v991_v7 = vmul.f32 %v990_v1, %v4992_v8 }
 0x132   : > { %v312_v11 = vpop.permute.xlu1 %311  ;;  %v332_v13 = vpop.permute.xlu0 %331 }
 0x133   : > { %v316_v18 = vadd.f32 %v312_v11, %v302_v9  ;;  %v337_v26 = vadd.f32 %v332_v13, %v323_v10  ;;  %v1004_v10 = vstv %s5160_s5  ;;  %v429_v11 = vstv %s5165_s6  ;;  %s5260_s5 = sld [smem:[#allocation5 + $0x1e]]  ;;  %s5266_s6 = sld [smem:[#allocation5 + $0x4d]] }
 0x134   : > { %867 = vrot.lane.b32.xlu1 %v862_v15, %s4661_s17  ;;  %923 = vrot.lane.b32.xlu0 %v919_v16, %s4660_s15  ;;  %v1005_v21 = vmul.f32 %v1004_v10, %v4992_v8  ;;  %v430_v23 = vmul.f32 %v429_v11, %v4968_v56  ;;  %v431_v56 = vmul.f32 %v429_v11, %v4974_v61 }
 0x135   : > { %v324_v27 = vadd.f32 %v322_v20, %v316_v18  ;;  %v956_v20 = vmul.f32 %v954_v36, %v4985_v3  ;;  %v1040_v36 = vstv %s5179_s8  ;;  %s5278_s8 = sld [smem:[#allocation5 + $0x4f]] }
 0x136   : > { %v334_v30 = vpop.permute.xlu1 %333  ;;  %v346_v28 = vpop.permute.xlu0 %345 }
 0x137   : > { %v351_v37 = vadd.f32 %v346_v28, %v337_v26  ;;  %v338_v40 = vadd.f32 %v334_v30, %v324_v27  ;;  %v1026_v26 = vstv %s5171_s7  ;;  %s5276_s7 = sld [smem:[#allocation5 + $0x49]] }
 0x138   : > { %889 = vrot.lane.b32.xlu1 %v884_v33, %s4660_s15  ;;  %937 = vrot.lane.b32.xlu0 %v933_v34, %s4661_s17  ;;  %v970_v34 = vmul.f32 %v968_v52, %v4985_v3  ;;  %v1062_v52 = vstv %s5190_s12  ;;  %s5291_s12 = sld [smem:[#allocation5 + $0x50]] }
 0x139   : > { %v360_v41 = vadd.f32 %v358_v35, %v351_v37  ;;  %v1027_v37 = vmul.f32 %v1026_v26, %v5004_v17 }
 0x13a   : > { %v348_v42 = vpop.permute.xlu1 %347  ;;  %v369_v44 = vpop.permute.xlu0 %368 }
 0x13b   : > { %v352_v50 = vadd.f32 %v348_v42, %v338_v40  ;;  %v374_v57 = vadd.f32 %v369_v44, %v360_v41  ;;  %v466_v40 = vstv %s5184_s11  ;;  %s5283_s11 = sld [smem:[#allocation5 + $0x21]] }
 0x13c   : > { %903 = vrot.lane.b32.xlu1 %v898_v46, %s4661_s17  ;;  %959 = vrot.lane.b32.xlu0 %v955_v47, %s4660_s15  ;;  %v992_v47 = vmul.f32 %v990_v1, %v4998_v12 }
 0x13d   : > { %v361_v19 = vadd.f32 %v359_v51, %v352_v50  ;;  %v1041_v50 = vmul.f32 %v1040_v36, %v5004_v17  ;;  %v467_v51 = vmul.f32 %v466_v40, %v4978_v62  ;;  %v468_v62 = vmul.f32 %v466_v40, %v4985_v3 }
 0x13e   : > { %v371_v58 = vpop.permute.xlu1 %370  ;;  %v383_v59 = vpop.permute.xlu0 %382 }
 0x13f   : > { %v388_v45 = vadd.f32 %v383_v59, %v374_v57  ;;  %v375_v2 = vadd.f32 %v371_v58, %v361_v19  ;;  %v1006_v59 = vmul.f32 %v1004_v10, %v4998_v12 }
 0x140   : > { %925 = vrot.lane.b32.xlu1 %v920_v60, %s4660_s15  ;;  %973 = vrot.lane.b32.xlu0 %v969_v63, %s4661_s17  ;;  %v1063_v60 = vmul.f32 %v1062_v52, %v5014_v25 }
 0x141   : > { %v396_v4 = vadd.f32 %v394_v0, %v388_v45  ;;  %v1076_v45 = vstv %s5198_s13  ;;  %v502_v0 = vstv %s5203_s14  ;;  %s5302_s13 = sld [smem:[#allocation5 + $0x52]]  ;;  %s5315_s14 = sld [smem:[#allocation5 + $0x53]] }
 0x142   : > { %v385_v5 = vpop.permute.xlu1 %384  ;;  %v405_v29 = vpop.permute.xlu0 %404  ;;  %v1078_v40 = vmul.f32 %v1076_v45, %v5021_v31 }
 0x143   : > { %v389_v9 = vadd.f32 %v385_v5, %v375_v2  ;;  %v410_v13 = vadd.f32 %v405_v29, %v396_v4  ;;  %v1028_v29 = vmul.f32 %v1026_v26, %v5010_v22 }
 0x144   : > { %939 = vrot.lane.b32.xlu1 %v934_v6, %s4661_s17  ;;  %995 = vrot.lane.b32.xlu0 %v991_v7, %s4660_s15  ;;  %v1077_v6 = vmul.f32 %v1076_v45, %v5014_v25  ;;  %v503_v7 = vmul.f32 %v502_v0, %v4992_v8  ;;  %v504_v8 = vmul.f32 %v502_v0, %v4998_v12 }
 0x145   : > { %v397_v15 = vadd.f32 %v395_v48, %v389_v9  ;;  %v1098_v9 = vstv %s5209_s16  ;;  %s5327_s16 = sld [smem:[#allocation5 + $0x24]] }
 0x146   : > { %v407_v16 = vpop.permute.xlu1 %406  ;;  %v419_v18 = vpop.permute.xlu0 %418 }
 0x147   : > { %v424_v53 = vadd.f32 %v419_v18, %v410_v13  ;;  %v411_v27 = vadd.f32 %v407_v16, %v397_v15  ;;  %v1042_v15 = vmul.f32 %v1040_v36, %v5010_v22  ;;  %v1099_v16 = vmul.f32 %v1098_v9, %v5028_v39 }
 0x148   : > { %961 = vrot.lane.b32.xlu1 %v956_v20, %s4660_s15  ;;  %1009 = vrot.lane.b32.xlu0 %v1005_v21, %s4661_s17  ;;  %v1112_v20 = vstv %s5217_s18  ;;  %v538_v21 = vstv %s5222_s19  ;;  %s5331_s18 = sld [smem:[#allocation5 + $0x55]]  ;;  %s5347_s19 = sld [smem:[#allocation5 + $0x27]] }
 0x149   : > { %v432_v30 = vadd.f32 %v430_v23, %v424_v53 }
 0x14a   : > { %v421_v28 = vpop.permute.xlu1 %420  ;;  %v441_v33 = vpop.permute.xlu0 %440 }
 0x14b   : > { %v425_v35 = vadd.f32 %v421_v28, %v411_v27  ;;  %v446_v41 = vadd.f32 %v441_v33, %v432_v30  ;;  %v1064_v30 = vmul.f32 %v1062_v52, %v5021_v31  ;;  %v1113_v28 = vmul.f32 %v1112_v20, %v5028_v39 }
 0x14c   : > { %975 = vrot.lane.b32.xlu1 %v970_v34, %s4661_s17  ;;  %1031 = vrot.lane.b32.xlu0 %v1027_v37, %s4660_s15  ;;  %v539_v33 = vmul.f32 %v538_v21, %v5004_v17  ;;  %v1134_v34 = vstv %s5228_s20  ;;  %v540_v17 = vmul.f32 %v538_v21, %v5010_v22  ;;  %v1291_v21 = vstv %s5278_s8  ;;  %s5368_s20 = sld [smem:[#allocation5 + $0x2a]] }
 0x14d   : > { %v433_v42 = vadd.f32 %v431_v56, %v425_v35  ;;  %s5447_s8 = sld [smem:[#allocation5 + $0x42]] }
 0x14e   : > { %v443_v44 = vpop.permute.xlu1 %442  ;;  %v455_v46 = vpop.permute.xlu0 %454 }
 0x14f   : > { %v460_v61 = vadd.f32 %v455_v46, %v446_v41  ;;  %v447_v55 = vadd.f32 %v443_v44, %v433_v42  ;;  %v1135_v41 = vmul.f32 %v1134_v34, %v5040_v49  ;;  %v1148_v44 = vstv %s5236_s0  ;;  %s5390_s0 = sld [smem:[#allocation5 + $0x2d]] }
 0x150   : > { %997 = vrot.lane.b32.xlu1 %v992_v47, %s4660_s15  ;;  %1045 = vrot.lane.b32.xlu0 %v1041_v50, %s4661_s17  ;;  %v575_v46 = vstv %s5241_s25  ;;  %v1149_v22 = vmul.f32 %v1148_v44, %v5040_v49  ;;  %s5403_s25 = sld [smem:[#allocation5 + $0x30]] }
 0x151   : > { %v469_v57 = vadd.f32 %v467_v51, %v460_v61  ;;  %v1100_v61 = vmul.f32 %v1098_v9, %v5034_v43 }
 0x152   : > { %v457_v19 = vpop.permute.xlu1 %456  ;;  %v478_v58 = vpop.permute.xlu0 %477 }
 0x153   : > { %v461_v63 = vadd.f32 %v457_v19, %v447_v55  ;;  %v483_v1 = vadd.f32 %v478_v58, %v469_v57  ;;  %v576_v57 = vmul.f32 %v575_v46, %v5014_v25  ;;  %v1233_v19 = vstv %s5247_s27  ;;  %s5418_s27 = sld [smem:[#allocation5 + $0x33]] }
 0x154   : > { %1011 = vrot.lane.b32.xlu1 %v1006_v59, %s4661_s17  ;;  %1067 = vrot.lane.b32.xlu0 %v1063_v60, %s4660_s15  ;;  %v1114_v60 = vmul.f32 %v1112_v20, %v5034_v43  ;;  %v1234_v45 = vmul.f32 %v1233_v19, %v4903_v14  ;;  %v577_v25 = vmul.f32 %v575_v46, %v5021_v31  ;;  %v1219_v20 = vstv %s5276_s7  ;;  %s5442_s7 = sld [smem:[#allocation5 + $0x3f]] }
 0x155   : > { %v470_v2 = vadd.f32 %v468_v62, %v461_v63  ;;  %v1136_v31 = vmul.f32 %v1134_v34, %v5048_v54  ;;  %v1305_v34 = vstv %s5291_s12  ;;  %s4228_s12 = sld [smem:[#allocation5 + $0x48]] }
 0x156   : > { %v480_v4 = vpop.permute.xlu1 %479  ;;  %v492_v5 = vpop.permute.xlu0 %491 }
 0x157   : > { %v497_v3 = vadd.f32 %v492_v5, %v483_v1  ;;  %v484_v48 = vadd.f32 %v480_v4, %v470_v2  ;;  %v1255_v1 = vstv %s5255_s28  ;;  %v611_v2 = vstv %s5260_s5  ;;  %s5423_s28 = sld [smem:[#allocation5 + $0x36]]  ;;  %s5431_s5 = sld [smem:[#allocation5 + $0x39]] }
 0x158   : > { %1033 = vrot.lane.b32.xlu1 %v1028_v29, %s4660_s15  ;;  %1081 = vrot.lane.b32.xlu0 %v1077_v6, %s4661_s17  ;;  %v612_v9 = vmul.f32 %v611_v2, %v5028_v39  ;;  %v613_v39 = vmul.f32 %v611_v2, %v5034_v43  ;;  %v1292_v43 = vmul.f32 %v1291_v21, %v4932_v32  ;;  %v5384_v2 = vld [vmem:[#allocation2 + $0x1] sm:$0xff] }
 0x159   : > { %v505_v10 = vadd.f32 %v503_v7, %v497_v3  ;;  %v1256_v3 = vmul.f32 %v1255_v1, %v4918_v24 }
 0x15a   : > { %v494_v11 = vpop.permute.xlu1 %493  ;;  %v514_v13 = vpop.permute.xlu0 %513 }
 0x15b   : > { %v498_v18 = vadd.f32 %v494_v11, %v484_v48  ;;  %v519_v53 = vadd.f32 %v514_v13, %v505_v10  ;;  %v1269_v48 = vstv %s5266_s6  ;;  %s5434_s6 = sld [smem:[#allocation5 + $0x3c]] }
 0x15c   : > { %1047 = vrot.lane.b32.xlu1 %v1042_v15, %s4661_s17  ;;  %1103 = vrot.lane.b32.xlu0 %v1099_v16, %s4660_s15  ;;  %v1150_v16 = vmul.f32 %v1148_v44, %v5048_v54 }
 0x15d   : > { %v506_v23 = vadd.f32 %v504_v8, %v498_v18  ;;  %v1270_v18 = vmul.f32 %v1269_v48, %v4918_v24  ;;  %v1220_v24 = vmul.f32 %v1219_v20, %v4903_v14 }
 0x15e   : > { %v516_v26 = vpop.permute.xlu1 %515  ;;  %v528_v27 = vpop.permute.xlu0 %527 }
 0x15f   : > { %v533_v12 = vadd.f32 %v528_v27, %v519_v53  ;;  %v520_v37 = vadd.f32 %v516_v26, %v506_v23  ;;  %v647_v53 = vstv %s5283_s11  ;;  %s5450_s11 = sld [smem:[#allocation5 + $0x45]] }
 0x160   : > { %1069 = vrot.lane.b32.xlu1 %v1064_v30, %s4660_s15  ;;  %1117 = vrot.lane.b32.xlu0 %v1113_v28, %s4661_s17 }
 0x161   : > { %v541_v35 = vadd.f32 %v539_v33, %v533_v12  ;;  %v648_v12 = vmul.f32 %v647_v53, %v5040_v49  ;;  %v5312_v33 = vld [vmem:[#allocation2 + $0x8] sm:$0xff]  ;;  %v1306_v49 = vmul.f32 %v1305_v34, %v4932_v32 }
 0x162   : > { %v530_v56 = vpop.permute.xlu1 %529  ;;  %v550_v36 = vpop.permute.xlu0 %549 }
 0x163   : > { %v534_v42 = vadd.f32 %v530_v56, %v520_v37  ;;  %v555_v47 = vadd.f32 %v550_v36, %v541_v35  ;;  %v1221_v36 = vmul.f32 %v1219_v20, %v5312_v33  ;;  %v4529_v20 = vld [vmem:[#allocation2 + $0x9] sm:$0xff] }
 0x164   : > { %1083 = vrot.lane.b32.xlu1 %v1078_v40, %s4661_s17  ;;  %1139 = vrot.lane.b32.xlu0 %v1135_v41, %s4660_s15  ;;  %v649_v41 = vmul.f32 %v647_v53, %v5048_v54  ;;  %v1235_v54 = vmul.f32 %v1233_v19, %v5312_v33  ;;  %v1363_v19 = vstv %s5331_s18  ;;  %v5400_v53 = vld [vmem:[#allocation2 + $0x20] sm:$0xff]  ;;  %s5519_s18 = sld [smem:[#allocation5 + $0x5f]] }
 0x165   : > { %v542_v50 = vadd.f32 %v540_v17, %v534_v42  ;;  %v1327_v42 = vstv %s5302_s13  ;;  %s5457_s13 = sld [smem:[#allocation5 + $0x4b]] }
 0x166   : > { %v552_v51 = vpop.permute.xlu1 %551  ;;  %v564_v52 = vpop.permute.xlu0 %563  ;;  %v1328_v46 = vmul.f32 %v1327_v42, %v4942_v38 }
 0x167   : > { %v569_v55 = vadd.f32 %v564_v52, %v555_v47  ;;  %v556_v58 = vadd.f32 %v552_v51, %v542_v50  ;;  %v5349_v47 = vld [vmem:[#allocation2 + $0x9] sm:$0xff]  ;;  %v1341_v50 = vstv %s5315_s14  ;;  %s5461_s14 = sld [smem:[#allocation5 + $0x56]] }
 0x168   : > { %1105 = vrot.lane.b32.xlu1 %v1100_v61, %s4660_s15  ;;  %1153 = vrot.lane.b32.xlu0 %v1149_v22, %s4661_s17  ;;  %v1257_v52 = vmul.f32 %v1255_v1, %v5349_v47  ;;  %v1342_v22 = vmul.f32 %v1341_v50, %v4942_v38  ;;  %v1271_v38 = vmul.f32 %v1269_v48, %v5349_v47 }
 0x169   : > { %v578_v59 = vadd.f32 %v576_v57, %v569_v55  ;;  %v732_v55 = vstv %s5327_s16  ;;  %v5363_v57 = vld [vmem:[#allocation2 + $0x19] sm:$0xff]  ;;  %s5463_s16 = sld [smem:[#allocation5 + $0x4e]] }
 0x16a   : > { %v566_v63 = vpop.permute.xlu1 %565  ;;  %v587_v62 = vpop.permute.xlu0 %586 }
 0x16b   : > { %v570_v0 = vadd.f32 %v566_v63, %v556_v58  ;;  %v592_v4 = vadd.f32 %v587_v62, %v578_v59  ;;  %v5370_v58 = vld [vmem:[#allocation2] sm:$0xff]  ;;  %v768_v63 = vstv %s5347_s19  ;;  %s5469_s19 = sld [smem:[#allocation5 + $0x58]] }
 0x16c   : > { %1119 = vrot.lane.b32.xlu1 %v1114_v60, %s4661_s17  ;;  %1238 = vrot.lane.b32.xlu0 %v1234_v45, %s4661_s17  ;;  %v733_v59 = vmul.f32 %v5370_v58, %v732_v55  ;;  %v1364_v45 = vmul.f32 %v1363_v19, %v5363_v57 }
 0x16d   : > { %v579_v5 = vadd.f32 %v577_v25, %v570_v0  ;;  %v5380_v25 = vld [vmem:[#allocation2 + $0xa] sm:$0xff] }
 0x16e   : > { %v589_v29 = vpop.permute.xlu1 %588  ;;  %v601_v6 = vpop.permute.xlu0 %600 }
 0x16f   : > { %v606_v7 = vadd.f32 %v601_v6, %v592_v4  ;;  %v593_v10 = vadd.f32 %v589_v29, %v579_v5  ;;  %v769_v4 = vmul.f32 %v5384_v2, %v768_v63  ;;  %v1293_v6 = vmul.f32 %v1291_v21, %v5380_v25 }
 0x170   : > { %1141 = vrot.lane.b32.xlu1 %v1136_v31, %s4660_s15  ;;  %1260 = vrot.lane.b32.xlu0 %v1256_v3, %s4660_s15  ;;  %v4527_v3 = vld [vmem:[#allocation2 + $0x8] sm:$0xff]  ;;  %v770_v21 = vmul.f32 %v4529_v20, %v768_v63  ;;  %v4532_v63 = vld [vmem:[#allocation2 + $0x19] sm:$0xff] }
 0x171   : > { %v614_v11 = vadd.f32 %v612_v9, %v606_v7  ;;  %v734_v7 = vmul.f32 %v4527_v3, %v732_v55  ;;  %v804_v9 = vstv %s5368_s20  ;;  %v4535_v20 = vld [vmem:[#allocation2 + $0x21] sm:$0xff]  ;;  %s5472_s20 = sld [smem:[#allocation5 + $0x51]] }
 0x172   : > { %v603_v13 = vpop.permute.xlu1 %602  ;;  %v623_v15 = vpop.permute.xlu0 %622 }
 0x173   : > { %v607_v8 = vadd.f32 %v603_v13, %v593_v10  ;;  %v628_v23 = vadd.f32 %v623_v15, %v614_v11  ;;  %v1307_v15 = vmul.f32 %v1305_v34, %v5380_v25 }
 0x174   : > { %1155 = vrot.lane.b32.xlu1 %v1150_v16, %s4661_s17  ;;  %1274 = vrot.lane.b32.xlu0 %v1270_v18, %s4661_s17 }
 0x175   : > { %v615_v26 = vadd.f32 %v613_v39, %v607_v8  ;;  %v5397_v8 = vld [vmem:[#allocation2 + $0x2] sm:$0xff] }
 0x176   : > { %v625_v27 = vpop.permute.xlu1 %624  ;;  %v637_v30 = vpop.permute.xlu0 %636  ;;  %v805_v39 = vmul.f32 %v5397_v8, %v804_v9 }
 0x177   : > { %v642_v28 = vadd.f32 %v637_v30, %v628_v23  ;;  %v629_v37 = vadd.f32 %v625_v27, %v615_v26 }
 0x178   : > { %1224 = vrot.lane.b32.xlu1 %v1220_v24, %s4660_s15  ;;  %1296 = vrot.lane.b32.xlu0 %v1292_v43, %s4660_s15  ;;  %v1329_v24 = vmul.f32 %v1327_v42, %v5400_v53  ;;  %v840_v43 = vstv %s5390_s0  ;;  %s5476_s0 = sld [smem:[#allocation5 + $0x59]] }
 0x179   : > { %v5319_v35 = vadd.f32 %v648_v12, %v642_v28 }
 0x17a   : > { %v639_v14 = vpop.permute.xlu1 %638  ;;  %v5321_v56 = vpop.permute.xlu0 %658 }
 0x17b   : > { %v643_v40 = vadd.f32 %v639_v14, %v629_v37  ;;  %v5410_v37 = vld [vmem:[#allocation2 + $0x18] sm:$0xff] }
 0x17c   : > { %1226 = vrot.lane.b32.xlu1 %v1221_v36, %s4660_s15  ;;  %1310 = vrot.lane.b32.xlu0 %v1306_v49, %s4661_s17  ;;  %v841_v14 = vmul.f32 %v5410_v37, %v840_v43 }
 0x17d   : > { %v5335_v17 = vadd.f32 %v649_v41, %v643_v40  ;;  %v1343_v40 = vmul.f32 %v1341_v50, %v5400_v53 }
 0x17e   : > { %v5337_v44 = vpop.permute.xlu1 %660  ;;  %v5339_v32 = vpop.permute.xlu0 %672 }
 0x180   : > { %1240 = vrot.lane.b32.xlu1 %v1235_v54, %s4661_s17  ;;  %1332 = vrot.lane.b32.xlu0 %v1328_v46, %s4660_s15  ;;  %v4531_v46 = vld [vmem:[#allocation2 + $0xa] sm:$0xff] }
 0x181   : > { %v806_v42 = vmul.f32 %v4531_v46, %v804_v9 }
 0x182   : > { %v5354_v61 = vpop.permute.xlu1 %674  ;;  %v758_v51 = vpop.permute.xlu0 %757 }
 0x184   : > { %1262 = vrot.lane.b32.xlu1 %v1257_v52, %s4660_s15  ;;  %1346 = vrot.lane.b32.xlu0 %v1342_v22, %s4661_s17 }
 0x186   : > { %v744_v60 = vpop.permute.xlu1 %743  ;;  %v780_v62 = vpop.permute.xlu0 %779 }
 0x187   : > { %v749_v0 = vadd.f32 %v744_v60, %v733_v59 }
 0x188   : > { %1276 = vrot.lane.b32.xlu1 %v1271_v38, %s4661_s17  ;;  %1368 = vrot.lane.b32.xlu0 %v1364_v45, %s4660_s15 }
 0x189   : > { %v763_v1 = vadd.f32 %v758_v51, %v749_v0  ;;  %v876_v51 = vstv %s5403_s25  ;;  %s5485_s25 = sld [smem:[#allocation5 + $0x5b]] }
 0x18a   : > { %v746_v5 = vpop.permute.xlu1 %745  ;;  %v794_v29 = vpop.permute.xlu0 %793 }
 0x18b   : > { %v771_v31 = vadd.f32 %v769_v4, %v763_v1  ;;  %v750_v10 = vadd.f32 %v746_v5, %v734_v7  ;;  %v4533_v4 = vld [vmem:[#allocation2 + $0x20] sm:$0xff] }
 0x18c   : > { %1298 = vrot.lane.b32.xlu1 %v1293_v6, %s4660_s15  ;;  %v842_v5 = vmul.f32 %v4533_v4, %v840_v43  ;;  %v912_v6 = vstv %s5418_s27  ;;  %v4536_v43 = vld [vmem:[#allocation2 + $0x30] sm:$0xff]  ;;  %s5488_s27 = sld [smem:[#allocation5 + $0x54]] }
 0x18d   : > { %v785_v48 = vadd.f32 %v780_v62, %v771_v31  ;;  %v877_v62 = vmul.f32 %v4532_v63, %v876_v51 }
 0x18e   : > { %v760_v11 = vpop.permute.xlu1 %759  ;;  %v816_v13 = vpop.permute.xlu0 %815 }
 0x18f   : > { %v799_v16 = vadd.f32 %v794_v29, %v785_v48  ;;  %v764_v18 = vadd.f32 %v760_v11, %v750_v10  ;;  %v664_v29 = vadd.f32 %v5321_v56, %v5319_v35  ;;  %v4534_v11 = vld [vmem:[#allocation2 + $0x1a] sm:$0xff] }
 0x190   : > { %1312 = vrot.lane.b32.xlu1 %v1307_v15, %s4661_s17 }
 0x191   : > { %v807_v23 = vadd.f32 %v805_v39, %v799_v16  ;;  %v772_v26 = vadd.f32 %v770_v21, %v764_v18  ;;  %v5426_v7 = vadd.f32 %v5339_v32, %v664_v29  ;;  %v878_v21 = vmul.f32 %v4535_v20, %v876_v51 }
 0x192   : > { %v782_v27 = vpop.permute.xlu1 %781  ;;  %v830_v30 = vpop.permute.xlu0 %829  ;;  %v948_v32 = vstv %s5423_s28  ;;  %s5495_s28 = sld [smem:[#allocation5 + $0x5c]] }
 0x193   : > { %v821_v28 = vadd.f32 %v816_v13, %v807_v23  ;;  %v786_v12 = vadd.f32 %v782_v27, %v772_v26  ;;  %v913_v13 = vmul.f32 %v4534_v11, %v912_v6  ;;  %v681_v35 = vsel %vm680_vm6, %v5426_v7, 0.0 }
 0x194   : > { %1334 = vrot.lane.b32.xlu1 %v1329_v24, %s4660_s15 }
 0x195   : > { %v835_v34 = vadd.f32 %v830_v30, %v821_v28  ;;  %v949_v28 = vmul.f32 %v4536_v43, %v948_v32 }
 0x196   : > { %v796_v36 = vpop.permute.xlu1 %795  ;;  %v852_v49 = vpop.permute.xlu0 %851 }
 0x197   : > { %v800_v41 = vadd.f32 %v796_v36, %v786_v12  ;;  %v843_v54 = vadd.f32 %v841_v14, %v835_v34 }
 0x198   : > { %1348 = vrot.lane.b32.xlu1 %v1343_v40, %s4661_s17  ;;  %v4537_v40 = vld [vmem:[#allocation2 + $0x22] sm:$0xff] }
 0x199   : > { %v857_v52 = vadd.f32 %v852_v49, %v843_v54  ;;  %v808_v22 = vadd.f32 %v806_v42, %v800_v41  ;;  %v914_v41 = vmul.f32 %v4537_v40, %v912_v6  ;;  %v984_v54 = vstv %s5431_s5  ;;  %s5508_s5 = sld [smem:[#allocation5 + $0x5e]] }
 0x19a   : > { %v818_v55 = vpop.permute.xlu1 %817  ;;  %v866_v59 = vpop.permute.xlu0 %865 }
 0x19b   : > { %v871_v60 = vadd.f32 %v866_v59, %v857_v52  ;;  %v822_v38 = vadd.f32 %v818_v55, %v808_v22  ;;  %v4538_v55 = vld [vmem:[#allocation2 + $0x31] sm:$0xff] }
 0x19c   : > { %v985_v59 = vmul.f32 %v4538_v55, %v984_v54 }
 0x19d   : > { %v879_v45 = vadd.f32 %v877_v62, %v871_v60  ;;  %v665_v60 = vadd.f32 %v5337_v44, %v5335_v17  ;;  %v4540_v44 = vld [vmem:[#allocation2 + $0x32] sm:$0xff] }
 0x19e   : > { %v832_v50 = vpop.permute.xlu1 %831  ;;  %v888_v0 = vpop.permute.xlu0 %887 }
 0x19f   : > { %v836_v1 = vadd.f32 %v832_v50, %v822_v38  ;;  %v893_v31 = vadd.f32 %v888_v0, %v879_v45  ;;  %v5439_v50 = vadd.f32 %v5354_v61, %v665_v60  ;;  %v4545_v60 = vld [vmem:[#allocation2 + $0x50] sm:$0xff] }
 0x1a1   : > { %v844_v3 = vadd.f32 %v842_v5, %v836_v1  ;;  %v4539_v1 = vld [vmem:[#allocation2 + $0x38] sm:$0xff]  ;;  %v1020_v5 = vstv %s5434_s6  ;;  %v684_v17 = vsel %vm680_vm6, %v5439_v50, 0.0  ;;  %s5531_s6 = sld [smem:[#allocation5 + $0x61]] }
 0x1a2   : > { %v854_v9 = vpop.permute.xlu1 %853  ;;  %v902_v48 = vpop.permute.xlu0 %901  ;;  %v950_v4 = vmul.f32 %v4539_v1, %v948_v32 }
 0x1a3   : > { %v907_v10 = vadd.f32 %v902_v48, %v893_v31  ;;  %v858_v15 = vadd.f32 %v854_v9, %v844_v3  ;;  %v1021_v48 = vmul.f32 %v4540_v44, %v1020_v5  ;;  %v4547_v44 = vld [vmem:[#allocation2 + $0x51] sm:$0xff] }
 0x1a5   : > { %v915_v16 = vadd.f32 %v913_v13, %v907_v10 }
 0x1a6   : > { %v868_v18 = vpop.permute.xlu1 %867  ;;  %v924_v39 = vpop.permute.xlu0 %923 }
 0x1a7   : > { %v872_v56 = vadd.f32 %v868_v18, %v858_v15  ;;  %682 = vadd.xlane.f32.xlu0 %v681_v35  ;;  %v929_v23 = vadd.f32 %v924_v39, %v915_v16  ;;  %v4541_v16 = vld [vmem:[#allocation2 + $0x39] sm:$0xff]  ;;  %v1056_v39 = vstv %s5442_s7  ;;  %s5540_s7 = sld [smem:[#allocation5 + $0x62]] }
 0x1a8   : > { %v986_v18 = vmul.f32 %v4541_v16, %v984_v54 }
 0x1a9   : > { %v880_v26 = vadd.f32 %v878_v21, %v872_v56 }
 0x1aa   : > { %v890_v27 = vpop.permute.xlu1 %889  ;;  %v938_v30 = vpop.permute.xlu0 %937 }
 0x1ab   : > { %v943_v24 = vadd.f32 %v938_v30, %v929_v23  ;;  %v894_v12 = vadd.f32 %v890_v27, %v880_v26  ;;  %v4542_v23 = vld [vmem:[#allocation2 + $0x48] sm:$0xff] }
 0x1ac   : > { %v1057_v26 = vmul.f32 %v4542_v23, %v1056_v39 }
 0x1ad   : > { %v951_v34 = vadd.f32 %v949_v28, %v943_v24 }
 0x1ae   : > { %v904_v14 = vpop.permute.xlu1 %903  ;;  %v960_v36 = vpop.permute.xlu0 %959 }
 0x1af   : > { %v908_v49 = vadd.f32 %v904_v14, %v894_v12  ;;  %v965_v46 = vadd.f32 %v960_v36, %v951_v34  ;;  %v4543_v12 = vld [vmem:[#allocation2 + $0x3a] sm:$0xff]  ;;  %v1092_v14 = vstv %s5447_s8  ;;  %s5549_s8 = sld [smem:[#allocation5 + $0x64]] }
 0x1b0   : > { %v1022_v34 = vmul.f32 %v4543_v12, %v1020_v5  ;;  %v4546_v5 = vld [vmem:[#allocation2 + $0x4a] sm:$0xff] }
 0x1b1   : > { %v916_v42 = vadd.f32 %v914_v41, %v908_v49 }
 0x1b2   : > { %v926_v51 = vpop.permute.xlu1 %925  ;;  %v974_v52 = vpop.permute.xlu0 %973 }
 0x1b3   : > { %v979_v22 = vadd.f32 %v974_v52, %v965_v46  ;;  %v930_v63 = vadd.f32 %v926_v51, %v916_v42  ;;  %v4544_v46 = vld [vmem:[#allocation2 + $0x49] sm:$0xff] }
 0x1b4   : > { %v1093_v42 = vmul.f32 %v4544_v46, %v1092_v14 }
 0x1b5   : > { %v987_v62 = vadd.f32 %v985_v59, %v979_v22 }
 0x1b6   : > { %v940_v38 = vpop.permute.xlu1 %939  ;;  %v996_v45 = vpop.permute.xlu0 %995 }
 0x1b7   : > { %v944_v0 = vadd.f32 %v940_v38, %v930_v63  ;;  %v1001_v29 = vadd.f32 %v996_v45, %v987_v62  ;;  %v1058_v63 = vmul.f32 %v4545_v60, %v1056_v39  ;;  %v1128_v62 = vstv %s5450_s11  ;;  %s5561_s11 = sld [smem:[#allocation5 + $0x65]] }
 0x1b9   : > { %v952_v6 = vadd.f32 %v950_v4, %v944_v0 }
 0x1ba   : > { %v962_v31 = vpop.permute.xlu1 %961  ;;  %v1010_v3 = vpop.permute.xlu0 %1009 }
 0x1bb   : > { %v1015_v9 = vadd.f32 %v1010_v3, %v1001_v29  ;;  %v966_v61 = vadd.f32 %v962_v31, %v952_v6  ;;  %v1129_v29 = vmul.f32 %v4546_v5, %v1128_v62 }
 0x1bc   : > { %685 = vadd.xlane.f32.xlu1 %v684_v17 }
 0x1bd   : > { %v1023_v10 = vadd.f32 %v1021_v48, %v1015_v9  ;;  %v1094_v48 = vmul.f32 %v4547_v44, %v1092_v14  ;;  %v1249_v14 = vstv %s5457_s13  ;;  %s5579_s13 = sld [smem:[#allocation5 + $0x68]] }
 0x1be   : > { %v976_v11 = vpop.permute.xlu1 %975  ;;  %v1032_v13 = vpop.permute.xlu0 %1031 }
 0x1bf   : > { %v980_v15 = vadd.f32 %v976_v11, %v966_v61  ;;  %v1037_v35 = vadd.f32 %v1032_v13, %v1023_v10 }
 0x1c1   : > { %v988_v56 = vadd.f32 %v986_v18, %v980_v15 }
 0x1c2   : > { %v998_v20 = vpop.permute.xlu1 %997  ;;  %v1046_v21 = vpop.permute.xlu0 %1045 }
 0x1c3   : > { %v1051_v32 = vadd.f32 %v1046_v21, %v1037_v35  ;;  %v1002_v27 = vadd.f32 %v998_v20, %v988_v56  ;;  %v4548_v20 = vld [vmem:[#allocation2 + $0x52] sm:$0xff] }
 0x1c4   : > { %v1130_v21 = vmul.f32 %v4548_v20, %v1128_v62  ;;  %v1399_v62 = vstv %s5469_s19  ;;  %s5606_s19 = sld [smem:[#allocation5 + $0x6e]] }
 0x1c5   : > { %v1059_v30 = vadd.f32 %v1057_v26, %v1051_v32 }
 0x1c6   : > { %v1012_v24 = vpop.permute.xlu1 %1011  ;;  %v1068_v43 = vpop.permute.xlu0 %1067 }
 0x1c7   : > { %v1016_v28 = vadd.f32 %v1012_v24, %v1002_v27  ;;  %v1073_v36 = vadd.f32 %v1068_v43, %v1059_v30  ;;  %v1213_v43 = vstv %s4228_s12  ;;  %s5570_s12 = sld [smem:[#allocation5 + $0x67]] }
 0x1c8   : > { %v1214_v12 = vmul.f32 %v5370_v58, %v1213_v43  ;;  %v1215_v58 = vmul.f32 %v1213_v43, %v5312_v33  ;;  %v1449_v43 = vstv %s5495_s28  ;;  %s5651_s28 = sld [smem:[#allocation5 + $0x76]] }
 0x1c9   : > { %v1024_v49 = vadd.f32 %v1022_v34, %v1016_v28 }
 0x1ca   : > { %v1034_v40 = vpop.permute.xlu1 %1033  ;;  %v1082_v41 = vpop.permute.xlu0 %1081 }
 0x1cb   : > { %v1087_v54 = vadd.f32 %v1082_v41, %v1073_v36  ;;  %v1038_v51 = vadd.f32 %v1034_v40, %v1024_v49  ;;  %v1250_v41 = vmul.f32 %v5384_v2, %v1249_v14 }
 0x1cd   : > { %v1095_v52 = vadd.f32 %v1093_v42, %v1087_v54 }
 0x1ce   : > { %v1048_v22 = vpop.permute.xlu1 %1047  ;;  %v1104_v55 = vpop.permute.xlu0 %1103 }
 0x1cf   : > { %v1052_v59 = vadd.f32 %v1048_v22, %v1038_v51  ;;  %v1109_v38 = vadd.f32 %v1104_v55, %v1095_v52  ;;  %v1377_v51 = vstv %s5461_s14  ;;  %v1285_v52 = vstv %s5463_s16  ;;  %s5588_s14 = sld [smem:[#allocation5 + $0x6a]]  ;;  %s5597_s16 = sld [smem:[#allocation5 + $0x6d]] }
 0x1d1   : > { %v1060_v45 = vadd.f32 %v1058_v63, %v1052_v59  ;;  %v1378_v63 = vmul.f32 %v1377_v51, %v5363_v57 }
 0x1d2   : > { %v1070_v0 = vpop.permute.xlu1 %1069  ;;  %v1118_v1 = vpop.permute.xlu0 %1117 }
 0x1d3   : > { %v1123_v4 = vadd.f32 %v1118_v1, %v1109_v38  ;;  %v1074_v6 = vadd.f32 %v1070_v0, %v1060_v45  ;;  %v1286_v38 = vmul.f32 %v5397_v8, %v1285_v52  ;;  %v1251_v0 = vmul.f32 %v1249_v14, %v5349_v47  ;;  %v5483_v1 = vld [vmem:[#allocation2 + $0x1a] sm:$0xff] }
 0x1d5   : > { %v1131_v31 = vadd.f32 %v1129_v29, %v1123_v4  ;;  %v1321_v29 = vstv %s5472_s20  ;;  %s5617_s20 = sld [smem:[#allocation5 + $0x70]] }
 0x1d6   : > { %v1084_v3 = vpop.permute.xlu1 %1083  ;;  %v1140_v9 = vpop.permute.xlu0 %1139 }
 0x1d7   : > { %v1088_v17 = vadd.f32 %v1084_v3, %v1074_v6  ;;  %v1145_v61 = vadd.f32 %v1140_v9, %v1131_v31  ;;  %v1400_v31 = vmul.f32 %v1399_v62, %v5483_v1  ;;  %v5492_v3 = vld [vmem:[#allocation2 + $0x21] sm:$0xff]  ;;  %v1413_v9 = vstv %s5476_s0  ;;  %s5624_s0 = sld [smem:[#allocation5 + $0x71]] }
 0x1d9   : > { %v1096_v10 = vadd.f32 %v1094_v48, %v1088_v17  ;;  %v1322_v48 = vmul.f32 %v5410_v37, %v1321_v29  ;;  %v1357_v37 = vstv %s5488_s27  ;;  %s5642_s27 = sld [smem:[#allocation5 + $0x74]] }
 0x1da   : > { %v1106_v11 = vpop.permute.xlu1 %1105  ;;  %v1154_v13 = vpop.permute.xlu0 %1153 }
 0x1db   : > { %v5453_v15 = vadd.f32 %v1154_v13, %v1145_v61  ;;  %v1110_v16 = vadd.f32 %v1106_v11, %v1096_v10  ;;  %v1365_v10 = vmul.f32 %v1363_v19, %v5492_v3  ;;  %v1414_v13 = vmul.f32 %v1413_v9, %v5483_v1 }
 0x1dd   : > { %v1161_v18 = vsel %vm680_vm6, %v5453_v15, 0.0 }
 0x1de   : > { %v1120_v39 = vpop.permute.xlu1 %1119  ;;  %1162 = vadd.xlane.f32.xlu0 %v1161_v18  ;;  %v1239_v35 = vpop.permute.xlu0 %1238 }
 0x1df   : > { %v1124_v56 = vadd.f32 %v1120_v39, %v1110_v16  ;;  %v1287_v39 = vmul.f32 %v1285_v52, %v5380_v25 }
 0x1e1   : > { %v1132_v32 = vadd.f32 %v1130_v21, %v1124_v56  ;;  %v1435_v56 = vstv %s5485_s25  ;;  %v1379_v21 = vmul.f32 %v1377_v51, %v5492_v3  ;;  %s5635_s25 = sld [smem:[#allocation5 + $0x73]] }
 0x1e2   : > { %v1142_v23 = vpop.permute.xlu1 %1141  ;;  %v1261_v26 = vpop.permute.xlu0 %1260 }
 0x1e3   : > { %v1146_v27 = vadd.f32 %v1142_v23, %v1132_v32 }
 0x1e6   : > { %v1156_v30 = vpop.permute.xlu1 %1155  ;;  %v1275_v24 = vpop.permute.xlu0 %1274 }
 0x1e7   : > { %v5459_v28 = vadd.f32 %v1156_v30, %v1146_v27  ;;  %v5514_v27 = vld [vmem:[#allocation2 + $0x22] sm:$0xff] }
 0x1e8   : > { %v1401_v14 = vmul.f32 %v1399_v62, %v5514_v27 }
 0x1e9   : > { %v1164_v34 = vsel %vm680_vm6, %v5459_v28, 0.0 }
 0x1ea   : > { %v1225_v36 = vpop.permute.xlu1 %1224  ;;  %1165 = vadd.xlane.f32.xlu1 %v1164_v34  ;;  %v1297_v40 = vpop.permute.xlu0 %1296 }
 0x1eb   : > { %v1230_v49 = vadd.f32 %v1225_v36, %v1214_v12 }
 0x1ed   : > { %v1244_v54 = vadd.f32 %v1239_v35, %v1230_v49  ;;  %v5505_v35 = vld [vmem:[#allocation2 + $0x30] sm:$0xff] }
 0x1ee   : > { %v1227_v46 = vpop.permute.xlu1 %1226  ;;  %v1311_v59 = vpop.permute.xlu0 %1310  ;;  %v1450_v49 = vmul.f32 %v1449_v43, %v5505_v35 }
 0x1ef   : > { %v1252_v42 = vadd.f32 %v1250_v41, %v1244_v54  ;;  %v1231_v55 = vadd.f32 %v1227_v46, %v1215_v58  ;;  %v1323_v41 = vmul.f32 %v1321_v29, %v5400_v53  ;;  %v5528_v54 = vld [vmem:[#allocation2 + $0x31] sm:$0xff]  ;;  %v1471_v46 = vstv %s5508_s5  ;;  %s5658_s5 = sld [smem:[#allocation5 + $0x77]] }
 0x1f0   : > { %v1415_v58 = vmul.f32 %v1413_v9, %v5514_v27  ;;  %v1472_v52 = vmul.f32 %v1471_v46, %v5528_v54 }
 0x1f1   : > { %v1266_v22 = vadd.f32 %v1261_v26, %v1252_v42  ;;  %v1436_v26 = vmul.f32 %v1435_v56, %v5505_v35 }
 0x1f2   : > { %v1241_v60 = vpop.permute.xlu1 %1240  ;;  %v1333_v17 = vpop.permute.xlu0 %1332 }
 0x1f3   : > { %v1280_v2 = vadd.f32 %v1275_v24, %v1266_v22  ;;  %v1245_v45 = vadd.f32 %v1241_v60, %v1231_v55  ;;  %v1358_v24 = vmul.f32 %v1357_v37, %v5363_v57  ;;  %v5536_v22 = vld [vmem:[#allocation2 + $0x38] sm:$0xff]  ;;  %v1485_v55 = vstv %s5519_s18  ;;  %s5667_s18 = sld [smem:[#allocation5 + $0x79]] }
 0x1f4   : > { %1382 = vrot.lane.b32.xlu0 %v1378_v63, %s4661_s17  ;;  %v1437_v60 = vmul.f32 %v1435_v56, %v5536_v22  ;;  %v1486_v62 = vmul.f32 %v1485_v55, %v5528_v54 }
 0x1f5   : > { %v1288_v4 = vadd.f32 %v1286_v38, %v1280_v2  ;;  %v1253_v5 = vadd.f32 %v1251_v0, %v1245_v45  ;;  %v5546_v38 = vld [vmem:[#allocation2 + $0x32] sm:$0xff]  ;;  %v1507_v45 = vstv %s5531_s6  ;;  %v1359_v0 = vmul.f32 %v1357_v37, %v5492_v3  ;;  %s5674_s6 = sld [smem:[#allocation5 + $0x7a]] }
 0x1f6   : > { %v1263_v6 = vpop.permute.xlu1 %1262  ;;  %v1347_v32 = vpop.permute.xlu0 %1346  ;;  %v1508_v29 = vmul.f32 %v1507_v45, %v5546_v38 }
 0x1f7   : > { %v1302_v8 = vadd.f32 %v1297_v40, %v1288_v4  ;;  %v1267_v61 = vadd.f32 %v1263_v6, %v1253_v5  ;;  %v1451_v4 = vmul.f32 %v1449_v43, %v5536_v22  ;;  %v5557_v6 = vld [vmem:[#allocation2 + $0x39] sm:$0xff]  ;;  %v5611_v43 = vld [vmem:[#allocation2 + $0x51] sm:$0xff] }
 0x1f8   : > { %1404 = vrot.lane.b32.xlu0 %v1400_v31, %s4660_s15  ;;  %v1521_v31 = vstv %s5540_s7  ;;  %s5681_s7 = sld [smem:[#allocation5 + $0x7c]] }
 0x1f9   : > { %v1316_v44 = vadd.f32 %v1311_v59, %v1302_v8  ;;  %v1473_v8 = vmul.f32 %v1471_v46, %v5557_v6  ;;  %v1522_v9 = vmul.f32 %v1521_v31, %v5546_v38 }
 0x1fa   : > { %v1277_v11 = vpop.permute.xlu1 %1276 }
 0x1fb   : > { %v1324_v16 = vadd.f32 %v1322_v48, %v1316_v44  ;;  %v1281_v18 = vadd.f32 %v1277_v11, %v1267_v61  ;;  %1370 = vrot.lane.b32.xlu1 %v1365_v10, %s4660_s15  ;;  %v1543_v44 = vstv %s5549_s8  ;;  %v1487_v48 = vmul.f32 %v1485_v55, %v5557_v6  ;;  %v5575_v10 = vld [vmem:[#allocation2 + $0x3a] sm:$0xff]  ;;  %s5688_s8 = sld [smem:[#allocation5 + $0x7d]] }
 0x1fc   : > { %1418 = vrot.lane.b32.xlu0 %v1414_v13, %s4661_s17  ;;  %v1557_v11 = vstv %s5561_s11  ;;  %v1509_v13 = vmul.f32 %v1507_v45, %v5575_v10  ;;  %v1523_v56 = vmul.f32 %v1521_v31, %v5575_v10  ;;  %s5695_s11 = sld [smem:[#allocation5 + $0x7f]] }
 0x1fd   : > { %v1338_v20 = vadd.f32 %v1333_v17, %v1324_v16  ;;  %v1289_v19 = vadd.f32 %v1287_v39, %v1281_v18  ;;  %v5567_v17 = vld [vmem:[#allocation2 + $0x48] sm:$0xff]  ;;  %v1579_v39 = vstv %s5570_s12  ;;  %s5702_s12 = sld [smem:[#allocation5 + $0x80]] }
 0x1fe   : > { %v1299_v23 = vpop.permute.xlu1 %1298  ;;  %v1544_v61 = vmul.f32 %v1543_v44, %v5567_v17  ;;  %v1558_v16 = vmul.f32 %v1557_v11, %v5567_v17  ;;  %v5585_v18 = vld [vmem:[#allocation2 + $0x49] sm:$0xff] }
 0x1ff   : > { %v1352_v30 = vadd.f32 %v1347_v32, %v1338_v20  ;;  %1384 = vrot.lane.b32.xlu1 %v1379_v21, %s4661_s17  ;;  %v1303_v34 = vadd.f32 %v1299_v23, %v1289_v19  ;;  %v1580_v37 = vmul.f32 %v1579_v39, %v5585_v18  ;;  %v5593_v20 = vld [vmem:[#allocation2 + $0x50] sm:$0xff]  ;;  %v1593_v19 = vstv %s5579_s13  ;;  %s5709_s13 = sld [smem:[#allocation5 + $0x82]] }
 0x200   : > { %1440 = vrot.lane.b32.xlu0 %v1436_v26, %s4660_s15  ;;  %v1545_v21 = vmul.f32 %v1543_v44, %v5593_v20  ;;  %v1594_v32 = vmul.f32 %v1593_v19, %v5585_v18  ;;  %v5603_v23 = vld [vmem:[#allocation2 + $0x4a] sm:$0xff]  ;;  %v1615_v26 = vstv %s5588_s14  ;;  %s5716_s14 = sld [smem:[#allocation5 + $0x83]] }
 0x201   : > { %v5522_v12 = vadd.f32 %v1358_v24, %v1352_v30  ;;  %v1559_v30 = vmul.f32 %v1557_v11, %v5593_v20  ;;  %v1616_v24 = vmul.f32 %v1615_v26, %v5603_v23 }
 0x202   : > { %v1313_v36 = vpop.permute.xlu1 %1312 }
 0x203   : > { %v1317_v40 = vadd.f32 %v1313_v36, %v1303_v34  ;;  %1406 = vrot.lane.b32.xlu1 %v1401_v14, %s4660_s15  ;;  %v5614_v34 = vld [vmem:[#allocation2] sm:$0xff]  ;;  %v1700_v14 = vstv %s5597_s16  ;;  %v1581_v36 = vmul.f32 %v1579_v39, %v5611_v43  ;;  %v1858_v39 = vstv %s5674_s6  ;;  %s5723_s16 = sld [smem:[#allocation5 + $0x85]]  ;;  %s5779_s6 = sld [smem:[#allocation5 + $0x8c]] }
 0x204   : > { %1454 = vrot.lane.b32.xlu0 %v1450_v49, %s4661_s17  ;;  %v1701_v49 = vmul.f32 %v1700_v14, %v5614_v34 }
 0x205   : > { %v1325_v42 = vadd.f32 %v1323_v41, %v1317_v40  ;;  %v1714_v40 = vstv %s5606_s19  ;;  %v1595_v41 = vmul.f32 %v1593_v19, %v5611_v43  ;;  %v1880_v19 = vstv %s5681_s7  ;;  %s5730_s19 = sld [smem:[#allocation5 + $0x6b]]  ;;  %s5787_s7 = sld [smem:[#allocation5 + $0x8e]] }
 0x206   : > { %v1335_v51 = vpop.permute.xlu1 %1334  ;;  %v1715_v46 = vmul.f32 %v1714_v40, %v5614_v34  ;;  %v1716_v45 = vmul.f32 %v1714_v40, %v5312_v33  ;;  %v1952_v40 = vstv %s5709_s13  ;;  %s5828_s13 = sld [smem:[#allocation5 + $0x66]] }
 0x207   : > { %1420 = vrot.lane.b32.xlu1 %v1415_v58, %s4661_s17  ;;  %v1339_v59 = vadd.f32 %v1335_v51, %v1325_v42  ;;  %v5629_v42 = vld [vmem:[#allocation2 + $0x52] sm:$0xff]  ;;  %v5632_v58 = vld [vmem:[#allocation2 + $0x1] sm:$0xff]  ;;  %v1736_v51 = vstv %s5617_s20  ;;  %s5734_s20 = sld [smem:[#allocation5 + $0x57]] }
 0x208   : > { %1476 = vrot.lane.b32.xlu0 %v1472_v52, %s4660_s15  ;;  %v1617_v52 = vmul.f32 %v1615_v26, %v5629_v42  ;;  %v1737_v55 = vmul.f32 %v1736_v51, %v5632_v58 }
 0x20a   : > { %v1349_v63 = vpop.permute.xlu1 %1348 }
 0x20b   : > { %v1353_v2 = vadd.f32 %v1349_v63, %v1339_v59  ;;  %1442 = vrot.lane.b32.xlu1 %v1437_v60, %s4660_s15  ;;  %v1750_v59 = vstv %s5624_s0  ;;  %v1702_v60 = vmul.f32 %v1700_v14, %v5312_v33  ;;  %v1930_v14 = vstv %s5702_s12  ;;  %s5741_s0 = sld [smem:[#allocation5 + $0x86]]  ;;  %s5814_s12 = sld [smem:[#allocation5 + $0x63]] }
 0x20c   : > { %1490 = vrot.lane.b32.xlu0 %v1486_v62, %s4661_s17  ;;  %v1751_v63 = vmul.f32 %v1750_v59, %v5632_v58  ;;  %v5648_v62 = vld [vmem:[#allocation2 + $0x2] sm:$0xff]  ;;  %v1752_v33 = vmul.f32 %v1750_v59, %v5349_v47 }
 0x20d   : > { %v5554_v5 = vadd.f32 %v1359_v0, %v1353_v2  ;;  %v1772_v2 = vstv %s5635_s25  ;;  %s5750_s25 = sld [smem:[#allocation5 + $0x88]] }
 0x20e   : > { %v1773_v0 = vmul.f32 %v1772_v2, %v5648_v62 }
 0x20f   : > { %1456 = vrot.lane.b32.xlu1 %v1451_v4, %s4661_s17  ;;  %v1786_v4 = vstv %s5642_s27  ;;  %s5755_s27 = sld [smem:[#allocation5 + $0x5a]] }
 0x210   : > { %1512 = vrot.lane.b32.xlu0 %v1508_v29, %s4660_s15  ;;  %v1738_v29 = vmul.f32 %v1736_v51, %v5349_v47  ;;  %v1787_v31 = vmul.f32 %v1786_v4, %v5648_v62  ;;  %v1788_v47 = vmul.f32 %v1786_v4, %v5380_v25  ;;  %v1369_v51 = vpop.permute.xlu0 %1368  ;;  %v1629_v4 = vstv %s5730_s19  ;;  %s5849_s19 = sld [smem:[#allocation5 + $0x6f]] }
 0x213   : > { %1478 = vrot.lane.b32.xlu1 %v1473_v8, %s4660_s15  ;;  %v5664_v8 = vld [vmem:[#allocation2 + $0x18] sm:$0xff] }
 0x214   : > { %1526 = vrot.lane.b32.xlu0 %v1522_v9, %s4661_s17  ;;  %v1808_v9 = vstv %s5651_s28  ;;  %s5761_s28 = sld [smem:[#allocation5 + $0x89]] }
 0x215   : > { %v1809_v44 = vmul.f32 %v1808_v9, %v5664_v8 }
 0x217   : > { %1492 = vrot.lane.b32.xlu1 %v1487_v48, %s4661_s17  ;;  %v1822_v48 = vstv %s5658_s5  ;;  %s5769_s5 = sld [smem:[#allocation5 + $0x8b]] }
 0x218   : > { %1548 = vrot.lane.b32.xlu0 %v1544_v61, %s4660_s15  ;;  %v1774_v61 = vmul.f32 %v1772_v2, %v5380_v25  ;;  %v1823_v11 = vmul.f32 %v1822_v48, %v5664_v8  ;;  %v1824_v25 = vmul.f32 %v1822_v48, %v5400_v53  ;;  %v1932_v2 = vmul.f32 %v1930_v14, %v5536_v22 }
 0x219   : > { %v2002_v48 = vstv %s5741_s0  ;;  %s5884_s0 = sld [smem:[#allocation5 + $0x75]] }
 0x21b   : > { %1514 = vrot.lane.b32.xlu1 %v1509_v13, %s4660_s15  ;;  %v1844_v13 = vstv %s5667_s18  ;;  %s5774_s18 = sld [smem:[#allocation5 + $0x5d]] }
 0x21c   : > { %1562 = vrot.lane.b32.xlu0 %v1558_v16, %s4661_s17  ;;  %v1845_v16 = vmul.f32 %v1844_v13, %v5363_v57 }
 0x21f   : > { %1528 = vrot.lane.b32.xlu1 %v1523_v56, %s4661_s17  ;;  %v1810_v56 = vmul.f32 %v1808_v9, %v5400_v53  ;;  %v1860_v53 = vmul.f32 %v1858_v39, %v5492_v3  ;;  %v1374_v9 = vadd.f32 %v1369_v51, %v5522_v12  ;;  %v2003_v12 = vmul.f32 %v2002_v48, %v5546_v38 }
 0x220   : > { %1584 = vrot.lane.b32.xlu0 %v1580_v37, %s4660_s15  ;;  %v1859_v37 = vmul.f32 %v1858_v39, %v5363_v57  ;;  %v1846_v57 = vmul.f32 %v1844_v13, %v5492_v3 }
 0x221   : > { %v1465_v51 = vstv %s5774_s18  ;;  %s5912_s18 = sld [smem:[#allocation5 + $0x84]] }
 0x223   : > { %1550 = vrot.lane.b32.xlu1 %v1545_v21, %s4660_s15  ;;  %v1881_v21 = vmul.f32 %v1880_v19, %v5483_v1 }
 0x224   : > { %1598 = vrot.lane.b32.xlu0 %v1594_v32, %s4661_s17  ;;  %v1894_v32 = vstv %s5688_s8  ;;  %s5792_s8 = sld [smem:[#allocation5 + $0x60]] }
 0x225   : > { %v1895_v26 = vmul.f32 %v1894_v32, %v5483_v1 }
 0x227   : > { %1564 = vrot.lane.b32.xlu1 %v1559_v30, %s4661_s17  ;;  %v1916_v30 = vstv %s5695_s11  ;;  %s5794_s11 = sld [smem:[#allocation5 + $0x8f]] }
 0x228   : > { %1620 = vrot.lane.b32.xlu0 %v1616_v24, %s4660_s15  ;;  %v1917_v24 = vmul.f32 %v1916_v30, %v5505_v35 }
 0x22b   : > { %1586 = vrot.lane.b32.xlu1 %v1581_v36, %s4660_s15  ;;  %v1882_v36 = vmul.f32 %v1880_v19, %v5514_v27  ;;  %v1429_v19 = vstv %s5755_s27  ;;  %s5900_s27 = sld [smem:[#allocation5 + $0x7b]] }
 0x22c   : > { %1705 = vrot.lane.b32.xlu0 %v1701_v49, %s4660_s15  ;;  %v1931_v49 = vmul.f32 %v1930_v14, %v5505_v35 }
 0x22f   : > { %1600 = vrot.lane.b32.xlu1 %v1595_v41, %s4661_s17  ;;  %v1896_v41 = vmul.f32 %v1894_v32, %v5514_v27 }
 0x230   : > { %1719 = vrot.lane.b32.xlu0 %v1715_v46, %s4661_s17  ;;  %v1953_v46 = vmul.f32 %v1952_v40, %v5528_v54 }
 0x233   : > { %1622 = vrot.lane.b32.xlu1 %v1617_v52, %s4660_s15  ;;  %v1966_v52 = vstv %s5716_s14  ;;  %s5839_s14 = sld [smem:[#allocation5 + $0x69]] }
 0x234   : > { %1741 = vrot.lane.b32.xlu0 %v1737_v55, %s4660_s15  ;;  %v1918_v55 = vmul.f32 %v1916_v30, %v5536_v22  ;;  %v1967_v59 = vmul.f32 %v1966_v52, %v5528_v54  ;;  %v1968_v13 = vmul.f32 %v1966_v52, %v5557_v6 }
 0x237   : > { %1707 = vrot.lane.b32.xlu1 %v1702_v60, %s4660_s15  ;;  %v5737_v60 = vpop.xlane.xlu0 %682 }
 0x238   : > { %1755 = vrot.lane.b32.xlu0 %v1751_v63, %s4661_s17  ;;  %v1988_v63 = vstv %s5723_s16  ;;  %s5845_s16 = sld [smem:[#allocation5 + $0x6c]] }
 0x23b   : > { %1721 = vrot.lane.b32.xlu1 %v1716_v45, %s4661_s17  ;;  %v1989_v45 = vmul.f32 %v1988_v63, %v5546_v38 }
 0x23c   : > { %1777 = vrot.lane.b32.xlu0 %v1773_v0, %s4660_s15 }
 0x23f   : > { %1743 = vrot.lane.b32.xlu1 %v1738_v29, %s4660_s15  ;;  %v1954_v29 = vmul.f32 %v1952_v40, %v5557_v6 }
 0x240   : > { %1791 = vrot.lane.b32.xlu0 %v1787_v31, %s4661_s17  ;;  %v1393_v31 = vstv %s5734_s20  ;;  %s5869_s20 = sld [smem:[#allocation5 + $0x72]] }
 0x243   : > { %1757 = vrot.lane.b32.xlu1 %v1752_v33, %s4661_s17  ;;  %v1630_v33 = vmul.f32 %v1629_v4, %v5603_v23 }
 0x244   : > { %1813 = vrot.lane.b32.xlu0 %v1809_v44, %s4660_s15 }
 0x247   : > { %1779 = vrot.lane.b32.xlu1 %v1774_v61, %s4660_s15 }
 0x248   : > { %1827 = vrot.lane.b32.xlu0 %v1823_v11, %s4661_s17  ;;  %v1394_v11 = vmul.f32 %v1393_v31, %v5483_v1 }
 0x24b   : > { %1793 = vrot.lane.b32.xlu1 %v1788_v47, %s4661_s17 }
 0x24c   : > { %1849 = vrot.lane.b32.xlu0 %v1845_v16, %s4660_s15  ;;  %v686_v16 = vpop.xlane.xlu1 %685 }
 0x24f   : > { %1815 = vrot.lane.b32.xlu1 %v1810_v56, %s4660_s15  ;;  %v2024_v56 = vstv %s5750_s25  ;;  %s5896_s25 = sld [smem:[#allocation5 + $0x78]] }
 0x250   : > { %1863 = vrot.lane.b32.xlu0 %v1859_v37, %s4661_s17  ;;  %v1990_v37 = vmul.f32 %v1988_v63, %v5575_v10 }
 0x253   : > { %1829 = vrot.lane.b32.xlu1 %v1824_v25, %s4661_s17 }
 0x254   : > { %1885 = vrot.lane.b32.xlu0 %v1881_v21, %s4660_s15  ;;  %v2025_v21 = vmul.f32 %v2024_v56, %v5567_v17 }
 0x257   : > { %1851 = vrot.lane.b32.xlu1 %v1846_v57, %s4660_s15 }
 0x258   : > { %1899 = vrot.lane.b32.xlu0 %v1895_v26, %s4661_s17  ;;  %v2038_v26 = vstv %s5761_s28  ;;  %s5903_s28 = sld [smem:[#allocation5 + $0x7e]] }
 0x25b   : > { %1865 = vrot.lane.b32.xlu1 %v1860_v53, %s4661_s17  ;;  %v1430_v53 = vmul.f32 %v1429_v19, %v5505_v35 }
 0x25c   : > { %1921 = vrot.lane.b32.xlu0 %v1917_v24, %s4660_s15  ;;  %v1631_v24 = vmul.f32 %v1629_v4, %v5629_v42 }
 0x25f   : > { %1887 = vrot.lane.b32.xlu1 %v1882_v36, %s4660_s15  ;;  %v2039_v36 = vmul.f32 %v2038_v26, %v5567_v17 }
 0x260   : > { %1935 = vrot.lane.b32.xlu0 %v1931_v49, %s4661_s17 }
 0x263   : > { %1901 = vrot.lane.b32.xlu1 %v1896_v41, %s4661_s17  ;;  %v2060_v41 = vstv %s5769_s5  ;;  %s5907_s5 = sld [smem:[#allocation5 + $0x81]] }
 0x264   : > { %1957 = vrot.lane.b32.xlu0 %v1953_v46, %s4660_s15  ;;  %v2004_v46 = vmul.f32 %v2002_v48, %v5575_v10 }
 0x267   : > { %1923 = vrot.lane.b32.xlu1 %v1918_v55, %s4660_s15 }
 0x268   : > { %1971 = vrot.lane.b32.xlu0 %v1967_v59, %s4661_s17  ;;  %v2061_v59 = vmul.f32 %v2060_v41, %v5585_v18 }
 0x26b   : > { %1937 = vrot.lane.b32.xlu1 %v1932_v2, %s4661_s17  ;;  %v5747_v0 = vpop.xlane.xlu0 %1162 }
 0x26c   : > { %1993 = vrot.lane.b32.xlu0 %v1989_v45, %s4660_s15  ;;  %v2074_v45 = vstv %s5779_s6  ;;  %s5919_s6 = sld [smem:[#allocation5 + $0x87]] }
 0x26f   : > { %1959 = vrot.lane.b32.xlu1 %v1954_v29, %s4660_s15  ;;  %v1383_v44 = vpop.permute.xlu0 %1382 }
 0x270   : > { %v1388_v61 = vadd.f32 %v1383_v44, %v1374_v9  ;;  %1634 = vrot.lane.b32.xlu0 %v1630_v33, %s4661_s17  ;;  %v1395_v9 = vmul.f32 %v1393_v31, %v5514_v27  ;;  %v2026_v33 = vmul.f32 %v2024_v56, %v5593_v20  ;;  %v687_v44 = vadd.f32 %v686_v16, %v5737_v60 }
 0x271   : > { %v2040_v31 = vmul.f32 %v2038_v26, %v5593_v20  ;;  %v1431_v26 = vmul.f32 %v1429_v19, %v5536_v22  ;;  %v2076_v19 = vmul.f32 %v2074_v45, %v5611_v43 }
 0x272   : > { %v1396_v47 = vadd.f32 %v1394_v11, %v1388_v61  ;;  %v2075_v11 = vmul.f32 %v2074_v45, %v5585_v18  ;;  %v688_v56 = vrot.slane %v687_v44, 4 }
 0x273   : > { %1973 = vrot.lane.b32.xlu1 %v1968_v13, %s4661_s17  ;;  %v1405_v39 = vpop.permute.xlu0 %1404 }
 0x274   : > { %2007 = vrot.lane.b32.xlu0 %v2003_v12, %s4661_s17  ;;  %v1410_v25 = vadd.f32 %v1405_v39, %v1396_v47  ;;  %v2096_v12 = vstv %s5787_s7  ;;  %v1501_v39 = vstv %s5792_s8  ;;  %s5927_s7 = sld [smem:[#allocation5 + $0x8a]]  ;;  %s5934_s8 = sld [smem:[#allocation5 + $0x8d]] }
 0x275   : > { %v2097_v16 = vmul.f32 %v2096_v12, %v5603_v23  ;;  %v2098_v45 = vmul.f32 %v2096_v12, %v5629_v42 }
 0x277   : > { %1995 = vrot.lane.b32.xlu1 %v1990_v37, %s4660_s15  ;;  %v1166_v32 = vpop.xlane.xlu1 %1165  ;;  %v1419_v57 = vpop.permute.xlu0 %1418  ;;  %v2110_v37 = vstv %s5794_s11  ;;  %s5986_s11 = sld [smem:[#allocation6 + $0x4]] }
 0x278   : > { %v1424_v30 = vadd.f32 %v1419_v57, %v1410_v25  ;;  %2029 = vrot.lane.b32.xlu0 %v2025_v21, %s4660_s15 }
 0x27a   : > { %v1432_v14 = vadd.f32 %v1430_v53, %v1424_v30 }
 0x27b   : > { %1636 = vrot.lane.b32.xlu1 %v1631_v24, %s4661_s17  ;;  %v1371_v49 = vpop.permute.xlu1 %1370  ;;  %v1441_v40 = vpop.permute.xlu0 %1440  ;;  %v1502_v24 = vmul.f32 %v1501_v39, %v5546_v38 }
 0x27c   : > { %2043 = vrot.lane.b32.xlu0 %v2039_v36, %s4661_s17  ;;  %v1375_v52 = vadd.f32 %v1371_v49, %v5554_v5  ;;  %v1446_v55 = vadd.f32 %v1441_v40, %v1432_v14  ;;  %v1466_v5 = vmul.f32 %v1465_v51, %v5528_v54  ;;  %v2062_v14 = vmul.f32 %v2060_v41, %v5611_v43 }
 0x27d   : > { %v2111_v36 = vmul.f32 %v2110_v37, %v5603_v23  ;;  %v689_v49 = vadd.f32 %v688_v56, %v687_v44  ;;  %v1167_v40 = vadd.f32 %v1166_v32, %v5747_v0  ;;  %v2112_v56 = vmul.f32 %v2110_v37, %v5629_v42 }
 0x27f   : > { %2009 = vrot.lane.b32.xlu1 %v2004_v46, %s4661_s17  ;;  %v1385_v63 = vpop.permute.xlu1 %1384  ;;  %v1455_v2 = vpop.permute.xlu0 %1454  ;;  %v690_v41 = vrot.slane %v689_v49, 2 }
 0x280   : > { %v1389_v4 = vadd.f32 %v1385_v63, %v1375_v52  ;;  %v1460_v29 = vadd.f32 %v1455_v2, %v1446_v55  ;;  %2065 = vrot.lane.b32.xlu0 %v2061_v59, %s4660_s15  ;;  %v1537_v63 = vstv %s5814_s12  ;;  %v1168_v2 = vrot.slane %v1167_v40, 4  ;;  %s4300_s12 = sld [smem:[#allocation6 + $0x1]] }
 0x281   : > { %v1538_v44 = vmul.f32 %v1537_v63, %v5567_v17 }
 0x282   : > { %v1397_v48 = vadd.f32 %v1395_v9, %v1389_v4  ;;  %v1468_v61 = vadd.f32 %v1466_v5, %v1460_v29 }
 0x283   : > { %2031 = vrot.lane.b32.xlu1 %v2026_v33, %s4660_s15  ;;  %v1407_v13 = vpop.permute.xlu1 %1406  ;;  %v1477_v47 = vpop.permute.xlu0 %1476  ;;  %v1467_v33 = vmul.f32 %v1465_v51, %v5557_v6 }
 0x284   : > { %2079 = vrot.lane.b32.xlu0 %v2075_v11, %s4661_s17  ;;  %v1411_v25 = vadd.f32 %v1407_v13, %v1397_v48  ;;  %v1482_v60 = vadd.f32 %v1477_v47, %v1468_v61  ;;  %v691_v48 = vadd.f32 %v690_v41, %v689_v49  ;;  %v1169_v61 = vadd.f32 %v1168_v2, %v1167_v40 }
 0x287   : > { %2045 = vrot.lane.b32.xlu1 %v2040_v31, %s4661_s17  ;;  %v1421_v21 = vpop.permute.xlu1 %1420  ;;  %v1491_v57 = vpop.permute.xlu0 %1490 }
 0x288   : > { %v1425_v30 = vadd.f32 %v1421_v21, %v1411_v25  ;;  %v1496_v53 = vadd.f32 %v1491_v57, %v1482_v60  ;;  %2101 = vrot.lane.b32.xlu0 %v2097_v16, %s4660_s15  ;;  %v1573_v25 = vstv %s5828_s13  ;;  %v692_v60 = vrot.slane %v691_v48, 1  ;;  %s5988_s13 = sld [smem:[#allocation6 + $0x5]] }
 0x289   : > { %v1170_v16 = vrot.slane %v1169_v61, 2 }
 0x28a   : > { %v1433_v46 = vadd.f32 %v1431_v26, %v1425_v30  ;;  %v1504_v52 = vadd.f32 %v1502_v24, %v1496_v53  ;;  %v1503_v26 = vmul.f32 %v1501_v39, %v5575_v10  ;;  %v1574_v24 = vmul.f32 %v1573_v25, %v5585_v18 }
 0x28b   : > { %2067 = vrot.lane.b32.xlu1 %v2062_v14, %s4660_s15  ;;  %v1443_v55 = vpop.permute.xlu1 %1442  ;;  %v1513_v59 = vpop.permute.xlu0 %1512  ;;  %v693_v14 = vadd.f32 %v692_v60, %v691_v48  ;;  %v1171_v37 = vadd.f32 %v1170_v16, %v1169_v61  ;;  %v1694_v61 = vstv %s5845_s16  ;;  %s4301_s16 = sld [smem:[#allocation6 + $0x2]] }
 0x28c   : > { %2115 = vrot.lane.b32.xlu0 %v2111_v36, %s4661_s17  ;;  %v1447_v4 = vadd.f32 %v1443_v55, %v1433_v46  ;;  %v1518_v29 = vadd.f32 %v1513_v59, %v1504_v52  ;;  %v1609_v52 = vstv %s5839_s14  ;;  %v1695_v16 = vmul.f32 %v1694_v61, %v5614_v34  ;;  %s5997_s14 = sld [smem:[#allocation6 + $0x7]] }
 0x28d   : > { %v1172_v55 = vrot.slane %v1171_v37, 1  ;;  %v694_v41 = vmul.f32 0.00390625, %v693_v14 }
 0x28f   : > { %2081 = vrot.lane.b32.xlu1 %v2076_v19, %s4661_s17  ;;  %v1457_v0 = vpop.permute.xlu1 %1456  ;;  %v1527_v32 = vpop.permute.xlu0 %1526 }
 0x290   : > { %v1461_v9 = vadd.f32 %v1457_v0, %v1447_v4  ;;  %v1532_v5 = vadd.f32 %v1527_v32, %v1518_v29  ;;  %v1539_v0 = vmul.f32 %v1537_v63, %v5593_v20  ;;  %v1610_v32 = vmul.f32 %v1609_v52, %v5603_v23 }
 0x292   : > { %v1469_v11 = vadd.f32 %v1467_v33, %v1461_v9  ;;  %v1540_v13 = vadd.f32 %v1538_v44, %v1532_v5  ;;  %v1173_v9 = vadd.f32 %v1172_v55, %v1171_v37  ;;  %v5854_v44 = vsub.f32 %v5426_v7, %v694_v41 }
 0x293   : > { %2103 = vrot.lane.b32.xlu1 %v2098_v45, %s4660_s15  ;;  %v1479_v47 = vpop.permute.xlu1 %1478  ;;  %v1549_v31 = vpop.permute.xlu0 %1548  ;;  %v1575_v7 = vmul.f32 %v1573_v25, %v5611_v43  ;;  %v1611_v55 = vmul.f32 %v1609_v52, %v5629_v42 }
 0x294   : > { %v1483_v51 = vadd.f32 %v1479_v47, %v1469_v11  ;;  %v1554_v21 = vadd.f32 %v1549_v31, %v1540_v13  ;;  %v5860_v11 = vsub.f32 %v5439_v50, %v694_v41  ;;  %v697_v13 = vmul.f32 %v5854_v44, %v5854_v44 }
 0x295   : > { %v1174_v47 = vmul.f32 0.00390625, %v1173_v9 }
 0x297   : > { %2117 = vrot.lane.b32.xlu1 %v2112_v56, %s4661_s17  ;;  %v1493_v12 = vpop.permute.xlu1 %1492  ;;  %v1563_v57 = vpop.permute.xlu0 %1562 }
 0x298   : > { %v1497_v30 = vadd.f32 %v1493_v12, %v1483_v51  ;;  %v1568_v53 = vadd.f32 %v1563_v57, %v1554_v21  ;;  %v698_v51 = vmul.f32 %v5860_v11, %v5860_v11  ;;  %v1730_v21 = vstv %s5849_s19  ;;  %s6006_s19 = sld [smem:[#allocation6 + $0x8]] }
 0x299   : > { %v699_v57 = vsel %vm680_vm6, %v697_v13, 0.0  ;;  %v1731_v25 = vmul.f32 %v1730_v21, %v5632_v58 }
 0x29a   : > { %v1505_v36 = vadd.f32 %v1503_v26, %v1497_v30  ;;  %v1576_v49 = vadd.f32 %v1574_v24, %v1568_v53  ;;  %v5873_v30 = vsub.f32 %v5453_v15, %v1174_v47  ;;  %v702_v24 = vsel %vm680_vm6, %v698_v51, 0.0 }
 0x29b   : > { %v1515_v40 = vpop.permute.xlu1 %1514  ;;  %v1585_v46 = vpop.permute.xlu0 %1584 }
 0x29c   : > { %v1519_v59 = vadd.f32 %v1515_v40, %v1505_v36  ;;  %v1590_v19 = vadd.f32 %v1585_v46, %v1576_v49  ;;  %v1177_v36 = vmul.f32 %v5873_v30, %v5873_v30  ;;  %v5880_v49 = vsub.f32 %v5459_v28, %v1174_v47 }
 0x29e   : > { %v1179_v41 = vsel %vm680_vm6, %v1177_v36, 0.0  ;;  %v4551_v36 = vld [vmem:[#allocation2 + $0xa] sm:$0xff] }
 0x29f   : > { %v1529_v2 = vpop.permute.xlu1 %1528  ;;  %v1599_v4 = vpop.permute.xlu0 %1598 }
 0x2a0   : > { %v1533_v29 = vadd.f32 %v1529_v2, %v1519_v59  ;;  %v1604_v39 = vadd.f32 %v1599_v4, %v1590_v19  ;;  %v1766_v59 = vstv %s5869_s20  ;;  %v1178_v2 = vmul.f32 %v5880_v49, %v5880_v49  ;;  %s6022_s20 = sld [smem:[#allocation6 + $0xb]] }
 0x2a2   : > { %v1541_v5 = vadd.f32 %v1539_v0, %v1533_v29  ;;  %v5851_v33 = vadd.f32 %v1610_v32, %v1604_v39  ;;  %v1767_v39 = vmul.f32 %v1766_v59, %v5648_v62  ;;  %v1182_v52 = vsel %vm680_vm6, %v1178_v2, 0.0 }
 0x2a3   : > { %v1551_v45 = vpop.permute.xlu1 %1550  ;;  %v5856_v48 = vpop.permute.xlu0 %1620 }
 0x2a4   : > { %v1555_v63 = vadd.f32 %v1551_v45, %v1541_v5  ;;  %v4549_v5 = vld [vmem:[#allocation2 + $0x8] sm:$0xff] }
 0x2a5   : > { %v1696_v45 = vmul.f32 %v4549_v5, %v1694_v61 }
 0x2a7   : > { %v1565_v31 = vpop.permute.xlu1 %1564  ;;  %v1706_v56 = vpop.permute.xlu0 %1705 }
 0x2a8   : > { %v1569_v60 = vadd.f32 %v1565_v31, %v1555_v63  ;;  %v1711_v50 = vadd.f32 %v1706_v56, %v1695_v16  ;;  %v1802_v63 = vstv %s5884_s0  ;;  %s6033_s0 = sld [smem:[#allocation6 + $0xd]] }
 0x2a9   : > { %v1803_v51 = vmul.f32 %v1802_v63, %v5664_v8 }
 0x2aa   : > { %v1577_v12 = vadd.f32 %v1575_v7, %v1569_v60  ;;  %v4550_v7 = vld [vmem:[#allocation2 + $0x9] sm:$0xff] }
 0x2ab   : > { %v1587_v53 = vpop.permute.xlu1 %1586  ;;  %700 = vadd.xlane.f32.xlu0 %v699_v57  ;;  %v1720_v26 = vpop.permute.xlu0 %1719  ;;  %v1732_v62 = vmul.f32 %v4550_v7, %v1730_v21 }
 0x2ac   : > { %v1725_v34 = vadd.f32 %v1720_v26, %v1711_v50  ;;  %v1591_v14 = vadd.f32 %v1587_v53, %v1577_v12  ;;  %v1838_v26 = vstv %s5896_s25  ;;  %s6040_s25 = sld [smem:[#allocation6 + $0xe]] }
 0x2ae   : > { %v1733_v37 = vadd.f32 %v1731_v25, %v1725_v34 }
 0x2af   : > { %v1601_v40 = vpop.permute.xlu1 %1600  ;;  %703 = vadd.xlane.f32.xlu0 %v702_v24  ;;  %v1742_v15 = vpop.permute.xlu0 %1741 }
 0x2b0   : > { %v1605_v46 = vadd.f32 %v1601_v40, %v1591_v14  ;;  %v1747_v58 = vadd.f32 %v1742_v15, %v1733_v37  ;;  %v1768_v40 = vmul.f32 %v4551_v36, %v1766_v59  ;;  %v4552_v15 = vld [vmem:[#allocation2 + $0x19] sm:$0xff] }
 0x2b1   : > { %v1839_v21 = vmul.f32 %v4552_v15, %v1838_v26 }
 0x2b2   : > { %v5886_v19 = vadd.f32 %v1611_v55, %v1605_v46 }
 0x2b3   : > { %v5891_v28 = vpop.permute.xlu1 %1622  ;;  %1180 = vadd.xlane.f32.xlu0 %v1179_v41  ;;  %v1756_v4 = vpop.permute.xlu0 %1755  ;;  %v1874_v41 = vstv %s5900_s27  ;;  %s6051_s27 = sld [smem:[#allocation6 + $0x10]] }
 0x2b4   : > { %v1761_v29 = vadd.f32 %v1756_v4, %v1747_v58  ;;  %v1875_v59 = vmul.f32 %v1874_v41, %v5483_v1 }
 0x2b6   : > { %v1769_v0 = vadd.f32 %v1767_v39, %v1761_v29 }
 0x2b7   : > { %v1708_v32 = vpop.permute.xlu1 %1707  ;;  %1183 = vadd.xlane.f32.xlu0 %v1182_v52  ;;  %v1778_v9 = vpop.permute.xlu0 %1777 }
 0x2b8   : > { %v1712_v13 = vadd.f32 %v1708_v32, %v1696_v45  ;;  %v1783_v47 = vadd.f32 %v1778_v9, %v1769_v0  ;;  %v4553_v32 = vld [vmem:[#allocation2 + $0x20] sm:$0xff] }
 0x2b9   : > { %v1804_v9 = vmul.f32 %v4553_v32, %v1802_v63  ;;  %v1626_v32 = vadd.f32 %v5856_v48, %v5851_v33 }
 0x2bb   : > { %v1722_v31 = vpop.permute.xlu1 %1721  ;;  %v1792_v56 = vpop.permute.xlu0 %1791 }
 0x2bc   : > { %v1726_v60 = vadd.f32 %v1722_v31, %v1712_v13  ;;  %v1797_v16 = vadd.f32 %v1792_v56, %v1783_v47  ;;  %v1910_v31 = vstv %s5903_s28  ;;  %s6058_s28 = sld [smem:[#allocation6 + $0x11]] }
 0x2bd   : > { %v1911_v63 = vmul.f32 %v1910_v31, %v5505_v35 }
 0x2be   : > { %v1734_v50 = vadd.f32 %v1732_v62, %v1726_v60  ;;  %v1805_v12 = vadd.f32 %v1803_v51, %v1797_v16 }
 0x2bf   : > { %v1744_v57 = vpop.permute.xlu1 %1743  ;;  %v1814_v53 = vpop.permute.xlu0 %1813 }
 0x2c0   : > { %v1748_v61 = vadd.f32 %v1744_v57, %v1734_v50  ;;  %v1819_v34 = vadd.f32 %v1814_v53, %v1805_v12  ;;  %v1840_v50 = vmul.f32 %v1838_v26, %v5492_v3 }
 0x2c3   : > { %v1758_v25 = vpop.permute.xlu1 %1757  ;;  %v1828_v24 = vpop.permute.xlu0 %1827 }
 0x2c4   : > { %v1762_v14 = vadd.f32 %v1758_v25, %v1748_v61  ;;  %v1833_v37 = vadd.f32 %v1828_v24, %v1819_v34  ;;  %v1946_v61 = vstv %s5907_s5  ;;  %s6069_s5 = sld [smem:[#allocation6 + $0x13]] }
 0x2c5   : > { %v1947_v3 = vmul.f32 %v1946_v61, %v5528_v54 }
 0x2c6   : > { %v1770_v46 = vadd.f32 %v1768_v40, %v1762_v14  ;;  %v1841_v8 = vadd.f32 %v1839_v21, %v1833_v37  ;;  %v1876_v40 = vmul.f32 %v1874_v41, %v5514_v27 }
 0x2c7   : > { %v1780_v55 = vpop.permute.xlu1 %1779  ;;  %v1850_v58 = vpop.permute.xlu0 %1849 }
 0x2c8   : > { %v1784_v2 = vadd.f32 %v1780_v55, %v1770_v46  ;;  %v1855_v4 = vadd.f32 %v1850_v58, %v1841_v8  ;;  %v1982_v46 = vstv %s5912_s18  ;;  %s6076_s18 = sld [smem:[#allocation6 + $0x14]] }
 0x2cb   : > { %v1794_v29 = vpop.permute.xlu1 %1793  ;;  %v1864_v39 = vpop.permute.xlu0 %1863 }
 0x2cc   : > { %v1798_v52 = vadd.f32 %v1794_v29, %v1784_v2  ;;  %v1869_v0 = vadd.f32 %v1864_v39, %v1855_v4  ;;  %v1912_v39 = vmul.f32 %v1910_v31, %v5536_v22  ;;  %v1948_v22 = vmul.f32 %v1946_v61, %v5557_v6 }
 0x2ce   : > { %v1806_v5 = vadd.f32 %v1804_v9, %v1798_v52  ;;  %v1877_v45 = vadd.f32 %v1875_v59, %v1869_v0  ;;  %v1983_v52 = vmul.f32 %v1982_v46, %v5546_v38 }
 0x2cf   : > { %v1816_v13 = vpop.permute.xlu1 %1815  ;;  %v1886_v47 = vpop.permute.xlu0 %1885 }
 0x2d0   : > { %v1820_v56 = vadd.f32 %v1816_v13, %v1806_v5  ;;  %v1891_v60 = vadd.f32 %v1886_v47, %v1877_v45  ;;  %v2018_v47 = vstv %s5919_s6  ;;  %s6087_s6 = sld [smem:[#allocation6 + $0x16]] }
 0x2d3   : > { %v1830_v16 = vpop.permute.xlu1 %1829  ;;  %v1900_v7 = vpop.permute.xlu0 %1899 }
 0x2d4   : > { %v1834_v62 = vadd.f32 %v1830_v16, %v1820_v56  ;;  %v1905_v51 = vadd.f32 %v1900_v7, %v1891_v60  ;;  %v2019_v16 = vmul.f32 %v2018_v47, %v5567_v17  ;;  %v1627_v17 = vadd.f32 %v5891_v28, %v5886_v19 }
 0x2d6   : > { %v1842_v12 = vadd.f32 %v1840_v50, %v1834_v62  ;;  %v1913_v1 = vadd.f32 %v1911_v63, %v1905_v51  ;;  %v1984_v63 = vmul.f32 %v1982_v46, %v5575_v10 }
 0x2d7   : > { %v1852_v57 = vpop.permute.xlu1 %1851  ;;  %v1922_v53 = vpop.permute.xlu0 %1921 }
 0x2d8   : > { %v1856_v34 = vadd.f32 %v1852_v57, %v1842_v12  ;;  %v1927_v25 = vadd.f32 %v1922_v53, %v1913_v1  ;;  %v2054_v12 = vstv %s5927_s7  ;;  %s6094_s7 = sld [smem:[#allocation6 + $0x17]] }
 0x2db   : > { %v1866_v24 = vpop.permute.xlu1 %1865  ;;  %v1936_v14 = vpop.permute.xlu0 %1935 }
 0x2dc   : > { %v1870_v37 = vadd.f32 %v1866_v24, %v1856_v34  ;;  %v1941_v36 = vadd.f32 %v1936_v14, %v1927_v25  ;;  %v2055_v25 = vmul.f32 %v2054_v12, %v5585_v18 }
 0x2de   : > { %v1878_v26 = vadd.f32 %v1876_v40, %v1870_v37  ;;  %v1949_v35 = vadd.f32 %v1947_v3, %v1941_v36  ;;  %v2090_v40 = vstv %s5934_s8  ;;  %s6105_s8 = sld [smem:[#allocation6 + $0x19]] }
 0x2df   : > { %v1888_v15 = vpop.permute.xlu1 %1887  ;;  %v1958_v21 = vpop.permute.xlu0 %1957  ;;  %v2091_v18 = vmul.f32 %v2090_v40, %v5603_v23 }
 0x2e0   : > { %v1892_v8 = vadd.f32 %v1888_v15, %v1878_v26  ;;  %v1963_v55 = vadd.f32 %v1958_v21, %v1949_v35 }
 0x2e3   : > { %v1902_v58 = vpop.permute.xlu1 %1901  ;;  %v1972_v2 = vpop.permute.xlu0 %1971 }
 0x2e4   : > { %v1906_v4 = vadd.f32 %v1902_v58, %v1892_v8  ;;  %v1977_v29 = vadd.f32 %v1972_v2, %v1963_v55  ;;  %v2020_v8 = vmul.f32 %v2018_v47, %v5593_v20 }
 0x2e6   : > { %v1914_v27 = vadd.f32 %v1912_v39, %v1906_v4  ;;  %v1985_v54 = vadd.f32 %v1983_v52, %v1977_v29  ;;  %v2056_v29 = vmul.f32 %v2054_v12, %v5611_v43 }
 0x2e7   : > { %v1924_v41 = vpop.permute.xlu1 %1923  ;;  %v1994_v0 = vpop.permute.xlu0 %1993 }
 0x2e8   : > { %v1928_v9 = vadd.f32 %v1924_v41, %v1914_v27  ;;  %v1999_v38 = vadd.f32 %v1994_v0, %v1985_v54  ;;  %v2092_v0 = vmul.f32 %v2090_v40, %v5629_v42 }
 0x2eb   : > { %v1938_v59 = vpop.permute.xlu1 %1937  ;;  %v1635_v5 = vpop.permute.xlu0 %1634 }
 0x2ec   : > { %v1942_v45 = vadd.f32 %v1938_v59, %v1928_v9  ;;  %v5923_v13 = vadd.f32 %v1635_v5, %v1626_v32 }
 0x2ee   : > { %v1950_v31 = vadd.f32 %v1948_v22, %v1942_v45  ;;  %v1642_v56 = vsel %vm680_vm6, %v5923_v13, 0.0 }
 0x2ef   : > { %v1960_v60 = vpop.permute.xlu1 %1959  ;;  %1643 = vadd.xlane.f32.xlu0 %v1642_v56  ;;  %v2008_v33 = vpop.permute.xlu0 %2007 }
 0x2f0   : > { %v2013_v48 = vadd.f32 %v2008_v33, %v1999_v38  ;;  %v1964_v7 = vadd.f32 %v1960_v60, %v1950_v31 }
 0x2f2   : > { %v2021_v62 = vadd.f32 %v2019_v16, %v2013_v48 }
 0x2f3   : > { %v1974_v51 = vpop.permute.xlu1 %1973  ;;  %v2030_v50 = vpop.permute.xlu0 %2029 }
 0x2f4   : > { %v1978_v6 = vadd.f32 %v1974_v51, %v1964_v7  ;;  %v2035_v1 = vadd.f32 %v2030_v50, %v2021_v62 }
 0x2f6   : > { %v1986_v57 = vadd.f32 %v1984_v63, %v1978_v6 }
 0x2f7   : > { %v1996_v53 = vpop.permute.xlu1 %1995  ;;  %v2044_v61 = vpop.permute.xlu0 %2043 }
 0x2f8   : > { %v2049_v34 = vadd.f32 %v2044_v61, %v2035_v1  ;;  %v2000_v10 = vadd.f32 %v1996_v53, %v1986_v57 }
 0x2fa   : > { %v2057_v24 = vadd.f32 %v2055_v25, %v2049_v34 }
 0x2fb   : > { %v1637_v14 = vpop.permute.xlu1 %1636  ;;  %v2066_v37 = vpop.permute.xlu0 %2065 }
 0x2fc   : > { %v1641_v36 = vadd.f32 %v1637_v14, %v1627_v17  ;;  %v2071_v3 = vadd.f32 %v2066_v37, %v2057_v24 }
 0x2fe   : > { %v1645_v26 = vsel %vm680_vm6, %v1641_v36, 0.0 }
 0x2ff   : > { %1646 = vadd.xlane.f32.xlu1 %v1645_v26  ;;  %v2010_v35 = vpop.permute.xlu1 %2009  ;;  %v2080_v15 = vpop.permute.xlu0 %2079 }
 0x300   : > { %v2014_v21 = vadd.f32 %v2010_v35, %v2000_v10  ;;  %v2085_v46 = vadd.f32 %v2080_v15, %v2071_v3 }
 0x302   : > { %v2022_v55 = vadd.f32 %v2020_v8, %v2014_v21  ;;  %v2093_v19 = vadd.f32 %v2091_v18, %v2085_v46 }
 0x303   : > { %v2032_v28 = vpop.permute.xlu1 %2031  ;;  %v2102_v9 = vpop.permute.xlu0 %2101 }
 0x304   : > { %v2036_v58 = vadd.f32 %v2032_v28, %v2022_v55  ;;  %v2107_v12 = vadd.f32 %v2102_v9, %v2093_v19 }
 0x307   : > { %v2046_v2 = vpop.permute.xlu1 %2045  ;;  %v2116_v20 = vpop.permute.xlu0 %2115 }
 0x308   : > { %v2050_v4 = vadd.f32 %v2046_v2, %v2036_v58  ;;  %v2121_v1 = vadd.f32 %v2116_v20, %v2107_v12 }
 0x30a   : > { %v2058_v39 = vadd.f32 %v2056_v29, %v2050_v4 }
 0x30b   : > { %v2068_v52 = vpop.permute.xlu1 %2067 }
 0x30c   : > { %v2072_v27 = vadd.f32 %v2068_v52, %v2058_v39 }
 0x30f   : > { %v2082_v54 = vpop.permute.xlu1 %2081 }
 0x310   : > { %v2086_v41 = vadd.f32 %v2082_v54, %v2072_v27 }
 0x312   : > { %v2094_v32 = vadd.f32 %v2092_v0, %v2086_v41 }
 0x313   : > { %v2104_v5 = vpop.permute.xlu1 %2103 }
 0x314   : > { %v2108_v53 = vadd.f32 %v2104_v5, %v2094_v32 }
 0x317   : > { %v2118_v22 = vpop.permute.xlu1 %2117 }
 0x318   : > { %v2122_v61 = vadd.f32 %v2118_v22, %v2108_v53 }
 0x31a   : > { %v2126_v34 = vsel %vm680_vm6, %v2122_v61, 0.0 }
 0x338   : > { %v701_v59 = vpop.xlane.xlu0 %700 }
 0x33c   : > { %v704_v23 = vpop.xlane.xlu0 %703 }
 0x33d   : > { %v705_v25 = vadd.f32 %v704_v23, %v701_v59 }
 0x33f   : > { %v706_v17 = vrot.slane %v705_v25, 4 }
 0x340   : > { %v1181_v45 = vpop.xlane.xlu0 %1180 }
 0x341   : > { %v707_v37 = vadd.f32 %v706_v17, %v705_v25 }
 0x343   : > { %v708_v3 = vrot.slane %v707_v37, 2 }
 0x344   : > { %v1184_v47 = vpop.xlane.xlu0 %1183 }
 0x345   : > { %v1185_v24 = vadd.f32 %v1184_v47, %v1181_v45  ;;  %v709_v21 = vadd.f32 %v708_v3, %v707_v37 }
 0x347   : > { %v710_v28 = vrot.slane %v709_v21, 1 }
 0x349   : > { %v711_v39 = vadd.f32 %v710_v28, %v709_v21 }
 0x34b   : > { %v712_v0 = vmul.f32 0.00390625, %v711_v39 }
 0x34d   : > { %v713_v23 = vadd.f32 1e-05, %v712_v0 }
 0x34f   : > { %4509 = vrsqrt.f32 %v713_v23  ;;  %v2267_v23 = vstv %s6006_s19  ;;  %s6147_s19 = sld [smem:[#allocation6 + $0x1f]] }
 0x37c   : > { %v1644_v38 = vpop.xlane.xlu0 %1643 }
 0x38c   : > { %v1647_v31 = vpop.xlane.xlu1 %1646 }
 0x38d   : > { %v1648_v56 = vadd.f32 %v1647_v31, %v1644_v38 }
 0x38f   : > { %v1649_v43 = vrot.slane %v1648_v56, 4 }
 0x391   : > { %v1650_v60 = vadd.f32 %v1649_v43, %v1648_v56 }
 0x393   : > { %v1651_v33 = vrot.slane %v1650_v60, 2 }
 0x395   : > { %v1652_v48 = vadd.f32 %v1651_v33, %v1650_v60 }
 0x397   : > { %v1653_v16 = vrot.slane %v1652_v48, 1 }
 0x399   : > { %v1654_v7 = vadd.f32 %v1653_v16, %v1652_v48  ;;  %v4510_v16 = vpop.eup %4509 }
 0x39a   : > { %v716_v12 = vmul.f32 %v4510_v16, %v5860_v11 }
 0x39b   : > { %v1655_v62 = vmul.f32 0.00390625, %v1654_v7  ;;  %v715_v7 = vmul.f32 %v4510_v16, %v5854_v44 }
 0x39c   : > { %v718_v53 = vmax.f32 %v716_v12, 0.0 }
 0x39d   : > { %v5946_v42 = vsub.f32 %v5923_v13, %v1655_v62  ;;  %v5948_v51 = vsub.f32 %v1641_v36, %v1655_v62  ;;  %v2123_v13 = vsel %vm680_vm6, %v2121_v1, 0.0  ;;  %v1186_v36 = vrot.slane %v1185_v24, 4 }
 0x39f   : > { %v1658_v50 = vmul.f32 %v5946_v42, %v5946_v42  ;;  %v1659_v63 = vmul.f32 %v5948_v51, %v5948_v51  ;;  %v1187_v26 = vadd.f32 %v1186_v36, %v1185_v24 }
 0x3a1   : > { %v1660_v6 = vsel %vm680_vm6, %v1658_v50, 0.0  ;;  %v1663_v57 = vsel %vm680_vm6, %v1659_v63, 0.0  ;;  %v1188_v46 = vrot.slane %v1187_v26, 2  ;;  %v717_v50 = vmax.f32 %v715_v7, 0.0 }
 0x3a2   : > { %1661 = vadd.xlane.f32.xlu0 %v1660_v6  ;;  %v2325_v7 = vstv %s6033_s0  ;;  %s6167_s0 = sld [smem:[#allocation6 + $0x9]] }
 0x3a3   : > { %v1189_v58 = vadd.f32 %v1188_v46, %v1187_v26 }
 0x3a5   : > { %v1190_v52 = vrot.slane %v1189_v58, 1 }
 0x3a6   : > { %1664 = vadd.xlane.f32.xlu0 %v1663_v57 }
 0x3a7   : > { %v1191_v32 = vadd.f32 %v1190_v52, %v1189_v58  ;;  %v2217_v58 = vstv %s5986_s11  ;;  %v2231_v52 = vstv %s5988_s13  ;;  %s4325_s11 = sld [smem:[#allocation6 + $0x1a]]  ;;  %s4327_s13 = sld [smem:[#allocation6 + $0x1c]] }
 0x3a9   : > { %v1192_v5 = vmul.f32 0.00390625, %v1191_v32  ;;  %v2253_v32 = vstv %s5997_s14  ;;  %s6145_s14 = sld [smem:[#allocation6 + $0x3]] }
 0x3aa   : > { %2124 = vadd.xlane.f32.xlu0 %v2123_v13 }
 0x3ab   : > { %v1193_v56 = vadd.f32 1e-05, %v1192_v5 }
 0x3ad   : > { %4511 = vrsqrt.f32 %v1193_v56 }
 0x3ae   : > { %2127 = vadd.xlane.f32.xlu0 %v2126_v34 }
 0x3b7   : > { %v4512_v62 = vpop.eup %4511 }
 0x3b8   : > { %v1195_v6 = vmul.f32 %v4512_v62, %v5873_v30 }
 0x42f   : > { %v1662_v14 = vpop.xlane.xlu0 %1661 }
 0x433   : > { %v1665_v40 = vpop.xlane.xlu0 %1664 }
 0x434   : > { %v1666_v10 = vadd.f32 %v1665_v40, %v1662_v14 }
 0x436   : > { %v1667_v35 = vrot.slane %v1666_v10, 4 }
 0x437   : > { %v2125_v15 = vpop.xlane.xlu0 %2124 }
 0x438   : > { %v1668_v8 = vadd.f32 %v1667_v35, %v1666_v10 }
 0x43a   : > { %v1669_v2 = vrot.slane %v1668_v8, 2 }
 0x43b   : > { %v2128_v18 = vpop.xlane.xlu0 %2127 }
 0x43c   : > { %v2129_v55 = vadd.f32 %v2128_v18, %v2125_v15  ;;  %v1670_v27 = vadd.f32 %v1669_v2, %v1668_v8 }
 0x43e   : > { %v2130_v19 = vrot.slane %v2129_v55, 4  ;;  %v1671_v9 = vrot.slane %v1670_v27, 1 }
 0x440   : > { %v2131_v4 = vadd.f32 %v2130_v19, %v2129_v55  ;;  %v1672_v45 = vadd.f32 %v1671_v9, %v1670_v27  ;;  %v2195_v9 = vstv %s4301_s16  ;;  %s4328_s16 = sld [smem:[#allocation6 + $0x1d]] }
 0x442   : > { %v2132_v29 = vrot.slane %v2131_v4, 2  ;;  %v1673_v43 = vmul.f32 0.00390625, %v1672_v45 }
 0x444   : > { %v2133_v54 = vadd.f32 %v2132_v29, %v2131_v4  ;;  %v1674_v48 = vadd.f32 1e-05, %v1673_v43  ;;  %v2181_v4 = vstv %s4300_s12  ;;  %v2303_v43 = vstv %s6022_s20  ;;  %s2174_s12 = sld [smem:[#allocation6]] }
 0x445   : > { %s6159_s20 = sld [smem:[#allocation6 + $0x20]] }
 0x446   : > { %v2134_v41 = vrot.slane %v2133_v54, 1  ;;  %4513 = vrsqrt.f32 %v1674_v48 }
 0x448   : > { %v2135_v20 = vadd.f32 %v2134_v41, %v2133_v54 }
 0x44a   : > { %v2136_v59 = vmul.f32 0.00390625, %v2135_v20 }
 0x44c   : > { %v5958_v22 = vsub.f32 %v2122_v61, %v2136_v59  ;;  %v5960_v47 = vsub.f32 %v2121_v1, %v2136_v59  ;;  %v1197_v1 = vmax.f32 %v1195_v6, 0.0  ;;  %v1196_v61 = vmul.f32 %v4512_v62, %v5880_v49 }
 0x44d   : > { %v2339_v6 = vstv %s6040_s25  ;;  %s6174_s25 = sld [smem:[#allocation6 + $0x22]] }
 0x44e   : > { %v2140_v38 = vmul.f32 %v5958_v22, %v5958_v22  ;;  %v2139_v31 = vmul.f32 %v5960_v47, %v5960_v47  ;;  %v1198_v13 = vmax.f32 %v1196_v61, 0.0 }
 0x450   : > { %v2144_v60 = vsel %vm680_vm6, %v2140_v38, 0.0  ;;  %v2141_v33 = vsel %vm680_vm6, %v2139_v31, 0.0  ;;  %v4514_v63 = vpop.eup %4513 }
 0x451   : > { %2145 = vadd.xlane.f32.xlu0 %v2144_v60  ;;  %2142 = vadd.xlane.f32.xlu1 %v2141_v33  ;;  %v1676_v57 = vmul.f32 %v4514_v63, %v5946_v42  ;;  %v1677_v34 = vmul.f32 %v4514_v63, %v5948_v51 }
 0x453   : > { %v1678_v44 = vmax.f32 %v1676_v57, 0.0  ;;  %v1679_v11 = vmax.f32 %v1677_v34, 0.0 }
 0x462   : > { %721 = vrot.lane.b32.xlu1 %v717_v50, %s4659_s10 }
 0x466   : > { %1201 = vrot.lane.b32.xlu1 %v1197_v1, %s4659_s10 }
 0x467   : > { %723 = vrot.lane.b32.xlu0 %v718_v53, %s4659_s10  ;;  %v2361_v53 = vstv %s6051_s27  ;;  %s6183_s27 = sld [smem:[#allocation6 + $0x23]] }
 0x46a   : > { %1682 = vrot.lane.b32.xlu1 %v1678_v44, %s4659_s10 }
 0x46b   : > { %1203 = vrot.lane.b32.xlu0 %v1198_v13, %s4659_s10  ;;  %v2375_v13 = vstv %s6058_s28  ;;  %s6188_s28 = sld [smem:[#allocation6 + $0xc]] }
 0x46f   : > { %1684 = vrot.lane.b32.xlu0 %v1679_v11, %s4659_s10 }
 0x4de   : > { %v2146_v30 = vpop.xlane.xlu0 %2145  ;;  %v2143_v42 = vpop.xlane.xlu1 %2142 }
 0x4df   : > { %v2147_v25 = vadd.f32 %v2146_v30, %v2143_v42 }
 0x4e1   : > { %v2148_v17 = vrot.slane %v2147_v25, 4 }
 0x4e2   : > { %v724_v49 = vpop.permute.xlu0 %723  ;;  %v722_v24 = vpop.permute.xlu1 %721 }
 0x4e3   : > { %v2149_v14 = vadd.f32 %v2148_v17, %v2147_v25  ;;  %728 = vst.msk [vmem:[#allocation3 + $0x9] sm:$0xff] %vm236_vm5, %v724_v49  ;;  %727 = vst.msk [vmem:[#allocation3 + $0x1] sm:$0xff] %vm236_vm5, %v722_v24  ;;  %v2397_v25 = vstv %s6069_s5  ;;  %v2411_v24 = vstv %s6076_s18  ;;  %s6193_s5 = sld [smem:[#allocation6 + $0x25]]  ;;  %s6206_s18 = sld [smem:[#allocation6 + $0x26]] }
 0x4e5   : > { %v2150_v37 = vrot.slane %v2149_v14, 2 }
 0x4e6   : > { %v1204_v51 = vpop.permute.xlu0 %1203  ;;  %v1202_v36 = vpop.permute.xlu1 %1201 }
 0x4e7   : > { %v2151_v40 = vadd.f32 %v2150_v37, %v2149_v14  ;;  %1209 = vst.msk [vmem:[#allocation3 + $0x21] sm:$0xff] %vm236_vm5, %v1204_v51  ;;  %1208 = vst.msk [vmem:[#allocation3 + $0x19] sm:$0xff] %vm236_vm5, %v1202_v36 }
 0x4e9   : > { %v2152_v10 = vrot.slane %v2151_v40, 1 }
 0x4ea   : > { %v1685_v3 = vpop.permute.xlu0 %1684  ;;  %v1683_v26 = vpop.permute.xlu1 %1682  ;;  %v5992_v28 = vld [vmem:[#allocation3 + $0x1] sm:$0xff]  ;;  %v6046_v48 = vld [vmem:[#allocation3 + $0xa] sm:$0xff] }
 0x4eb   : > { %v2153_v35 = vadd.f32 %v2152_v10, %v2151_v40  ;;  %1690 = vst.msk [vmem:[#allocation3 + $0x39] sm:$0xff] %vm236_vm5, %v1685_v3  ;;  %1689 = vst.msk [vmem:[#allocation3 + $0x31] sm:$0xff] %vm236_vm5, %v1683_v26  ;;  %v5995_v2 = vld [vmem:[#allocation3] sm:$0xff]  ;;  %v2218_v29 = vmul.f32 %v2217_v58, %v5992_v28  ;;  %v6004_v27 = vld [vmem:[#allocation3 + $0x8] sm:$0xff]  ;;  %v2232_v54 = vmul.f32 %v2231_v52, %v5992_v28  ;;  %v2433_v40 = vstv %s6087_s6  ;;  %s6209_s6 = sld [smem:[#allocation6 + $0xf]] }
 0x4ec   : > { %v2182_v39 = vmul.f32 %v2181_v4, %v5995_v2  ;;  %v2183_v41 = vmul.f32 %v2181_v4, %v6004_v27  ;;  %v6012_v0 = vld [vmem:[#allocation3 + $0x2] sm:$0xff]  ;;  %v2196_v59 = vmul.f32 %v2195_v9, %v5995_v2  ;;  %v2197_v45 = vmul.f32 %v2195_v9, %v6004_v27 }
 0x4ed   : > { %v2154_v15 = vmul.f32 0.00390625, %v2153_v35  ;;  %v2254_v20 = vmul.f32 %v2253_v32, %v6012_v0  ;;  %v2268_v5 = vmul.f32 %v2267_v23, %v6012_v0  ;;  %v2255_v62 = vmul.f32 %v2253_v32, %v6046_v48 }
 0x4ee   : > { %v6048_v16 = vld [vmem:[#allocation3 + $0x19] sm:$0xff]  ;;  %v2269_v63 = vmul.f32 %v2267_v23, %v6046_v48  ;;  %v6082_v30 = vld [vmem:[#allocation3 + $0x21] sm:$0xff]  ;;  %v2447_v26 = vstv %s6094_s7  ;;  %s6211_s7 = sld [smem:[#allocation6 + $0x28]] }
 0x4ef   : > { %v2155_v21 = vadd.f32 1e-05, %v2154_v15  ;;  %v2326_v50 = vmul.f32 %v2325_v7, %v6048_v16  ;;  %v2340_v12 = vmul.f32 %v2339_v6, %v6048_v16  ;;  %v6064_v1 = vld [vmem:[#allocation3 + $0x20] sm:$0xff]  ;;  %v2327_v17 = vmul.f32 %v2325_v7, %v6082_v30 }
 0x4f0   : > { %v6066_v57 = vld [vmem:[#allocation3 + $0x1a] sm:$0xff]  ;;  %v2305_v34 = vmul.f32 %v2303_v43, %v6064_v1  ;;  %v2341_v14 = vmul.f32 %v2339_v6, %v6082_v30  ;;  %v6100_v51 = vld [vmem:[#allocation3 + $0x22] sm:$0xff] }
 0x4f1   : > { %4515 = vrsqrt.f32 %v2155_v21  ;;  %v2362_v44 = vmul.f32 %v2361_v53, %v6066_v57  ;;  %v2376_v11 = vmul.f32 %v2375_v13, %v6066_v57  ;;  %v2363_v10 = vmul.f32 %v2361_v53, %v6100_v51 }
 0x4f2   : > { %v6084_v42 = vld [vmem:[#allocation3 + $0x30] sm:$0xff]  ;;  %v2377_v35 = vmul.f32 %v2375_v13, %v6100_v51  ;;  %v6116_v21 = vld [vmem:[#allocation3 + $0x38] sm:$0xff] }
 0x4f3   : > { %v2398_v49 = vmul.f32 %v2397_v25, %v6084_v42  ;;  %v2412_v37 = vmul.f32 %v2411_v24, %v6084_v42  ;;  %v6102_v36 = vld [vmem:[#allocation3 + $0x31] sm:$0xff] }
 0x4f4   : > { %v2434_v3 = vmul.f32 %v2433_v40, %v6102_v36  ;;  %v2448_v15 = vmul.f32 %v2447_v26, %v6102_v36 }
 0x4fb   : > { %v4516_v46 = vpop.eup %4515 }
 0x4fc   : > { %v2158_v8 = vmul.f32 %v4516_v46, %v5958_v22  ;;  %v2157_v18 = vmul.f32 %v4516_v46, %v5960_v47  ;;  %v6028_v22 = vld [vmem:[#allocation3 + $0x9] sm:$0xff]  ;;  %v6030_v47 = vld [vmem:[#allocation3 + $0x18] sm:$0xff] }
 0x4fd   : > { %v2219_v31 = vmul.f32 %v2217_v58, %v6028_v22  ;;  %v2233_v60 = vmul.f32 %v2231_v52, %v6028_v22  ;;  %v2304_v33 = vmul.f32 %v2303_v43, %v6030_v47  ;;  %v6118_v46 = vld [vmem:[#allocation3 + $0x32] sm:$0xff]  ;;  %v2413_v58 = vmul.f32 %v2411_v24, %v6116_v21 }
 0x4fe   : > { %v2160_v55 = vmax.f32 %v2158_v8, 0.0  ;;  %v2159_v19 = vmax.f32 %v2157_v18, 0.0  ;;  %v2469_v8 = vstv %s6105_s8  ;;  %v2399_v18 = vmul.f32 %v2397_v25, %v6116_v21  ;;  %s6219_s8 = sld [smem:[#allocation6 + $0x29]] }
 0x4ff   : > { %v2541_v25 = vstv %s6147_s19  ;;  %s6259_s19 = sld [smem:[#allocation6 + $0x6d]] }
 0x500   : > { %2165 = vrot.lane.b32.xlu0 %v2160_v55, %s4659_s10  ;;  %2163 = vrot.lane.b32.xlu1 %v2159_v19, %s4659_s10  ;;  %s6015_s10 = sld [smem:[#allocation6 + $0xa]]  ;;  %v2470_v55 = vmul.f32 %v2469_v8, %v6118_v46  ;;  %v2483_v19 = vstv %s4325_s11 }
 0x501   : > { %v2484_v4 = vmul.f32 %v2483_v19, %v6118_v46  ;;  %s6225_s11 = sld [smem:[#allocation6 + $0x12]] }
 0x504   : > { %2222 = vrot.lane.b32.xlu0 %v2218_v29, %s4660_s15  ;;  %2186 = vrot.lane.b32.xlu1 %v2182_v39, %s4660_s15  ;;  %v6129_v29 = vld [vmem:[#allocation3 + $0x39] sm:$0xff] }
 0x505   : > { %v2435_v39 = vmul.f32 %v2433_v40, %v6129_v29  ;;  %v2449_v52 = vmul.f32 %v2447_v26, %v6129_v29 }
 0x506   : > { %v2289_v38 = vstv %s6015_s10  ;;  %s6153_s10 = sld [smem:[#allocation6 + $0x6]] }
 0x507   : > { %v2290_v56 = vmul.f32 %v2289_v38, %v6030_v47  ;;  %v2291_v61 = vmul.f32 %v2289_v38, %v6064_v1 }
 0x508   : > { %2236 = vrot.lane.b32.xlu0 %v2232_v54, %s4661_s17  ;;  %2188 = vrot.lane.b32.xlu1 %v2183_v41, %s4660_s15  ;;  %v6136_v54 = vld [vmem:[#allocation3 + $0x3a] sm:$0xff] }
 0x509   : > { %v2471_v41 = vmul.f32 %v2469_v8, %v6136_v54  ;;  %v2485_v32 = vmul.f32 %v2483_v19, %v6136_v54  ;;  %v2555_v8 = vstv %s6159_s20  ;;  %s6275_s20 = sld [smem:[#allocation6 + $0x4a]] }
 0x50c   : > { %2258 = vrot.lane.b32.xlu0 %v2254_v20, %s4660_s15  ;;  %2200 = vrot.lane.b32.xlu1 %v2196_v59, %s4661_s17 }
 0x510   : > { %2272 = vrot.lane.b32.xlu0 %v2268_v5, %s4661_s17  ;;  %2202 = vrot.lane.b32.xlu1 %v2197_v45, %s4661_s17  ;;  %v2175_v5 = vstv %s2174_s12  ;;  %v2505_v45 = vstv %s4327_s13  ;;  %s6232_s12 = sld [smem:[#allocation6 + $0x2b]]  ;;  %s6239_s13 = sld [smem:[#allocation6 + $0x2c]] }
 0x514   : > { %2224 = vrot.lane.b32.xlu1 %v2219_v31, %s4660_s15  ;;  %2294 = vrot.lane.b32.xlu0 %v2290_v56, %s4660_s15 }
 0x518   : > { %2238 = vrot.lane.b32.xlu1 %v2233_v60, %s4661_s17  ;;  %2308 = vrot.lane.b32.xlu0 %v2304_v33, %s4661_s17  ;;  %v2176_v60 = vmul.f32 %v2175_v5, %v5995_v2 }
 0x51c   : > { %2260 = vrot.lane.b32.xlu1 %v2255_v62, %s4660_s15  ;;  %2330 = vrot.lane.b32.xlu0 %v2326_v50, %s4660_s15  ;;  %v2211_v62 = vstv %s6145_s14  ;;  %v2519_v50 = vstv %s4328_s16  ;;  %s6242_s14 = sld [smem:[#allocation6 + $0x15]]  ;;  %s6251_s16 = sld [smem:[#allocation6 + $0x49]] }
 0x520   : > { %2274 = vrot.lane.b32.xlu1 %v2269_v63, %s4661_s17  ;;  %2344 = vrot.lane.b32.xlu0 %v2340_v12, %s4661_s17  ;;  %v2177_v63 = vmul.f32 %v2175_v5, %v6004_v27 }
 0x524   : > { %2296 = vrot.lane.b32.xlu1 %v2291_v61, %s4660_s15  ;;  %2366 = vrot.lane.b32.xlu0 %v2362_v44, %s4660_s15  ;;  %v2212_v61 = vmul.f32 %v2211_v62, %v5992_v28 }
 0x528   : > { %2310 = vrot.lane.b32.xlu1 %v2305_v34, %s4661_s17  ;;  %2380 = vrot.lane.b32.xlu0 %v2376_v11, %s4661_s17 }
 0x52c   : > { %2332 = vrot.lane.b32.xlu1 %v2327_v17, %s4660_s15  ;;  %2402 = vrot.lane.b32.xlu0 %v2398_v49, %s4660_s15 }
 0x530   : > { %2346 = vrot.lane.b32.xlu1 %v2341_v14, %s4661_s17  ;;  %2416 = vrot.lane.b32.xlu0 %v2412_v37, %s4661_s17  ;;  %v2247_v14 = vstv %s6153_s10  ;;  %s6262_s10 = sld [smem:[#allocation6 + $0x18]] }
 0x534   : > { %2368 = vrot.lane.b32.xlu1 %v2363_v10, %s4660_s15  ;;  %2438 = vrot.lane.b32.xlu0 %v2434_v3, %s4660_s15  ;;  %v2213_v10 = vmul.f32 %v2211_v62, %v6028_v22 }
 0x538   : > { %2382 = vrot.lane.b32.xlu1 %v2377_v35, %s4661_s17  ;;  %2452 = vrot.lane.b32.xlu0 %v2448_v15, %s4661_s17 }
 0x53c   : > { %2404 = vrot.lane.b32.xlu1 %v2399_v18, %s4660_s15  ;;  %2474 = vrot.lane.b32.xlu0 %v2470_v55, %s4660_s15  ;;  %v2248_v18 = vmul.f32 %v2247_v14, %v6012_v0 }
 0x540   : > { %2418 = vrot.lane.b32.xlu1 %v2413_v58, %s4661_s17  ;;  %2488 = vrot.lane.b32.xlu0 %v2484_v4, %s4661_s17 }
 0x544   : > { %2440 = vrot.lane.b32.xlu1 %v2435_v39, %s4660_s15 }
 0x548   : > { %2454 = vrot.lane.b32.xlu1 %v2449_v52, %s4661_s17  ;;  %v2283_v52 = vstv %s6167_s0  ;;  %s6282_s0 = sld [smem:[#allocation6 + $0x6e]] }
 0x54c   : > { %2476 = vrot.lane.b32.xlu1 %v2471_v41, %s4660_s15 }
 0x550   : > { %2490 = vrot.lane.b32.xlu1 %v2485_v32, %s4661_s17 }
 0x572   : > { %v2166_v9 = vpop.permute.xlu0 %2165  ;;  %v2164_v20 = vpop.permute.xlu1 %2163 }
 0x573   : > { %2171 = vst.msk [vmem:[#allocation3 + $0x51] sm:$0xff] %vm236_vm5, %v2166_v9  ;;  %2170 = vst.msk [vmem:[#allocation3 + $0x49] sm:$0xff] %vm236_vm5, %v2164_v20  ;;  %v2577_v20 = vstv %s6174_s25  ;;  %s6285_s25 = sld [smem:[#allocation6 + $0x1b]] }
 0x576   : > { %v2223_v59 = vpop.permute.xlu0 %2222  ;;  %v2187_v23 = vpop.permute.xlu1 %2186 }
 0x577   : > { %v2192_v6 = vadd.f32 %v2187_v23, %v2176_v60  ;;  %v2249_v60 = vmul.f32 %v2247_v14, %v6046_v48 }
 0x57a   : > { %v2237_v38 = vpop.permute.xlu0 %2236  ;;  %v2189_v31 = vpop.permute.xlu1 %2188  ;;  %v6149_v56 = vld [vmem:[#allocation3 + $0x50] sm:$0xff]  ;;  %v6151_v43 = vld [vmem:[#allocation3 + $0x48] sm:$0xff] }
 0x57b   : > { %v2507_v33 = vmul.f32 %v2505_v45, %v6149_v56  ;;  %v2506_v7 = vmul.f32 %v2505_v45, %v6151_v43  ;;  %v2521_v13 = vmul.f32 %v2519_v50, %v6149_v56  ;;  %v2520_v34 = vmul.f32 %v2519_v50, %v6151_v43  ;;  %v6169_v11 = vld [vmem:[#allocation3 + $0x51] sm:$0xff]  ;;  %v6172_v17 = vld [vmem:[#allocation3 + $0x49] sm:$0xff] }
 0x57c   : > { %v2193_v49 = vadd.f32 %v2189_v31, %v2177_v63  ;;  %v2543_v35 = vmul.f32 %v2541_v25, %v6169_v11  ;;  %v2542_v15 = vmul.f32 %v2541_v25, %v6172_v17  ;;  %v2557_v41 = vmul.f32 %v2555_v8, %v6169_v11  ;;  %v6195_v9 = vld [vmem:[#allocation3 + $0x52] sm:$0xff] }
 0x57d   : > { %2512 = vrot.lane.b32.xlu1 %v2507_v33, %s4660_s15  ;;  %2510 = vrot.lane.b32.xlu0 %v2506_v7, %s4660_s15  ;;  %v2556_v32 = vmul.f32 %v2555_v8, %v6172_v17  ;;  %v2284_v45 = vmul.f32 %v2283_v52, %v6030_v47  ;;  %v2579_v62 = vmul.f32 %v2577_v20, %v6195_v9 }
 0x57e   : > { %v2259_v12 = vpop.permute.xlu0 %2258  ;;  %v2201_v53 = vpop.permute.xlu1 %2200  ;;  %v2285_v8 = vmul.f32 %v2283_v52, %v6064_v1 }
 0x57f   : > { %v2206_v44 = vadd.f32 %v2201_v53, %v2192_v6  ;;  %v2591_v6 = vstv %s6183_s27  ;;  %v2319_v53 = vstv %s6188_s28  ;;  %s6294_s27 = sld [smem:[#allocation6 + $0x4c]]  ;;  %s6301_s28 = sld [smem:[#allocation6 + $0x70]] }
 0x580   : > { %v2320_v14 = vmul.f32 %v2319_v53, %v6048_v16 }
 0x581   : > { %v2214_v24 = vadd.f32 %v2212_v61, %v2206_v44  ;;  %2526 = vrot.lane.b32.xlu1 %v2521_v13, %s4661_s17  ;;  %2524 = vrot.lane.b32.xlu0 %v2520_v34, %s4661_s17  ;;  %v2593_v34 = vmul.f32 %v2591_v6, %v6195_v9 }
 0x582   : > { %v2273_v37 = vpop.permute.xlu0 %2272  ;;  %v2203_v40 = vpop.permute.xlu1 %2202 }
 0x583   : > { %v2228_v3 = vadd.f32 %v2223_v59, %v2214_v24  ;;  %v2207_v26 = vadd.f32 %v2203_v40, %v2193_v49  ;;  %v6198_v59 = vld [vmem:[#allocation3 + $0x4a] sm:$0xff]  ;;  %v2655_v49 = vstv %s6193_s5  ;;  %s6313_s5 = sld [smem:[#allocation6 + $0x4d]] }
 0x584   : > { %v2578_v50 = vmul.f32 %v2577_v20, %v6198_v59  ;;  %v2592_v25 = vmul.f32 %v2591_v6, %v6198_v59 }
 0x585   : > { %v2242_v55 = vadd.f32 %v2237_v38, %v2228_v3  ;;  %2548 = vrot.lane.b32.xlu1 %v2543_v35, %s4660_s15  ;;  %2546 = vrot.lane.b32.xlu0 %v2542_v15, %s4660_s15  ;;  %v2215_v19 = vadd.f32 %v2213_v10, %v2207_v26  ;;  %v2656_v3 = vmul.f32 %v2655_v49, %v5995_v2 }
 0x586   : > { %v2295_v58 = vpop.permute.xlu0 %2294  ;;  %v2225_v4 = vpop.permute.xlu1 %2224  ;;  %v2657_v15 = vmul.f32 %v2655_v49, %v6004_v27 }
 0x587   : > { %v2250_v39 = vadd.f32 %v2248_v18, %v2242_v55  ;;  %v2229_v5 = vadd.f32 %v2225_v4, %v2215_v19  ;;  %v2355_v18 = vstv %s6209_s6  ;;  %v2669_v55 = vstv %s6206_s18  ;;  %s6322_s18 = sld [smem:[#allocation6 + $0x71]]  ;;  %s4382_s6 = sld [smem:[#allocation6 + $0x4f]] }
 0x588   : > { %v2691_v19 = vstv %s6211_s7  ;;  %v2356_v20 = vmul.f32 %v2355_v18, %v6066_v57  ;;  %v2670_v52 = vmul.f32 %v2669_v55, %v5995_v2  ;;  %s4422_s7 = sld [smem:[#allocation6 + $0x73]] }
 0x589   : > { %v2264_v23 = vadd.f32 %v2259_v12, %v2250_v39  ;;  %2562 = vrot.lane.b32.xlu1 %v2557_v41, %s4661_s17  ;;  %2560 = vrot.lane.b32.xlu0 %v2556_v32, %s4661_s17 }
 0x58a   : > { %v2309_v38 = vpop.permute.xlu0 %2308  ;;  %v2239_v31 = vpop.permute.xlu1 %2238 }
 0x58b   : > { %v2278_v33 = vadd.f32 %v2273_v37, %v2264_v23  ;;  %v2243_v7 = vadd.f32 %v2239_v31, %v2229_v5  ;;  %v2692_v23 = vmul.f32 %v2691_v19, %v5992_v28  ;;  %v2705_v5 = vstv %s6219_s8  ;;  %s4383_s8 = sld [smem:[#allocation6 + $0x50]] }
 0x58c   : > { %v2706_v6 = vmul.f32 %v2705_v5, %v5992_v28 }
 0x58d   : > { %v2286_v63 = vadd.f32 %v2284_v45, %v2278_v33  ;;  %2584 = vrot.lane.b32.xlu1 %v2579_v62, %s4660_s15  ;;  %2582 = vrot.lane.b32.xlu0 %v2578_v50, %s4660_s15  ;;  %v2251_v12 = vadd.f32 %v2249_v60, %v2243_v7  ;;  %v2671_v33 = vmul.f32 %v2669_v55, %v6004_v27  ;;  %v2391_v7 = vstv %s6225_s11  ;;  %s4423_s11 = sld [smem:[#allocation6 + $0x74]] }
 0x58e   : > { %v2331_v61 = vpop.permute.xlu0 %2330  ;;  %v2261_v44 = vpop.permute.xlu1 %2260 }
 0x58f   : > { %v2300_v13 = vadd.f32 %v2295_v58, %v2286_v63  ;;  %v2265_v37 = vadd.f32 %v2261_v44, %v2251_v12  ;;  %v2321_v63 = vmul.f32 %v2319_v53, %v6082_v30  ;;  %v2727_v12 = vstv %s6232_s12  ;;  %s4345_s12 = sld [smem:[#allocation6 + $0x2e]] }
 0x590   : > { %v2392_v44 = vmul.f32 %v2391_v7, %v6084_v42  ;;  %v2728_v53 = vmul.f32 %v2727_v12, %v6012_v0 }
 0x591   : > { %v2314_v24 = vadd.f32 %v2309_v38, %v2300_v13  ;;  %2598 = vrot.lane.b32.xlu1 %v2593_v34, %s4661_s17  ;;  %2596 = vrot.lane.b32.xlu0 %v2592_v25, %s4661_s17 }
 0x592   : > { %v2345_v40 = vpop.permute.xlu0 %2344  ;;  %v2275_v10 = vpop.permute.xlu1 %2274 }
 0x593   : > { %v2322_v26 = vadd.f32 %v2320_v14, %v2314_v24  ;;  %v2279_v35 = vadd.f32 %v2275_v10, %v2265_v37  ;;  %v2693_v24 = vmul.f32 %v2691_v19, %v6028_v22  ;;  %v2741_v14 = vstv %s6239_s13  ;;  %s6368_s13 = sld [smem:[#allocation6 + $0x53]] }
 0x594   : > { %v2427_v37 = vstv %s6242_s14  ;;  %v2357_v19 = vmul.f32 %v2355_v18, %v6100_v51  ;;  %s4385_s14 = sld [smem:[#allocation6 + $0x52]] }
 0x595   : > { %v2336_v58 = vadd.f32 %v2331_v61, %v2322_v26  ;;  %2660 = vrot.lane.b32.xlu1 %v2656_v3, %s4660_s15  ;;  %2662 = vrot.lane.b32.xlu0 %v2657_v15, %s4660_s15  ;;  %v2287_v4 = vadd.f32 %v2285_v8, %v2279_v35  ;;  %v2707_v26 = vmul.f32 %v2705_v5, %v6028_v22 }
 0x596   : > { %v2367_v39 = vpop.permute.xlu0 %2366  ;;  %v2297_v41 = vpop.permute.xlu1 %2296  ;;  %v2742_v35 = vmul.f32 %v2741_v14, %v6012_v0  ;;  %v2428_v55 = vmul.f32 %v2427_v37, %v6102_v36  ;;  %v2463_v36 = vstv %s6262_s10  ;;  %s6374_s10 = sld [smem:[#allocation6 + $0x77]] }
 0x597   : > { %v2350_v32 = vadd.f32 %v2345_v40, %v2336_v58  ;;  %v2301_v38 = vadd.f32 %v2297_v41, %v2287_v4  ;;  %v3131_v58 = vstv %s6251_s16  ;;  %s4425_s16 = sld [smem:[#allocation6 + $0x76]] }
 0x599   : > { %v2358_v45 = vadd.f32 %v2356_v20, %v2350_v32  ;;  %2674 = vrot.lane.b32.xlu1 %v2670_v52, %s4661_s17  ;;  %2696 = vrot.lane.b32.xlu0 %v2692_v23, %s4660_s15  ;;  %v2729_v20 = vmul.f32 %v2727_v12, %v6046_v48  ;;  %v3133_v52 = vmul.f32 %v3131_v58, %v6004_v27  ;;  %v3607_v23 = vstv %s6259_s19  ;;  %s4346_s19 = sld [smem:[#allocation6 + $0x2f]] }
 0x59a   : > { %v2381_v31 = vpop.permute.xlu0 %2380  ;;  %v2311_v60 = vpop.permute.xlu1 %2310 }
 0x59b   : > { %v2372_v62 = vadd.f32 %v2367_v39, %v2358_v45  ;;  %v2315_v50 = vadd.f32 %v2311_v60, %v2301_v38  ;;  %v3609_v60 = vmul.f32 %v3607_v23, %v6004_v27 }
 0x59d   : > { %v2386_v61 = vadd.f32 %v2381_v31, %v2372_v62  ;;  %2676 = vrot.lane.b32.xlu1 %v2671_v33, %s4661_s17  ;;  %2710 = vrot.lane.b32.xlu0 %v2706_v6, %s4661_s17  ;;  %v2323_v13 = vadd.f32 %v2321_v63, %v2315_v50  ;;  %v3132_v31 = vmul.f32 %v3131_v58, %v5995_v2  ;;  %v3145_v63 = vstv %s6275_s20  ;;  %s6381_s20 = sld [smem:[#allocation6 + $0x31]] }
 0x59e   : > { %v2403_v34 = vpop.permute.xlu0 %2402  ;;  %v2333_v25 = vpop.permute.xlu1 %2332  ;;  %v2464_v50 = vmul.f32 %v2463_v36, %v6118_v46  ;;  %v2393_v6 = vmul.f32 %v2391_v7, %v6116_v21  ;;  %v3147_v46 = vmul.f32 %v3145_v63, %v6004_v27  ;;  %v2499_v21 = vstv %s6285_s25  ;;  %s4329_s25 = sld [smem:[#allocation6 + $0x1e]] }
 0x59f   : > { %v2394_v49 = vadd.f32 %v2392_v44, %v2386_v61  ;;  %v2337_v10 = vadd.f32 %v2333_v25, %v2323_v13  ;;  %v3608_v25 = vmul.f32 %v3607_v23, %v5995_v2 }
 0x5a1   : > { %v2408_v40 = vadd.f32 %v2403_v34, %v2394_v49  ;;  %2698 = vrot.lane.b32.xlu1 %v2693_v24, %s4660_s15  ;;  %2732 = vrot.lane.b32.xlu0 %v2728_v53, %s4660_s15  ;;  %v3621_v49 = vstv %s6282_s0  ;;  %s6388_s0 = sld [smem:[#allocation6 + $0x55]] }
 0x5a2   : > { %v2417_v42 = vpop.permute.xlu0 %2416  ;;  %v2347_v3 = vpop.permute.xlu1 %2346  ;;  %v3622_v58 = vmul.f32 %v3621_v49, %v5995_v2 }
 0x5a3   : > { %v2422_v15 = vadd.f32 %v2417_v42, %v2408_v40  ;;  %v2351_v8 = vadd.f32 %v2347_v3, %v2337_v10  ;;  %v3146_v40 = vmul.f32 %v3145_v63, %v5995_v2  ;;  %v3623_v10 = vmul.f32 %v3621_v49, %v6004_v27 }
 0x5a4   : > { %v3679_v63 = vstv %s4422_s7  ;;  %s6432_s7 = sld [smem:[#allocation6 + $0x34]] }
 0x5a5   : > { %2712 = vrot.lane.b32.xlu1 %v2707_v26, %s4661_s17  ;;  %2746 = vrot.lane.b32.xlu0 %v2742_v35, %s4661_s17  ;;  %v2430_v4 = vadd.f32 %v2428_v55, %v2422_v15  ;;  %v2359_v39 = vadd.f32 %v2357_v19, %v2351_v8  ;;  %v2429_v26 = vmul.f32 %v2427_v37, %v6129_v29  ;;  %v3167_v15 = vstv %s6294_s27  ;;  %s6394_s27 = sld [smem:[#allocation6 + $0x79]] }
 0x5a6   : > { %v2439_v41 = vpop.permute.xlu0 %2438  ;;  %v2369_v32 = vpop.permute.xlu1 %2368  ;;  %v2500_v35 = vmul.f32 %v2499_v21, %v6151_v43  ;;  %v3643_v29 = vstv %s6301_s28  ;;  %s6402_s28 = sld [smem:[#allocation6 + $0x32]] }
 0x5a7   : > { %v2444_v18 = vadd.f32 %v2439_v41, %v2430_v4  ;;  %v2373_v5 = vadd.f32 %v2369_v32, %v2359_v39  ;;  %v3169_v4 = vmul.f32 %v3167_v15, %v6028_v22  ;;  %v3168_v39 = vmul.f32 %v3167_v15, %v5992_v28 }
 0x5a8   : > { %v3645_v41 = vmul.f32 %v3643_v29, %v6028_v22  ;;  %v2465_v32 = vmul.f32 %v2463_v36, %v6136_v54  ;;  %v3644_v23 = vmul.f32 %v3643_v29, %v5992_v28 }
 0x5a9   : > { %2734 = vrot.lane.b32.xlu1 %v2729_v20, %s4660_s15  ;;  %3138 = vrot.lane.b32.xlu0 %v3133_v52, %s4660_s15  ;;  %v3181_v20 = vstv %s6313_s5  ;;  %s6406_s5 = sld [smem:[#allocation6 + $0x21]] }
 0x5aa   : > { %v2453_v45 = vpop.permute.xlu0 %2452  ;;  %v2383_v38 = vpop.permute.xlu1 %2382 }
 0x5ab   : > { %v2458_v33 = vadd.f32 %v2453_v45, %v2444_v18  ;;  %v2387_v62 = vadd.f32 %v2383_v38, %v2373_v5  ;;  %v3183_v18 = vmul.f32 %v3181_v20, %v6028_v22  ;;  %v3657_v5 = vstv %s6322_s18  ;;  %s6413_s18 = sld [smem:[#allocation6 + $0x56]] }
 0x5ac   : > { %v3182_v38 = vmul.f32 %v3181_v20, %v5992_v28 }
 0x5ad   : > { %3136 = vrot.lane.b32.xlu1 %v3132_v31, %s4660_s15  ;;  %3614 = vrot.lane.b32.xlu0 %v3609_v60, %s4660_s15  ;;  %v2466_v12 = vadd.f32 %v2464_v50, %v2458_v33  ;;  %v2395_v61 = vadd.f32 %v2393_v6, %v2387_v62  ;;  %v3659_v31 = vmul.f32 %v3657_v5, %v6028_v22  ;;  %v3203_v33 = vstv %s4382_s6  ;;  %s6422_s6 = sld [smem:[#allocation6 + $0x7a]] }
 0x5ae   : > { %v2475_v44 = vpop.permute.xlu0 %2474  ;;  %v2405_v13 = vpop.permute.xlu1 %2404  ;;  %v2501_v60 = vmul.f32 %v2499_v21, %v6149_v56  ;;  %v3658_v50 = vmul.f32 %v3657_v5, %v5992_v28  ;;  %v3205_v6 = vmul.f32 %v3203_v33, %v6046_v48  ;;  %v3204_v22 = vmul.f32 %v3203_v33, %v6012_v0 }
 0x5af   : > { %v2409_v34 = vadd.f32 %v2405_v13, %v2395_v61  ;;  %v2480_v7 = vadd.f32 %v2475_v44, %v2466_v12  ;;  %v3681_v56 = vmul.f32 %v3679_v63, %v6046_v48  ;;  %v3217_v12 = vstv %s4383_s8  ;;  %s6436_s8 = sld [smem:[#allocation6 + $0x24]] }
 0x5b0   : > { %v3680_v28 = vmul.f32 %v3679_v63, %v6012_v0  ;;  %v3218_v61 = vmul.f32 %v3217_v12, %v6012_v0  ;;  %v3693_v44 = vstv %s4423_s11  ;;  %v2743_v13 = vmul.f32 %v2741_v14, %v6046_v48  ;;  %s6449_s11 = sld [smem:[#allocation6 + $0x58]] }
 0x5b1   : > { %3612 = vrot.lane.b32.xlu1 %v3608_v25, %s4660_s15  ;;  %3152 = vrot.lane.b32.xlu0 %v3147_v46, %s4661_s17  ;;  %v2763_v25 = vstv %s4345_s12  ;;  %v3219_v46 = vmul.f32 %v3217_v12, %v6046_v48  ;;  %v3239_v21 = vstv %s4385_s14  ;;  %v3695_v14 = vmul.f32 %v3693_v44, %v6046_v48  ;;  %s6453_s12 = sld [smem:[#allocation6 + $0x27]]  ;;  %s6462_s14 = sld [smem:[#allocation6 + $0x7c]] }
 0x5b2   : > { %v2489_v24 = vpop.permute.xlu0 %2488  ;;  %v2419_v53 = vpop.permute.xlu1 %2418  ;;  %v2764_v49 = vmul.f32 %v2763_v25, %v6030_v47  ;;  %v3241_v48 = vmul.f32 %v3239_v21, %v6064_v1 }
 0x5b3   : > { %v2494_v42 = vadd.f32 %v2489_v24, %v2480_v7  ;;  %v2423_v3 = vadd.f32 %v2419_v53, %v2409_v34  ;;  %v3694_v34 = vmul.f32 %v3693_v44, %v6012_v0  ;;  %v3240_v0 = vmul.f32 %v3239_v21, %v6030_v47 }
 0x5b4   : > { %v3715_v7 = vstv %s4425_s16  ;;  %v2765_v24 = vmul.f32 %v2763_v25, %v6064_v1  ;;  %s6469_s16 = sld [smem:[#allocation6 + $0x2a]] }
 0x5b5   : > { %3150 = vrot.lane.b32.xlu1 %v3146_v40, %s4661_s17  ;;  %3628 = vrot.lane.b32.xlu0 %v3623_v10, %s4661_s17  ;;  %v2431_v8 = vadd.f32 %v2429_v26, %v2423_v3  ;;  %v6317_v55 = vadd.f32 %v2500_v35, %v2494_v42  ;;  %v3716_v53 = vmul.f32 %v3715_v7, %v6030_v47  ;;  %v2777_v40 = vstv %s4346_s19  ;;  %s6475_s19 = sld [smem:[#allocation6 + $0x35]] }
 0x5b6   : > { %v2441_v19 = vpop.permute.xlu1 %2440  ;;  %v2778_v10 = vmul.f32 %v2777_v40, %v6030_v47  ;;  %v3253_v42 = vstv %s6368_s13  ;;  %v3717_v3 = vmul.f32 %v3715_v7, %v6064_v1  ;;  %v3729_v35 = vstv %s6374_s10  ;;  %s6491_s13 = sld [smem:[#allocation6 + $0x59]]  ;;  %s6495_s10 = sld [smem:[#allocation6 + $0x2d]] }
 0x5b7   : > { %v2445_v27 = vadd.f32 %v2441_v19, %v2431_v8  ;;  %v3254_v26 = vmul.f32 %v3253_v42, %v6030_v47  ;;  %v2779_v15 = vmul.f32 %v2777_v40, %v6064_v1  ;;  %v3730_v8 = vmul.f32 %v3729_v35, %v6030_v47 }
 0x5b8   : > { %v2799_v19 = vstv %s6381_s20  ;;  %v3255_v29 = vmul.f32 %v3253_v42, %v6064_v1  ;;  %v2535_v47 = vstv %s4329_s25  ;;  %v2835_v7 = vstv %s6432_s7  ;;  %s6500_s20 = sld [smem:[#allocation6 + $0x7d]]  ;;  %s6520_s25 = sld [smem:[#allocation6 + $0x48]] }
 0x5b9   : > { %3626 = vrot.lane.b32.xlu1 %v3622_v58, %s4661_s17  ;;  %3174 = vrot.lane.b32.xlu0 %v3169_v4, %s4660_s15  ;;  %v2800_v4 = vmul.f32 %v2799_v19, %v6048_v16  ;;  %v2536_v5 = vmul.f32 %v2535_v47, %v6172_v17  ;;  %s6566_s7 = sld [smem:[#allocation6 + $0x38]] }
 0x5ba   : > { %v2455_v43 = vpop.permute.xlu1 %2454 }
 0x5bb   : > { %v2459_v37 = vadd.f32 %v2455_v43, %v2445_v27  ;;  %v3275_v43 = vstv %s6388_s0  ;;  %s6516_s0 = sld [smem:[#allocation6 + $0x37]] }
 0x5bc   : > { %v3276_v20 = vmul.f32 %v3275_v43, %v6048_v16  ;;  %v3277_v63 = vmul.f32 %v3275_v43, %v6082_v30 }
 0x5bd   : > { %3172 = vrot.lane.b32.xlu1 %v3168_v39, %s4660_s15  ;;  %3650 = vrot.lane.b32.xlu0 %v3645_v41, %s4660_s15  ;;  %v2467_v2 = vadd.f32 %v2465_v32, %v2459_v37 }
 0x5be   : > { %v2477_v52 = vpop.permute.xlu1 %2476 }
 0x5bf   : > { %v2481_v45 = vadd.f32 %v2477_v52, %v2467_v2  ;;  %v3731_v2 = vmul.f32 %v3729_v35, %v6064_v1  ;;  %v3751_v52 = vstv %s6394_s27  ;;  %s6531_s27 = sld [smem:[#allocation6 + $0x5b]] }
 0x5c0   : > { %v3752_v1 = vmul.f32 %v3751_v52, %v6048_v16 }
 0x5c1   : > { %3648 = vrot.lane.b32.xlu1 %v3644_v23, %s4660_s15  ;;  %3188 = vrot.lane.b32.xlu0 %v3183_v18, %s4661_s17 }
 0x5c2   : > { %v2491_v54 = vpop.permute.xlu1 %2490 }
 0x5c3   : > { %v2495_v36 = vadd.f32 %v2491_v54, %v2481_v45  ;;  %v2537_v45 = vmul.f32 %v2535_v47, %v6169_v11  ;;  %v2571_v11 = vstv %s6406_s5  ;;  %s6542_s5 = sld [smem:[#allocation6 + $0x4b]] }
 0x5c5   : > { %3186 = vrot.lane.b32.xlu1 %v3182_v38, %s4661_s17  ;;  %3664 = vrot.lane.b32.xlu0 %v3659_v31, %s4661_s17  ;;  %v6342_v62 = vadd.f32 %v2501_v60, %v2495_v36  ;;  %v2801_v31 = vmul.f32 %v2799_v19, %v6082_v30  ;;  %v2813_v60 = vstv %s6402_s28  ;;  %s6540_s28 = sld [smem:[#allocation6 + $0x6c]] }
 0x5c9   : > { %3662 = vrot.lane.b32.xlu1 %v3658_v50, %s4661_s17  ;;  %3210 = vrot.lane.b32.xlu0 %v3205_v6, %s4660_s15  ;;  %v2814_v6 = vmul.f32 %v2813_v60, %v6048_v16 }
 0x5cd   : > { %3208 = vrot.lane.b32.xlu1 %v3204_v22, %s4660_s15  ;;  %3686 = vrot.lane.b32.xlu0 %v3681_v56, %s4660_s15  ;;  %v3289_v22 = vstv %s6413_s18  ;;  %s6552_s18 = sld [smem:[#allocation6 + $0x7f]] }
 0x5d1   : > { %3684 = vrot.lane.b32.xlu1 %v3680_v28, %s4660_s15  ;;  %3222 = vrot.lane.b32.xlu0 %v3218_v61, %s4661_s17  ;;  %v2572_v28 = vmul.f32 %v2571_v11, %v6198_v59  ;;  %v2573_v61 = vmul.f32 %v2571_v11, %v6195_v9  ;;  %v3290_v9 = vmul.f32 %v3289_v22, %v6048_v16 }
 0x5d2   : > { %v3753_v59 = vmul.f32 %v3751_v52, %v6082_v30  ;;  %v2837_v52 = vmul.f32 %v2835_v7, %v6100_v51 }
 0x5d5   : > { %2748 = vrot.lane.b32.xlu1 %v2743_v13, %s4661_s17  ;;  %3698 = vrot.lane.b32.xlu0 %v3694_v34, %s4661_s17 }
 0x5d9   : > { %3224 = vrot.lane.b32.xlu1 %v3219_v46, %s4661_s17  ;;  %2768 = vrot.lane.b32.xlu0 %v2764_v49, %s4660_s15  ;;  %v3765_v46 = vstv %s6422_s6  ;;  %s6560_s6 = sld [smem:[#allocation6 + $0x6f]] }
 0x5dd   : > { %3700 = vrot.lane.b32.xlu1 %v3695_v14, %s4661_s17  ;;  %3244 = vrot.lane.b32.xlu0 %v3240_v0, %s4660_s15  ;;  %v3766_v14 = vmul.f32 %v3765_v46, %v6048_v16  ;;  %v2815_v0 = vmul.f32 %v2813_v60, %v6082_v30  ;;  %v6471_v16 = vld [vmem:[#allocation3] sm:$0xff] }
 0x5e1   : > { %2770 = vrot.lane.b32.xlu1 %v2765_v24, %s4660_s15  ;;  %3720 = vrot.lane.b32.xlu0 %v3716_v53, %s4660_s15  ;;  %v2649_v24 = vstv %s6436_s8  ;;  %s6582_s8 = sld [smem:[#allocation6 + $0x5c]] }
 0x5e2   : > { %v2650_v42 = vmul.f32 %v6471_v16, %v2649_v24 }
 0x5e5   : > { %3246 = vrot.lane.b32.xlu1 %v3241_v48, %s4660_s15  ;;  %2782 = vrot.lane.b32.xlu0 %v2778_v10, %s4661_s17  ;;  %v2836_v48 = vmul.f32 %v2835_v7, %v6066_v57  ;;  %v3291_v10 = vmul.f32 %v3289_v22, %v6082_v30 }
 0x5e9   : > { %3722 = vrot.lane.b32.xlu1 %v3717_v3, %s4660_s15  ;;  %3258 = vrot.lane.b32.xlu0 %v3254_v26, %s4661_s17  ;;  %v3311_v3 = vstv %s6449_s11  ;;  %v2685_v26 = vstv %s6453_s12  ;;  %s6593_s11 = sld [smem:[#allocation6 + $0x80]]  ;;  %s6597_s12 = sld [smem:[#allocation6 + $0x4e]] }
 0x5ea   : > { %v3312_v19 = vmul.f32 %v3311_v3, %v6066_v57 }
 0x5ed   : > { %2784 = vrot.lane.b32.xlu1 %v2779_v15, %s4661_s17  ;;  %3734 = vrot.lane.b32.xlu0 %v3730_v8, %s4661_s17 }
 0x5ef   : > { %v2511_v27 = vpop.permute.xlu0 %2510  ;;  %v2513_v58 = vpop.permute.xlu1 %2512 }
 0x5f0   : > { %v2516_v37 = vadd.f32 %v2511_v27, %v6317_v55  ;;  %v2517_v39 = vadd.f32 %v2513_v58, %v6342_v62  ;;  %v3767_v27 = vmul.f32 %v3765_v46, %v6082_v30  ;;  %v6482_v58 = vld [vmem:[#allocation3 + $0x8] sm:$0xff] }
 0x5f1   : > { %2804 = vrot.lane.b32.xlu0 %v2800_v4, %s4660_s15  ;;  %3260 = vrot.lane.b32.xlu1 %v3255_v29, %s4661_s17  ;;  %v2651_v4 = vmul.f32 %v6482_v58, %v2649_v24  ;;  %v6485_v29 = vld [vmem:[#allocation3 + $0x1] sm:$0xff]  ;;  %v6533_v24 = vld [vmem:[#allocation3 + $0x18] sm:$0xff] }
 0x5f2   : > { %v2686_v43 = vmul.f32 %v6485_v29, %v2685_v26 }
 0x5f3   : > { %v2525_v41 = vpop.permute.xlu0 %2524  ;;  %v2527_v32 = vpop.permute.xlu1 %2526 }
 0x5f4   : > { %v2530_v23 = vadd.f32 %v2525_v41, %v2516_v37  ;;  %v2531_v18 = vadd.f32 %v2527_v32, %v2517_v39  ;;  %v6488_v37 = vld [vmem:[#allocation3 + $0x1a] sm:$0xff]  ;;  %v3787_v39 = vstv %s6462_s14  ;;  %s6603_s14 = sld [smem:[#allocation6 + $0x3a]] }
 0x5f5   : > { %3280 = vrot.lane.b32.xlu0 %v3276_v20, %s4660_s15  ;;  %3736 = vrot.lane.b32.xlu1 %v3731_v2, %s4661_s17  ;;  %v3788_v2 = vmul.f32 %v3787_v39, %v6488_v37 }
 0x5f6   : > { %v2538_v55 = vadd.f32 %v2536_v5, %v2530_v23  ;;  %v2539_v54 = vadd.f32 %v2537_v45, %v2531_v18  ;;  %v2721_v23 = vstv %s6469_s16  ;;  %v6502_v45 = vld [vmem:[#allocation3 + $0x9] sm:$0xff]  ;;  %s6607_s16 = sld [smem:[#allocation6 + $0x72]] }
 0x5f7   : > { %v2547_v36 = vpop.permute.xlu0 %2546  ;;  %v2549_v38 = vpop.permute.xlu1 %2548 }
 0x5f8   : > { %v2552_v17 = vadd.f32 %v2547_v36, %v2538_v55  ;;  %v2553_v33 = vadd.f32 %v2549_v38, %v2539_v54  ;;  %v2687_v55 = vmul.f32 %v6502_v45, %v2685_v26  ;;  %v2849_v54 = vstv %s6475_s19  ;;  %v6508_v38 = vld [vmem:[#allocation3 + $0x2] sm:$0xff]  ;;  %s6611_s19 = sld [smem:[#allocation6 + $0x5e]] }
 0x5f9   : > { %3756 = vrot.lane.b32.xlu0 %v3752_v1, %s4660_s15  ;;  %2806 = vrot.lane.b32.xlu1 %v2801_v31, %s4660_s15  ;;  %v2722_v1 = vmul.f32 %v6508_v38, %v2721_v23  ;;  %v2851_v26 = vmul.f32 %v2849_v54, %v6100_v51 }
 0x5fb   : > { %v2561_v62 = vpop.permute.xlu0 %2560  ;;  %v2563_v50 = vpop.permute.xlu1 %2562 }
 0x5fc   : > { %v2566_v56 = vadd.f32 %v2561_v62, %v2552_v17  ;;  %v2567_v12 = vadd.f32 %v2563_v50, %v2553_v33  ;;  %v2850_v17 = vmul.f32 %v2849_v54, %v6066_v57  ;;  %v3313_v33 = vmul.f32 %v3311_v3, %v6100_v51  ;;  %v6563_v51 = vld [vmem:[#allocation3 + $0x22] sm:$0xff] }
 0x5fd   : > { %2818 = vrot.lane.b32.xlu0 %v2814_v6, %s4661_s17  ;;  %3282 = vrot.lane.b32.xlu1 %v3277_v63, %s4660_s15  ;;  %v3325_v50 = vstv %s6491_s13  ;;  %v6514_v6 = vld [vmem:[#allocation3 + $0x22] sm:$0xff]  ;;  %v2757_v63 = vstv %s6495_s10  ;;  %s6623_s13 = sld [smem:[#allocation6 + $0x82]]  ;;  %s6690_s10 = sld [smem:[#allocation6 + $0x30]] }
 0x5fe   : > { %v6438_v44 = vadd.f32 %v2572_v28, %v2566_v56  ;;  %v6440_v13 = vadd.f32 %v2573_v61, %v2567_v12  ;;  %v6523_v28 = vld [vmem:[#allocation3 + $0x1a] sm:$0xff] }
 0x5ff   : > { %v6442_v34 = vpop.permute.xlu0 %2582  ;;  %v6444_v25 = vpop.permute.xlu1 %2584  ;;  %v3326_v61 = vmul.f32 %v6523_v28, %v3325_v50 }
 0x601   : > { %3294 = vrot.lane.b32.xlu0 %v3290_v9, %s4661_s17  ;;  %3758 = vrot.lane.b32.xlu1 %v3753_v59, %s4660_s15  ;;  %v3789_v9 = vmul.f32 %v3787_v39, %v6514_v6  ;;  %v3801_v59 = vstv %s6500_s20  ;;  %v3347_v39 = vstv %s6531_s27  ;;  %s6635_s20 = sld [smem:[#allocation6 + $0x3b]]  ;;  %s6653_s27 = sld [smem:[#allocation6 + $0x75]] }
 0x602   : > { %v3802_v3 = vmul.f32 %v3801_v59, %v6488_v37 }
 0x603   : > { %v6455_v49 = vpop.permute.xlu0 %2596  ;;  %v6457_v21 = vpop.permute.xlu1 %2598 }
 0x605   : > { %3770 = vrot.lane.b32.xlu0 %v3766_v14, %s4661_s17  ;;  %2820 = vrot.lane.b32.xlu1 %v2815_v0, %s4661_s17  ;;  %v6528_v0 = vld [vmem:[#allocation3 + $0xa] sm:$0xff] }
 0x606   : > { %v2723_v7 = vmul.f32 %v6528_v0, %v2721_v23  ;;  %v3803_v23 = vmul.f32 %v3801_v59, %v6514_v6 }
 0x607   : > { %v2663_v53 = vpop.permute.xlu0 %2662  ;;  %v2661_v40 = vpop.permute.xlu1 %2660 }
 0x608   : > { %v2666_v35 = vadd.f32 %v2661_v40, %v2650_v42  ;;  %v2667_v30 = vadd.f32 %v2663_v53, %v2651_v4  ;;  %v2758_v53 = vmul.f32 %v6533_v24, %v2757_v63 }
 0x609   : > { %2840 = vrot.lane.b32.xlu0 %v2836_v48, %s4660_s15  ;;  %3296 = vrot.lane.b32.xlu1 %v3291_v10, %s4661_s17 }
 0x60b   : > { %v2697_v15 = vpop.permute.xlu0 %2696  ;;  %v2675_v8 = vpop.permute.xlu1 %2674 }
 0x60c   : > { %v2680_v47 = vadd.f32 %v2675_v8, %v2666_v35  ;;  %v6554_v35 = vld [vmem:[#allocation3 + $0x30] sm:$0xff]  ;;  %v3125_v8 = vstv %s6520_s25  ;;  %s6649_s25 = sld [smem:[#allocation6 + $0x5f]] }
 0x60d   : > { %3316 = vrot.lane.b32.xlu0 %v3312_v19, %s4660_s15  ;;  %3772 = vrot.lane.b32.xlu1 %v3767_v27, %s4661_s17 }
 0x60e   : > { %v2688_v41 = vadd.f32 %v2686_v43, %v2680_v47  ;;  %v3327_v43 = vmul.f32 %v6563_v51, %v3325_v50  ;;  %v3127_v47 = vmul.f32 %v6482_v58, %v3125_v8 }
 0x60f   : > { %v2711_v32 = vpop.permute.xlu0 %2710  ;;  %v2677_v20 = vpop.permute.xlu1 %2676 }
 0x610   : > { %v2702_v18 = vadd.f32 %v2697_v15, %v2688_v41  ;;  %v2681_v5 = vadd.f32 %v2677_v20, %v2667_v30  ;;  %v2871_v15 = vstv %s6516_s0  ;;  %v3601_v30 = vstv %s6540_s28  ;;  %s6639_s0 = sld [smem:[#allocation6 + $0x51]]  ;;  %s6657_s28 = sld [smem:[#allocation6 + $0x83]] }
 0x611   : > { %3792 = vrot.lane.b32.xlu0 %v3788_v2, %s4660_s15  ;;  %2842 = vrot.lane.b32.xlu1 %v2837_v52, %s4660_s15  ;;  %v2872_v4 = vmul.f32 %v2871_v15, %v6554_v35  ;;  %v3161_v41 = vstv %s6542_s5  ;;  %v3348_v52 = vmul.f32 %v3347_v39, %v6554_v35  ;;  %s6667_s5 = sld [smem:[#allocation6 + $0x3d]] }
 0x612   : > { %v2716_v36 = vadd.f32 %v2711_v32, %v2702_v18  ;;  %v2689_v31 = vadd.f32 %v2687_v55, %v2681_v5  ;;  %v3823_v18 = vstv %s6552_s18  ;;  %v3603_v5 = vmul.f32 %v6482_v58, %v3601_v30  ;;  %s6699_s18 = sld [smem:[#allocation6 + $0x54]] }
 0x613   : > { %v2733_v60 = vpop.permute.xlu0 %2732  ;;  %v2699_v11 = vpop.permute.xlu1 %2698  ;;  %v3126_v55 = vmul.f32 %v6471_v16, %v3125_v8  ;;  %v3602_v58 = vmul.f32 %v6471_v16, %v3601_v30  ;;  %v3824_v50 = vmul.f32 %v3823_v18, %v6554_v35 }
 0x614   : > { %v2724_v62 = vadd.f32 %v2722_v1, %v2716_v36  ;;  %v2703_v56 = vadd.f32 %v2699_v11, %v2689_v31  ;;  %v6579_v36 = vld [vmem:[#allocation3 + $0x38] sm:$0xff]  ;;  %v3163_v1 = vmul.f32 %v6502_v45, %v3161_v41  ;;  %v3637_v31 = vstv %s6560_s6  ;;  %s6704_s6 = sld [smem:[#allocation6 + $0x78]] }
 0x615   : > { %2854 = vrot.lane.b32.xlu0 %v2850_v17, %s4661_s17  ;;  %3318 = vrot.lane.b32.xlu1 %v3313_v33, %s4660_s15 }
 0x616   : > { %v2738_v22 = vadd.f32 %v2733_v60, %v2724_v62 }
 0x617   : > { %v2747_v57 = vpop.permute.xlu0 %2746  ;;  %v2713_v12 = vpop.permute.xlu1 %2712 }
 0x618   : > { %v2752_v46 = vadd.f32 %v2747_v57, %v2738_v22  ;;  %v2717_v14 = vadd.f32 %v2713_v12, %v2703_v56  ;;  %v2873_v22 = vmul.f32 %v2871_v15, %v6579_v36  ;;  %v2885_v56 = vstv %s6566_s7  ;;  %s6709_s7 = sld [smem:[#allocation6 + $0x33]] }
 0x619   : > { %3330 = vrot.lane.b32.xlu0 %v3326_v61, %s4661_s17  ;;  %3794 = vrot.lane.b32.xlu1 %v3789_v9, %s4660_s15  ;;  %v3639_v61 = vmul.f32 %v6502_v45, %v3637_v31  ;;  %v3162_v9 = vmul.f32 %v6485_v29, %v3161_v41  ;;  %v3349_v45 = vmul.f32 %v3347_v39, %v6579_v36 }
 0x61a   : > { %v6544_v40 = vadd.f32 %v2723_v7, %v2717_v14  ;;  %v6546_v48 = vadd.f32 %v2758_v53, %v2752_v46  ;;  %v2886_v53 = vmul.f32 %v2885_v56, %v6554_v35 }
 0x61b   : > { %v3139_v10 = vpop.permute.xlu0 %3138  ;;  %v6548_v42 = vpop.permute.xlu1 %2734 }
 0x61c   : > { %v3143_v32 = vadd.f32 %v3139_v10, %v3127_v47 }
 0x61d   : > { %3806 = vrot.lane.b32.xlu0 %v3802_v3, %s4661_s17  ;;  %2856 = vrot.lane.b32.xlu1 %v2851_v26, %s4661_s17  ;;  %v3361_v3 = vstv %s6582_s8  ;;  %v3638_v26 = vmul.f32 %v6485_v29, %v3637_v31  ;;  %v3197_v29 = vstv %s6597_s12  ;;  %s6713_s8 = sld [smem:[#allocation6 + $0x57]]  ;;  %s6736_s12 = sld [smem:[#allocation6 + $0x61]] }
 0x61f   : > { %v3615_v19 = vpop.permute.xlu0 %3614  ;;  %v3137_v27 = vpop.permute.xlu1 %3136 }
 0x620   : > { %v3619_v60 = vadd.f32 %v3615_v19, %v3603_v5  ;;  %v3142_v11 = vadd.f32 %v3137_v27, %v3126_v55  ;;  %v3362_v27 = vmul.f32 %v3361_v3, %v6554_v35 }
 0x621   : > { %2876 = vrot.lane.b32.xlu0 %v2872_v4, %s4660_s15  ;;  %3332 = vrot.lane.b32.xlu1 %v3327_v43, %s4661_s17  ;;  %v3825_v4 = vmul.f32 %v3823_v18, %v6579_v36  ;;  %v3837_v43 = vstv %s6593_s11  ;;  %v3673_v18 = vstv %s6607_s16  ;;  %s6718_s11 = sld [smem:[#allocation6 + $0x7b]]  ;;  %s6741_s16 = sld [smem:[#allocation6 + $0x36]] }
 0x622   : > { %v3838_v41 = vmul.f32 %v3837_v43, %v6554_v35 }
 0x623   : > { %v3153_v20 = vpop.permute.xlu0 %3152  ;;  %v3613_v2 = vpop.permute.xlu1 %3612 }
 0x624   : > { %v3157_v54 = vadd.f32 %v3153_v20, %v3143_v32  ;;  %v3618_v16 = vadd.f32 %v3613_v2, %v3602_v58  ;;  %v2887_v32 = vmul.f32 %v2885_v56, %v6579_v36  ;;  %v6619_v2 = vld [vmem:[#allocation3 + $0x31] sm:$0xff] }
 0x625   : > { %3352 = vrot.lane.b32.xlu0 %v3348_v52, %s4660_s15  ;;  %3808 = vrot.lane.b32.xlu1 %v3803_v23, %s4661_s17  ;;  %v2907_v52 = vstv %s6603_s14  ;;  %v3199_v23 = vmul.f32 %v6528_v0, %v3197_v29  ;;  %s6739_s14 = sld [smem:[#allocation6 + $0x85]] }
 0x626   : > { %v3165_v17 = vadd.f32 %v3163_v1, %v3157_v54 }
 0x627   : > { %v3629_v33 = vpop.permute.xlu0 %3628  ;;  %v3151_v62 = vpop.permute.xlu1 %3150 }
 0x628   : > { %v3633_v57 = vadd.f32 %v3629_v33, %v3619_v60  ;;  %v3156_v12 = vadd.f32 %v3151_v62, %v3142_v11  ;;  %v2908_v60 = vmul.f32 %v2907_v52, %v6619_v2  ;;  %v3363_v11 = vmul.f32 %v3361_v3, %v6579_v36 }
 0x629   : > { %3828 = vrot.lane.b32.xlu0 %v3824_v50, %s4660_s15  ;;  %2878 = vrot.lane.b32.xlu1 %v2873_v22, %s4660_s15  ;;  %v3675_v62 = vmul.f32 %v6528_v0, %v3673_v18  ;;  %v3198_v50 = vmul.f32 %v6508_v38, %v3197_v29  ;;  %v3839_v0 = vmul.f32 %v3837_v43, %v6579_v36  ;;  %v3397_v29 = vstv %s6649_s25  ;;  %s6761_s25 = sld [smem:[#allocation6 + $0x86]] }
 0x62a   : > { %v3641_v59 = vadd.f32 %v3639_v61, %v3633_v57  ;;  %v3164_v46 = vadd.f32 %v3162_v9, %v3156_v12 }
 0x62b   : > { %v3175_v14 = vpop.permute.xlu0 %3174  ;;  %v3627_v7 = vpop.permute.xlu1 %3626 }
 0x62c   : > { %v3632_v10 = vadd.f32 %v3627_v7, %v3618_v16  ;;  %v3179_v47 = vadd.f32 %v3175_v14, %v3165_v17  ;;  %v3383_v17 = vstv %s6611_s19  ;;  %v3674_v14 = vmul.f32 %v6508_v38, %v3673_v18  ;;  %s6743_s19 = sld [smem:[#allocation6 + $0x3e]] }
 0x62d   : > { %2890 = vrot.lane.b32.xlu0 %v2886_v53, %s4661_s17  ;;  %3354 = vrot.lane.b32.xlu1 %v3349_v45, %s4660_s15  ;;  %v3384_v9 = vmul.f32 %v3383_v17, %v6619_v2  ;;  %v2921_v38 = vstv %s6635_s20  ;;  %s6749_s20 = sld [smem:[#allocation6 + $0x62]] }
 0x62e   : > { %v3640_v15 = vadd.f32 %v3638_v26, %v3632_v10  ;;  %v3233_v26 = vstv %s6639_s0  ;;  %s6756_s0 = sld [smem:[#allocation6 + $0x7e]] }
 0x62f   : > { %v3651_v8 = vpop.permute.xlu0 %3650  ;;  %v3173_v19 = vpop.permute.xlu1 %3172 }
 0x630   : > { %v3655_v5 = vadd.f32 %v3651_v8, %v3641_v59  ;;  %v3178_v55 = vadd.f32 %v3173_v19, %v3164_v46  ;;  %v3859_v59 = vstv %s6623_s13  ;;  %v6646_v46 = vld [vmem:[#allocation3 + $0x39] sm:$0xff]  ;;  %s6747_s13 = sld [smem:[#allocation6 + $0x5a]] }
 0x631   : > { %3366 = vrot.lane.b32.xlu0 %v3362_v27, %s4661_s17  ;;  %3830 = vrot.lane.b32.xlu1 %v3825_v4, %s4660_s15  ;;  %v3860_v10 = vmul.f32 %v3859_v59, %v6619_v2  ;;  %v2909_v3 = vmul.f32 %v2907_v52, %v6646_v46  ;;  %v2922_v27 = vmul.f32 %v2921_v38, %v6619_v2 }
 0x632   : > { %v3385_v4 = vmul.f32 %v3383_v17, %v6646_v46  ;;  %v3861_v18 = vmul.f32 %v3859_v59, %v6646_v46 }
 0x633   : > { %v3189_v39 = vpop.permute.xlu0 %3188  ;;  %v3649_v30 = vpop.permute.xlu1 %3648 }
 0x634   : > { %v3193_v20 = vadd.f32 %v3189_v39, %v3179_v47  ;;  %v3654_v22 = vadd.f32 %v3649_v30, %v3640_v15  ;;  %v3234_v47 = vmul.f32 %v6533_v24, %v3233_v26  ;;  %v3709_v39 = vstv %s6653_s27  ;;  %s6774_s27 = sld [smem:[#allocation6 + $0x40]] }
 0x635   : > { %3842 = vrot.lane.b32.xlu0 %v3838_v41, %s4661_s17  ;;  %2892 = vrot.lane.b32.xlu1 %v2887_v32, %s4661_s17  ;;  %v2739_v30 = vadd.f32 %v6548_v42, %v6544_v40 }
 0x636   : > { %v6628_v54 = vadd.f32 %v3199_v23, %v3193_v20  ;;  %v3398_v23 = vmul.f32 %v3397_v29, %v6619_v2 }
 0x637   : > { %v3665_v1 = vpop.permute.xlu0 %3664  ;;  %v3187_v31 = vpop.permute.xlu1 %3186 }
 0x638   : > { %v3669_v58 = vadd.f32 %v3665_v1, %v3655_v5  ;;  %v3192_v33 = vadd.f32 %v3187_v31, %v3178_v55  ;;  %v3873_v5 = vstv %s6657_s28  ;;  %v3710_v31 = vmul.f32 %v6533_v24, %v3709_v39  ;;  %v6685_v24 = vld [vmem:[#allocation3 + $0x32] sm:$0xff]  ;;  %s6784_s28 = sld [smem:[#allocation6 + $0x64]] }
 0x639   : > { %2912 = vrot.lane.b32.xlu0 %v2908_v60, %s4660_s15  ;;  %3368 = vrot.lane.b32.xlu1 %v3363_v11, %s4661_s17  ;;  %v4563_v60 = vld [vmem:[#allocation3 + $0x20] sm:$0xff] }
 0x63a   : > { %v6641_v56 = vadd.f32 %v3675_v62, %v3669_v58  ;;  %v3200_v57 = vadd.f32 %v3198_v50, %v3192_v33  ;;  %v2759_v11 = vmul.f32 %v4563_v60, %v2757_v63  ;;  %v3874_v62 = vmul.f32 %v3873_v5, %v6619_v2 }
 0x63b   : > { %v3211_v12 = vpop.permute.xlu0 %3210  ;;  %v3663_v61 = vpop.permute.xlu1 %3662  ;;  %v2923_v50 = vmul.f32 %v2921_v38, %v6646_v46  ;;  %v3235_v63 = vmul.f32 %v4563_v60, %v3233_v26 }
 0x63c   : > { %v3668_v16 = vadd.f32 %v3663_v61, %v3654_v22  ;;  %v3215_v40 = vadd.f32 %v3211_v12, %v6628_v54 }
 0x63d   : > { %3388 = vrot.lane.b32.xlu0 %v3384_v9, %s4660_s15  ;;  %3844 = vrot.lane.b32.xlu1 %v3839_v0, %s4661_s17 }
 0x63e   : > { %v3676_v7 = vadd.f32 %v3674_v14, %v3668_v16  ;;  %v3399_v16 = vmul.f32 %v3397_v29, %v6646_v46  ;;  %v3711_v14 = vmul.f32 %v4563_v60, %v3709_v39 }
 0x63f   : > { %v3687_v53 = vpop.permute.xlu0 %3686  ;;  %v3209_v45 = vpop.permute.xlu1 %3208 }
 0x640   : > { %v3214_v15 = vadd.f32 %v3209_v45, %v3200_v57  ;;  %v2943_v57 = vstv %s6667_s5  ;;  %v3691_v54 = vadd.f32 %v3687_v53, %v6641_v56  ;;  %v3875_v45 = vmul.f32 %v3873_v5, %v6646_v46  ;;  %s6789_s5 = sld [smem:[#allocation6 + $0x39]] }
 0x641   : > { %3864 = vrot.lane.b32.xlu0 %v3860_v10, %s4660_s15  ;;  %2914 = vrot.lane.b32.xlu1 %v2909_v3, %s4660_s15  ;;  %v2944_v0 = vmul.f32 %v2943_v57, %v6685_v24  ;;  %v2793_v10 = vstv %s6690_s10  ;;  %s6796_s10 = sld [smem:[#allocation6 + $0x88]] }
 0x643   : > { %v3223_v8 = vpop.permute.xlu0 %3222  ;;  %v3685_v19 = vpop.permute.xlu1 %3684 }
 0x644   : > { %v3228_v43 = vadd.f32 %v3223_v8, %v3214_v15  ;;  %v3690_v41 = vadd.f32 %v3685_v19, %v3676_v7  ;;  %v4564_v8 = vld [vmem:[#allocation3 + $0x19] sm:$0xff] }
 0x645   : > { %2926 = vrot.lane.b32.xlu0 %v2922_v27, %s4661_s17  ;;  %3390 = vrot.lane.b32.xlu1 %v3385_v4, %s4660_s15  ;;  %v2794_v19 = vmul.f32 %v4564_v8, %v2793_v10  ;;  %v3269_v27 = vstv %s6699_s18  ;;  %s6801_s18 = sld [smem:[#allocation6 + $0x5d]] }
 0x646   : > { %v3236_v32 = vadd.f32 %v3234_v47, %v3228_v43 }
 0x647   : > { %v3699_v20 = vpop.permute.xlu0 %3698  ;;  %v2749_v52 = vpop.permute.xlu1 %2748 }
 0x648   : > { %v3704_v55 = vadd.f32 %v3699_v20, %v3690_v41  ;;  %v2753_v1 = vadd.f32 %v2749_v52, %v2739_v30  ;;  %v3270_v30 = vmul.f32 %v4564_v8, %v3269_v27  ;;  %v3745_v41 = vstv %s6704_s6  ;;  %s6806_s6 = sld [smem:[#allocation6 + $0x41]] }
 0x649   : > { %3402 = vrot.lane.b32.xlu0 %v3398_v23, %s4661_s17  ;;  %3866 = vrot.lane.b32.xlu1 %v3861_v18, %s4660_s15 }
 0x64a   : > { %v3712_v42 = vadd.f32 %v3710_v31, %v3704_v55  ;;  %v2761_v17 = vadd.f32 %v2759_v11, %v2753_v1  ;;  %v3746_v1 = vmul.f32 %v4564_v8, %v3745_v41  ;;  %v4565_v31 = vld [vmem:[#allocation3 + $0x21] sm:$0xff] }
 0x64b   : > { %v2769_v58 = vpop.permute.xlu0 %2768  ;;  %v3225_v33 = vpop.permute.xlu1 %3224  ;;  %v2795_v60 = vmul.f32 %v4565_v31, %v2793_v10  ;;  %v3305_v10 = vstv %s6713_s8  ;;  %s6818_s8 = sld [smem:[#allocation6 + $0x65]] }
 0x64c   : > { %v3229_v22 = vadd.f32 %v3225_v33, %v3215_v40  ;;  %v2774_v3 = vadd.f32 %v2769_v58, %v6546_v48 }
 0x64d   : > { %3878 = vrot.lane.b32.xlu0 %v3874_v62, %s4661_s17  ;;  %2928 = vrot.lane.b32.xlu1 %v2923_v50, %s4661_s17  ;;  %v3271_v50 = vmul.f32 %v4565_v31, %v3269_v27  ;;  %v3306_v27 = vmul.f32 %v6523_v28, %v3305_v10 }
 0x64e   : > { %v3237_v12 = vadd.f32 %v3235_v63, %v3229_v22 }
 0x64f   : > { %v3245_v61 = vpop.permute.xlu0 %3244  ;;  %v3701_v9 = vpop.permute.xlu1 %3700 }
 0x650   : > { %v3705_v59 = vadd.f32 %v3701_v9, %v3691_v54  ;;  %v3250_v4 = vadd.f32 %v3245_v61, %v3236_v32  ;;  %v3747_v61 = vmul.f32 %v4565_v31, %v3745_v41  ;;  %v2588_v9 = vadd.f32 %v6442_v34, %v6438_v44 }
 0x651   : > { %2948 = vrot.lane.b32.xlu0 %v2944_v0, %s4660_s15  ;;  %3404 = vrot.lane.b32.xlu1 %v3399_v16, %s4661_s17 }
 0x652   : > { %v3713_v7 = vadd.f32 %v3711_v14, %v3705_v59  ;;  %v6716_v0 = vadd.f32 %v6455_v49, %v2588_v9  ;;  %v2829_v14 = vstv %s6709_s7  ;;  %v2589_v49 = vadd.f32 %v6444_v25, %v6440_v13  ;;  %s6811_s7 = sld [smem:[#allocation6 + $0x81]] }
 0x653   : > { %v3721_v56 = vpop.permute.xlu0 %3720  ;;  %v2771_v53 = vpop.permute.xlu1 %2770  ;;  %v2830_v34 = vmul.f32 %v6523_v28, %v2829_v14  ;;  %v2957_v9 = vstv %s6743_s19  ;;  %s6857_s19 = sld [smem:[#allocation6 + $0x8b]] }
 0x654   : > { %v3726_v20 = vadd.f32 %v3721_v56, %v3712_v42  ;;  %v2775_v52 = vadd.f32 %v2771_v53, %v2761_v17  ;;  %v6728_v8 = vadd.f32 %v6457_v21, %v2589_v49 }
 0x655   : > { %3880 = vrot.lane.b32.xlu1 %v3875_v45, %s4661_s17  ;;  %v2604_v45 = vsel %vm680_vm6, %v6716_v0, 0.0 }
 0x656   : > { %v2607_v25 = vsel %vm680_vm6, %v6728_v8, 0.0 }
 0x657   : > { %v2783_v38 = vpop.permute.xlu0 %2782  ;;  %v3247_v26 = vpop.permute.xlu1 %3246 }
 0x658   : > { %v2788_v15 = vadd.f32 %v2783_v38, %v2774_v3  ;;  %v3251_v11 = vadd.f32 %v3247_v26, %v3237_v12 }
 0x65a   : > { %v2796_v43 = vadd.f32 %v2794_v19, %v2788_v15 }
 0x65b   : > { %v3259_v29 = vpop.permute.xlu0 %3258  ;;  %v3723_v47 = vpop.permute.xlu1 %3722 }
 0x65c   : > { %v3264_v39 = vadd.f32 %v3259_v29, %v3250_v4  ;;  %v3727_v42 = vadd.f32 %v3723_v47, %v3713_v7  ;;  %v3781_v4 = vstv %s6718_s11  ;;  %s6827_s11 = sld [smem:[#allocation6 + $0x89]] }
 0x65d   : > { %v3782_v41 = vmul.f32 %v3781_v4, %v6488_v37 }
 0x65e   : > { %v3272_v23 = vadd.f32 %v3270_v30, %v3264_v39 }
 0x65f   : > { %v3735_v18 = vpop.permute.xlu0 %3734  ;;  %v2785_v5 = vpop.permute.xlu1 %2784 }
 0x660   : > { %v3740_v55 = vadd.f32 %v3735_v18, %v3726_v20  ;;  %v2789_v48 = vadd.f32 %v2785_v5, %v2775_v52  ;;  %v2831_v52 = vmul.f32 %v6563_v51, %v2829_v14 }
 0x662   : > { %v3748_v40 = vadd.f32 %v3746_v1, %v3740_v55  ;;  %v2797_v58 = vadd.f32 %v2795_v60, %v2789_v48  ;;  %v3307_v48 = vmul.f32 %v6563_v51, %v3305_v10  ;;  %v3433_v10 = vstv %s6749_s20  ;;  %s6867_s20 = sld [smem:[#allocation6 + $0x44]] }
 0x663   : > { %v2805_v32 = vpop.permute.xlu0 %2804  ;;  %v3261_v33 = vpop.permute.xlu1 %3260 }
 0x664   : > { %v3265_v62 = vadd.f32 %v3261_v33, %v3251_v11  ;;  %v2810_v7 = vadd.f32 %v2805_v32, %v2796_v43 }
 0x666   : > { %v3273_v17 = vadd.f32 %v3271_v50, %v3265_v62 }
 0x667   : > { %v3281_v22 = vpop.permute.xlu0 %3280  ;;  %v3737_v63 = vpop.permute.xlu1 %3736 }
 0x668   : > { %v3741_v54 = vadd.f32 %v3737_v63, %v3727_v42  ;;  %v3286_v3 = vadd.f32 %v3281_v22, %v3272_v23  ;;  %v3895_v42 = vstv %s6739_s14  ;;  %v2865_v22 = vstv %s6741_s16  ;;  %s6845_s14 = sld [smem:[#allocation6 + $0x67]]  ;;  %s6850_s16 = sld [smem:[#allocation6 + $0x3c]] }
 0x669   : > { %v2866_v14 = vmul.f32 %v2865_v22, %v6554_v35 }
 0x66a   : > { %v3749_v12 = vadd.f32 %v3747_v61, %v3741_v54  ;;  %v3896_v61 = vmul.f32 %v3895_v42, %v6685_v24 }
 0x66b   : > { %v3757_v16 = vpop.permute.xlu0 %3756  ;;  %v2807_v59 = vpop.permute.xlu1 %2806 }
 0x66c   : > { %v3762_v43 = vadd.f32 %v3757_v16, %v3748_v40  ;;  %v2811_v29 = vadd.f32 %v2807_v59, %v2797_v58  ;;  %v3783_v40 = vmul.f32 %v3781_v4, %v6514_v6  ;;  %v3419_v58 = vstv %s6736_s12  ;;  %s6836_s12 = sld [smem:[#allocation6 + $0x43]] }
 0x66d   : > { %v3420_v50 = vmul.f32 %v3419_v58, %v6685_v24 }
 0x66f   : > { %v2819_v56 = vpop.permute.xlu0 %2818  ;;  %v3283_v53 = vpop.permute.xlu1 %3282 }
 0x670   : > { %v2824_v44 = vadd.f32 %v2819_v56, %v2810_v7  ;;  %2605 = vadd.xlane.f32.xlu0 %v2604_v45  ;;  %v3287_v21 = vadd.f32 %v3283_v53, %v3273_v17  ;;  %v6753_v17 = vld [vmem:[#allocation3 + $0x3a] sm:$0xff]  ;;  %v3341_v7 = vstv %s6747_s13  ;;  %s6862_s13 = sld [smem:[#allocation6 + $0x60]] }
 0x671   : > { %v2945_v59 = vmul.f32 %v2943_v57, %v6753_v17  ;;  %v3421_v57 = vmul.f32 %v3419_v58, %v6753_v17 }
 0x672   : > { %v2832_v38 = vadd.f32 %v2830_v34, %v2824_v44  ;;  %v2958_v34 = vmul.f32 %v2957_v9, %v6685_v24 }
 0x673   : > { %v3295_v26 = vpop.permute.xlu0 %3294  ;;  %v3759_v15 = vpop.permute.xlu1 %3758 }
 0x674   : > { %v3300_v19 = vadd.f32 %v3295_v26, %v3286_v3  ;;  %v3763_v37 = vadd.f32 %v3759_v15, %v3749_v12  ;;  %v3817_v26 = vstv %s6756_s0  ;;  %s6872_s0 = sld [smem:[#allocation6 + $0x84]] }
 0x676   : > { %v3308_v47 = vadd.f32 %v3306_v27, %v3300_v19 }
 0x677   : > { %v3771_v39 = vpop.permute.xlu0 %3770  ;;  %v2821_v30 = vpop.permute.xlu1 %2820 }
 0x678   : > { %v3776_v20 = vadd.f32 %v3771_v39, %v3762_v43  ;;  %v2825_v13 = vadd.f32 %v2821_v30, %v2811_v29  ;;  %v3434_v43 = vmul.f32 %v3433_v10, %v6685_v24  ;;  %v3897_v29 = vmul.f32 %v3895_v42, %v6753_v17 }
 0x679   : > { %2608 = vadd.xlane.f32.xlu1 %v2607_v25  ;;  %v2901_v42 = vstv %s6789_s5  ;;  %s6908_s5 = sld [smem:[#allocation6 + $0x6a]] }
 0x67a   : > { %v3784_v28 = vadd.f32 %v3782_v41, %v3776_v20  ;;  %v2833_v23 = vadd.f32 %v2831_v52, %v2825_v13  ;;  %v3818_v41 = vmul.f32 %v3817_v26, %v6554_v35  ;;  %v2867_v20 = vmul.f32 %v2865_v22, %v6579_v36 }
 0x67b   : > { %v2841_v18 = vpop.permute.xlu0 %2840  ;;  %v3297_v5 = vpop.permute.xlu1 %3296 }
 0x67c   : > { %v3301_v55 = vadd.f32 %v3297_v5, %v3287_v21  ;;  %v2846_v6 = vadd.f32 %v2841_v18, %v2832_v38  ;;  %v3342_v38 = vmul.f32 %v3341_v7, %v6554_v35  ;;  %v2959_v35 = vmul.f32 %v2957_v9, %v6753_v17 }
 0x67d   : > { %v3343_v5 = vmul.f32 %v3341_v7, %v6579_v36 }
 0x67e   : > { %v3309_v1 = vadd.f32 %v3307_v48, %v3301_v55  ;;  %v6793_v55 = vld [vmem:[#allocation3 + $0x48] sm:$0xff]  ;;  %v2979_v48 = vstv %s6774_s27  ;;  %s6888_s27 = sld [smem:[#allocation6 + $0x8c]] }
 0x67f   : > { %v3317_v31 = vpop.permute.xlu0 %3316  ;;  %v3773_v60 = vpop.permute.xlu1 %3772  ;;  %v2980_v58 = vmul.f32 %v2979_v48, %v6793_v55 }
 0x680   : > { %v3777_v11 = vadd.f32 %v3773_v60, %v3763_v37  ;;  %v3322_v56 = vadd.f32 %v3317_v31, %v3308_v47  ;;  %v3909_v47 = vstv %s6761_s25  ;;  %v3435_v60 = vmul.f32 %v3433_v10, %v6753_v17  ;;  %s6879_s25 = sld [smem:[#allocation6 + $0x68]] }
 0x682   : > { %v3785_v51 = vadd.f32 %v3783_v40, %v3777_v11 }
 0x683   : > { %v3793_v32 = vpop.permute.xlu0 %3792  ;;  %v2843_v33 = vpop.permute.xlu1 %2842 }
 0x684   : > { %v2847_v62 = vadd.f32 %v2843_v33, %v2833_v23  ;;  %v3798_v15 = vadd.f32 %v3793_v32, %v3784_v28  ;;  %v3910_v28 = vmul.f32 %v3909_v47, %v6685_v24  ;;  %v3455_v32 = vstv %s6784_s28  ;;  %s6897_s28 = sld [smem:[#allocation6 + $0x46]] }
 0x686   : > { %3424 = vrot.lane.b32.xlu0 %v3420_v50, %s4660_s15 }
 0x687   : > { %v2855_v63 = vpop.permute.xlu0 %2854  ;;  %v3319_v54 = vpop.permute.xlu1 %3318 }
 0x688   : > { %v2860_v12 = vadd.f32 %v2855_v63, %v2846_v6  ;;  %v3323_v16 = vadd.f32 %v3319_v54, %v3309_v1  ;;  %v3456_v63 = vmul.f32 %v3455_v32, %v6793_v55  ;;  %v3931_v54 = vstv %s6796_s10  ;;  %s6922_s10 = sld [smem:[#allocation6 + $0x8e]] }
 0x68a   : > { %3900 = vrot.lane.b32.xlu0 %v3896_v61, %s4660_s15  ;;  %2950 = vrot.lane.b32.xlu1 %v2945_v59, %s4660_s15  ;;  %v2868_v53 = vadd.f32 %v2866_v14, %v2860_v12  ;;  %v6816_v61 = vld [vmem:[#allocation3 + $0x50] sm:$0xff]  ;;  %v3377_v59 = vstv %s6801_s18  ;;  %s4370_s18 = sld [smem:[#allocation6 + $0x47]] }
 0x68b   : > { %v3331_v45 = vpop.permute.xlu0 %3330  ;;  %v3795_v44 = vpop.permute.xlu1 %3794 }
 0x68c   : > { %v3336_v49 = vadd.f32 %v3331_v45, %v3322_v56  ;;  %v3799_v3 = vadd.f32 %v3795_v44, %v3785_v51  ;;  %v3819_v51 = vmul.f32 %v3817_v26, %v6579_v36  ;;  %v3911_v36 = vmul.f32 %v3909_v47, %v6753_v17 }
 0x68d   : > { %v3932_v56 = vmul.f32 %v3931_v54, %v6793_v55  ;;  %v2993_v45 = vstv %s6806_s6  ;;  %v2903_v47 = vmul.f32 %v2901_v42, %v6646_v46  ;;  %s4410_s6 = sld [smem:[#allocation6 + $0x6b]] }
 0x68e   : > { %2962 = vrot.lane.b32.xlu0 %v2958_v34, %s4661_s17  ;;  %3426 = vrot.lane.b32.xlu1 %v3421_v57, %s4660_s15  ;;  %v3344_v19 = vadd.f32 %v3342_v38, %v3336_v49  ;;  %v3378_v49 = vmul.f32 %v3377_v59, %v6619_v2  ;;  %v2994_v26 = vmul.f32 %v2993_v45, %v6793_v55 }
 0x68f   : > { %v3807_v27 = vpop.permute.xlu0 %3806  ;;  %v2857_v4 = vpop.permute.xlu1 %2856 }
 0x690   : > { %v3812_v39 = vadd.f32 %v3807_v27, %v3798_v15  ;;  %v2861_v30 = vadd.f32 %v2857_v4, %v2847_v62  ;;  %v3457_v15 = vmul.f32 %v3455_v32, %v6816_v61 }
 0x692   : > { %3438 = vrot.lane.b32.xlu0 %v3434_v43, %s4661_s17  ;;  %3902 = vrot.lane.b32.xlu1 %v3897_v29, %s4660_s15  ;;  %v3820_v13 = vadd.f32 %v3818_v41, %v3812_v39  ;;  %v2869_v25 = vadd.f32 %v2867_v20, %v2861_v30  ;;  %v3933_v20 = vmul.f32 %v3931_v54, %v6816_v61  ;;  %v3967_v54 = vstv %s6857_s19  ;;  %s6998_s19 = sld [smem:[#allocation6 + $0x69]] }
 0x693   : > { %v2877_v52 = vpop.permute.xlu0 %2876  ;;  %v3333_v21 = vpop.permute.xlu1 %3332 }
 0x694   : > { %v2882_v23 = vadd.f32 %v2877_v52, %v2868_v53  ;;  %v3337_v18 = vadd.f32 %v3333_v21, %v3323_v16  ;;  %v2902_v16 = vmul.f32 %v2901_v42, %v6619_v2  ;;  %v2981_v53 = vmul.f32 %v2979_v48, %v6816_v61  ;;  %v6854_v48 = vld [vmem:[#allocation3 + $0x49] sm:$0xff] }
 0x695   : > { %v2937_v42 = vstv %s6850_s16  ;;  %s6995_s16 = sld [smem:[#allocation6 + $0x45]] }
 0x696   : > { %3914 = vrot.lane.b32.xlu0 %v3910_v28, %s4661_s17  ;;  %2964 = vrot.lane.b32.xlu1 %v2959_v35, %s4661_s17  ;;  %v3345_v37 = vadd.f32 %v3343_v5, %v3337_v18  ;;  %v3379_v28 = vmul.f32 %v3377_v59, %v6646_v46  ;;  %v2995_v5 = vmul.f32 %v2993_v45, %v6816_v61 }
 0x697   : > { %v3353_v1 = vpop.permute.xlu0 %3352  ;;  %v3809_v31 = vpop.permute.xlu1 %3808  ;;  %v2938_v59 = vmul.f32 %v2937_v42, %v6685_v24 }
 0x698   : > { %v3358_v11 = vadd.f32 %v3353_v1, %v3344_v19  ;;  %v3813_v40 = vadd.f32 %v3809_v31, %v3799_v3  ;;  %v3853_v3 = vstv %s6811_s7  ;;  %v3469_v19 = vstv %s6818_s8  ;;  %s4450_s7 = sld [smem:[#allocation6 + $0x8f]] }
 0x699   : > { %v3854_v29 = vmul.f32 %v3853_v3, %v6619_v2  ;;  %v3470_v41 = vmul.f32 %v3469_v19, %v6793_v55  ;;  %v3471_v32 = vmul.f32 %v3469_v19, %v6816_v61  ;;  %s6961_s8 = sld [smem:[#allocation6 + $0x3f]] }
 0x69a   : > { %2984 = vrot.lane.b32.xlu0 %v2980_v58, %s4660_s15  ;;  %3440 = vrot.lane.b32.xlu1 %v3435_v60, %s4661_s17  ;;  %v3821_v33 = vadd.f32 %v3819_v51, %v3813_v40 }
 0x69b   : > { %v3829_v62 = vpop.permute.xlu0 %3828  ;;  %v2879_v50 = vpop.permute.xlu1 %2878 }
 0x69c   : > { %v3834_v22 = vadd.f32 %v3829_v62, %v3820_v13  ;;  %v2883_v6 = vadd.f32 %v2879_v50, %v2869_v25  ;;  %v3945_v13 = vstv %s6827_s11  ;;  %s6969_s11 = sld [smem:[#allocation6 + $0x87]] }
 0x69d   : > { %v3946_v35 = vmul.f32 %v3945_v13, %v6793_v55 }
 0x69e   : > { %3460 = vrot.lane.b32.xlu0 %v3456_v63, %s4660_s15  ;;  %3916 = vrot.lane.b32.xlu1 %v3911_v36, %s4661_s17  ;;  %v3947_v36 = vmul.f32 %v3945_v13, %v6816_v61 }
 0x69f   : > { %v2891_v9 = vpop.permute.xlu0 %2890  ;;  %v3355_v12 = vpop.permute.xlu1 %3354 }
 0x6a0   : > { %v2896_v14 = vadd.f32 %v2891_v9, %v2882_v23  ;;  %v3359_v7 = vadd.f32 %v3355_v12, %v3345_v37  ;;  %v3015_v37 = vstv %s6836_s12  ;;  %v6877_v9 = vld [vmem:[#allocation3 + $0x51] sm:$0xff]  ;;  %s6983_s12 = sld [smem:[#allocation6 + $0x66]] }
 0x6a1   : > { %v3016_v51 = vmul.f32 %v3015_v37, %v6854_v48  ;;  %v3017_v45 = vmul.f32 %v3015_v37, %v6877_v9  ;;  %v3969_v13 = vmul.f32 %v3967_v54, %v6877_v9  ;;  %v6919_v37 = vld [vmem:[#allocation3 + $0x4a] sm:$0xff] }
 0x6a2   : > { %3936 = vrot.lane.b32.xlu0 %v3932_v56, %s4660_s15  ;;  %2986 = vrot.lane.b32.xlu1 %v2981_v53, %s4660_s15  ;;  %v2904_v44 = vadd.f32 %v2902_v16, %v2896_v14  ;;  %v3413_v14 = vstv %s6862_s13  ;;  %v3968_v53 = vmul.f32 %v3967_v54, %v6854_v48  ;;  %v3541_v54 = vstv %s4410_s6  ;;  %s7002_s13 = sld [smem:[#allocation6 + $0x8d]]  ;;  %s4662_s6 = smov [#allocation7]  }
 0x6a3   : > { %v3367_v34 = vpop.permute.xlu0 %3366  ;;  %v3831_v10 = vpop.permute.xlu1 %3830 }
 0x6a4   : > { %v3372_v57 = vadd.f32 %v3367_v34, %v3358_v11  ;;  %v3835_v38 = vadd.f32 %v3831_v10, %v3821_v33  ;;  %v3855_v11 = vmul.f32 %v3853_v3, %v6646_v46  ;;  %v3491_v33 = vstv %s6845_s14  ;;  %s6987_s14 = sld [smem:[#allocation6 + $0x8a]] }
 0x6a5   : > { %v3492_v63 = vmul.f32 %v3491_v33, %v6854_v48  ;;  %v3414_v3 = vmul.f32 %v3413_v14, %v6685_v24  ;;  %v3493_v19 = vmul.f32 %v3491_v33, %v6877_v9 }
 0x6a6   : > { %2998 = vrot.lane.b32.xlu0 %v2994_v26, %s4661_s17  ;;  %3462 = vrot.lane.b32.xlu1 %v3457_v15, %s4660_s15  ;;  %v3380_v27 = vadd.f32 %v3378_v49, %v3372_v57  ;;  %v3889_v57 = vstv %s6872_s0 }
 0x6a7   : > { %v3843_v4 = vpop.permute.xlu0 %3842  ;;  %v2893_v43 = vpop.permute.xlu1 %2892 }
 0x6a8   : > { %v3848_v39 = vadd.f32 %v3843_v4, %v3834_v22  ;;  %v2897_v30 = vadd.f32 %v2893_v43, %v2883_v6 }
 0x6aa   : > { %3474 = vrot.lane.b32.xlu0 %v3470_v41, %s4661_s17  ;;  %3938 = vrot.lane.b32.xlu1 %v3933_v20, %s4660_s15  ;;  %v3856_v25 = vadd.f32 %v3854_v29, %v3848_v39  ;;  %v2905_v52 = vadd.f32 %v2903_v47, %v2897_v30  ;;  %v3890_v47 = vmul.f32 %v3889_v57, %v6685_v24 }
 0x6ab   : > { %v2913_v21 = vpop.permute.xlu0 %2912  ;;  %v3369_v2 = vpop.permute.xlu1 %3368  ;;  %v2939_v39 = vmul.f32 %v2937_v42, %v6753_v17  ;;  %v6937_v42 = vld [vmem:[#allocation3 + $0x52] sm:$0xff] }
 0x6ac   : > { %v2918_v23 = vadd.f32 %v2913_v21, %v2904_v44  ;;  %v3373_v18 = vadd.f32 %v3369_v2, %v3359_v7  ;;  %v3029_v44 = vstv %s6867_s20  ;;  %s119_s20 = sand.u32 1, %s4646_s21  }
 0x6ad   : > { %v3030_v15 = vmul.f32 %v3029_v44, %v6854_v48  ;;  %s4154_s0 = sshll.u32 %s119_s20, 6 }
 0x6ae   : > { %3950 = vrot.lane.b32.xlu0 %v3946_v35, %s4661_s17  ;;  %3000 = vrot.lane.b32.xlu1 %v2995_v5, %s4661_s17  ;;  %v3381_v1 = vadd.f32 %v3379_v28, %v3373_v18  ;;  %v3415_v28 = vmul.f32 %v3413_v14, %v6753_v17  ;;  %v3031_v5 = vmul.f32 %v3029_v44, %v6877_v9 }
 0x6af   : > { %v3389_v31 = vpop.permute.xlu0 %3388  ;;  %v3845_v60 = vpop.permute.xlu1 %3844 }
 0x6b0   : > { %v3394_v40 = vadd.f32 %v3389_v31, %v3380_v27  ;;  %v3849_v58 = vadd.f32 %v3845_v60, %v3835_v38  ;;  %v3505_v27 = vstv %s6879_s25  ;;  %s7081_s25 = scalar_lea.vmem [#allocation7], %s4154_s0 }
 0x6b1   : > { %v3506_v20 = vmul.f32 %v3505_v27, %v6854_v48 }
 0x6b2   : > { %3020 = vrot.lane.b32.xlu0 %v3016_v51, %s4660_s15  ;;  %3476 = vrot.lane.b32.xlu1 %v3471_v32, %s4661_s17  ;;  %v3857_v62 = vadd.f32 %v3855_v11, %v3849_v58  ;;  %v3507_v58 = vmul.f32 %v3505_v27, %v6877_v9  ;;  %v3891_v51 = vmul.f32 %v3889_v57, %v6753_v17  ;;  %v3527_v32 = vstv %s6908_s5 }
 0x6b3   : > { %v3865_v50 = vpop.permute.xlu0 %3864  ;;  %v2915_v46 = vpop.permute.xlu1 %2914 }
 0x6b4   : > { %v3870_v22 = vadd.f32 %v3865_v50, %v3856_v25  ;;  %v2919_v6 = vadd.f32 %v2915_v46, %v2905_v52  ;;  %v3981_v25 = vstv %s6888_s27  ;;  %v4003_v46 = vstv %s6922_s10  ;;  %s4461_s27 = sshll.u32 %s4712_s24, 10  ;;  %s7122_s24 = scalar_lea.sflag [#allocation8], %s119_s20 }
 0x6b5   : > { %v3982_v35 = vmul.f32 %v3981_v25, %v6854_v48  ;;  %v3983_v50 = vmul.f32 %v3981_v25, %v6877_v9  ;;  %v4004_v17 = vmul.f32 %v4003_v46, %v6919_v37 }
 0x6b6   : > { %3496 = vrot.lane.b32.xlu0 %v3492_v63, %s4660_s15  ;;  %3952 = vrot.lane.b32.xlu1 %v3947_v36, %s4661_s17  ;;  %v3529_v36 = vmul.f32 %v3527_v32, %v6937_v42 }
 0x6b7   : > { %v2927_v12 = vpop.permute.xlu0 %2926  ;;  %v3391_v16 = vpop.permute.xlu1 %3390 }
 0x6b8   : > { %v2932_v7 = vadd.f32 %v2927_v12, %v2918_v23  ;;  %v3395_v56 = vadd.f32 %v3391_v16, %v3381_v1  ;;  %v3051_v1 = vstv %s6897_s28  ;;  %v3542_v12 = vmul.f32 %v3541_v54, %v6919_v37  ;;  %s4088_s28 = sshll.u32 %s7081_s25, 4  ;;  %s7114_s28 = int_to_ptr.vmem [resolvable:$true] %s4088_s28 }
 0x6b9   : > { %v4005_v16 = vmul.f32 %v4003_v46, %v6937_v42 }
 0x6ba   : > { %3972 = vrot.lane.b32.xlu0 %v3968_v53, %s4660_s15  ;;  %3022 = vrot.lane.b32.xlu1 %v3017_v45, %s4660_s15  ;;  %v2940_v34 = vadd.f32 %v2938_v59, %v2932_v7  ;;  %v4017_v59 = vstv %s4450_s7  ;;  %s4594_s7 = sshll.u32 %s4662_s6, 4  ;;  %s4595_s7 = int_to_ptr.vmem [resolvable:$false] %s4594_s7 }
 0x6bb   : > { %v3403_v10 = vpop.permute.xlu0 %3402  ;;  %v3867_v49 = vpop.permute.xlu1 %3866  ;;  %v4018_v14 = vmul.f32 %v4017_v59, %v6919_v37  ;;  %v4019_v53 = vmul.f32 %v4017_v59, %v6937_v42  ;;  %p4597_p10 = scmp.lt.s32.totalorder %s7114_s28, %s4595_s7 }
 0x6bc   : > { %v3408_v38 = vadd.f32 %v3403_v10, %v3394_v40  ;;  %v3871_v26 = vadd.f32 %v3867_v49, %v3857_v62  ;;  %v3052_v40 = vmul.f32 %v3051_v1, %v6919_v37  ;;  %v3528_v62 = vmul.f32 %v3527_v32, %v6919_v37 }
 0x6be   : > { %3034 = vrot.lane.b32.xlu0 %v3030_v15, %s4661_s17  ;;  %3498 = vrot.lane.b32.xlu1 %v3493_v19, %s4660_s15  ;;  %v6901_v4 = vadd.f32 %v3414_v3, %v3408_v38  ;;  %v2973_v38 = vstv %s6961_s8  ;;  %s4596_s8 = scalar_lea.vmem %s4595_s7, 2048 }
 0x6bf   : > { %v3879_v43 = vpop.permute.xlu0 %3878  ;;  %v2929_v29 = vpop.permute.xlu1 %2928  ;;  %v2974_v27 = vmul.f32 %v2973_v38, %v6793_v55 }
 0x6c0   : > { %v3884_v30 = vadd.f32 %v3879_v43, %v3870_v22  ;;  %v2933_v41 = vadd.f32 %v2929_v29, %v2919_v6  ;;  %v3053_v22 = vmul.f32 %v3051_v1, %v6937_v42  ;;  %v3065_v6 = vstv %s4370_s18  ;;  %s7112_s18 = scalar_lea.hbm %s7165_s3, %s4461_s27 }
 0x6c1   : > { %v3066_v63 = vmul.f32 %v3065_v6, %v6919_v37  ;;  %v3067_v7 = vmul.f32 %v3065_v6, %v6937_v42  ;;  %v2975_v1 = vmul.f32 %v2973_v38, %v6816_v61 }
 0x6c2   : > { %3510 = vrot.lane.b32.xlu0 %v3506_v20, %s4661_s17  ;;  %3974 = vrot.lane.b32.xlu1 %v3969_v13, %s4660_s15  ;;  %v3892_v52 = vadd.f32 %v3890_v47, %v3884_v30  ;;  %v6912_v21 = vadd.f32 %v2939_v39, %v2933_v41  ;;  %v3925_v13 = vstv %s6969_s11 }
 0x6c3   : > { %v2949_v24 = vpop.permute.xlu0 %2948  ;;  %v3405_v2 = vpop.permute.xlu1 %3404 }
 0x6c4   : > { %v6915_v23 = vadd.f32 %v2949_v24, %v2940_v34  ;;  %v3409_v18 = vadd.f32 %v3405_v2, %v3395_v56  ;;  %v3543_v56 = vmul.f32 %v3541_v54, %v6937_v42  ;;  %v3485_v54 = vstv %s6983_s12 }
 0x6c6   : > { %3986 = vrot.lane.b32.xlu0 %v3982_v35, %s4661_s17  ;;  %3036 = vrot.lane.b32.xlu1 %v3031_v5, %s4661_s17  ;;  %v6926_v31 = vadd.f32 %v3415_v28, %v3409_v18  ;;  %v3926_v28 = vmul.f32 %v3925_v13, %v6793_v55 }
 0x6c7   : > { %v3881_v60 = vpop.permute.xlu1 %3880 }
 0x6c8   : > { %v3885_v11 = vadd.f32 %v3881_v60, %v3871_v26 }
 0x6ca   : > { %3056 = vrot.lane.b32.xlu0 %v3052_v40, %s4660_s15  ;;  %3512 = vrot.lane.b32.xlu1 %v3507_v58, %s4661_s17  ;;  %v3893_v33 = vadd.f32 %v3891_v51, %v3885_v11 }
 0x6ce   : > { %3532 = vrot.lane.b32.xlu0 %v3528_v62, %s4660_s15  ;;  %3988 = vrot.lane.b32.xlu1 %v3983_v50, %s4661_s17  ;;  %v3927_v62 = vmul.f32 %v3925_v13, %v6816_v61 }
 0x6d2   : > { %4008 = vrot.lane.b32.xlu0 %v4004_v17, %s4660_s15  ;;  %3058 = vrot.lane.b32.xlu1 %v3053_v22, %s4660_s15 }
 0x6d6   : > { %3070 = vrot.lane.b32.xlu0 %v3066_v63, %s4661_s17  ;;  %3534 = vrot.lane.b32.xlu1 %v3529_v36, %s4660_s15 }
 0x6da   : > { %3546 = vrot.lane.b32.xlu0 %v3542_v12, %s4661_s17  ;;  %4010 = vrot.lane.b32.xlu1 %v4005_v16, %s4660_s15  ;;  %s6964_s15 = sld [smem:[#allocation6 + $0x63]] }
 0x6de   : > { %4022 = vrot.lane.b32.xlu0 %v4018_v14, %s4661_s17  ;;  %3072 = vrot.lane.b32.xlu1 %v3067_v7, %s4661_s17 }
 0x6e0   : > { %v3449_v43 = vstv %s6964_s15 }
 0x6e1   : > { %v3450_v41 = vmul.f32 %v3449_v43, %v6793_v55  ;;  %v3451_v58 = vmul.f32 %v3449_v43, %v6816_v61  ;;  %v3961_v61 = vstv %s6987_s14 }
 0x6e2   : > { %3548 = vrot.lane.b32.xlu1 %v3543_v56, %s4661_s17  ;;  %v3486_v56 = vmul.f32 %v3485_v54, %v6854_v48 }
 0x6e6   : > { %4024 = vrot.lane.b32.xlu1 %v4019_v53, %s4661_s17  ;;  %s6980_s17 = sld [smem:[#allocation6 + $0x42]] }
 0x6ec   : > { %v3009_v50 = vstv %s6980_s17 }
 0x6ed   : > { %v3010_v36 = vmul.f32 %v3009_v50, %v6854_v48 }
 0x6fd   : > { %v2606_v45 = vpop.xlane.xlu0 %2605 }
 0x701   : > { %v3425_v44 = vpop.permute.xlu0 %3424 }
 0x702   : > { %v3430_v34 = vadd.f32 %v3425_v44, %v6901_v4 }
 0x705   : > { %v3901_v10 = vpop.permute.xlu0 %3900 }
 0x706   : > { %v3906_v49 = vadd.f32 %v3901_v10, %v3892_v52  ;;  %v2609_v3 = vpop.xlane.xlu1 %2608 }
 0x707   : > { %v6966_v57 = vadd.f32 %v2609_v3, %v2606_v45 }
 0x709   : > { %v2963_v26 = vpop.permute.xlu0 %2962 }
 0x70a   : > { %v2968_v15 = vadd.f32 %v2963_v26, %v6915_v23  ;;  %v2951_v19 = vpop.permute.xlu1 %2950 }
 0x70b   : > { %v2955_v4 = vadd.f32 %v2951_v19, %v6912_v21 }
 0x70c   : > { %v2976_v29 = vadd.f32 %v2974_v27, %v2968_v15  ;;  %v3011_v27 = vmul.f32 %v3009_v50, %v6877_v9 }
 0x70d   : > { %v3439_v47 = vpop.permute.xlu0 %3438 }
 0x70e   : > { %v3444_v39 = vadd.f32 %v3439_v47, %v3430_v34  ;;  %v3427_v30 = vpop.permute.xlu1 %3426 }
 0x70f   : > { %v3431_v20 = vadd.f32 %v3427_v30, %v6926_v31  ;;  %v3487_v30 = vmul.f32 %v3485_v54, %v6877_v9  ;;  %v2611_v54 = vrot.slane %v6966_v57, 4 }
 0x710   : > { %v3452_v25 = vadd.f32 %v3450_v41, %v3444_v39 }
 0x711   : > { %v3915_v52 = vpop.permute.xlu0 %3914 }
 0x712   : > { %v3920_v24 = vadd.f32 %v3915_v52, %v3906_v49  ;;  %v3903_v2 = vpop.permute.xlu1 %3902  ;;  %v3962_v49 = vmul.f32 %v3961_v61, %v6854_v48  ;;  %v3963_v52 = vmul.f32 %v3961_v61, %v6877_v9  ;;  %v3997_v9 = vstv %s7002_s13 }
 0x713   : > { %v3907_v23 = vadd.f32 %v3903_v2, %v3893_v33  ;;  %v3998_v50 = vmul.f32 %v3997_v9, %v6919_v37  ;;  %v2612_v61 = vadd.f32 %v2611_v54, %v6966_v57 }
 0x714   : > { %v3928_v18 = vadd.f32 %v3926_v28, %v3920_v24  ;;  %v3045_v24 = vstv %s6995_s16 }
 0x715   : > { %v2985_v35 = vpop.permute.xlu0 %2984 }
 0x716   : > { %v2965_v21 = vpop.permute.xlu1 %2964  ;;  %v2990_v46 = vadd.f32 %v2985_v35, %v2976_v29 }
 0x717   : > { %v2969_v5 = vadd.f32 %v2965_v21, %v2955_v4  ;;  %v3046_v21 = vmul.f32 %v3045_v24, %v6919_v37 }
 0x719   : > { %v3461_v60 = vpop.permute.xlu0 %3460  ;;  %v2977_v11 = vadd.f32 %v2975_v1, %v2969_v5  ;;  %v3521_v5 = vstv %s6998_s19 }
 0x71a   : > { %v3441_v31 = vpop.permute.xlu1 %3440  ;;  %v3466_v12 = vadd.f32 %v3461_v60, %v3452_v25 }
 0x71b   : > { %v3445_v40 = vadd.f32 %v3441_v31, %v3431_v20 }
 0x71d   : > { %v3937_v55 = vpop.permute.xlu0 %3936  ;;  %v3453_v51 = vadd.f32 %v3451_v58, %v3445_v40  ;;  %v3522_v58 = vmul.f32 %v3521_v5, %v6919_v37 }
 0x71e   : > { %v3917_v32 = vpop.permute.xlu1 %3916  ;;  %v3942_v53 = vadd.f32 %v3937_v55, %v3928_v18 }
 0x71f   : > { %v3921_v33 = vadd.f32 %v3917_v32, %v3907_v23 }
 0x721   : > { %v2999_v17 = vpop.permute.xlu0 %2998  ;;  %v3929_v22 = vadd.f32 %v3927_v62, %v3921_v33 }
 0x722   : > { %v3004_v6 = vadd.f32 %v2999_v17, %v2990_v46  ;;  %v2987_v63 = vpop.permute.xlu1 %2986 }
 0x723   : > { %v2991_v38 = vadd.f32 %v2987_v63, %v2977_v11 }
 0x724   : > { %v3012_v16 = vadd.f32 %v3010_v36, %v3004_v6  ;;  %v3047_v36 = vmul.f32 %v3045_v24, %v6937_v42 }
 0x725   : > { %v3475_v59 = vpop.permute.xlu0 %3474 }
 0x726   : > { %v3480_v14 = vadd.f32 %v3475_v59, %v3466_v12  ;;  %v3463_v7 = vpop.permute.xlu1 %3462 }
 0x727   : > { %v3467_v4 = vadd.f32 %v3463_v7, %v3453_v51 }
 0x728   : > { %v3488_v45 = vadd.f32 %v3486_v56, %v3480_v14  ;;  %v3523_v56 = vmul.f32 %v3521_v5, %v6937_v42 }
 0x729   : > { %v3951_v44 = vpop.permute.xlu0 %3950 }
 0x72a   : > { %v3956_v34 = vadd.f32 %v3951_v44, %v3942_v53  ;;  %v3939_v10 = vpop.permute.xlu1 %3938 }
 0x72b   : > { %v3943_v48 = vadd.f32 %v3939_v10, %v3929_v22  ;;  %v3999_v10 = vmul.f32 %v3997_v9, %v6937_v42 }
 0x72c   : > { %v3964_v3 = vadd.f32 %v3962_v49, %v3956_v34 }
 0x72d   : > { %v3021_v26 = vpop.permute.xlu0 %3020 }
 0x72e   : > { %v3001_v15 = vpop.permute.xlu1 %3000  ;;  %v3026_v2 = vadd.f32 %v3021_v26, %v3012_v16 }
 0x72f   : > { %v3005_v19 = vadd.f32 %v3001_v15, %v2991_v38 }
 0x731   : > { %v3497_v43 = vpop.permute.xlu0 %3496  ;;  %v3013_v29 = vadd.f32 %v3011_v27, %v3005_v19 }
 0x732   : > { %v3477_v47 = vpop.permute.xlu1 %3476  ;;  %v3502_v1 = vadd.f32 %v3497_v43, %v3488_v45 }
 0x733   : > { %v3481_v39 = vadd.f32 %v3477_v47, %v3467_v4 }
 0x735   : > { %v3973_v41 = vpop.permute.xlu0 %3972  ;;  %v3489_v20 = vadd.f32 %v3487_v30, %v3481_v39 }
 0x736   : > { %v3953_v13 = vpop.permute.xlu1 %3952  ;;  %v3978_v55 = vadd.f32 %v3973_v41, %v3964_v3  ;;  %v2613_v3 = vrot.slane %v2612_v61, 2 }
 0x737   : > { %v3957_v25 = vadd.f32 %v3953_v13, %v3943_v48 }
 0x738   : > { %v2614_v43 = vadd.f32 %v2613_v3, %v2612_v61 }
 0x739   : > { %v3035_v28 = vpop.permute.xlu0 %3034  ;;  %v3965_v23 = vadd.f32 %v3963_v52, %v3957_v25 }
 0x73a   : > { %v3040_v18 = vadd.f32 %v3035_v28, %v3026_v2  ;;  %v3023_v35 = vpop.permute.xlu1 %3022  ;;  %v2615_v39 = vrot.slane %v2614_v43, 1 }
 0x73b   : > { %v3027_v17 = vadd.f32 %v3023_v35, %v3013_v29 }
 0x73c   : > { %v3048_v60 = vadd.f32 %v3046_v21, %v3040_v18  ;;  %v2616_v48 = vadd.f32 %v2615_v39, %v2614_v43 }
 0x73d   : > { %v3511_v11 = vpop.permute.xlu0 %3510 }
 0x73e   : > { %v3516_v31 = vadd.f32 %v3511_v11, %v3502_v1  ;;  %v3499_v40 = vpop.permute.xlu1 %3498  ;;  %v2617_v24 = vmul.f32 0.00390625, %v2616_v48 }
 0x73f   : > { %v3503_v12 = vadd.f32 %v3499_v40, %v3489_v20 }
 0x740   : > { %v3524_v51 = vadd.f32 %v3522_v58, %v3516_v31  ;;  %v7035_v9 = vsub.f32 %v6728_v8, %v2617_v24 }
 0x741   : > { %v3987_v32 = vpop.permute.xlu0 %3986 }
 0x742   : > { %v3992_v33 = vadd.f32 %v3987_v32, %v3978_v55  ;;  %v3975_v62 = vpop.permute.xlu1 %3974 }
 0x743   : > { %v3979_v53 = vadd.f32 %v3975_v62, %v3965_v23 }
 0x744   : > { %v4000_v46 = vadd.f32 %v3998_v50, %v3992_v33 }
 0x745   : > { %v3057_v22 = vpop.permute.xlu0 %3056 }
 0x746   : > { %v3037_v6 = vpop.permute.xlu1 %3036  ;;  %v3062_v49 = vadd.f32 %v3057_v22, %v3048_v60  ;;  %v7029_v60 = vsub.f32 %v6716_v0, %v2617_v24 }
 0x747   : > { %v3041_v63 = vadd.f32 %v3037_v6, %v3027_v17 }
 0x748   : > { %v2620_v58 = vmul.f32 %v7029_v60, %v7029_v60 }
 0x749   : > { %v3533_v16 = vpop.permute.xlu0 %3532  ;;  %v3049_v59 = vadd.f32 %v3047_v36, %v3041_v63 }
 0x74a   : > { %v3513_v14 = vpop.permute.xlu1 %3512  ;;  %v3538_v27 = vadd.f32 %v3533_v16, %v3524_v51  ;;  %v2622_v55 = vsel %vm680_vm6, %v2620_v58, 0.0  ;;  %v2621_v51 = vmul.f32 %v7035_v9, %v7035_v9 }
 0x74b   : > { %v3517_v7 = vadd.f32 %v3513_v14, %v3503_v12 }
 0x74c   : > { %v2625_v0 = vsel %vm680_vm6, %v2621_v51, 0.0  ;;  %v2640_v51 = vld [vmem:[%s4877_s9] sm:$0xff] }
 0x74d   : > { %v4009_v37 = vpop.permute.xlu0 %4008  ;;  %v3525_v45 = vadd.f32 %v3523_v56, %v3517_v7 }
 0x74e   : > { %v3989_v44 = vpop.permute.xlu1 %3988  ;;  %v4014_v25 = vadd.f32 %v4009_v37, %v4000_v46 }
 0x74f   : > { %v3993_v34 = vadd.f32 %v3989_v44, %v3979_v53 }
 0x751   : > { %v3071_v38 = vpop.permute.xlu0 %3070  ;;  %v4001_v26 = vadd.f32 %v3999_v10, %v3993_v34 }
 0x752   : > { %v7014_v15 = vadd.f32 %v3071_v38, %v3062_v49  ;;  %v3059_v19 = vpop.permute.xlu1 %3058 }
 0x753   : > { %v3063_v41 = vadd.f32 %v3059_v19, %v3049_v59 }
 0x754   : > { %v3078_v4 = vsel %vm680_vm6, %v7014_v15, 0.0 }
 0x755   : > { %v3547_v57 = vpop.permute.xlu0 %3546  ;;  %3079 = vadd.xlane.f32.xlu0 %v3078_v4 }
 0x756   : > { %v7018_v29 = vadd.f32 %v3547_v57, %v3538_v27  ;;  %v3535_v47 = vpop.permute.xlu1 %3534 }
 0x757   : > { %v3539_v2 = vadd.f32 %v3535_v47, %v3525_v45 }
 0x758   : > { %v3554_v42 = vsel %vm680_vm6, %v7018_v29, 0.0 }
 0x759   : > { %3555 = vadd.xlane.f32.xlu0 %v3554_v42  ;;  %v4023_v20 = vpop.permute.xlu0 %4022 }
 0x75a   : > { %v4011_v30 = vpop.permute.xlu1 %4010  ;;  %v7022_v28 = vadd.f32 %v4023_v20, %v4014_v25 }
 0x75b   : > { %v4015_v21 = vadd.f32 %v4011_v30, %v4001_v26 }
 0x75c   : > { %v4030_v5 = vsel %vm680_vm6, %v7022_v28, 0.0 }
 0x75e   : > { %v3073_v13 = vpop.permute.xlu1 %3072 }
 0x75f   : > { %v3077_v52 = vadd.f32 %v3073_v13, %v3063_v41 }
 0x761   : > { %v3081_v23 = vsel %vm680_vm6, %v3077_v52, 0.0 }
 0x762   : > { %3082 = vadd.xlane.f32.xlu1 %v3081_v23  ;;  %v3549_v18 = vpop.permute.xlu1 %3548 }
 0x763   : > { %v3553_v35 = vadd.f32 %v3549_v18, %v3539_v2 }
 0x765   : > { %v3557_v1 = vsel %vm680_vm6, %v3553_v35, 0.0 }
 0x766   : > { %4031 = vadd.xlane.f32.xlu1 %v4030_v5  ;;  %3558 = vadd.xlane.f32.xlu0 %v3557_v1  ;;  %v4025_v11 = vpop.permute.xlu1 %4024 }
 0x767   : > { %v4029_v31 = vadd.f32 %v4025_v11, %v4015_v21 }
 0x769   : > { %v4033_v40 = vsel %vm680_vm6, %v4029_v31, 0.0 }
 0x76a   : > { %4034 = vadd.xlane.f32.xlu0 %v4033_v40 }
 0x76e   : > { %2623 = vadd.xlane.f32.xlu0 %v2622_v55 }
 0x772   : > { %2626 = vadd.xlane.f32.xlu0 %v2625_v0  ;;  %v2641_v0 = vld [vmem:[%s4877_s9 + $0x8] sm:$0xff] }
 0x7e2   : > { %v3080_v32 = vpop.xlane.xlu0 %3079 }
 0x7e6   : > { %v3556_v33 = vpop.xlane.xlu0 %3555 }
 0x7ef   : > { %v3083_v62 = vpop.xlane.xlu1 %3082 }
 0x7f0   : > { %v3084_v50 = vadd.f32 %v3083_v62, %v3080_v32 }
 0x7f2   : > { %v3085_v46 = vrot.slane %v3084_v50, 4 }
 0x7f3   : > { %v3559_v17 = vpop.xlane.xlu0 %3558  ;;  %v4032_v36 = vpop.xlane.xlu1 %4031 }
 0x7f4   : > { %v3086_v22 = vadd.f32 %v3085_v46, %v3084_v50  ;;  %v3560_v6 = vadd.f32 %v3559_v17, %v3556_v33 }
 0x7f6   : > { %v3087_v8 = vrot.slane %v3086_v22, 2  ;;  %v3561_v63 = vrot.slane %v3560_v6, 4 }
 0x7f7   : > { %v4035_v54 = vpop.xlane.xlu0 %4034 }
 0x7f8   : > { %v3088_v12 = vadd.f32 %v3087_v8, %v3086_v22  ;;  %v3562_v16 = vadd.f32 %v3561_v63, %v3560_v6  ;;  %v4036_v59 = vadd.f32 %v4035_v54, %v4032_v36 }
 0x7fa   : > { %v3089_v14 = vrot.slane %v3088_v12, 1  ;;  %v3563_v7 = vrot.slane %v3562_v16, 2  ;;  %v4037_v56 = vrot.slane %v4036_v59, 4 }
 0x7fb   : > { %v2624_v61 = vpop.xlane.xlu0 %2623 }
 0x7fc   : > { %v3090_v53 = vadd.f32 %v3089_v14, %v3088_v12  ;;  %v3564_v37 = vadd.f32 %v3563_v7, %v3562_v16  ;;  %v4038_v45 = vadd.f32 %v4037_v56, %v4036_v59 }
 0x7fe   : > { %v3091_v44 = vmul.f32 0.00390625, %v3090_v53  ;;  %v3565_v34 = vrot.slane %v3564_v37, 1  ;;  %v4039_v10 = vrot.slane %v4038_v45, 2 }
 0x7ff   : > { %v2627_v49 = vpop.xlane.xlu0 %2626 }
 0x800   : > { %v3566_v3 = vadd.f32 %v3565_v34, %v3564_v37  ;;  %v4040_v38 = vadd.f32 %v4039_v10, %v4038_v45  ;;  %v2628_v26 = vadd.f32 %v2627_v49, %v2624_v61  ;;  %v7041_v19 = vsub.f32 %v3077_v52, %v3091_v44 }
 0x801   : > { %v7044_v27 = vsub.f32 %v7014_v15, %v3091_v44 }
 0x802   : > { %v3567_v4 = vmul.f32 0.00390625, %v3566_v3  ;;  %v4041_v43 = vrot.slane %v4040_v38, 1  ;;  %v2629_v57 = vrot.slane %v2628_v26, 4  ;;  %v3095_v47 = vmul.f32 %v7041_v19, %v7041_v19 }
 0x803   : > { %v3094_v42 = vmul.f32 %v7044_v27, %v7044_v27 }
 0x804   : > { %v4042_v39 = vadd.f32 %v4041_v43, %v4040_v38  ;;  %v2630_v30 = vadd.f32 %v2629_v57, %v2628_v26  ;;  %v3099_v48 = vsel %vm680_vm6, %v3095_v47, 0.0  ;;  %v7051_v41 = vsub.f32 %v3553_v35, %v3567_v4 }
 0x805   : > { %3100 = vadd.xlane.f32.xlu0 %v3099_v48  ;;  %v3096_v20 = vsel %vm680_vm6, %v3094_v42, 0.0  ;;  %v7055_v15 = vsub.f32 %v7018_v29, %v3567_v4  ;;  %v4371_v48 = vld [vmem:[%s4877_s9 + $0x10] sm:$0xff] }
 0x806   : > { %v4043_v13 = vmul.f32 0.00390625, %v4042_v39  ;;  %v2631_v25 = vrot.slane %v2630_v30, 2  ;;  %3097 = vadd.xlane.f32.xlu1 %v3096_v20  ;;  %v3571_v52 = vmul.f32 %v7051_v41, %v7051_v41  ;;  %v4372_v20 = vld [vmem:[%s4877_s9 + $0x18] sm:$0xff] }
 0x807   : > { %v3570_v24 = vmul.f32 %v7055_v15, %v7055_v15 }
 0x808   : > { %v2632_v2 = vadd.f32 %v2631_v25, %v2630_v30  ;;  %v3575_v23 = vsel %vm680_vm6, %v3571_v52, 0.0  ;;  %v7062_v18 = vsub.f32 %v4029_v31, %v4043_v13  ;;  %v7065_v35 = vsub.f32 %v7022_v28, %v4043_v13 }
 0x809   : > { %3576 = vadd.xlane.f32.xlu0 %v3575_v23  ;;  %v3572_v29 = vsel %vm680_vm6, %v3570_v24, 0.0  ;;  %v4411_v23 = vld [vmem:[%s4877_s9 + $0x20] sm:$0xff] }
 0x80a   : > { %v2633_v21 = vrot.slane %v2632_v2, 1  ;;  %3573 = vadd.xlane.f32.xlu1 %v3572_v29  ;;  %v4047_v5 = vmul.f32 %v7062_v18, %v7062_v18  ;;  %v4046_v1 = vmul.f32 %v7065_v35, %v7065_v35  ;;  %v4412_v29 = vld [vmem:[%s4877_s9 + $0x28] sm:$0xff] }
 0x80c   : > { %v2634_v11 = vadd.f32 %v2633_v21, %v2632_v2  ;;  %v4051_v31 = vsel %vm680_vm6, %v4047_v5, 0.0  ;;  %v4048_v28 = vsel %vm680_vm6, %v4046_v1, 0.0 }
 0x80d   : > { %4052 = vadd.xlane.f32.xlu0 %v4051_v31  ;;  %v4452_v31 = vld [vmem:[%s4877_s9 + $0x38] sm:$0xff] }
 0x80e   : > { %v2635_v40 = vmul.f32 0.00390625, %v2634_v11  ;;  %4049 = vadd.xlane.f32.xlu1 %v4048_v28  ;;  %v4451_v11 = vld [vmem:[%s4877_s9 + $0x30] sm:$0xff]  ;;  %s4590_s9 = scalar_lea.vmem %s7114_s28, 1024 }
 0x80f   : > { %p4591_p7 = scmp.ne.s32.totalorder %s7114_s28, %s4590_s9  ;;  %p4598_p11 = scmp.lt.s32.totalorder %s4596_s8, %s4590_s9 }
 0x810   : > { %v2636_v58 = vadd.f32 1e-05, %v2635_v40 }
 0x811   : > { %p4592_p8 = pnand %p4591_p7, %p4729_p1  ;;  %p4599_p12 = por %p4598_p11, %p4597_p10 }
 0x812   : > { %4517 = vrsqrt.f32 %v2636_v58 }
 0x813   : > { %p4593_p9 = pneg %p4592_p8 }
 0x815   : > { %p4600_p13 = pnand %p4599_p12, %p4593_p9 }
 0x81c   : > { %v4518_v55 = vpop.eup %4517 }
 0x81d   : > { %v2638_v32 = vmul.f32 %v4518_v55, %v7029_v60  ;;  %v2639_v33 = vmul.f32 %v4518_v55, %v7035_v9 }
 0x81f   : > { %v2642_v62 = vadd.f32 %v2640_v51, %v2638_v32  ;;  %v2643_v50 = vadd.f32 %v2641_v0, %v2639_v33 }
 0x821   : > { %2644 = vst.msk [vmem:[%s7081_s25] sm:$0xff] %vm680_vm6, %v2642_v62  ;;  %2645 = vst.msk [vmem:[%s7081_s25 + $0x8] sm:$0xff] %vm680_vm6, %v2643_v50 }
 0x892   : > { %v3101_v46 = vpop.xlane.xlu0 %3100 }
 0x893   : > { %v3098_v17 = vpop.xlane.xlu1 %3097 }
 0x894   : > { %v3102_v22 = vadd.f32 %v3101_v46, %v3098_v17 }
 0x896   : > { %v3103_v6 = vrot.slane %v3102_v22, 4  ;;  %v3577_v8 = vpop.xlane.xlu0 %3576 }
 0x897   : > { %v3574_v63 = vpop.xlane.xlu1 %3573 }
 0x898   : > { %v3104_v36 = vadd.f32 %v3103_v6, %v3102_v22  ;;  %v3578_v60 = vadd.f32 %v3577_v8, %v3574_v63 }
 0x89a   : > { %v3105_v54 = vrot.slane %v3104_v36, 2  ;;  %v3579_v9 = vrot.slane %v3578_v60, 4  ;;  %v4053_v12 = vpop.xlane.xlu0 %4052 }
 0x89b   : > { %v4050_v16 = vpop.xlane.xlu1 %4049 }
 0x89c   : > { %v3106_v59 = vadd.f32 %v3105_v54, %v3104_v36  ;;  %v3580_v14 = vadd.f32 %v3579_v9, %v3578_v60  ;;  %v4054_v7 = vadd.f32 %v4053_v12, %v4050_v16 }
 0x89e   : > { %v3107_v56 = vrot.slane %v3106_v59, 1  ;;  %v3581_v61 = vrot.slane %v3580_v14, 2  ;;  %v4055_v53 = vrot.slane %v4054_v7, 4 }
 0x8a0   : > { %v3108_v37 = vadd.f32 %v3107_v56, %v3106_v59  ;;  %v3582_v45 = vadd.f32 %v3581_v61, %v3580_v14  ;;  %v4056_v44 = vadd.f32 %v4055_v53, %v4054_v7 }
 0x8a2   : > { %v3109_v34 = vmul.f32 0.00390625, %v3108_v37  ;;  %v3583_v10 = vrot.slane %v3582_v45, 1  ;;  %v4057_v49 = vrot.slane %v4056_v44, 2 }
 0x8a4   : > { %v3110_v3 = vadd.f32 1e-05, %v3109_v34  ;;  %v3584_v38 = vadd.f32 %v3583_v10, %v3582_v45  ;;  %v4058_v26 = vadd.f32 %v4057_v49, %v4056_v44 }
 0x8a6   : > { %4519 = vrsqrt.f32 %v3110_v3  ;;  %v3585_v4 = vmul.f32 0.00390625, %v3584_v38  ;;  %v4059_v43 = vrot.slane %v4058_v26, 1 }
 0x8a8   : > { %v3586_v57 = vadd.f32 1e-05, %v3585_v4  ;;  %v4060_v47 = vadd.f32 %v4059_v43, %v4058_v26 }
 0x8aa   : > { %4521 = vrsqrt.f32 %v3586_v57  ;;  %v4061_v42 = vmul.f32 0.00390625, %v4060_v47 }
 0x8ac   : > { %v4062_v39 = vadd.f32 1e-05, %v4061_v42 }
 0x8ae   : > { %4523 = vrsqrt.f32 %v4062_v39 }
 0x8b0   : > { %v4520_v30 = vpop.eup %4519 }
 0x8b1   : > { %v3112_v13 = vmul.f32 %v4520_v30, %v7044_v27  ;;  %v3113_v25 = vmul.f32 %v4520_v30, %v7041_v19 }
 0x8b3   : > { %v3117_v52 = vadd.f32 %v4371_v48, %v3112_v13  ;;  %v3118_v24 = vadd.f32 %v4372_v20, %v3113_v25 }
 0x8b4   : > { %v4522_v2 = vpop.eup %4521 }
 0x8b5   : > { %4373 = vst.msk [vmem:[%s7081_s25 + $0x10] sm:$0xff] %vm680_vm6, %v3117_v52  ;;  %4374 = vst.msk [vmem:[%s7081_s25 + $0x18] sm:$0xff] %vm680_vm6, %v3118_v24  ;;  %v3588_v21 = vmul.f32 %v4522_v2, %v7055_v15  ;;  %v3589_v5 = vmul.f32 %v4522_v2, %v7051_v41 }
 0x8b7   : > { %v3593_v27 = vadd.f32 %v4411_v23, %v3588_v21  ;;  %v3594_v19 = vadd.f32 %v4412_v29, %v3589_v5 }
 0x8b8   : > { %v4524_v1 = vpop.eup %4523 }
 0x8b9   : > { %4413 = vst.msk [vmem:[%s7081_s25 + $0x20] sm:$0xff] %vm680_vm6, %v3593_v27  ;;  %4414 = vst.msk [vmem:[%s7081_s25 + $0x28] sm:$0xff] %vm680_vm6, %v3594_v19  ;;  %v4064_v28 = vmul.f32 %v4524_v1, %v7065_v35  ;;  %v4065_v15 = vmul.f32 %v4524_v1, %v7062_v18 }
 0x8bb   : > { %v4069_v41 = vadd.f32 %v4451_v11, %v4064_v28  ;;  %v4070_v40 = vadd.f32 %v4452_v31, %v4065_v15 }
 0x8bd   : > { %4453 = vst.msk [vmem:[%s7081_s25 + $0x30] sm:$0xff] %vm680_vm6, %v4069_v41  ;;  %4454 = vst.msk [vmem:[%s7081_s25 + $0x38] sm:$0xff] %vm680_vm6, %v4070_v40 }
 0x8be   : > { %4603 = shalt.err (!%p4600_p13)
}
 0x8bf   : > { %s4604_s15 = scalar_lea.hbm %s7112_s18, 1024  ;;  %s4608_s12 = scalar_lea.hbm %s7165_s3, 2048 }
 0x8c0   : > { %p4605_p0 = scmp.ne.s32.totalorder %s7112_s18, %s4604_s15  ;;  %p4609_p5 = scmp.lt.u32.totalorder %s7112_s18, %s7165_s3 }
 0x8c1   : > { %p4610_p6 = scmp.lt.u32.totalorder %s4608_s12, %s4604_s15  ;;  %p4612_p8 = scmp.lt.u32.totalorder %s4604_s15, %s7112_s18 }
 0x8c2   : > { %p4606_p3 = pnand %p4605_p0, %p4729_p1 }
 0x8c3   : > { %p4611_p7 = por %p4610_p6, %p4609_p5 }
 0x8c4   : > { %p4607_p4 = pneg %p4606_p3 }
 0x8c5   : > { %p4613_p9 = por %p4612_p8, %p4611_p7 }
 0x8c7   : > { %p4614_p10 = pnand %p4613_p9, %p4607_p4 }
 0x8c9   : > { %4617 = shalt.err (!%p4614_p10)
}
 0x8ca   : > { %s4663_s19 = smov 128   ;;  %s4664_s13 = smov 8  }
 0x8cb   : > { %4462 = dma.vmem_to_hbm [thread:$0]  (%p4729_p1), %s7114_s28, 1024, %s7112_s18, %s7122_s24, %s4663_s19, %s4663_s19, %s4664_s13  }
 0x8cc PF: > { %p4468_p11 = scmp.ge.s32.totalorder %s4654_s23, 2  ;;  %s4103_s20 = sand.u32 1, %s4642_s1  }
 0x8cd   : > { %s4104_s0 = scalar_lea.sflag [#allocation8], %s4103_s20 }
 0x8ce   : > { %p4465_p12 = pnand %p4468_p11, %p4733_p2 }
 0x8d0   : > { %4637 = dma.done.wait (!%p4465_p12), %s4104_s0, 1024  }
 0x8d1   : > { %4639 = vsyncadd (!%p4465_p12), %s4104_s0, 4294966272  ;;  %p23_p13 = scmp.ge.s32.totalorder %s4716_s26, 4   ;;  %s7169_s1 = smov %s4646_s21 }
 0x8d2   : > { %s7170_s21 = smov %s4650_s22  ;;  %s7171_s22 = smov %s4727_s29 }
 0x8d3   : > { %s7172_s23 = smov %s4716_s26  ;;  %25 = sbr.rel (!%p23_p13) target bundleno = 28 (0x1c), region = 71 }
 0x8da   :  { %4109 = vsyncpa [#allocation8], 1 }
 0x8db   :  { %4111 = vsyncpa [#allocation8 + $0x1], 1 }

</bundles_post_ra>
